<compile_context>
chip_gen: v6e
topology: v6e:2x2x1
jax: 0.10.0
libtpu: 0.0.40
codegen_flags: <defaults>
</compile_context>

<pallas_src>
import jax
import jax.numpy as jnp
from jax import lax
from jax.experimental import pallas as pl
from jax.experimental.pallas import tpu as pltpu

HIDDEN = 128        # module default
NUM_LAYERS = 2
INPUT_SIZE = 2
OUTPUT_SIZE = 2


def _sigmoid(x):
    # tanh form: transcendental goes to the EUP slot, no VALU divide sequence.
    return 0.5 * (jnp.tanh(0.5 * x) + 1.0)


def _gates_to_hc(gates, c, H):
    """gates: (B, 4H) pre-activations in PyTorch (i, f, g, o) order."""
    i = _sigmoid(gates[:, 0 * H:1 * H])
    f = _sigmoid(gates[:, 1 * H:2 * H])
    g = jnp.tanh(gates[:, 2 * H:3 * H])
    o = _sigmoid(gates[:, 3 * H:4 * H])
    c_new = f * c + i * g
    h_new = o * jnp.tanh(c_new)
    return h_new, c_new


# ----------------------- fused encoder + decoder kernel ----------------------
def _traj_lstm_kernel(x_ref,                                   # (T*B, I)
                      enc_wih0_ref, enc_whh0_ref, enc_b0_ref,  # (I,4H) (H,4H) (1,4H)
                      enc_w1_ref, enc_b1_ref,                  # (2H,4H) (1,4H)
                      dec_wih0_ref, dec_whh0_ref, dec_b0_ref,  # (O,4H) (H,4H) (1,4H)
                      dec_w1_ref, dec_b1_ref,                  # (2H,4H) (1,4H)
                      fc_w_ref, fc_b_ref,                      # (H,O) (1,O)
                      out_ref,                                 # (target_len, B, O)
                      xproj_scr):                              # VMEM (T*B, 4H)
    target_len, B, O = out_ref.shape
    H = enc_whh0_ref.shape[0]
    T = x_ref.shape[0] // B
    f32 = jnp.float32

    # Hoist small operands out of the recurrent loops (they stay in vregs).
    enc_b0 = enc_b0_ref[...]
    enc_b1 = enc_b1_ref[...]
    dec_wih0 = dec_wih0_ref[...]
    dec_b0 = dec_b0_ref[...]
    dec_b1 = dec_b1_ref[...]
    fc_w = fc_w_ref[...]
    fc_b = fc_b_ref[...]

    # Encoder layer-0 input projection for ALL timesteps in one matmul;
    # only h @ W_hh0 remains on the serial dependence path.
    xproj_scr[...] = jnp.dot(x_ref[...], enc_wih0_ref[...],
                             preferred_element_type=f32)

    zeros = jnp.zeros((B, H), f32)

    # ----------------------------- encoder -----------------------------------
    def enc_step(t, carry):
        h0, c0, h1, c1 = carry
        start = pl.multiple_of(t * B, B)
        g0 = (xproj_scr[pl.ds(start, B), :]
              + jnp.dot(h0, enc_whh0_ref[...], preferred_element_type=f32)
              + enc_b0)
        h0, c0 = _gates_to_hc(g0, c0, H)
        xh1 = jnp.concatenate([h0, h1], axis=-1)                # (B, 2H)
        g1 = jnp.dot(xh1, enc_w1_ref[...], preferred_element_type=f32) + enc_b1
        h1, c1 = _gates_to_hc(g1, c1, H)
        return h0, c0, h1, c1

    h0, c0, h1, c1 = lax.fori_loop(0, T, enc_step,
                                   (zeros, zeros, zeros, zeros), unroll=True)

    # ----------------------------- decoder -----------------------------------
    # Seed with the last encoder input step (valid because INPUT_SIZE == OUTPUT_SIZE,
    # exactly as in the PyTorch module).
    x0 = x_ref[pl.ds((T - 1) * B, B), :]                        # (B, O)

    def dec_step(t, carry):
        x, h0, c0, h1, c1 = carry
        g0 = (jnp.dot(x, dec_wih0, preferred_element_type=f32)
              + jnp.dot(h0, dec_whh0_ref[...], preferred_element_type=f32)
              + dec_b0)
        h0, c0 = _gates_to_hc(g0, c0, H)
        xh1 = jnp.concatenate([h0, h1], axis=-1)                # (B, 2H)
        g1 = jnp.dot(xh1, dec_w1_ref[...], preferred_element_type=f32) + dec_b1
        h1, c1 = _gates_to_hc(g1, c1, H)
        pred = jnp.dot(h1, fc_w, preferred_element_type=f32) + fc_b
        out_ref[t] = pred                                       # VMEM store; one slab DMA at end
        return pred, h0, c0, h1, c1

    lax.fori_loop(0, target_len, dec_step, (x0, h0, c0, h1, c1))


# --------------------------------- wrapper -----------------------------------
def trajectory_lstm_forward(params, input_seq, target_len=45):
    """input_seq: (B, T, input_size) batch-first, like the PyTorch module."""
    B, T, I = input_seq.shape
    H, O = HIDDEN, OUTPUT_SIZE

    # Time-major, flattened so the in-kernel precompute is a single 2-D matmul.
    x_tm = jnp.transpose(input_seq, (1, 0, 2)).reshape(T * B, I)

    # Stack layer-1 W_ih / W_hh along the contraction dim (fused gate matmul).
    enc_w1 = jnp.concatenate([params["enc_wih1"], params["enc_whh1"]], axis=0)
    dec_w1 = jnp.concatenate([params["dec_wih1"], params["dec_whh1"]], axis=0)

    def full(shape):
        return pl.BlockSpec(shape, lambda i, _s=shape: (0,) * len(_s))

    out_tm = pl.pallas_call(
        _traj_lstm_kernel,
        grid=(1,),
        in_specs=[
            full((T * B, I)),
            full((I, 4 * H)), full((H, 4 * H)), full((1, 4 * H)),
            full((2 * H, 4 * H)), full((1, 4 * H)),
            full((O, 4 * H)), full((H, 4 * H)), full((1, 4 * H)),
            full((2 * H, 4 * H)), full((1, 4 * H)),
            full((H, O)), full((1, O)),
        ],
        out_specs=full((target_len, B, O)),
        out_shape=jax.ShapeDtypeStruct((target_len, B, O), jnp.float32),
        scratch_shapes=[pltpu.VMEM((T * B, 4 * H), jnp.float32)],
        compiler_params=pltpu.CompilerParams(
            dimension_semantics=("arbitrary",)),
    )(x_tm,
      params["enc_wih0"], params["enc_whh0"], params["enc_b0"],
      enc_w1, params["enc_b1"],
      params["dec_wih0"], params["dec_whh0"], params["dec_b0"],
      dec_w1, params["dec_b1"],
      params["fc_w"], params["fc_b"])

    return jnp.transpose(out_tm, (1, 0, 2))                     # (B, target_len, O)


# ------------------------- params & pure-JAX reference -----------------------
def init_params(key):
    # PyTorch default init: U(-1/sqrt(H), 1/sqrt(H)); b_ih + b_hh folded into one bias.
    k = 1.0 / float(jnp.sqrt(HIDDEN))
    keys = jax.random.split(key, 14)
    H, I, O = HIDDEN, INPUT_SIZE, OUTPUT_SIZE

    def u(kk, shape):
        return jax.random.uniform(kk, shape, jnp.float32, -k, k)

    return {
        "enc_wih0": u(keys[0], (I, 4 * H)), "enc_whh0": u(keys[1], (H, 4 * H)),
        "enc_b0": u(keys[2], (1, 4 * H)),
        "enc_wih1": u(keys[3], (H, 4 * H)), "enc_whh1": u(keys[4], (H, 4 * H)),
        "enc_b1": u(keys[5], (1, 4 * H)),
        "dec_wih0": u(keys[6], (O, 4 * H)), "dec_whh0": u(keys[7], (H, 4 * H)),
        "dec_b0": u(keys[8], (1, 4 * H)),
        "dec_wih1": u(keys[9], (H, 4 * H)), "dec_whh1": u(keys[10], (H, 4 * H)),
        "dec_b1": u(keys[11], (1, 4 * H)),
        "fc_w": u(keys[12], (H, O)), "fc_b": u(keys[13], (1, O)),
    }


def _lstm_cell_ref(x, h, c, w_ih, w_hh, b):
    H = h.shape[-1]
    gates = x @ w_ih + h @ w_hh + b
    return _gates_to_hc(gates, c, H)


def reference_forward(p, input_seq, target_len=45):
    B, T, _ = input_seq.shape
    H, L = HIDDEN, NUM_LAYERS
    h = [jnp.zeros((B, H), jnp.float32) for _ in range(L)]
    c = [jnp.zeros((B, H), jnp.float32) for _ in range(L)]
    for t in range(T):
        x = input_seq[:, t, :]
        h[0], c[0] = _lstm_cell_ref(x, h[0], c[0], p["enc_wih0"], p["enc_whh0"], p["enc_b0"])
        h[1], c[1] = _lstm_cell_ref(h[0], h[1], c[1], p["enc_wih1"], p["enc_whh1"], p["enc_b1"])
    x = input_seq[:, -1, :]
    outs = []
    for _ in range(target_len):
        h[0], c[0] = _lstm_cell_ref(x, h[0], c[0], p["dec_wih0"], p["dec_whh0"], p["dec_b0"])
        h[1], c[1] = _lstm_cell_ref(h[0], h[1], c[1], p["dec_wih1"], p["dec_whh1"], p["dec_b1"])
        pred = h[1] @ p["fc_w"] + p["fc_b"]
        outs.append(pred[:, None, :])
        x = pred
    return jnp.concatenate(outs, axis=1)


if __name__ == "__main__":
    key = jax.random.PRNGKey(0)
    pkey, xkey = jax.random.split(key)
    params = init_params(pkey)

    # B=8 fills the 8 f32 sublanes; T=8 input steps; 45 decoded steps.
    B, T, target_len = 8, 8, 45
    input_seq = jax.random.normal(xkey, (B, T, INPUT_SIZE), jnp.float32)

    out = trajectory_lstm_forward(params, input_seq, target_len)
    out = jax.block_until_ready(out)

    assert out.shape == (B, target_len, OUTPUT_SIZE), out.shape
    assert bool(jnp.all(jnp.isfinite(out)))

    ref = reference_forward(params, input_seq, target_len)
    max_err = float(jnp.max(jnp.abs(out - ref)))
    # loose tolerance: in-kernel f32 matmuls may use MXU reduced-precision passes
    assert jnp.allclose(out, ref, atol=2e-2, rtol=5e-2), f"max_err={max_err}"

    print("KERNEL_OK")
</pallas_src>

<mosaic_0001>
module attributes {stable_mosaic.version = 11 : i64} {
  func.func @_traj_lstm_kernel(%arg0: i32, %arg1: memref<64x2xf32, #tpu.memory_space<vmem>>, %arg2: memref<2x512xf32, #tpu.memory_space<vmem>>, %arg3: memref<128x512xf32, #tpu.memory_space<vmem>>, %arg4: memref<1x512xf32, #tpu.memory_space<vmem>>, %arg5: memref<256x512xf32, #tpu.memory_space<vmem>>, %arg6: memref<1x512xf32, #tpu.memory_space<vmem>>, %arg7: memref<2x512xf32, #tpu.memory_space<vmem>>, %arg8: memref<128x512xf32, #tpu.memory_space<vmem>>, %arg9: memref<1x512xf32, #tpu.memory_space<vmem>>, %arg10: memref<256x512xf32, #tpu.memory_space<vmem>>, %arg11: memref<1x512xf32, #tpu.memory_space<vmem>>, %arg12: memref<128x2xf32, #tpu.memory_space<vmem>>, %arg13: memref<1x2xf32, #tpu.memory_space<vmem>>, %arg14: memref<45x8x2xf32, #tpu.memory_space<vmem>>, %arg15: memref<64x512xf32, #tpu.memory_space<vmem>>) attributes {dimension_semantics = [#tpu.dimension_semantics<arbitrary>], iteration_bounds = array<i64: 1>, scalar_prefetch = 0 : i64, scratch_operands = 1 : i64, tpu.core_type = #tpu.core_type<tc>, window_params = [{pipeline_mode = #tpu.pipeline_mode<synchronous>, transform_indices = @transform_0, window_bounds = array<i64: 64, 2>}, {pipeline_mode = #tpu.pipeline_mode<synchronous>, transform_indices = @transform_1, window_bounds = array<i64: 2, 512>}, {pipeline_mode = #tpu.pipeline_mode<synchronous>, transform_indices = @transform_2, window_bounds = array<i64: 128, 512>}, {pipeline_mode = #tpu.pipeline_mode<synchronous>, transform_indices = @transform_3, window_bounds = array<i64: 1, 512>}, {pipeline_mode = #tpu.pipeline_mode<synchronous>, transform_indices = @transform_4, window_bounds = array<i64: 256, 512>}, {pipeline_mode = #tpu.pipeline_mode<synchronous>, transform_indices = @transform_5, window_bounds = array<i64: 1, 512>}, {pipeline_mode = #tpu.pipeline_mode<synchronous>, transform_indices = @transform_6, window_bounds = array<i64: 2, 512>}, {pipeline_mode = #tpu.pipeline_mode<synchronous>, transform_indices = @transform_7, window_bounds = array<i64: 128, 512>}, {pipeline_mode = #tpu.pipeline_mode<synchronous>, transform_indices = @transform_8, window_bounds = array<i64: 1, 512>}, {pipeline_mode = #tpu.pipeline_mode<synchronous>, transform_indices = @transform_9, window_bounds = array<i64: 256, 512>}, {pipeline_mode = #tpu.pipeline_mode<synchronous>, transform_indices = @transform_10, window_bounds = array<i64: 1, 512>}, {pipeline_mode = #tpu.pipeline_mode<synchronous>, transform_indices = @transform_11, window_bounds = array<i64: 128, 2>}, {pipeline_mode = #tpu.pipeline_mode<synchronous>, transform_indices = @transform_12, window_bounds = array<i64: 1, 2>}, {pipeline_mode = #tpu.pipeline_mode<synchronous>, transform_indices = @transform_13, window_bounds = array<i64: 45, 8, 2>}]} {
    %c0 = arith.constant 0 : index
    %c0_0 = arith.constant 0 : index
    %0 = vector.load %arg4[%c0, %c0_0] : memref<1x512xf32, #tpu.memory_space<vmem>>, vector<1x512xf32>
    %c0_1 = arith.constant 0 : index
    %c0_2 = arith.constant 0 : index
    %1 = vector.load %arg6[%c0_1, %c0_2] : memref<1x512xf32, #tpu.memory_space<vmem>>, vector<1x512xf32>
    %c0_3 = arith.constant 0 : index
    %c0_4 = arith.constant 0 : index
    %2 = vector.load %arg7[%c0_3, %c0_4] : memref<2x512xf32, #tpu.memory_space<vmem>>, vector<2x512xf32>
    %c0_5 = arith.constant 0 : index
    %c0_6 = arith.constant 0 : index
    %3 = vector.load %arg9[%c0_5, %c0_6] : memref<1x512xf32, #tpu.memory_space<vmem>>, vector<1x512xf32>
    %c0_7 = arith.constant 0 : index
    %c0_8 = arith.constant 0 : index
    %4 = vector.load %arg11[%c0_7, %c0_8] : memref<1x512xf32, #tpu.memory_space<vmem>>, vector<1x512xf32>
    %c0_9 = arith.constant 0 : index
    %c0_10 = arith.constant 0 : index
    %5 = vector.load %arg12[%c0_9, %c0_10] : memref<128x2xf32, #tpu.memory_space<vmem>>, vector<128x2xf32>
    %c0_11 = arith.constant 0 : index
    %c0_12 = arith.constant 0 : index
    %6 = vector.load %arg13[%c0_11, %c0_12] : memref<1x2xf32, #tpu.memory_space<vmem>>, vector<1x2xf32>
    %c0_13 = arith.constant 0 : index
    %c0_14 = arith.constant 0 : index
    %7 = vector.load %arg1[%c0_13, %c0_14] : memref<64x2xf32, #tpu.memory_space<vmem>>, vector<64x2xf32>
    %c0_15 = arith.constant 0 : index
    %c0_16 = arith.constant 0 : index
    %8 = vector.load %arg2[%c0_15, %c0_16] : memref<2x512xf32, #tpu.memory_space<vmem>>, vector<2x512xf32>
    %cst = arith.constant dense<0.000000e+00> : vector<64x512xf32>
    %9 = tpu.matmul %7, %8, %cst {dimension_numbers = #tpu.dot_dimension_numbers<[1], [0], [0], [1], [0, 0, 1, 1], [], []>} : vector<64x2xf32>, vector<2x512xf32>, vector<64x512xf32> -> vector<64x512xf32>
    %c0_17 = arith.constant 0 : index
    %c0_18 = arith.constant 0 : index
    %10 = vector.load %arg15[%c0_17, %c0_18] : memref<64x512xf32, #tpu.memory_space<vmem>>, vector<64x512xf32>
    tpu.vector_store %arg15[%c0_17, %c0_18], %9 {strides = array<i32>} : memref<64x512xf32, #tpu.memory_space<vmem>>, vector<64x512xf32>,
    %cst_19 = arith.constant 0.000000e+00 : f32
    %11 = vector.broadcast %cst_19 : f32 to vector<8x128xf32>
    %c0_i32 = arith.constant 0 : i32
    %c8_i32 = arith.constant 8 : i32
    %12 = arith.muli %c0_i32, %c8_i32 : i32
    %13 = tpu.assume_multiple %12, 8 : i32
    %14 = arith.index_cast %13 : i32 to index
    %c0_20 = arith.constant 0 : index
    %15 = vector.load %arg15[%14, %c0_20] : memref<64x512xf32, #tpu.memory_space<vmem>>, vector<8x512xf32>
    %c0_21 = arith.constant 0 : index
    %c0_22 = arith.constant 0 : index
    %16 = vector.load %arg3[%c0_21, %c0_22] : memref<128x512xf32, #tpu.memory_space<vmem>>, vector<128x512xf32>
    %cst_23 = arith.constant dense<0.000000e+00> : vector<8x512xf32>
    %17 = tpu.matmul %11, %16, %cst_23 {dimension_numbers = #tpu.dot_dimension_numbers<[1], [0], [0], [1], [0, 0, 1, 1], [], []>} : vector<8x128xf32>, vector<128x512xf32>, vector<8x512xf32> -> vector<8x512xf32>
    %18 = arith.addf %15, %17 : vector<8x512xf32>
    %19 = vector.broadcast %0 : vector<1x512xf32> to vector<8x512xf32>
    %20 = arith.addf %18, %19 : vector<8x512xf32>
    %21 = vector.extract_strided_slice %20 {offsets = [0, 0], sizes = [8, 128], strides = [1, 1]} : vector<8x512xf32> to vector<8x128xf32>
    %cst_24 = arith.constant 5.000000e-01 : f32
    %22 = vector.broadcast %cst_24 : f32 to vector<8x128xf32>
    %23 = arith.mulf %22, %21 : vector<8x128xf32>
    %24 = math.tanh %23 : vector<8x128xf32>
    %cst_25 = arith.constant 1.000000e+00 : f32
    %25 = vector.broadcast %cst_25 : f32 to vector<8x128xf32>
    %26 = arith.addf %24, %25 : vector<8x128xf32>
    %cst_26 = arith.constant 5.000000e-01 : f32
    %27 = vector.broadcast %cst_26 : f32 to vector<8x128xf32>
    %28 = arith.mulf %27, %26 : vector<8x128xf32>
    %29 = vector.extract_strided_slice %20 {offsets = [0, 128], sizes = [8, 128], strides = [1, 1]} : vector<8x512xf32> to vector<8x128xf32>
    %cst_27 = arith.constant 5.000000e-01 : f32
    %30 = vector.broadcast %cst_27 : f32 to vector<8x128xf32>
    %31 = arith.mulf %30, %29 : vector<8x128xf32>
    %32 = math.tanh %31 : vector<8x128xf32>
    %cst_28 = arith.constant 1.000000e+00 : f32
    %33 = vector.broadcast %cst_28 : f32 to vector<8x128xf32>
    %34 = arith.addf %32, %33 : vector<8x128xf32>
    %cst_29 = arith.constant 5.000000e-01 : f32
    %35 = vector.broadcast %cst_29 : f32 to vector<8x128xf32>
    %36 = arith.mulf %35, %34 : vector<8x128xf32>
    %37 = vector.extract_strided_slice %20 {offsets = [0, 256], sizes = [8, 128], strides = [1, 1]} : vector<8x512xf32> to vector<8x128xf32>
    %38 = math.tanh %37 : vector<8x128xf32>
    %39 = vector.extract_strided_slice %20 {offsets = [0, 384], sizes = [8, 128], strides = [1, 1]} : vector<8x512xf32> to vector<8x128xf32>
    %cst_30 = arith.constant 5.000000e-01 : f32
    %40 = vector.broadcast %cst_30 : f32 to vector<8x128xf32>
    %41 = arith.mulf %40, %39 : vector<8x128xf32>
    %42 = math.tanh %41 : vector<8x128xf32>
    %cst_31 = arith.constant 1.000000e+00 : f32
    %43 = vector.broadcast %cst_31 : f32 to vector<8x128xf32>
    %44 = arith.addf %42, %43 : vector<8x128xf32>
    %cst_32 = arith.constant 5.000000e-01 : f32
    %45 = vector.broadcast %cst_32 : f32 to vector<8x128xf32>
    %46 = arith.mulf %45, %44 : vector<8x128xf32>
    %47 = arith.mulf %36, %11 : vector<8x128xf32>
    %48 = arith.mulf %28, %38 : vector<8x128xf32>
    %49 = arith.addf %47, %48 : vector<8x128xf32>
    %50 = math.tanh %49 : vector<8x128xf32>
    %51 = arith.mulf %46, %50 : vector<8x128xf32>
    %52 = tpu.concatenate %51, %11 in 1 : vector<8x128xf32>, vector<8x128xf32> -> vector<8x256xf32>
    %c0_33 = arith.constant 0 : index
    %c0_34 = arith.constant 0 : index
    %53 = vector.load %arg5[%c0_33, %c0_34] : memref<256x512xf32, #tpu.memory_space<vmem>>, vector<256x512xf32>
    %cst_35 = arith.constant dense<0.000000e+00> : vector<8x512xf32>
    %54 = tpu.matmul %52, %53, %cst_35 {dimension_numbers = #tpu.dot_dimension_numbers<[1], [0], [0], [1], [0, 0, 1, 1], [], []>} : vector<8x256xf32>, vector<256x512xf32>, vector<8x512xf32> -> vector<8x512xf32>
    %55 = vector.broadcast %1 : vector<1x512xf32> to vector<8x512xf32>
    %56 = arith.addf %54, %55 : vector<8x512xf32>
    %57 = vector.extract_strided_slice %56 {offsets = [0, 0], sizes = [8, 128], strides = [1, 1]} : vector<8x512xf32> to vector<8x128xf32>
    %cst_36 = arith.constant 5.000000e-01 : f32
    %58 = vector.broadcast %cst_36 : f32 to vector<8x128xf32>
    %59 = arith.mulf %58, %57 : vector<8x128xf32>
    %60 = math.tanh %59 : vector<8x128xf32>
    %cst_37 = arith.constant 1.000000e+00 : f32
    %61 = vector.broadcast %cst_37 : f32 to vector<8x128xf32>
    %62 = arith.addf %60, %61 : vector<8x128xf32>
    %cst_38 = arith.constant 5.000000e-01 : f32
    %63 = vector.broadcast %cst_38 : f32 to vector<8x128xf32>
    %64 = arith.mulf %63, %62 : vector<8x128xf32>
    %65 = vector.extract_strided_slice %56 {offsets = [0, 128], sizes = [8, 128], strides = [1, 1]} : vector<8x512xf32> to vector<8x128xf32>
    %cst_39 = arith.constant 5.000000e-01 : f32
    %66 = vector.broadcast %cst_39 : f32 to vector<8x128xf32>
    %67 = arith.mulf %66, %65 : vector<8x128xf32>
    %68 = math.tanh %67 : vector<8x128xf32>
    %cst_40 = arith.constant 1.000000e+00 : f32
    %69 = vector.broadcast %cst_40 : f32 to vector<8x128xf32>
    %70 = arith.addf %68, %69 : vector<8x128xf32>
    %cst_41 = arith.constant 5.000000e-01 : f32
    %71 = vector.broadcast %cst_41 : f32 to vector<8x128xf32>
    %72 = arith.mulf %71, %70 : vector<8x128xf32>
    %73 = vector.extract_strided_slice %56 {offsets = [0, 256], sizes = [8, 128], strides = [1, 1]} : vector<8x512xf32> to vector<8x128xf32>
    %74 = math.tanh %73 : vector<8x128xf32>
    %75 = vector.extract_strided_slice %56 {offsets = [0, 384], sizes = [8, 128], strides = [1, 1]} : vector<8x512xf32> to vector<8x128xf32>
    %cst_42 = arith.constant 5.000000e-01 : f32
    %76 = vector.broadcast %cst_42 : f32 to vector<8x128xf32>
    %77 = arith.mulf %76, %75 : vector<8x128xf32>
    %78 = math.tanh %77 : vector<8x128xf32>
    %cst_43 = arith.constant 1.000000e+00 : f32
    %79 = vector.broadcast %cst_43 : f32 to vector<8x128xf32>
    %80 = arith.addf %78, %79 : vector<8x128xf32>
    %cst_44 = arith.constant 5.000000e-01 : f32
    %81 = vector.broadcast %cst_44 : f32 to vector<8x128xf32>
    %82 = arith.mulf %81, %80 : vector<8x128xf32>
    %83 = arith.mulf %72, %11 : vector<8x128xf32>
    %84 = arith.mulf %64, %74 : vector<8x128xf32>
    %85 = arith.addf %83, %84 : vector<8x128xf32>
    %86 = math.tanh %85 : vector<8x128xf32>
    %87 = arith.mulf %82, %86 : vector<8x128xf32>
    %c1_i32 = arith.constant 1 : i32
    %c8_i32_45 = arith.constant 8 : i32
    %88 = arith.muli %c1_i32, %c8_i32_45 : i32
    %89 = tpu.assume_multiple %88, 8 : i32
    %90 = arith.index_cast %89 : i32 to index
    %c0_46 = arith.constant 0 : index
    %91 = vector.load %arg15[%90, %c0_46] : memref<64x512xf32, #tpu.memory_space<vmem>>, vector<8x512xf32>
    %c0_47 = arith.constant 0 : index
    %c0_48 = arith.constant 0 : index
    %92 = vector.load %arg3[%c0_47, %c0_48] : memref<128x512xf32, #tpu.memory_space<vmem>>, vector<128x512xf32>
    %cst_49 = arith.constant dense<0.000000e+00> : vector<8x512xf32>
    %93 = tpu.matmul %51, %92, %cst_49 {dimension_numbers = #tpu.dot_dimension_numbers<[1], [0], [0], [1], [0, 0, 1, 1], [], []>} : vector<8x128xf32>, vector<128x512xf32>, vector<8x512xf32> -> vector<8x512xf32>
    %94 = arith.addf %91, %93 : vector<8x512xf32>
    %95 = vector.broadcast %0 : vector<1x512xf32> to vector<8x512xf32>
    %96 = arith.addf %94, %95 : vector<8x512xf32>
    %97 = vector.extract_strided_slice %96 {offsets = [0, 0], sizes = [8, 128], strides = [1, 1]} : vector<8x512xf32> to vector<8x128xf32>
    %cst_50 = arith.constant 5.000000e-01 : f32
    %98 = vector.broadcast %cst_50 : f32 to vector<8x128xf32>
    %99 = arith.mulf %98, %97 : vector<8x128xf32>
    %100 = math.tanh %99 : vector<8x128xf32>
    %cst_51 = arith.constant 1.000000e+00 : f32
    %101 = vector.broadcast %cst_51 : f32 to vector<8x128xf32>
    %102 = arith.addf %100, %101 : vector<8x128xf32>
    %cst_52 = arith.constant 5.000000e-01 : f32
    %103 = vector.broadcast %cst_52 : f32 to vector<8x128xf32>
    %104 = arith.mulf %103, %102 : vector<8x128xf32>
    %105 = vector.extract_strided_slice %96 {offsets = [0, 128], sizes = [8, 128], strides = [1, 1]} : vector<8x512xf32> to vector<8x128xf32>
    %cst_53 = arith.constant 5.000000e-01 : f32
    %106 = vector.broadcast %cst_53 : f32 to vector<8x128xf32>
    %107 = arith.mulf %106, %105 : vector<8x128xf32>
    %108 = math.tanh %107 : vector<8x128xf32>
    %cst_54 = arith.constant 1.000000e+00 : f32
    %109 = vector.broadcast %cst_54 : f32 to vector<8x128xf32>
    %110 = arith.addf %108, %109 : vector<8x128xf32>
    %cst_55 = arith.constant 5.000000e-01 : f32
    %111 = vector.broadcast %cst_55 : f32 to vector<8x128xf32>
    %112 = arith.mulf %111, %110 : vector<8x128xf32>
    %113 = vector.extract_strided_slice %96 {offsets = [0, 256], sizes = [8, 128], strides = [1, 1]} : vector<8x512xf32> to vector<8x128xf32>
    %114 = math.tanh %113 : vector<8x128xf32>
    %115 = vector.extract_strided_slice %96 {offsets = [0, 384], sizes = [8, 128], strides = [1, 1]} : vector<8x512xf32> to vector<8x128xf32>
    %cst_56 = arith.constant 5.000000e-01 : f32
    %116 = vector.broadcast %cst_56 : f32 to vector<8x128xf32>
    %117 = arith.mulf %116, %115 : vector<8x128xf32>
    %118 = math.tanh %117 : vector<8x128xf32>
    %cst_57 = arith.constant 1.000000e+00 : f32
    %119 = vector.broadcast %cst_57 : f32 to vector<8x128xf32>
    %120 = arith.addf %118, %119 : vector<8x128xf32>
    %cst_58 = arith.constant 5.000000e-01 : f32
    %121 = vector.broadcast %cst_58 : f32 to vector<8x128xf32>
    %122 = arith.mulf %121, %120 : vector<8x128xf32>
    %123 = arith.mulf %112, %49 : vector<8x128xf32>
    %124 = arith.mulf %104, %114 : vector<8x128xf32>
    %125 = arith.addf %123, %124 : vector<8x128xf32>
    %126 = math.tanh %125 : vector<8x128xf32>
    %127 = arith.mulf %122, %126 : vector<8x128xf32>
    %128 = tpu.concatenate %127, %87 in 1 : vector<8x128xf32>, vector<8x128xf32> -> vector<8x256xf32>
    %c0_59 = arith.constant 0 : index
    %c0_60 = arith.constant 0 : index
    %129 = vector.load %arg5[%c0_59, %c0_60] : memref<256x512xf32, #tpu.memory_space<vmem>>, vector<256x512xf32>
    %cst_61 = arith.constant dense<0.000000e+00> : vector<8x512xf32>
    %130 = tpu.matmul %128, %129, %cst_61 {dimension_numbers = #tpu.dot_dimension_numbers<[1], [0], [0], [1], [0, 0, 1, 1], [], []>} : vector<8x256xf32>, vector<256x512xf32>, vector<8x512xf32> -> vector<8x512xf32>
    %131 = vector.broadcast %1 : vector<1x512xf32> to vector<8x512xf32>
    %132 = arith.addf %130, %131 : vector<8x512xf32>
    %133 = vector.extract_strided_slice %132 {offsets = [0, 0], sizes = [8, 128], strides = [1, 1]} : vector<8x512xf32> to vector<8x128xf32>
    %cst_62 = arith.constant 5.000000e-01 : f32
    %134 = vector.broadcast %cst_62 : f32 to vector<8x128xf32>
    %135 = arith.mulf %134, %133 : vector<8x128xf32>
    %136 = math.tanh %135 : vector<8x128xf32>
    %cst_63 = arith.constant 1.000000e+00 : f32
    %137 = vector.broadcast %cst_63 : f32 to vector<8x128xf32>
    %138 = arith.addf %136, %137 : vector<8x128xf32>
    %cst_64 = arith.constant 5.000000e-01 : f32
    %139 = vector.broadcast %cst_64 : f32 to vector<8x128xf32>
    %140 = arith.mulf %139, %138 : vector<8x128xf32>
    %141 = vector.extract_strided_slice %132 {offsets = [0, 128], sizes = [8, 128], strides = [1, 1]} : vector<8x512xf32> to vector<8x128xf32>
    %cst_65 = arith.constant 5.000000e-01 : f32
    %142 = vector.broadcast %cst_65 : f32 to vector<8x128xf32>
    %143 = arith.mulf %142, %141 : vector<8x128xf32>
    %144 = math.tanh %143 : vector<8x128xf32>
    %cst_66 = arith.constant 1.000000e+00 : f32
    %145 = vector.broadcast %cst_66 : f32 to vector<8x128xf32>
    %146 = arith.addf %144, %145 : vector<8x128xf32>
    %cst_67 = arith.constant 5.000000e-01 : f32
    %147 = vector.broadcast %cst_67 : f32 to vector<8x128xf32>
    %148 = arith.mulf %147, %146 : vector<8x128xf32>
    %149 = vector.extract_strided_slice %132 {offsets = [0, 256], sizes = [8, 128], strides = [1, 1]} : vector<8x512xf32> to vector<8x128xf32>
    %150 = math.tanh %149 : vector<8x128xf32>
    %151 = vector.extract_strided_slice %132 {offsets = [0, 384], sizes = [8, 128], strides = [1, 1]} : vector<8x512xf32> to vector<8x128xf32>
    %cst_68 = arith.constant 5.000000e-01 : f32
    %152 = vector.broadcast %cst_68 : f32 to vector<8x128xf32>
    %153 = arith.mulf %152, %151 : vector<8x128xf32>
    %154 = math.tanh %153 : vector<8x128xf32>
    %cst_69 = arith.constant 1.000000e+00 : f32
    %155 = vector.broadcast %cst_69 : f32 to vector<8x128xf32>
    %156 = arith.addf %154, %155 : vector<8x128xf32>
    %cst_70 = arith.constant 5.000000e-01 : f32
    %157 = vector.broadcast %cst_70 : f32 to vector<8x128xf32>
    %158 = arith.mulf %157, %156 : vector<8x128xf32>
    %159 = arith.mulf %148, %85 : vector<8x128xf32>
    %160 = arith.mulf %140, %150 : vector<8x128xf32>
    %161 = arith.addf %159, %160 : vector<8x128xf32>
    %162 = math.tanh %161 : vector<8x128xf32>
    %163 = arith.mulf %158, %162 : vector<8x128xf32>
    %c2_i32 = arith.constant 2 : i32
    %c8_i32_71 = arith.constant 8 : i32
    %164 = arith.muli %c2_i32, %c8_i32_71 : i32
    %165 = tpu.assume_multiple %164, 8 : i32
    %166 = arith.index_cast %165 : i32 to index
    %c0_72 = arith.constant 0 : index
    %167 = vector.load %arg15[%166, %c0_72] : memref<64x512xf32, #tpu.memory_space<vmem>>, vector<8x512xf32>
    %c0_73 = arith.constant 0 : index
    %c0_74 = arith.constant 0 : index
    %168 = vector.load %arg3[%c0_73, %c0_74] : memref<128x512xf32, #tpu.memory_space<vmem>>, vector<128x512xf32>
    %cst_75 = arith.constant dense<0.000000e+00> : vector<8x512xf32>
    %169 = tpu.matmul %127, %168, %cst_75 {dimension_numbers = #tpu.dot_dimension_numbers<[1], [0], [0], [1], [0, 0, 1, 1], [], []>} : vector<8x128xf32>, vector<128x512xf32>, vector<8x512xf32> -> vector<8x512xf32>
    %170 = arith.addf %167, %169 : vector<8x512xf32>
    %171 = vector.broadcast %0 : vector<1x512xf32> to vector<8x512xf32>
    %172 = arith.addf %170, %171 : vector<8x512xf32>
    %173 = vector.extract_strided_slice %172 {offsets = [0, 0], sizes = [8, 128], strides = [1, 1]} : vector<8x512xf32> to vector<8x128xf32>
    %cst_76 = arith.constant 5.000000e-01 : f32
    %174 = vector.broadcast %cst_76 : f32 to vector<8x128xf32>
    %175 = arith.mulf %174, %173 : vector<8x128xf32>
    %176 = math.tanh %175 : vector<8x128xf32>
    %cst_77 = arith.constant 1.000000e+00 : f32
    %177 = vector.broadcast %cst_77 : f32 to vector<8x128xf32>
    %178 = arith.addf %176, %177 : vector<8x128xf32>
    %cst_78 = arith.constant 5.000000e-01 : f32
    %179 = vector.broadcast %cst_78 : f32 to vector<8x128xf32>
    %180 = arith.mulf %179, %178 : vector<8x128xf32>
    %181 = vector.extract_strided_slice %172 {offsets = [0, 128], sizes = [8, 128], strides = [1, 1]} : vector<8x512xf32> to vector<8x128xf32>
    %cst_79 = arith.constant 5.000000e-01 : f32
    %182 = vector.broadcast %cst_79 : f32 to vector<8x128xf32>
    %183 = arith.mulf %182, %181 : vector<8x128xf32>
    %184 = math.tanh %183 : vector<8x128xf32>
    %cst_80 = arith.constant 1.000000e+00 : f32
    %185 = vector.broadcast %cst_80 : f32 to vector<8x128xf32>
    %186 = arith.addf %184, %185 : vector<8x128xf32>
    %cst_81 = arith.constant 5.000000e-01 : f32
    %187 = vector.broadcast %cst_81 : f32 to vector<8x128xf32>
    %188 = arith.mulf %187, %186 : vector<8x128xf32>
    %189 = vector.extract_strided_slice %172 {offsets = [0, 256], sizes = [8, 128], strides = [1, 1]} : vector<8x512xf32> to vector<8x128xf32>
    %190 = math.tanh %189 : vector<8x128xf32>
    %191 = vector.extract_strided_slice %172 {offsets = [0, 384], sizes = [8, 128], strides = [1, 1]} : vector<8x512xf32> to vector<8x128xf32>
    %cst_82 = arith.constant 5.000000e-01 : f32
    %192 = vector.broadcast %cst_82 : f32 to vector<8x128xf32>
    %193 = arith.mulf %192, %191 : vector<8x128xf32>
    %194 = math.tanh %193 : vector<8x128xf32>
    %cst_83 = arith.constant 1.000000e+00 : f32
    %195 = vector.broadcast %cst_83 : f32 to vector<8x128xf32>
    %196 = arith.addf %194, %195 : vector<8x128xf32>
    %cst_84 = arith.constant 5.000000e-01 : f32
    %197 = vector.broadcast %cst_84 : f32 to vector<8x128xf32>
    %198 = arith.mulf %197, %196 : vector<8x128xf32>
    %199 = arith.mulf %188, %125 : vector<8x128xf32>
    %200 = arith.mulf %180, %190 : vector<8x128xf32>
    %201 = arith.addf %199, %200 : vector<8x128xf32>
    %202 = math.tanh %201 : vector<8x128xf32>
    %203 = arith.mulf %198, %202 : vector<8x128xf32>
    %204 = tpu.concatenate %203, %163 in 1 : vector<8x128xf32>, vector<8x128xf32> -> vector<8x256xf32>
    %c0_85 = arith.constant 0 : index
    %c0_86 = arith.constant 0 : index
    %205 = vector.load %arg5[%c0_85, %c0_86] : memref<256x512xf32, #tpu.memory_space<vmem>>, vector<256x512xf32>
    %cst_87 = arith.constant dense<0.000000e+00> : vector<8x512xf32>
    %206 = tpu.matmul %204, %205, %cst_87 {dimension_numbers = #tpu.dot_dimension_numbers<[1], [0], [0], [1], [0, 0, 1, 1], [], []>} : vector<8x256xf32>, vector<256x512xf32>, vector<8x512xf32> -> vector<8x512xf32>
    %207 = vector.broadcast %1 : vector<1x512xf32> to vector<8x512xf32>
    %208 = arith.addf %206, %207 : vector<8x512xf32>
    %209 = vector.extract_strided_slice %208 {offsets = [0, 0], sizes = [8, 128], strides = [1, 1]} : vector<8x512xf32> to vector<8x128xf32>
    %cst_88 = arith.constant 5.000000e-01 : f32
    %210 = vector.broadcast %cst_88 : f32 to vector<8x128xf32>
    %211 = arith.mulf %210, %209 : vector<8x128xf32>
    %212 = math.tanh %211 : vector<8x128xf32>
    %cst_89 = arith.constant 1.000000e+00 : f32
    %213 = vector.broadcast %cst_89 : f32 to vector<8x128xf32>
    %214 = arith.addf %212, %213 : vector<8x128xf32>
    %cst_90 = arith.constant 5.000000e-01 : f32
    %215 = vector.broadcast %cst_90 : f32 to vector<8x128xf32>
    %216 = arith.mulf %215, %214 : vector<8x128xf32>
    %217 = vector.extract_strided_slice %208 {offsets = [0, 128], sizes = [8, 128], strides = [1, 1]} : vector<8x512xf32> to vector<8x128xf32>
    %cst_91 = arith.constant 5.000000e-01 : f32
    %218 = vector.broadcast %cst_91 : f32 to vector<8x128xf32>
    %219 = arith.mulf %218, %217 : vector<8x128xf32>
    %220 = math.tanh %219 : vector<8x128xf32>
    %cst_92 = arith.constant 1.000000e+00 : f32
    %221 = vector.broadcast %cst_92 : f32 to vector<8x128xf32>
    %222 = arith.addf %220, %221 : vector<8x128xf32>
    %cst_93 = arith.constant 5.000000e-01 : f32
    %223 = vector.broadcast %cst_93 : f32 to vector<8x128xf32>
    %224 = arith.mulf %223, %222 : vector<8x128xf32>
    %225 = vector.extract_strided_slice %208 {offsets = [0, 256], sizes = [8, 128], strides = [1, 1]} : vector<8x512xf32> to vector<8x128xf32>
    %226 = math.tanh %225 : vector<8x128xf32>
    %227 = vector.extract_strided_slice %208 {offsets = [0, 384], sizes = [8, 128], strides = [1, 1]} : vector<8x512xf32> to vector<8x128xf32>
    %cst_94 = arith.constant 5.000000e-01 : f32
    %228 = vector.broadcast %cst_94 : f32 to vector<8x128xf32>
    %229 = arith.mulf %228, %227 : vector<8x128xf32>
    %230 = math.tanh %229 : vector<8x128xf32>
    %cst_95 = arith.constant 1.000000e+00 : f32
    %231 = vector.broadcast %cst_95 : f32 to vector<8x128xf32>
    %232 = arith.addf %230, %231 : vector<8x128xf32>
    %cst_96 = arith.constant 5.000000e-01 : f32
    %233 = vector.broadcast %cst_96 : f32 to vector<8x128xf32>
    %234 = arith.mulf %233, %232 : vector<8x128xf32>
    %235 = arith.mulf %224, %161 : vector<8x128xf32>
    %236 = arith.mulf %216, %226 : vector<8x128xf32>
    %237 = arith.addf %235, %236 : vector<8x128xf32>
    %238 = math.tanh %237 : vector<8x128xf32>
    %239 = arith.mulf %234, %238 : vector<8x128xf32>
    %c3_i32 = arith.constant 3 : i32
    %c8_i32_97 = arith.constant 8 : i32
    %240 = arith.muli %c3_i32, %c8_i32_97 : i32
    %241 = tpu.assume_multiple %240, 8 : i32
    %242 = arith.index_cast %241 : i32 to index
    %c0_98 = arith.constant 0 : index
    %243 = vector.load %arg15[%242, %c0_98] : memref<64x512xf32, #tpu.memory_space<vmem>>, vector<8x512xf32>
    %c0_99 = arith.constant 0 : index
    %c0_100 = arith.constant 0 : index
    %244 = vector.load %arg3[%c0_99, %c0_100] : memref<128x512xf32, #tpu.memory_space<vmem>>, vector<128x512xf32>
    %cst_101 = arith.constant dense<0.000000e+00> : vector<8x512xf32>
    %245 = tpu.matmul %203, %244, %cst_101 {dimension_numbers = #tpu.dot_dimension_numbers<[1], [0], [0], [1], [0, 0, 1, 1], [], []>} : vector<8x128xf32>, vector<128x512xf32>, vector<8x512xf32> -> vector<8x512xf32>
    %246 = arith.addf %243, %245 : vector<8x512xf32>
    %247 = vector.broadcast %0 : vector<1x512xf32> to vector<8x512xf32>
    %248 = arith.addf %246, %247 : vector<8x512xf32>
    %249 = vector.extract_strided_slice %248 {offsets = [0, 0], sizes = [8, 128], strides = [1, 1]} : vector<8x512xf32> to vector<8x128xf32>
    %cst_102 = arith.constant 5.000000e-01 : f32
    %250 = vector.broadcast %cst_102 : f32 to vector<8x128xf32>
    %251 = arith.mulf %250, %249 : vector<8x128xf32>
    %252 = math.tanh %251 : vector<8x128xf32>
    %cst_103 = arith.constant 1.000000e+00 : f32
    %253 = vector.broadcast %cst_103 : f32 to vector<8x128xf32>
    %254 = arith.addf %252, %253 : vector<8x128xf32>
    %cst_104 = arith.constant 5.000000e-01 : f32
    %255 = vector.broadcast %cst_104 : f32 to vector<8x128xf32>
    %256 = arith.mulf %255, %254 : vector<8x128xf32>
    %257 = vector.extract_strided_slice %248 {offsets = [0, 128], sizes = [8, 128], strides = [1, 1]} : vector<8x512xf32> to vector<8x128xf32>
    %cst_105 = arith.constant 5.000000e-01 : f32
    %258 = vector.broadcast %cst_105 : f32 to vector<8x128xf32>
    %259 = arith.mulf %258, %257 : vector<8x128xf32>
    %260 = math.tanh %259 : vector<8x128xf32>
    %cst_106 = arith.constant 1.000000e+00 : f32
    %261 = vector.broadcast %cst_106 : f32 to vector<8x128xf32>
    %262 = arith.addf %260, %261 : vector<8x128xf32>
    %cst_107 = arith.constant 5.000000e-01 : f32
    %263 = vector.broadcast %cst_107 : f32 to vector<8x128xf32>
    %264 = arith.mulf %263, %262 : vector<8x128xf32>
    %265 = vector.extract_strided_slice %248 {offsets = [0, 256], sizes = [8, 128], strides = [1, 1]} : vector<8x512xf32> to vector<8x128xf32>
    %266 = math.tanh %265 : vector<8x128xf32>
    %267 = vector.extract_strided_slice %248 {offsets = [0, 384], sizes = [8, 128], strides = [1, 1]} : vector<8x512xf32> to vector<8x128xf32>
    %cst_108 = arith.constant 5.000000e-01 : f32
    %268 = vector.broadcast %cst_108 : f32 to vector<8x128xf32>
    %269 = arith.mulf %268, %267 : vector<8x128xf32>
    %270 = math.tanh %269 : vector<8x128xf32>
    %cst_109 = arith.constant 1.000000e+00 : f32
    %271 = vector.broadcast %cst_109 : f32 to vector<8x128xf32>
    %272 = arith.addf %270, %271 : vector<8x128xf32>
    %cst_110 = arith.constant 5.000000e-01 : f32
    %273 = vector.broadcast %cst_110 : f32 to vector<8x128xf32>
    %274 = arith.mulf %273, %272 : vector<8x128xf32>
    %275 = arith.mulf %264, %201 : vector<8x128xf32>
    %276 = arith.mulf %256, %266 : vector<8x128xf32>
    %277 = arith.addf %275, %276 : vector<8x128xf32>
    %278 = math.tanh %277 : vector<8x128xf32>
    %279 = arith.mulf %274, %278 : vector<8x128xf32>
    %280 = tpu.concatenate %279, %239 in 1 : vector<8x128xf32>, vector<8x128xf32> -> vector<8x256xf32>
    %c0_111 = arith.constant 0 : index
    %c0_112 = arith.constant 0 : index
    %281 = vector.load %arg5[%c0_111, %c0_112] : memref<256x512xf32, #tpu.memory_space<vmem>>, vector<256x512xf32>
    %cst_113 = arith.constant dense<0.000000e+00> : vector<8x512xf32>
    %282 = tpu.matmul %280, %281, %cst_113 {dimension_numbers = #tpu.dot_dimension_numbers<[1], [0], [0], [1], [0, 0, 1, 1], [], []>} : vector<8x256xf32>, vector<256x512xf32>, vector<8x512xf32> -> vector<8x512xf32>
    %283 = vector.broadcast %1 : vector<1x512xf32> to vector<8x512xf32>
    %284 = arith.addf %282, %283 : vector<8x512xf32>
    %285 = vector.extract_strided_slice %284 {offsets = [0, 0], sizes = [8, 128], strides = [1, 1]} : vector<8x512xf32> to vector<8x128xf32>
    %cst_114 = arith.constant 5.000000e-01 : f32
    %286 = vector.broadcast %cst_114 : f32 to vector<8x128xf32>
    %287 = arith.mulf %286, %285 : vector<8x128xf32>
    %288 = math.tanh %287 : vector<8x128xf32>
    %cst_115 = arith.constant 1.000000e+00 : f32
    %289 = vector.broadcast %cst_115 : f32 to vector<8x128xf32>
    %290 = arith.addf %288, %289 : vector<8x128xf32>
    %cst_116 = arith.constant 5.000000e-01 : f32
    %291 = vector.broadcast %cst_116 : f32 to vector<8x128xf32>
    %292 = arith.mulf %291, %290 : vector<8x128xf32>
    %293 = vector.extract_strided_slice %284 {offsets = [0, 128], sizes = [8, 128], strides = [1, 1]} : vector<8x512xf32> to vector<8x128xf32>
    %cst_117 = arith.constant 5.000000e-01 : f32
    %294 = vector.broadcast %cst_117 : f32 to vector<8x128xf32>
    %295 = arith.mulf %294, %293 : vector<8x128xf32>
    %296 = math.tanh %295 : vector<8x128xf32>
    %cst_118 = arith.constant 1.000000e+00 : f32
    %297 = vector.broadcast %cst_118 : f32 to vector<8x128xf32>
    %298 = arith.addf %296, %297 : vector<8x128xf32>
    %cst_119 = arith.constant 5.000000e-01 : f32
    %299 = vector.broadcast %cst_119 : f32 to vector<8x128xf32>
    %300 = arith.mulf %299, %298 : vector<8x128xf32>
    %301 = vector.extract_strided_slice %284 {offsets = [0, 256], sizes = [8, 128], strides = [1, 1]} : vector<8x512xf32> to vector<8x128xf32>
    %302 = math.tanh %301 : vector<8x128xf32>
    %303 = vector.extract_strided_slice %284 {offsets = [0, 384], sizes = [8, 128], strides = [1, 1]} : vector<8x512xf32> to vector<8x128xf32>
    %cst_120 = arith.constant 5.000000e-01 : f32
    %304 = vector.broadcast %cst_120 : f32 to vector<8x128xf32>
    %305 = arith.mulf %304, %303 : vector<8x128xf32>
    %306 = math.tanh %305 : vector<8x128xf32>
    %cst_121 = arith.constant 1.000000e+00 : f32
    %307 = vector.broadcast %cst_121 : f32 to vector<8x128xf32>
    %308 = arith.addf %306, %307 : vector<8x128xf32>
    %cst_122 = arith.constant 5.000000e-01 : f32
    %309 = vector.broadcast %cst_122 : f32 to vector<8x128xf32>
    %310 = arith.mulf %309, %308 : vector<8x128xf32>
    %311 = arith.mulf %300, %237 : vector<8x128xf32>
    %312 = arith.mulf %292, %302 : vector<8x128xf32>
    %313 = arith.addf %311, %312 : vector<8x128xf32>
    %314 = math.tanh %313 : vector<8x128xf32>
    %315 = arith.mulf %310, %314 : vector<8x128xf32>
    %c4_i32 = arith.constant 4 : i32
    %c8_i32_123 = arith.constant 8 : i32
    %316 = arith.muli %c4_i32, %c8_i32_123 : i32
    %317 = tpu.assume_multiple %316, 8 : i32
    %318 = arith.index_cast %317 : i32 to index
    %c0_124 = arith.constant 0 : index
    %319 = vector.load %arg15[%318, %c0_124] : memref<64x512xf32, #tpu.memory_space<vmem>>, vector<8x512xf32>
    %c0_125 = arith.constant 0 : index
    %c0_126 = arith.constant 0 : index
    %320 = vector.load %arg3[%c0_125, %c0_126] : memref<128x512xf32, #tpu.memory_space<vmem>>, vector<128x512xf32>
    %cst_127 = arith.constant dense<0.000000e+00> : vector<8x512xf32>
    %321 = tpu.matmul %279, %320, %cst_127 {dimension_numbers = #tpu.dot_dimension_numbers<[1], [0], [0], [1], [0, 0, 1, 1], [], []>} : vector<8x128xf32>, vector<128x512xf32>, vector<8x512xf32> -> vector<8x512xf32>
    %322 = arith.addf %319, %321 : vector<8x512xf32>
    %323 = vector.broadcast %0 : vector<1x512xf32> to vector<8x512xf32>
    %324 = arith.addf %322, %323 : vector<8x512xf32>
    %325 = vector.extract_strided_slice %324 {offsets = [0, 0], sizes = [8, 128], strides = [1, 1]} : vector<8x512xf32> to vector<8x128xf32>
    %cst_128 = arith.constant 5.000000e-01 : f32
    %326 = vector.broadcast %cst_128 : f32 to vector<8x128xf32>
    %327 = arith.mulf %326, %325 : vector<8x128xf32>
    %328 = math.tanh %327 : vector<8x128xf32>
    %cst_129 = arith.constant 1.000000e+00 : f32
    %329 = vector.broadcast %cst_129 : f32 to vector<8x128xf32>
    %330 = arith.addf %328, %329 : vector<8x128xf32>
    %cst_130 = arith.constant 5.000000e-01 : f32
    %331 = vector.broadcast %cst_130 : f32 to vector<8x128xf32>
    %332 = arith.mulf %331, %330 : vector<8x128xf32>
    %333 = vector.extract_strided_slice %324 {offsets = [0, 128], sizes = [8, 128], strides = [1, 1]} : vector<8x512xf32> to vector<8x128xf32>
    %cst_131 = arith.constant 5.000000e-01 : f32
    %334 = vector.broadcast %cst_131 : f32 to vector<8x128xf32>
    %335 = arith.mulf %334, %333 : vector<8x128xf32>
    %336 = math.tanh %335 : vector<8x128xf32>
    %cst_132 = arith.constant 1.000000e+00 : f32
    %337 = vector.broadcast %cst_132 : f32 to vector<8x128xf32>
    %338 = arith.addf %336, %337 : vector<8x128xf32>
    %cst_133 = arith.constant 5.000000e-01 : f32
    %339 = vector.broadcast %cst_133 : f32 to vector<8x128xf32>
    %340 = arith.mulf %339, %338 : vector<8x128xf32>
    %341 = vector.extract_strided_slice %324 {offsets = [0, 256], sizes = [8, 128], strides = [1, 1]} : vector<8x512xf32> to vector<8x128xf32>
    %342 = math.tanh %341 : vector<8x128xf32>
    %343 = vector.extract_strided_slice %324 {offsets = [0, 384], sizes = [8, 128], strides = [1, 1]} : vector<8x512xf32> to vector<8x128xf32>
    %cst_134 = arith.constant 5.000000e-01 : f32
    %344 = vector.broadcast %cst_134 : f32 to vector<8x128xf32>
    %345 = arith.mulf %344, %343 : vector<8x128xf32>
    %346 = math.tanh %345 : vector<8x128xf32>
    %cst_135 = arith.constant 1.000000e+00 : f32
    %347 = vector.broadcast %cst_135 : f32 to vector<8x128xf32>
    %348 = arith.addf %346, %347 : vector<8x128xf32>
    %cst_136 = arith.constant 5.000000e-01 : f32
    %349 = vector.broadcast %cst_136 : f32 to vector<8x128xf32>
    %350 = arith.mulf %349, %348 : vector<8x128xf32>
    %351 = arith.mulf %340, %277 : vector<8x128xf32>
    %352 = arith.mulf %332, %342 : vector<8x128xf32>
    %353 = arith.addf %351, %352 : vector<8x128xf32>
    %354 = math.tanh %353 : vector<8x128xf32>
    %355 = arith.mulf %350, %354 : vector<8x128xf32>
    %356 = tpu.concatenate %355, %315 in 1 : vector<8x128xf32>, vector<8x128xf32> -> vector<8x256xf32>
    %c0_137 = arith.constant 0 : index
    %c0_138 = arith.constant 0 : index
    %357 = vector.load %arg5[%c0_137, %c0_138] : memref<256x512xf32, #tpu.memory_space<vmem>>, vector<256x512xf32>
    %cst_139 = arith.constant dense<0.000000e+00> : vector<8x512xf32>
    %358 = tpu.matmul %356, %357, %cst_139 {dimension_numbers = #tpu.dot_dimension_numbers<[1], [0], [0], [1], [0, 0, 1, 1], [], []>} : vector<8x256xf32>, vector<256x512xf32>, vector<8x512xf32> -> vector<8x512xf32>
    %359 = vector.broadcast %1 : vector<1x512xf32> to vector<8x512xf32>
    %360 = arith.addf %358, %359 : vector<8x512xf32>
    %361 = vector.extract_strided_slice %360 {offsets = [0, 0], sizes = [8, 128], strides = [1, 1]} : vector<8x512xf32> to vector<8x128xf32>
    %cst_140 = arith.constant 5.000000e-01 : f32
    %362 = vector.broadcast %cst_140 : f32 to vector<8x128xf32>
    %363 = arith.mulf %362, %361 : vector<8x128xf32>
    %364 = math.tanh %363 : vector<8x128xf32>
    %cst_141 = arith.constant 1.000000e+00 : f32
    %365 = vector.broadcast %cst_141 : f32 to vector<8x128xf32>
    %366 = arith.addf %364, %365 : vector<8x128xf32>
    %cst_142 = arith.constant 5.000000e-01 : f32
    %367 = vector.broadcast %cst_142 : f32 to vector<8x128xf32>
    %368 = arith.mulf %367, %366 : vector<8x128xf32>
    %369 = vector.extract_strided_slice %360 {offsets = [0, 128], sizes = [8, 128], strides = [1, 1]} : vector<8x512xf32> to vector<8x128xf32>
    %cst_143 = arith.constant 5.000000e-01 : f32
    %370 = vector.broadcast %cst_143 : f32 to vector<8x128xf32>
    %371 = arith.mulf %370, %369 : vector<8x128xf32>
    %372 = math.tanh %371 : vector<8x128xf32>
    %cst_144 = arith.constant 1.000000e+00 : f32
    %373 = vector.broadcast %cst_144 : f32 to vector<8x128xf32>
    %374 = arith.addf %372, %373 : vector<8x128xf32>
    %cst_145 = arith.constant 5.000000e-01 : f32
    %375 = vector.broadcast %cst_145 : f32 to vector<8x128xf32>
    %376 = arith.mulf %375, %374 : vector<8x128xf32>
    %377 = vector.extract_strided_slice %360 {offsets = [0, 256], sizes = [8, 128], strides = [1, 1]} : vector<8x512xf32> to vector<8x128xf32>
    %378 = math.tanh %377 : vector<8x128xf32>
    %379 = vector.extract_strided_slice %360 {offsets = [0, 384], sizes = [8, 128], strides = [1, 1]} : vector<8x512xf32> to vector<8x128xf32>
    %cst_146 = arith.constant 5.000000e-01 : f32
    %380 = vector.broadcast %cst_146 : f32 to vector<8x128xf32>
    %381 = arith.mulf %380, %379 : vector<8x128xf32>
    %382 = math.tanh %381 : vector<8x128xf32>
    %cst_147 = arith.constant 1.000000e+00 : f32
    %383 = vector.broadcast %cst_147 : f32 to vector<8x128xf32>
    %384 = arith.addf %382, %383 : vector<8x128xf32>
    %cst_148 = arith.constant 5.000000e-01 : f32
    %385 = vector.broadcast %cst_148 : f32 to vector<8x128xf32>
    %386 = arith.mulf %385, %384 : vector<8x128xf32>
    %387 = arith.mulf %376, %313 : vector<8x128xf32>
    %388 = arith.mulf %368, %378 : vector<8x128xf32>
    %389 = arith.addf %387, %388 : vector<8x128xf32>
    %390 = math.tanh %389 : vector<8x128xf32>
    %391 = arith.mulf %386, %390 : vector<8x128xf32>
    %c5_i32 = arith.constant 5 : i32
    %c8_i32_149 = arith.constant 8 : i32
    %392 = arith.muli %c5_i32, %c8_i32_149 : i32
    %393 = tpu.assume_multiple %392, 8 : i32
    %394 = arith.index_cast %393 : i32 to index
    %c0_150 = arith.constant 0 : index
    %395 = vector.load %arg15[%394, %c0_150] : memref<64x512xf32, #tpu.memory_space<vmem>>, vector<8x512xf32>
    %c0_151 = arith.constant 0 : index
    %c0_152 = arith.constant 0 : index
    %396 = vector.load %arg3[%c0_151, %c0_152] : memref<128x512xf32, #tpu.memory_space<vmem>>, vector<128x512xf32>
    %cst_153 = arith.constant dense<0.000000e+00> : vector<8x512xf32>
    %397 = tpu.matmul %355, %396, %cst_153 {dimension_numbers = #tpu.dot_dimension_numbers<[1], [0], [0], [1], [0, 0, 1, 1], [], []>} : vector<8x128xf32>, vector<128x512xf32>, vector<8x512xf32> -> vector<8x512xf32>
    %398 = arith.addf %395, %397 : vector<8x512xf32>
    %399 = vector.broadcast %0 : vector<1x512xf32> to vector<8x512xf32>
    %400 = arith.addf %398, %399 : vector<8x512xf32>
    %401 = vector.extract_strided_slice %400 {offsets = [0, 0], sizes = [8, 128], strides = [1, 1]} : vector<8x512xf32> to vector<8x128xf32>
    %cst_154 = arith.constant 5.000000e-01 : f32
    %402 = vector.broadcast %cst_154 : f32 to vector<8x128xf32>
    %403 = arith.mulf %402, %401 : vector<8x128xf32>
    %404 = math.tanh %403 : vector<8x128xf32>
    %cst_155 = arith.constant 1.000000e+00 : f32
    %405 = vector.broadcast %cst_155 : f32 to vector<8x128xf32>
    %406 = arith.addf %404, %405 : vector<8x128xf32>
    %cst_156 = arith.constant 5.000000e-01 : f32
    %407 = vector.broadcast %cst_156 : f32 to vector<8x128xf32>
    %408 = arith.mulf %407, %406 : vector<8x128xf32>
    %409 = vector.extract_strided_slice %400 {offsets = [0, 128], sizes = [8, 128], strides = [1, 1]} : vector<8x512xf32> to vector<8x128xf32>
    %cst_157 = arith.constant 5.000000e-01 : f32
    %410 = vector.broadcast %cst_157 : f32 to vector<8x128xf32>
    %411 = arith.mulf %410, %409 : vector<8x128xf32>
    %412 = math.tanh %411 : vector<8x128xf32>
    %cst_158 = arith.constant 1.000000e+00 : f32
    %413 = vector.broadcast %cst_158 : f32 to vector<8x128xf32>
    %414 = arith.addf %412, %413 : vector<8x128xf32>
    %cst_159 = arith.constant 5.000000e-01 : f32
    %415 = vector.broadcast %cst_159 : f32 to vector<8x128xf32>
    %416 = arith.mulf %415, %414 : vector<8x128xf32>
    %417 = vector.extract_strided_slice %400 {offsets = [0, 256], sizes = [8, 128], strides = [1, 1]} : vector<8x512xf32> to vector<8x128xf32>
    %418 = math.tanh %417 : vector<8x128xf32>
    %419 = vector.extract_strided_slice %400 {offsets = [0, 384], sizes = [8, 128], strides = [1, 1]} : vector<8x512xf32> to vector<8x128xf32>
    %cst_160 = arith.constant 5.000000e-01 : f32
    %420 = vector.broadcast %cst_160 : f32 to vector<8x128xf32>
    %421 = arith.mulf %420, %419 : vector<8x128xf32>
    %422 = math.tanh %421 : vector<8x128xf32>
    %cst_161 = arith.constant 1.000000e+00 : f32
    %423 = vector.broadcast %cst_161 : f32 to vector<8x128xf32>
    %424 = arith.addf %422, %423 : vector<8x128xf32>
    %cst_162 = arith.constant 5.000000e-01 : f32
    %425 = vector.broadcast %cst_162 : f32 to vector<8x128xf32>
    %426 = arith.mulf %425, %424 : vector<8x128xf32>
    %427 = arith.mulf %416, %353 : vector<8x128xf32>
    %428 = arith.mulf %408, %418 : vector<8x128xf32>
    %429 = arith.addf %427, %428 : vector<8x128xf32>
    %430 = math.tanh %429 : vector<8x128xf32>
    %431 = arith.mulf %426, %430 : vector<8x128xf32>
    %432 = tpu.concatenate %431, %391 in 1 : vector<8x128xf32>, vector<8x128xf32> -> vector<8x256xf32>
    %c0_163 = arith.constant 0 : index
    %c0_164 = arith.constant 0 : index
    %433 = vector.load %arg5[%c0_163, %c0_164] : memref<256x512xf32, #tpu.memory_space<vmem>>, vector<256x512xf32>
    %cst_165 = arith.constant dense<0.000000e+00> : vector<8x512xf32>
    %434 = tpu.matmul %432, %433, %cst_165 {dimension_numbers = #tpu.dot_dimension_numbers<[1], [0], [0], [1], [0, 0, 1, 1], [], []>} : vector<8x256xf32>, vector<256x512xf32>, vector<8x512xf32> -> vector<8x512xf32>
    %435 = vector.broadcast %1 : vector<1x512xf32> to vector<8x512xf32>
    %436 = arith.addf %434, %435 : vector<8x512xf32>
    %437 = vector.extract_strided_slice %436 {offsets = [0, 0], sizes = [8, 128], strides = [1, 1]} : vector<8x512xf32> to vector<8x128xf32>
    %cst_166 = arith.constant 5.000000e-01 : f32
    %438 = vector.broadcast %cst_166 : f32 to vector<8x128xf32>
    %439 = arith.mulf %438, %437 : vector<8x128xf32>
    %440 = math.tanh %439 : vector<8x128xf32>
    %cst_167 = arith.constant 1.000000e+00 : f32
    %441 = vector.broadcast %cst_167 : f32 to vector<8x128xf32>
    %442 = arith.addf %440, %441 : vector<8x128xf32>
    %cst_168 = arith.constant 5.000000e-01 : f32
    %443 = vector.broadcast %cst_168 : f32 to vector<8x128xf32>
    %444 = arith.mulf %443, %442 : vector<8x128xf32>
    %445 = vector.extract_strided_slice %436 {offsets = [0, 128], sizes = [8, 128], strides = [1, 1]} : vector<8x512xf32> to vector<8x128xf32>
    %cst_169 = arith.constant 5.000000e-01 : f32
    %446 = vector.broadcast %cst_169 : f32 to vector<8x128xf32>
    %447 = arith.mulf %446, %445 : vector<8x128xf32>
    %448 = math.tanh %447 : vector<8x128xf32>
    %cst_170 = arith.constant 1.000000e+00 : f32
    %449 = vector.broadcast %cst_170 : f32 to vector<8x128xf32>
    %450 = arith.addf %448, %449 : vector<8x128xf32>
    %cst_171 = arith.constant 5.000000e-01 : f32
    %451 = vector.broadcast %cst_171 : f32 to vector<8x128xf32>
    %452 = arith.mulf %451, %450 : vector<8x128xf32>
    %453 = vector.extract_strided_slice %436 {offsets = [0, 256], sizes = [8, 128], strides = [1, 1]} : vector<8x512xf32> to vector<8x128xf32>
    %454 = math.tanh %453 : vector<8x128xf32>
    %455 = vector.extract_strided_slice %436 {offsets = [0, 384], sizes = [8, 128], strides = [1, 1]} : vector<8x512xf32> to vector<8x128xf32>
    %cst_172 = arith.constant 5.000000e-01 : f32
    %456 = vector.broadcast %cst_172 : f32 to vector<8x128xf32>
    %457 = arith.mulf %456, %455 : vector<8x128xf32>
    %458 = math.tanh %457 : vector<8x128xf32>
    %cst_173 = arith.constant 1.000000e+00 : f32
    %459 = vector.broadcast %cst_173 : f32 to vector<8x128xf32>
    %460 = arith.addf %458, %459 : vector<8x128xf32>
    %cst_174 = arith.constant 5.000000e-01 : f32
    %461 = vector.broadcast %cst_174 : f32 to vector<8x128xf32>
    %462 = arith.mulf %461, %460 : vector<8x128xf32>
    %463 = arith.mulf %452, %389 : vector<8x128xf32>
    %464 = arith.mulf %444, %454 : vector<8x128xf32>
    %465 = arith.addf %463, %464 : vector<8x128xf32>
    %466 = math.tanh %465 : vector<8x128xf32>
    %467 = arith.mulf %462, %466 : vector<8x128xf32>
    %c6_i32 = arith.constant 6 : i32
    %c8_i32_175 = arith.constant 8 : i32
    %468 = arith.muli %c6_i32, %c8_i32_175 : i32
    %469 = tpu.assume_multiple %468, 8 : i32
    %470 = arith.index_cast %469 : i32 to index
    %c0_176 = arith.constant 0 : index
    %471 = vector.load %arg15[%470, %c0_176] : memref<64x512xf32, #tpu.memory_space<vmem>>, vector<8x512xf32>
    %c0_177 = arith.constant 0 : index
    %c0_178 = arith.constant 0 : index
    %472 = vector.load %arg3[%c0_177, %c0_178] : memref<128x512xf32, #tpu.memory_space<vmem>>, vector<128x512xf32>
    %cst_179 = arith.constant dense<0.000000e+00> : vector<8x512xf32>
    %473 = tpu.matmul %431, %472, %cst_179 {dimension_numbers = #tpu.dot_dimension_numbers<[1], [0], [0], [1], [0, 0, 1, 1], [], []>} : vector<8x128xf32>, vector<128x512xf32>, vector<8x512xf32> -> vector<8x512xf32>
    %474 = arith.addf %471, %473 : vector<8x512xf32>
    %475 = vector.broadcast %0 : vector<1x512xf32> to vector<8x512xf32>
    %476 = arith.addf %474, %475 : vector<8x512xf32>
    %477 = vector.extract_strided_slice %476 {offsets = [0, 0], sizes = [8, 128], strides = [1, 1]} : vector<8x512xf32> to vector<8x128xf32>
    %cst_180 = arith.constant 5.000000e-01 : f32
    %478 = vector.broadcast %cst_180 : f32 to vector<8x128xf32>
    %479 = arith.mulf %478, %477 : vector<8x128xf32>
    %480 = math.tanh %479 : vector<8x128xf32>
    %cst_181 = arith.constant 1.000000e+00 : f32
    %481 = vector.broadcast %cst_181 : f32 to vector<8x128xf32>
    %482 = arith.addf %480, %481 : vector<8x128xf32>
    %cst_182 = arith.constant 5.000000e-01 : f32
    %483 = vector.broadcast %cst_182 : f32 to vector<8x128xf32>
    %484 = arith.mulf %483, %482 : vector<8x128xf32>
    %485 = vector.extract_strided_slice %476 {offsets = [0, 128], sizes = [8, 128], strides = [1, 1]} : vector<8x512xf32> to vector<8x128xf32>
    %cst_183 = arith.constant 5.000000e-01 : f32
    %486 = vector.broadcast %cst_183 : f32 to vector<8x128xf32>
    %487 = arith.mulf %486, %485 : vector<8x128xf32>
    %488 = math.tanh %487 : vector<8x128xf32>
    %cst_184 = arith.constant 1.000000e+00 : f32
    %489 = vector.broadcast %cst_184 : f32 to vector<8x128xf32>
    %490 = arith.addf %488, %489 : vector<8x128xf32>
    %cst_185 = arith.constant 5.000000e-01 : f32
    %491 = vector.broadcast %cst_185 : f32 to vector<8x128xf32>
    %492 = arith.mulf %491, %490 : vector<8x128xf32>
    %493 = vector.extract_strided_slice %476 {offsets = [0, 256], sizes = [8, 128], strides = [1, 1]} : vector<8x512xf32> to vector<8x128xf32>
    %494 = math.tanh %493 : vector<8x128xf32>
    %495 = vector.extract_strided_slice %476 {offsets = [0, 384], sizes = [8, 128], strides = [1, 1]} : vector<8x512xf32> to vector<8x128xf32>
    %cst_186 = arith.constant 5.000000e-01 : f32
    %496 = vector.broadcast %cst_186 : f32 to vector<8x128xf32>
    %497 = arith.mulf %496, %495 : vector<8x128xf32>
    %498 = math.tanh %497 : vector<8x128xf32>
    %cst_187 = arith.constant 1.000000e+00 : f32
    %499 = vector.broadcast %cst_187 : f32 to vector<8x128xf32>
    %500 = arith.addf %498, %499 : vector<8x128xf32>
    %cst_188 = arith.constant 5.000000e-01 : f32
    %501 = vector.broadcast %cst_188 : f32 to vector<8x128xf32>
    %502 = arith.mulf %501, %500 : vector<8x128xf32>
    %503 = arith.mulf %492, %429 : vector<8x128xf32>
    %504 = arith.mulf %484, %494 : vector<8x128xf32>
    %505 = arith.addf %503, %504 : vector<8x128xf32>
    %506 = math.tanh %505 : vector<8x128xf32>
    %507 = arith.mulf %502, %506 : vector<8x128xf32>
    %508 = tpu.concatenate %507, %467 in 1 : vector<8x128xf32>, vector<8x128xf32> -> vector<8x256xf32>
    %c0_189 = arith.constant 0 : index
    %c0_190 = arith.constant 0 : index
    %509 = vector.load %arg5[%c0_189, %c0_190] : memref<256x512xf32, #tpu.memory_space<vmem>>, vector<256x512xf32>
    %cst_191 = arith.constant dense<0.000000e+00> : vector<8x512xf32>
    %510 = tpu.matmul %508, %509, %cst_191 {dimension_numbers = #tpu.dot_dimension_numbers<[1], [0], [0], [1], [0, 0, 1, 1], [], []>} : vector<8x256xf32>, vector<256x512xf32>, vector<8x512xf32> -> vector<8x512xf32>
    %511 = vector.broadcast %1 : vector<1x512xf32> to vector<8x512xf32>
    %512 = arith.addf %510, %511 : vector<8x512xf32>
    %513 = vector.extract_strided_slice %512 {offsets = [0, 0], sizes = [8, 128], strides = [1, 1]} : vector<8x512xf32> to vector<8x128xf32>
    %cst_192 = arith.constant 5.000000e-01 : f32
    %514 = vector.broadcast %cst_192 : f32 to vector<8x128xf32>
    %515 = arith.mulf %514, %513 : vector<8x128xf32>
    %516 = math.tanh %515 : vector<8x128xf32>
    %cst_193 = arith.constant 1.000000e+00 : f32
    %517 = vector.broadcast %cst_193 : f32 to vector<8x128xf32>
    %518 = arith.addf %516, %517 : vector<8x128xf32>
    %cst_194 = arith.constant 5.000000e-01 : f32
    %519 = vector.broadcast %cst_194 : f32 to vector<8x128xf32>
    %520 = arith.mulf %519, %518 : vector<8x128xf32>
    %521 = vector.extract_strided_slice %512 {offsets = [0, 128], sizes = [8, 128], strides = [1, 1]} : vector<8x512xf32> to vector<8x128xf32>
    %cst_195 = arith.constant 5.000000e-01 : f32
    %522 = vector.broadcast %cst_195 : f32 to vector<8x128xf32>
    %523 = arith.mulf %522, %521 : vector<8x128xf32>
    %524 = math.tanh %523 : vector<8x128xf32>
    %cst_196 = arith.constant 1.000000e+00 : f32
    %525 = vector.broadcast %cst_196 : f32 to vector<8x128xf32>
    %526 = arith.addf %524, %525 : vector<8x128xf32>
    %cst_197 = arith.constant 5.000000e-01 : f32
    %527 = vector.broadcast %cst_197 : f32 to vector<8x128xf32>
    %528 = arith.mulf %527, %526 : vector<8x128xf32>
    %529 = vector.extract_strided_slice %512 {offsets = [0, 256], sizes = [8, 128], strides = [1, 1]} : vector<8x512xf32> to vector<8x128xf32>
    %530 = math.tanh %529 : vector<8x128xf32>
    %531 = vector.extract_strided_slice %512 {offsets = [0, 384], sizes = [8, 128], strides = [1, 1]} : vector<8x512xf32> to vector<8x128xf32>
    %cst_198 = arith.constant 5.000000e-01 : f32
    %532 = vector.broadcast %cst_198 : f32 to vector<8x128xf32>
    %533 = arith.mulf %532, %531 : vector<8x128xf32>
    %534 = math.tanh %533 : vector<8x128xf32>
    %cst_199 = arith.constant 1.000000e+00 : f32
    %535 = vector.broadcast %cst_199 : f32 to vector<8x128xf32>
    %536 = arith.addf %534, %535 : vector<8x128xf32>
    %cst_200 = arith.constant 5.000000e-01 : f32
    %537 = vector.broadcast %cst_200 : f32 to vector<8x128xf32>
    %538 = arith.mulf %537, %536 : vector<8x128xf32>
    %539 = arith.mulf %528, %465 : vector<8x128xf32>
    %540 = arith.mulf %520, %530 : vector<8x128xf32>
    %541 = arith.addf %539, %540 : vector<8x128xf32>
    %542 = math.tanh %541 : vector<8x128xf32>
    %543 = arith.mulf %538, %542 : vector<8x128xf32>
    %c7_i32 = arith.constant 7 : i32
    %c8_i32_201 = arith.constant 8 : i32
    %544 = arith.muli %c7_i32, %c8_i32_201 : i32
    %545 = tpu.assume_multiple %544, 8 : i32
    %546 = arith.index_cast %545 : i32 to index
    %c0_202 = arith.constant 0 : index
    %547 = vector.load %arg15[%546, %c0_202] : memref<64x512xf32, #tpu.memory_space<vmem>>, vector<8x512xf32>
    %c0_203 = arith.constant 0 : index
    %c0_204 = arith.constant 0 : index
    %548 = vector.load %arg3[%c0_203, %c0_204] : memref<128x512xf32, #tpu.memory_space<vmem>>, vector<128x512xf32>
    %cst_205 = arith.constant dense<0.000000e+00> : vector<8x512xf32>
    %549 = tpu.matmul %507, %548, %cst_205 {dimension_numbers = #tpu.dot_dimension_numbers<[1], [0], [0], [1], [0, 0, 1, 1], [], []>} : vector<8x128xf32>, vector<128x512xf32>, vector<8x512xf32> -> vector<8x512xf32>
    %550 = arith.addf %547, %549 : vector<8x512xf32>
    %551 = vector.broadcast %0 : vector<1x512xf32> to vector<8x512xf32>
    %552 = arith.addf %550, %551 : vector<8x512xf32>
    %553 = vector.extract_strided_slice %552 {offsets = [0, 0], sizes = [8, 128], strides = [1, 1]} : vector<8x512xf32> to vector<8x128xf32>
    %cst_206 = arith.constant 5.000000e-01 : f32
    %554 = vector.broadcast %cst_206 : f32 to vector<8x128xf32>
    %555 = arith.mulf %554, %553 : vector<8x128xf32>
    %556 = math.tanh %555 : vector<8x128xf32>
    %cst_207 = arith.constant 1.000000e+00 : f32
    %557 = vector.broadcast %cst_207 : f32 to vector<8x128xf32>
    %558 = arith.addf %556, %557 : vector<8x128xf32>
    %cst_208 = arith.constant 5.000000e-01 : f32
    %559 = vector.broadcast %cst_208 : f32 to vector<8x128xf32>
    %560 = arith.mulf %559, %558 : vector<8x128xf32>
    %561 = vector.extract_strided_slice %552 {offsets = [0, 128], sizes = [8, 128], strides = [1, 1]} : vector<8x512xf32> to vector<8x128xf32>
    %cst_209 = arith.constant 5.000000e-01 : f32
    %562 = vector.broadcast %cst_209 : f32 to vector<8x128xf32>
    %563 = arith.mulf %562, %561 : vector<8x128xf32>
    %564 = math.tanh %563 : vector<8x128xf32>
    %cst_210 = arith.constant 1.000000e+00 : f32
    %565 = vector.broadcast %cst_210 : f32 to vector<8x128xf32>
    %566 = arith.addf %564, %565 : vector<8x128xf32>
    %cst_211 = arith.constant 5.000000e-01 : f32
    %567 = vector.broadcast %cst_211 : f32 to vector<8x128xf32>
    %568 = arith.mulf %567, %566 : vector<8x128xf32>
    %569 = vector.extract_strided_slice %552 {offsets = [0, 256], sizes = [8, 128], strides = [1, 1]} : vector<8x512xf32> to vector<8x128xf32>
    %570 = math.tanh %569 : vector<8x128xf32>
    %571 = vector.extract_strided_slice %552 {offsets = [0, 384], sizes = [8, 128], strides = [1, 1]} : vector<8x512xf32> to vector<8x128xf32>
    %cst_212 = arith.constant 5.000000e-01 : f32
    %572 = vector.broadcast %cst_212 : f32 to vector<8x128xf32>
    %573 = arith.mulf %572, %571 : vector<8x128xf32>
    %574 = math.tanh %573 : vector<8x128xf32>
    %cst_213 = arith.constant 1.000000e+00 : f32
    %575 = vector.broadcast %cst_213 : f32 to vector<8x128xf32>
    %576 = arith.addf %574, %575 : vector<8x128xf32>
    %cst_214 = arith.constant 5.000000e-01 : f32
    %577 = vector.broadcast %cst_214 : f32 to vector<8x128xf32>
    %578 = arith.mulf %577, %576 : vector<8x128xf32>
    %579 = arith.mulf %568, %505 : vector<8x128xf32>
    %580 = arith.mulf %560, %570 : vector<8x128xf32>
    %581 = arith.addf %579, %580 : vector<8x128xf32>
    %582 = math.tanh %581 : vector<8x128xf32>
    %583 = arith.mulf %578, %582 : vector<8x128xf32>
    %584 = tpu.concatenate %583, %543 in 1 : vector<8x128xf32>, vector<8x128xf32> -> vector<8x256xf32>
    %c0_215 = arith.constant 0 : index
    %c0_216 = arith.constant 0 : index
    %585 = vector.load %arg5[%c0_215, %c0_216] : memref<256x512xf32, #tpu.memory_space<vmem>>, vector<256x512xf32>
    %cst_217 = arith.constant dense<0.000000e+00> : vector<8x512xf32>
    %586 = tpu.matmul %584, %585, %cst_217 {dimension_numbers = #tpu.dot_dimension_numbers<[1], [0], [0], [1], [0, 0, 1, 1], [], []>} : vector<8x256xf32>, vector<256x512xf32>, vector<8x512xf32> -> vector<8x512xf32>
    %587 = vector.broadcast %1 : vector<1x512xf32> to vector<8x512xf32>
    %588 = arith.addf %586, %587 : vector<8x512xf32>
    %589 = vector.extract_strided_slice %588 {offsets = [0, 0], sizes = [8, 128], strides = [1, 1]} : vector<8x512xf32> to vector<8x128xf32>
    %cst_218 = arith.constant 5.000000e-01 : f32
    %590 = vector.broadcast %cst_218 : f32 to vector<8x128xf32>
    %591 = arith.mulf %590, %589 : vector<8x128xf32>
    %592 = math.tanh %591 : vector<8x128xf32>
    %cst_219 = arith.constant 1.000000e+00 : f32
    %593 = vector.broadcast %cst_219 : f32 to vector<8x128xf32>
    %594 = arith.addf %592, %593 : vector<8x128xf32>
    %cst_220 = arith.constant 5.000000e-01 : f32
    %595 = vector.broadcast %cst_220 : f32 to vector<8x128xf32>
    %596 = arith.mulf %595, %594 : vector<8x128xf32>
    %597 = vector.extract_strided_slice %588 {offsets = [0, 128], sizes = [8, 128], strides = [1, 1]} : vector<8x512xf32> to vector<8x128xf32>
    %cst_221 = arith.constant 5.000000e-01 : f32
    %598 = vector.broadcast %cst_221 : f32 to vector<8x128xf32>
    %599 = arith.mulf %598, %597 : vector<8x128xf32>
    %600 = math.tanh %599 : vector<8x128xf32>
    %cst_222 = arith.constant 1.000000e+00 : f32
    %601 = vector.broadcast %cst_222 : f32 to vector<8x128xf32>
    %602 = arith.addf %600, %601 : vector<8x128xf32>
    %cst_223 = arith.constant 5.000000e-01 : f32
    %603 = vector.broadcast %cst_223 : f32 to vector<8x128xf32>
    %604 = arith.mulf %603, %602 : vector<8x128xf32>
    %605 = vector.extract_strided_slice %588 {offsets = [0, 256], sizes = [8, 128], strides = [1, 1]} : vector<8x512xf32> to vector<8x128xf32>
    %606 = math.tanh %605 : vector<8x128xf32>
    %607 = vector.extract_strided_slice %588 {offsets = [0, 384], sizes = [8, 128], strides = [1, 1]} : vector<8x512xf32> to vector<8x128xf32>
    %cst_224 = arith.constant 5.000000e-01 : f32
    %608 = vector.broadcast %cst_224 : f32 to vector<8x128xf32>
    %609 = arith.mulf %608, %607 : vector<8x128xf32>
    %610 = math.tanh %609 : vector<8x128xf32>
    %cst_225 = arith.constant 1.000000e+00 : f32
    %611 = vector.broadcast %cst_225 : f32 to vector<8x128xf32>
    %612 = arith.addf %610, %611 : vector<8x128xf32>
    %cst_226 = arith.constant 5.000000e-01 : f32
    %613 = vector.broadcast %cst_226 : f32 to vector<8x128xf32>
    %614 = arith.mulf %613, %612 : vector<8x128xf32>
    %615 = arith.mulf %604, %541 : vector<8x128xf32>
    %616 = arith.mulf %596, %606 : vector<8x128xf32>
    %617 = arith.addf %615, %616 : vector<8x128xf32>
    %618 = math.tanh %617 : vector<8x128xf32>
    %619 = arith.mulf %614, %618 : vector<8x128xf32>
    %c8_i32_227 = arith.constant 8 : i32
    %c56 = arith.constant 56 : index
    %c0_228 = arith.constant 0 : index
    %620 = vector.load %arg1[%c56, %c0_228] : memref<64x2xf32, #tpu.memory_space<vmem>>, vector<8x2xf32>
    %c0_i32_229 = arith.constant 0 : i32
    %c45_i32 = arith.constant 45 : i32
    %621 = arith.addi %c0_i32_229, %c45_i32 : i32
    %c1_i32_230 = arith.constant 1 : i32
    %622:5 = scf.for %arg16 = %c0_i32_229 to %621 step %c1_i32_230 iter_args(%arg17 = %620, %arg18 = %583, %arg19 = %581, %arg20 = %619, %arg21 = %617) -> (vector<8x2xf32>, vector<8x128xf32>, vector<8x128xf32>, vector<8x128xf32>, vector<8x128xf32>)  : i32 {
      %cst_232 = arith.constant dense<0.000000e+00> : vector<8x512xf32>
      %623 = tpu.matmul %arg17, %2, %cst_232 {dimension_numbers = #tpu.dot_dimension_numbers<[1], [0], [0], [1], [0, 0, 1, 1], [], []>} : vector<8x2xf32>, vector<2x512xf32>, vector<8x512xf32> -> vector<8x512xf32>
      %c0_233 = arith.constant 0 : index
      %c0_234 = arith.constant 0 : index
      %624 = vector.load %arg8[%c0_233, %c0_234] : memref<128x512xf32, #tpu.memory_space<vmem>>, vector<128x512xf32>
      %cst_235 = arith.constant dense<0.000000e+00> : vector<8x512xf32>
      %625 = tpu.matmul %arg18, %624, %cst_235 {dimension_numbers = #tpu.dot_dimension_numbers<[1], [0], [0], [1], [0, 0, 1, 1], [], []>} : vector<8x128xf32>, vector<128x512xf32>, vector<8x512xf32> -> vector<8x512xf32>
      %626 = arith.addf %623, %625 : vector<8x512xf32>
      %627 = vector.broadcast %3 : vector<1x512xf32> to vector<8x512xf32>
      %628 = arith.addf %626, %627 : vector<8x512xf32>
      %629 = vector.extract_strided_slice %628 {offsets = [0, 0], sizes = [8, 128], strides = [1, 1]} : vector<8x512xf32> to vector<8x128xf32>
      %cst_236 = arith.constant 5.000000e-01 : f32
      %630 = vector.broadcast %cst_236 : f32 to vector<8x128xf32>
      %631 = arith.mulf %630, %629 : vector<8x128xf32>
      %632 = math.tanh %631 : vector<8x128xf32>
      %cst_237 = arith.constant 1.000000e+00 : f32
      %633 = vector.broadcast %cst_237 : f32 to vector<8x128xf32>
      %634 = arith.addf %632, %633 : vector<8x128xf32>
      %cst_238 = arith.constant 5.000000e-01 : f32
      %635 = vector.broadcast %cst_238 : f32 to vector<8x128xf32>
      %636 = arith.mulf %635, %634 : vector<8x128xf32>
      %637 = vector.extract_strided_slice %628 {offsets = [0, 128], sizes = [8, 128], strides = [1, 1]} : vector<8x512xf32> to vector<8x128xf32>
      %cst_239 = arith.constant 5.000000e-01 : f32
      %638 = vector.broadcast %cst_239 : f32 to vector<8x128xf32>
      %639 = arith.mulf %638, %637 : vector<8x128xf32>
      %640 = math.tanh %639 : vector<8x128xf32>
      %cst_240 = arith.constant 1.000000e+00 : f32
      %641 = vector.broadcast %cst_240 : f32 to vector<8x128xf32>
      %642 = arith.addf %640, %641 : vector<8x128xf32>
      %cst_241 = arith.constant 5.000000e-01 : f32
      %643 = vector.broadcast %cst_241 : f32 to vector<8x128xf32>
      %644 = arith.mulf %643, %642 : vector<8x128xf32>
      %645 = vector.extract_strided_slice %628 {offsets = [0, 256], sizes = [8, 128], strides = [1, 1]} : vector<8x512xf32> to vector<8x128xf32>
      %646 = math.tanh %645 : vector<8x128xf32>
      %647 = vector.extract_strided_slice %628 {offsets = [0, 384], sizes = [8, 128], strides = [1, 1]} : vector<8x512xf32> to vector<8x128xf32>
      %cst_242 = arith.constant 5.000000e-01 : f32
      %648 = vector.broadcast %cst_242 : f32 to vector<8x128xf32>
      %649 = arith.mulf %648, %647 : vector<8x128xf32>
      %650 = math.tanh %649 : vector<8x128xf32>
      %cst_243 = arith.constant 1.000000e+00 : f32
      %651 = vector.broadcast %cst_243 : f32 to vector<8x128xf32>
      %652 = arith.addf %650, %651 : vector<8x128xf32>
      %cst_244 = arith.constant 5.000000e-01 : f32
      %653 = vector.broadcast %cst_244 : f32 to vector<8x128xf32>
      %654 = arith.mulf %653, %652 : vector<8x128xf32>
      %655 = arith.mulf %644, %arg19 : vector<8x128xf32>
      %656 = arith.mulf %636, %646 : vector<8x128xf32>
      %657 = arith.addf %655, %656 : vector<8x128xf32>
      %658 = math.tanh %657 : vector<8x128xf32>
      %659 = arith.mulf %654, %658 : vector<8x128xf32>
      %660 = tpu.concatenate %659, %arg20 in 1 : vector<8x128xf32>, vector<8x128xf32> -> vector<8x256xf32>
      %c0_245 = arith.constant 0 : index
      %c0_246 = arith.constant 0 : index
      %661 = vector.load %arg10[%c0_245, %c0_246] : memref<256x512xf32, #tpu.memory_space<vmem>>, vector<256x512xf32>
      %cst_247 = arith.constant dense<0.000000e+00> : vector<8x512xf32>
      %662 = tpu.matmul %660, %661, %cst_247 {dimension_numbers = #tpu.dot_dimension_numbers<[1], [0], [0], [1], [0, 0, 1, 1], [], []>} : vector<8x256xf32>, vector<256x512xf32>, vector<8x512xf32> -> vector<8x512xf32>
      %663 = vector.broadcast %4 : vector<1x512xf32> to vector<8x512xf32>
      %664 = arith.addf %662, %663 : vector<8x512xf32>
      %665 = vector.extract_strided_slice %664 {offsets = [0, 0], sizes = [8, 128], strides = [1, 1]} : vector<8x512xf32> to vector<8x128xf32>
      %cst_248 = arith.constant 5.000000e-01 : f32
      %666 = vector.broadcast %cst_248 : f32 to vector<8x128xf32>
      %667 = arith.mulf %666, %665 : vector<8x128xf32>
      %668 = math.tanh %667 : vector<8x128xf32>
      %cst_249 = arith.constant 1.000000e+00 : f32
      %669 = vector.broadcast %cst_249 : f32 to vector<8x128xf32>
      %670 = arith.addf %668, %669 : vector<8x128xf32>
      %cst_250 = arith.constant 5.000000e-01 : f32
      %671 = vector.broadcast %cst_250 : f32 to vector<8x128xf32>
      %672 = arith.mulf %671, %670 : vector<8x128xf32>
      %673 = vector.extract_strided_slice %664 {offsets = [0, 128], sizes = [8, 128], strides = [1, 1]} : vector<8x512xf32> to vector<8x128xf32>
      %cst_251 = arith.constant 5.000000e-01 : f32
      %674 = vector.broadcast %cst_251 : f32 to vector<8x128xf32>
      %675 = arith.mulf %674, %673 : vector<8x128xf32>
      %676 = math.tanh %675 : vector<8x128xf32>
      %cst_252 = arith.constant 1.000000e+00 : f32
      %677 = vector.broadcast %cst_252 : f32 to vector<8x128xf32>
      %678 = arith.addf %676, %677 : vector<8x128xf32>
      %cst_253 = arith.constant 5.000000e-01 : f32
      %679 = vector.broadcast %cst_253 : f32 to vector<8x128xf32>
      %680 = arith.mulf %679, %678 : vector<8x128xf32>
      %681 = vector.extract_strided_slice %664 {offsets = [0, 256], sizes = [8, 128], strides = [1, 1]} : vector<8x512xf32> to vector<8x128xf32>
      %682 = math.tanh %681 : vector<8x128xf32>
      %683 = vector.extract_strided_slice %664 {offsets = [0, 384], sizes = [8, 128], strides = [1, 1]} : vector<8x512xf32> to vector<8x128xf32>
      %cst_254 = arith.constant 5.000000e-01 : f32
      %684 = vector.broadcast %cst_254 : f32 to vector<8x128xf32>
      %685 = arith.mulf %684, %683 : vector<8x128xf32>
      %686 = math.tanh %685 : vector<8x128xf32>
      %cst_255 = arith.constant 1.000000e+00 : f32
      %687 = vector.broadcast %cst_255 : f32 to vector<8x128xf32>
      %688 = arith.addf %686, %687 : vector<8x128xf32>
      %cst_256 = arith.constant 5.000000e-01 : f32
      %689 = vector.broadcast %cst_256 : f32 to vector<8x128xf32>
      %690 = arith.mulf %689, %688 : vector<8x128xf32>
      %691 = arith.mulf %680, %arg21 : vector<8x128xf32>
      %692 = arith.mulf %672, %682 : vector<8x128xf32>
      %693 = arith.addf %691, %692 : vector<8x128xf32>
      %694 = math.tanh %693 : vector<8x128xf32>
      %695 = arith.mulf %690, %694 : vector<8x128xf32>
      %cst_257 = arith.constant dense<0.000000e+00> : vector<8x2xf32>
      %696 = tpu.matmul %695, %5, %cst_257 {dimension_numbers = #tpu.dot_dimension_numbers<[1], [0], [0], [1], [0, 0, 1, 1], [], []>} : vector<8x128xf32>, vector<128x2xf32>, vector<8x2xf32> -> vector<8x2xf32>
      %697 = vector.broadcast %6 : vector<1x2xf32> to vector<8x2xf32>
      %698 = arith.addf %696, %697 : vector<8x2xf32>
      %699 = arith.index_cast %arg16 : i32 to index
      %c0_258 = arith.constant 0 : index
      %c0_259 = arith.constant 0 : index
      %700 = vector.load %arg14[%699, %c0_258, %c0_259] : memref<45x8x2xf32, #tpu.memory_space<vmem>>, vector<1x8x2xf32>
      %701 = vector.shape_cast %700 : vector<1x8x2xf32> to vector<8x2xf32>
      %702 = vector.shape_cast %698 : vector<8x2xf32> to vector<1x8x2xf32>
      tpu.vector_store %arg14[%699, %c0_258, %c0_259], %702 {strides = array<i32>} : memref<45x8x2xf32, #tpu.memory_space<vmem>>, vector<1x8x2xf32>,
      scf.yield %698, %659, %657, %695, %693 : vector<8x2xf32>, vector<8x128xf32>, vector<8x128xf32>, vector<8x128xf32>, vector<8x128xf32>
    }
    %c45_i32_231 = arith.constant 45 : i32
    return
  }
  func.func @transform_0(%arg0: i32) -> (i32, i32) {
    %c0_i32 = arith.constant 0 : i32
    %c0_i32_0 = arith.constant 0 : i32
    %c0_i32_1 = arith.constant 0 : i32
    return %c0_i32, %c0_i32_0 : i32, i32
  }
  func.func @transform_1(%arg0: i32) -> (i32, i32) {
    %c0_i32 = arith.constant 0 : i32
    %c0_i32_0 = arith.constant 0 : i32
    %c0_i32_1 = arith.constant 0 : i32
    return %c0_i32, %c0_i32_0 : i32, i32
  }
  func.func @transform_2(%arg0: i32) -> (i32, i32) {
    %c0_i32 = arith.constant 0 : i32
    %c0_i32_0 = arith.constant 0 : i32
    %c0_i32_1 = arith.constant 0 : i32
    return %c0_i32, %c0_i32_0 : i32, i32
  }
  func.func @transform_3(%arg0: i32) -> (i32, i32) {
    %c0_i32 = arith.constant 0 : i32
    %c0_i32_0 = arith.constant 0 : i32
    %c0_i32_1 = arith.constant 0 : i32
    return %c0_i32, %c0_i32_0 : i32, i32
  }
  func.func @transform_4(%arg0: i32) -> (i32, i32) {
    %c0_i32 = arith.constant 0 : i32
    %c0_i32_0 = arith.constant 0 : i32
    %c0_i32_1 = arith.constant 0 : i32
    return %c0_i32, %c0_i32_0 : i32, i32
  }
  func.func @transform_5(%arg0: i32) -> (i32, i32) {
    %c0_i32 = arith.constant 0 : i32
    %c0_i32_0 = arith.constant 0 : i32
    %c0_i32_1 = arith.constant 0 : i32
    return %c0_i32, %c0_i32_0 : i32, i32
  }
  func.func @transform_6(%arg0: i32) -> (i32, i32) {
    %c0_i32 = arith.constant 0 : i32
    %c0_i32_0 = arith.constant 0 : i32
    %c0_i32_1 = arith.constant 0 : i32
    return %c0_i32, %c0_i32_0 : i32, i32
  }
  func.func @transform_7(%arg0: i32) -> (i32, i32) {
    %c0_i32 = arith.constant 0 : i32
    %c0_i32_0 = arith.constant 0 : i32
    %c0_i32_1 = arith.constant 0 : i32
    return %c0_i32, %c0_i32_0 : i32, i32
  }
  func.func @transform_8(%arg0: i32) -> (i32, i32) {
    %c0_i32 = arith.constant 0 : i32
    %c0_i32_0 = arith.constant 0 : i32
    %c0_i32_1 = arith.constant 0 : i32
    return %c0_i32, %c0_i32_0 : i32, i32
  }
  func.func @transform_9(%arg0: i32) -> (i32, i32) {
    %c0_i32 = arith.constant 0 : i32
    %c0_i32_0 = arith.constant 0 : i32
    %c0_i32_1 = arith.constant 0 : i32
    return %c0_i32, %c0_i32_0 : i32, i32
  }
  func.func @transform_10(%arg0: i32) -> (i32, i32) {
    %c0_i32 = arith.constant 0 : i32
    %c0_i32_0 = arith.constant 0 : i32
    %c0_i32_1 = arith.constant 0 : i32
    return %c0_i32, %c0_i32_0 : i32, i32
  }
  func.func @transform_11(%arg0: i32) -> (i32, i32) {
    %c0_i32 = arith.constant 0 : i32
    %c0_i32_0 = arith.constant 0 : i32
    %c0_i32_1 = arith.constant 0 : i32
    return %c0_i32, %c0_i32_0 : i32, i32
  }
  func.func @transform_12(%arg0: i32) -> (i32, i32) {
    %c0_i32 = arith.constant 0 : i32
    %c0_i32_0 = arith.constant 0 : i32
    %c0_i32_1 = arith.constant 0 : i32
    return %c0_i32, %c0_i32_0 : i32, i32
  }
  func.func @transform_13(%arg0: i32) -> (i32, i32, i32) {
    %c0_i32 = arith.constant 0 : i32
    %c0_i32_0 = arith.constant 0 : i32
    %c0_i32_1 = arith.constant 0 : i32
    %c0_i32_2 = arith.constant 0 : i32
    return %c0_i32, %c0_i32_0, %c0_i32_1 : i32, i32, i32
  }
}

</mosaic_0001>

<bundles_post_ra>
// kernel: tpu_custom_call.1
= control target key start
LH: loop header
LB: loop body
LE: loop exit
PB: predicated region body
PF: predicated region fallthrough
CT: control target
= control target key end

     0   :  { %18 = vsyncpa [#allocation4], 0  ;;  %s9028_s0 = inlined_call_operand.vmem [shape: f32[64,2], index: 0, kind: input, shape index: {}]   ;;  %s9029_s1 = inlined_call_operand.vmem [shape: f32[2,512], index: 1, kind: input, shape index: {}]   ;;  %s9030_s2 = inlined_call_operand.hbm [shape: f32[128,512], index: 2, kind: input, shape index: {}]   ;;  %s9031_s3 = inlined_call_operand.vmem [shape: f32[1,512], index: 3, kind: input, shape index: {}]   ;;  %s9032_s4 = inlined_call_operand.hbm [shape: f32[256,512], index: 4, kind: input, shape index: {}]   ;;  %s9033_s5 = inlined_call_operand.vmem [shape: f32[1,512], index: 5, kind: input, shape index: {}]   ;;  %s9034_s6 = inlined_call_operand.vmem [shape: f32[2,512], index: 6, kind: input, shape index: {}]   ;;  %s9035_s7 = inlined_call_operand.hbm [shape: f32[128,512], index: 7, kind: input, shape index: {}]   ;;  %s9036_s8 = inlined_call_operand.vmem [shape: f32[1,512], index: 8, kind: input, shape index: {}]   ;;  %s9037_s9 = inlined_call_operand.hbm [shape: f32[256,512], index: 9, kind: input, shape index: {}]   ;;  %s9038_s10 = inlined_call_operand.vmem [shape: f32[1,512], index: 10, kind: input, shape index: {}]   ;;  %s9039_s11 = inlined_call_operand.vmem [shape: f32[128,2], index: 11, kind: input, shape index: {}]   ;;  %s9040_s12 = inlined_call_operand.vmem [shape: f32[1,2], index: 12, kind: input, shape index: {}]   ;;  %s9041_s13 = inlined_call_operand.vmem [shape: f32[45,8,2], index: 13, kind: output, shape index: {}]  }
   0x1   :  { %19 = vsyncpa [#allocation6], 0 }
   0x2   :  { %20 = vsyncpa [#allocation9], 0  ;;  %s5239_s25 = smov [#allocation5]   ;;  %s5240_s27 = smov [#allocation3]  }
   0x3   :  { %s44_s26 = sshll.u32 %s5239_s25, 4  ;;  %s30_s28 = sshll.u32 %s5240_s27, 4  ;;  %s45_s26 = int_to_ptr.vmem [resolvable:$true] %s44_s26  ;;  %s31_s28 = int_to_ptr.vmem [resolvable:$true] %s30_s28 }
   0x4   :  { %s5113_s29 = scalar_lea.vmem %s45_s26, 16384  ;;  %p5118_p1 = scmp.lt.s32.totalorder %s45_s26, %s45_s26 }
   0x5   :  { %p5114_p0 = scmp.ne.s32.totalorder %s45_s26, %s5113_s29  ;;  %p5119_p2 = scmp.lt.s32.totalorder %s5113_s29, %s5113_s29 }
   0x7   :  { %p5120_p3 = por %p5119_p2, %p5118_p1 }
   0x9   :  { %p5121_p4 = pnand %p5120_p3, %p5114_p0 }
   0xb   :  { %5124 = shalt.err (!%p5121_p4)
}
   0xc   :  { %s5241_s30 = smov 512   ;;  %s5242_s14 = smov 32  }
   0xd   :  { %50 = dma.hbm_to_vmem [thread:$0]  %s9032_s4, 16384, %s45_s26, [#allocation6], %s5241_s30, %s5241_s30, %s5242_s14  }
   0xe   :  { %s5133_s17 = scalar_lea.vmem %s31_s28, 8192  ;;  %p5138_p6 = scmp.lt.s32.totalorder %s31_s28, %s31_s28 }
   0xf   :  { %p5134_p5 = scmp.ne.s32.totalorder %s31_s28, %s5133_s17  ;;  %p5139_p7 = scmp.lt.s32.totalorder %s5133_s17, %s5133_s17 }
  0x11   :  { %p5140_p8 = por %p5139_p7, %p5138_p6 }
  0x13   :  { %p5141_p9 = pnand %p5140_p8, %p5134_p5 }
  0x15   :  { %5144 = shalt.err (!%p5141_p9)
}
  0x16   :  { %36 = dma.hbm_to_vmem [thread:$0]  %s9030_s2, 8192, %s31_s28, [#allocation4], %s5241_s30, %s5241_s30, %s5242_s14  }
  0x17   :  { %s5243_s20 = smov [#allocation7]   ;;  %s5244_s22 = smov [#allocation8]  }
  0x18   :  { %s60_s21 = sshll.u32 %s5243_s20, 4  ;;  %s74_s23 = sshll.u32 %s5244_s22, 4  ;;  %s61_s21 = int_to_ptr.vmem [resolvable:$true] %s60_s21  ;;  %s75_s23 = int_to_ptr.vmem [resolvable:$true] %s74_s23 }
  0x19   :  { %s5153_s4 = scalar_lea.vmem %s61_s21, 8192  ;;  %p5158_p11 = scmp.lt.s32.totalorder %s61_s21, %s61_s21 }
  0x1a   :  { %p5154_p10 = scmp.ne.s32.totalorder %s61_s21, %s5153_s4  ;;  %p5159_p12 = scmp.lt.s32.totalorder %s5153_s4, %s5153_s4 }
  0x1c   :  { %p5160_p13 = por %p5159_p12, %p5158_p11 }
  0x1e   :  { %p5161_p0 = pnand %p5160_p13, %p5154_p10 }
  0x20   :  { %5164 = shalt.err (!%p5161_p0)
}
  0x21   :  { %66 = dma.hbm_to_vmem [thread:$0]  %s9035_s7, 8192, %s61_s21, [#allocation6], %s5241_s30, %s5241_s30, %s5242_s14  }
  0x22   :  { %s5173_s2 = scalar_lea.vmem %s75_s23, 16384  ;;  %p5178_p2 = scmp.lt.s32.totalorder %s75_s23, %s75_s23 }
  0x23   :  { %p5174_p1 = scmp.ne.s32.totalorder %s75_s23, %s5173_s2  ;;  %p5179_p3 = scmp.lt.s32.totalorder %s5173_s2, %s5173_s2 }
  0x25   :  { %p5180_p4 = por %p5179_p3, %p5178_p2 }
  0x27   :  { %p5181_p5 = pnand %p5180_p4, %p5174_p1 }
  0x29   :  { %5184 = shalt.err (!%p5181_p5)
}
  0x2a   :  { %80 = dma.hbm_to_vmem [thread:$0]  %s9037_s9, 16384, %s75_s23, [#allocation9], %s5241_s30, %s5241_s30, %s5242_s14  }
  0x2b   :  { %5209 = dma.done.wait [#allocation4], 8192  }
  0x2c   :  { %5210 = vsyncadd [#allocation4], 4294959104 }
  0x2d   :  { %5211 = dma.done.wait [#allocation6], 24576  }
  0x2e   :  { %5212 = vsyncadd [#allocation6], 4294942720 }
  0x2f   :  { %5213 = dma.done.wait [#allocation9], 16384  }
  0x30   :  { %5214 = vsyncadd [#allocation9], 4294950912  ;;  %v9042_v0 = vmov 0.0   ;;  %v5246_v1 = vmov 1983009808   ;;  %v135_v3 = vlaneseq  ;;  %v5348_v4 = vld [vmem:[%s9034_s6] sm:$0xff] }
  0x31   :  { %246 = vmatprep.mubr.f32.mxu0 %v9042_v0  ;;  %359 = vmatprep.mubr.f32.mxu1 %v9042_v0  ;;  %v133_v2 = vunpack.c.l.s4 %v5246_v1  ;;  %9686 = vst [vmem:[#allocation13_spill] sm:$0xff] %v5348_v4  ;;  %v5353_v5 = vld [vmem:[%s9036_s8] sm:$0xf]  ;;  %v5370_v10 = vld [vmem:[%s9039_s11 + $0x8] sm:$0xff]  ;;  %v5375_v11 = vld [vmem:[%s9039_s11 + $0x10] sm:$0xff]  ;;  %vm173_vm0 = vcmask 1041408  }
  0x32   :  { %9687 = vst [vmem:[#allocation14_spill] sm:$0xff] %v5353_v5  ;;  %v5358_v6 = vld [vmem:[%s9038_s10] sm:$0xf]  ;;  %v5360_v8 = vshrl.u32 %v135_v3, 7  ;;  %9690 = vst [vmem:[#allocation17_spill] sm:$0xff] %v5370_v10  ;;  %v5380_v12 = vld [vmem:[%s9039_s11 + $0x18] sm:$0xff] }
  0x33   :  { %9688 = vst [vmem:[#allocation15_spill] sm:$0xff] %v5358_v6  ;;  %v134_v7 = vunpack.c.0.s8 %v133_v2  ;;  %v5365_v9 = vld [vmem:[%s9039_s11] sm:$0xff]  ;;  %9691 = vst [vmem:[#allocation18_spill] sm:$0xff] %v5375_v11  ;;  %v5390_v14 = vld [vmem:[%s9039_s11 + $0x28] sm:$0xff]  ;;  %vm148_vm1 = vcmask 15360  }
  0x34   :  { %9689 = vst [vmem:[#allocation16_spill] sm:$0xff] %v5365_v9  ;;  %9692 = vst [vmem:[#allocation19_spill] sm:$0xff] %v5380_v12  ;;  %v5385_v13 = vld [vmem:[%s9039_s11 + $0x20] sm:$0xff]  ;;  %v5395_v15 = vld [vmem:[%s9039_s11 + $0x30] sm:$0xff] }
  0x35   :  { %9693 = vst [vmem:[#allocation20_spill] sm:$0xff] %v5385_v13  ;;  %9694 = vst [vmem:[#allocation21_spill] sm:$0xff] %v5390_v14  ;;  %v5400_v16 = vld [vmem:[%s9039_s11 + $0x38] sm:$0xff]  ;;  %v5405_v17 = vld [vmem:[%s9039_s11 + $0x40] sm:$0xff]  ;;  %v5423_v21 = vsub.s32 %v134_v7, %v5360_v8 }
  0x36   :  { %9695 = vst [vmem:[#allocation22_spill] sm:$0xff] %v5395_v15  ;;  %9696 = vst [vmem:[#allocation23_spill] sm:$0xff] %v5400_v16  ;;  %v5410_v18 = vld [vmem:[%s9039_s11 + $0x48] sm:$0xff]  ;;  %v5415_v19 = vld [vmem:[%s9039_s11 + $0x50] sm:$0xff] }
  0x37   :  { %9697 = vst [vmem:[#allocation24_spill] sm:$0xff] %v5405_v17  ;;  %9698 = vst [vmem:[#allocation25_spill] sm:$0xff] %v5410_v18  ;;  %v5420_v20 = vld [vmem:[%s9039_s11 + $0x58] sm:$0xff]  ;;  %v5428_v22 = vld [vmem:[%s9039_s11 + $0x60] sm:$0xff] }
  0x38   :  { %9699 = vst [vmem:[#allocation26_spill] sm:$0xff] %v5415_v19  ;;  %9700 = vst [vmem:[#allocation27_spill] sm:$0xff] %v5420_v20  ;;  %v5433_v23 = vld [vmem:[%s9039_s11 + $0x68] sm:$0xff]  ;;  %v5438_v24 = vld [vmem:[%s9039_s11 + $0x70] sm:$0xff] }
  0x39   :  { %9701 = vst [vmem:[#allocation28_spill] sm:$0xff] %v5423_v21  ;;  %9702 = vst [vmem:[#allocation29_spill] sm:$0xff] %v5428_v22  ;;  %v5443_v25 = vld [vmem:[%s9039_s11 + $0x78] sm:$0xff]  ;;  %v5448_v26 = vld [vmem:[%s9040_s12] ss:$0 sm:$0xff] }
  0x3a   :  { %9703 = vst [vmem:[#allocation30_spill] sm:$0xff] %v5433_v23  ;;  %9704 = vst [vmem:[#allocation31_spill] sm:$0xff] %v5438_v24  ;;  %v129_v27 = vld [vmem:[%s9029_s1] sm:$0xff]  ;;  %v5458_v33 = vld [vmem:[#allocation3 + $0x1e8] sm:$0xff] }
  0x3b   :  { %9705 = vst [vmem:[#allocation32_spill] sm:$0xff] %v5443_v25  ;;  %9706 = vst [vmem:[#allocation33_spill] sm:$0xff] %v5448_v26  ;;  %v138_v28 = vrot.slane %v129_v27, %v5423_v21  ;;  %v131_v29 = vcombine.high %v129_v27, %v129_v27  ;;  %v121_v31 = vld [vmem:[%s9028_s0] sm:$0xff]  ;;  %v5464_v36 = vld [vmem:[#allocation3 + $0x1c8] sm:$0xff]  ;;  %v9707_v26 = vmov 0.0  }
  0x3c   :  { %v5461_v34 = vld [vmem:[#allocation3 + $0x1e0] sm:$0xff]  ;;  %v5468_v37 = vld [vmem:[#allocation3 + $0x1f8] sm:$0xff]  ;;  %v5476_v39 = vld [vmem:[#allocation3 + $0x1f0] sm:$0xff] }
  0x3d   :  { %v146_v30 = vcombine.high %v138_v28, %v138_v28  ;;  %v145_v32 = vrot.slane %v131_v29, %v5423_v21  ;;  %v5472_v38 = vld [vmem:[#allocation3 + $0x1c0] sm:$0xff]  ;;  %v122_v40 = vld [vmem:[%s9028_s0 + $0x8] sm:$0xff]  ;;  %v5485_v42 = vld [vmem:[#allocation3 + $0x1d8] sm:$0xff] }
  0x3e   :  { %v5483_v41 = vld [vmem:[#allocation3 + $0x1a8] sm:$0xff]  ;;  %v5489_v43 = vld [vmem:[#allocation3 + $0x1a0] sm:$0xff]  ;;  %v5493_v44 = vld [vmem:[#allocation3 + $0x1d0] sm:$0xff] }
  0x3f   :  { %4210 = vmatprep.subr.msk.mxu0 %vm173_vm0, %v146_v30  ;;  %v147_v35 = vcombine.high %v145_v32, %v145_v32  ;;  %v5495_v45 = vld [vmem:[#allocation3 + $0x188] sm:$0xff]  ;;  %v5499_v46 = vld [vmem:[#allocation3 + $0x1b8] sm:$0xff]  ;;  %v5503_v47 = vld [vmem:[#allocation3 + $0x180] sm:$0xff] }
  0x40   :  { %4211 = vmatpush1.msk.msra.mxu0 %vm173_vm0, %v138_v28  ;;  %v5507_v48 = vld [vmem:[#allocation3 + $0x1b0] sm:$0xff]  ;;  %v5514_v50 = vld [vmem:[#allocation3 + $0x168] sm:$0xff]  ;;  %v5516_v51 = vld [vmem:[#allocation3 + $0x198] sm:$0xff] }
  0x41   :  { %4212 = vmatmul.mubr.msk.f32.vlgmr.msra.gmra.mxu0 %vm148_vm1, %v121_v31  ;;  %511 = vmatprep.subr.mxu0 %v5458_v33  ;;  %v123_v49 = vld [vmem:[%s9028_s0 + $0x10] sm:$0xff]  ;;  %v5520_v52 = vld [vmem:[#allocation3 + $0x160] sm:$0xff]  ;;  %v5526_v54 = vld [vmem:[#allocation3 + $0x148] sm:$0xff] }
  0x42   :  { %4220 = vmatprep.subr.msk.mxu1 %vm173_vm0, %v147_v35  ;;  %512 = vmatpush1.msra.mxu0 %v5461_v34  ;;  %v5524_v53 = vld [vmem:[#allocation3 + $0x190] sm:$0xff]  ;;  %v5530_v55 = vld [vmem:[#allocation3 + $0x178] sm:$0xff]  ;;  %v5534_v56 = vld [vmem:[#allocation3 + $0x140] sm:$0xff] }
  0x43   :  { %4221 = vmatpush1.msk.msra.mxu1 %vm173_vm0, %v145_v32  ;;  %513 = vmatprep.subr.mxu0 %v5464_v36  ;;  %v5538_v57 = vld [vmem:[#allocation3 + $0x170] sm:$0xff]  ;;  %v124_v58 = vld [vmem:[%s9028_s0 + $0x18] sm:$0xff]  ;;  %v5545_v59 = vld [vmem:[#allocation3 + $0x128] sm:$0xff] }
  0x44   :  { %4222 = vmatmul.mubr.msk.f32.vlgmr.msra.gmra.mxu1 %vm148_vm1, %v121_v31  ;;  %582 = vmatprep.subr.mxu1 %v5468_v37  ;;  %v5547_v60 = vld [vmem:[#allocation3 + $0x158] sm:$0xff]  ;;  %v5551_v61 = vld [vmem:[#allocation3 + $0x120] sm:$0xff]  ;;  %v5555_v62 = vld [vmem:[#allocation3 + $0x150] sm:$0xff] }
  0x45   :  { %252 = vmatprep.mubr.f32.mxu0 %v9042_v0  ;;  %514 = vmatpush1.msra.mxu0 %v5472_v38  ;;  %v5557_v63 = vld [vmem:[#allocation3 + $0x108] sm:$0xff]  ;;  %v5561_v1 = vld [vmem:[#allocation3 + $0x138] sm:$0xff]  ;;  %v5565_v2 = vld [vmem:[#allocation3 + $0x100] sm:$0xff] }
  0x46   :  { %583 = vmatpush1.msra.mxu1 %v5476_v39  ;;  %4213 = vmatmul.mubr.msk.f32.gmra.mxu0 %vm148_vm1, %v122_v40  ;;  %v5569_v3 = vld [vmem:[#allocation3 + $0x130] sm:$0xff]  ;;  %v125_v7 = vld [vmem:[%s9028_s0 + $0x20] sm:$0xff]  ;;  %v5576_v27 = vld [vmem:[#allocation3 + $0xe8] sm:$0xff] }
  0x47   :  { %515 = vmatprep.subr.mxu0 %v5483_v41  ;;  %584 = vmatprep.subr.mxu1 %v5485_v42  ;;  %v5578_v28 = vld [vmem:[#allocation3 + $0x118] sm:$0xff]  ;;  %v5582_v29 = vld [vmem:[#allocation3 + $0xe0] sm:$0xff]  ;;  %v5586_v30 = vld [vmem:[#allocation3 + $0x110] sm:$0xff] }
  0x48   :  { %365 = vmatprep.mubr.f32.mxu1 %v9042_v0  ;;  %516 = vmatpush1.msra.mxu0 %v5489_v43  ;;  %v5588_v31 = vld [vmem:[#allocation3 + $0xc8] sm:$0xff]  ;;  %v5592_v32 = vld [vmem:[#allocation3 + $0xf8] sm:$0xff]  ;;  %v5596_v35 = vld [vmem:[#allocation3 + $0xc0] sm:$0xff] }
  0x49   :  { %585 = vmatpush1.msra.mxu1 %v5493_v44  ;;  %517 = vmatprep.subr.mxu0 %v5495_v45  ;;  %v5613_v6 = vld [vmem:[#allocation3 + $0xa0] sm:$0xff]  ;;  %v5617_v9 = vld [vmem:[#allocation3 + $0xd0] sm:$0xff]  ;;  %v5619_v10 = vld [vmem:[#allocation3 + $0x88] sm:$0xff] }
  0x4a   :  { %4223 = vmatmul.mubr.msk.f32.gmra.mxu1 %vm148_vm1, %v122_v40  ;;  %586 = vmatprep.subr.mxu1 %v5499_v46  ;;  %v5600_v40 = vld [vmem:[#allocation3 + $0xf0] sm:$0xff]  ;;  %9708 = vst [vmem:[#allocation34_spill] sm:$0xff] %v5619_v10  ;;  %v5627_v11 = vld [vmem:[#allocation3 + $0x80] sm:$0xff]  ;;  %v5638_v14 = vld [vmem:[#allocation3 + $0x68] sm:$0xff] }
  0x4b   :  { %258 = vmatprep.mubr.f32.mxu0 %v9042_v0  ;;  %518 = vmatpush1.msra.mxu0 %v5503_v47  ;;  %9709 = vst [vmem:[#allocation35_spill] sm:$0xff] %v5627_v11  ;;  %v5631_v12 = vld [vmem:[#allocation3 + $0xb0] sm:$0xff]  ;;  %9710 = vst [vmem:[#allocation36_spill] sm:$0xff] %v5638_v14  ;;  %v5640_v15 = vld [vmem:[#allocation3 + $0x98] sm:$0xff] }
  0x4c   :  { %587 = vmatpush1.msra.mxu1 %v5507_v48  ;;  %4214 = vmatmul.mubr.msk.f32.gmra.mxu0 %vm148_vm1, %v123_v49  ;;  %v127_v13 = vld [vmem:[%s9028_s0 + $0x30] sm:$0xff]  ;;  %9711 = vst [vmem:[#allocation37_spill] sm:$0xff] %v5640_v15  ;;  %v5644_v16 = vld [vmem:[#allocation3 + $0x60] sm:$0xff]  ;;  %v5650_v18 = vld [vmem:[#allocation3 + $0x48] sm:$0xff] }
  0x4d   :  { %519 = vmatprep.subr.mxu0 %v5514_v50  ;;  %588 = vmatprep.subr.mxu1 %v5516_v51  ;;  %9712 = vst [vmem:[#allocation38_spill] sm:$0xff] %v5644_v16  ;;  %v5648_v17 = vld [vmem:[#allocation3 + $0x90] sm:$0xff]  ;;  %9714 = vst [vmem:[#allocation40_spill] sm:$0xff] %v5650_v18  ;;  %v5658_v19 = vld [vmem:[#allocation3 + $0x40] sm:$0xff] }
  0x4e   :  { %371 = vmatprep.mubr.f32.mxu1 %v9042_v0  ;;  %520 = vmatpush1.msra.mxu0 %v5520_v52  ;;  %9713 = vst [vmem:[#allocation39_spill] sm:$0xff] %v5648_v17  ;;  %9716 = vst [vmem:[#allocation42_spill] sm:$0xff] %v5658_v19  ;;  %v5663_v20 = vld [vmem:[%s9028_s0 + $0x38] sm:$0xff]   ;;  %v5667_v22 = vld [vmem:[#allocation3 + $0x70] sm:$0xff] }
  0x4f   :  { %589 = vmatpush1.msra.mxu1 %v5524_v53  ;;  %521 = vmatprep.subr.mxu0 %v5526_v54  ;;  %9717 = vst [vmem:[#allocation43_spill] sm:$0xff] %v5663_v20  ;;  %9718 = vst [vmem:[#allocation44_spill] sm:$0xff] %v5667_v22  ;;  %v5671_v23 = vld [vmem:[#allocation3 + $0x28] sm:$0xff]  ;;  %v5673_v24 = vld [vmem:[#allocation3 + $0x58] sm:$0xff] }
  0x50   :  { %4224 = vmatmul.mubr.msk.f32.gmra.mxu1 %vm148_vm1, %v123_v49  ;;  %590 = vmatprep.subr.mxu1 %v5530_v55  ;;  %v126_v49 = vld [vmem:[%s9028_s0 + $0x28] sm:$0xff]  ;;  %9719 = vst [vmem:[#allocation45_spill] sm:$0xff] %v5671_v23  ;;  %9720 = vst [vmem:[#allocation46_spill] sm:$0xff] %v5673_v24  ;;  %v5677_v25 = vld [vmem:[#allocation3 + $0x20] sm:$0xff] }
  0x51   :  { %264 = vmatprep.mubr.f32.mxu0 %v9042_v0  ;;  %522 = vmatpush1.msra.mxu0 %v5534_v56  ;;  %9721 = vst [vmem:[#allocation47_spill] sm:$0xff] %v5677_v25  ;;  %v5682_v5 = vld [vmem:[#allocation3 + $0x50] sm:$0xff]  ;;  %v5688_v21 = vld [vmem:[#allocation3 + $0x38] sm:$0xff]  ;;  %v5692_v4 = vld [vmem:[#allocation3] sm:$0xff] }
  0x52   :  { %591 = vmatpush1.msra.mxu1 %v5538_v57  ;;  %4215 = vmatmul.mubr.msk.f32.gmra.mxu0 %vm148_vm1, %v124_v58  ;;  %9722 = vst [vmem:[#allocation48_spill] sm:$0xff] %v5682_v5  ;;  %9724 = vst [vmem:[#allocation50_spill] sm:$0xff] %v5688_v21 }
  0x53   :  { %523 = vmatprep.subr.mxu0 %v5545_v59  ;;  %592 = vmatprep.subr.mxu1 %v5547_v60  ;;  %9725 = vst [vmem:[#allocation51_spill] sm:$0xff] %v5692_v4 }
  0x54   :  { %377 = vmatprep.mubr.f32.mxu1 %v9042_v0  ;;  %524 = vmatpush1.msra.mxu0 %v5551_v61 }
  0x55   :  { %593 = vmatpush1.msra.mxu1 %v5555_v62  ;;  %525 = vmatprep.subr.mxu0 %v5557_v63 }
  0x56   :  { %4225 = vmatmul.mubr.msk.f32.gmra.mxu1 %vm148_vm1, %v124_v58  ;;  %594 = vmatprep.subr.mxu1 %v5561_v1  ;;  %v5607_v58 = vld [vmem:[#allocation3 + $0xa8] sm:$0xff] }
  0x57   :  { %270 = vmatprep.mubr.f32.mxu0 %v9042_v0  ;;  %526 = vmatpush1.msra.mxu0 %v5565_v2 }
  0x58   :  { %595 = vmatpush1.msra.mxu1 %v5569_v3  ;;  %4216 = vmatmul.mubr.msk.f32.gmra.mxu0 %vm148_vm1, %v125_v7 }
  0x59   :  { %527 = vmatprep.subr.mxu0 %v5576_v27  ;;  %596 = vmatprep.subr.mxu1 %v5578_v28 }
  0x5a   :  { %383 = vmatprep.mubr.f32.mxu1 %v9042_v0  ;;  %528 = vmatpush1.msra.mxu0 %v5582_v29  ;;  %v5609_v0 = vld [vmem:[#allocation3 + $0xd8] sm:$0xff] }
  0x5b   :  { %597 = vmatpush1.msra.mxu1 %v5586_v30  ;;  %529 = vmatprep.subr.mxu0 %v5588_v31 }
  0x5c   :  { %4226 = vmatmul.mubr.msk.f32.gmra.mxu1 %vm148_vm1, %v125_v7  ;;  %598 = vmatprep.subr.mxu1 %v5592_v32  ;;  %v5623_v7 = vld [vmem:[#allocation3 + $0xb8] sm:$0xff] }
  0x5d   :  { %276 = vmatprep.mubr.f32.mxu0 %v9707_v26  ;;  %530 = vmatpush1.msra.mxu0 %v5596_v35 }
  0x5e   :  { %599 = vmatpush1.msra.mxu1 %v5600_v40  ;;  %4217 = vmatmul.mubr.msk.f32.gmra.mxu0 %vm148_vm1, %v126_v49 }
  0x5f   :  { %531 = vmatprep.subr.mxu0 %v5607_v58  ;;  %600 = vmatprep.subr.mxu1 %v5609_v0 }
  0x60   :  { %389 = vmatprep.mubr.f32.mxu1 %v9707_v26  ;;  %532 = vmatpush1.msra.mxu0 %v5613_v6 }
  0x61   :  { %601 = vmatpush1.msra.mxu1 %v5617_v9  ;;  %533 = vmatprep.subr.mxu0 %v5619_v10 }
  0x62   :  { %4227 = vmatmul.mubr.msk.f32.gmra.mxu1 %vm148_vm1, %v126_v49  ;;  %602 = vmatprep.subr.mxu1 %v5623_v7  ;;  %v5654_v49 = vld [vmem:[#allocation3 + $0x78] sm:$0xff] }
  0x63   :  { %282 = vmatprep.mubr.f32.mxu0 %v9707_v26  ;;  %534 = vmatpush1.msra.mxu0 %v5627_v11  ;;  %9715 = vst [vmem:[#allocation41_spill] sm:$0xff] %v5654_v49 }
  0x64   :  { %603 = vmatpush1.msra.mxu1 %v5631_v12  ;;  %4218 = vmatmul.mubr.msk.f32.gmra.mxu0 %vm148_vm1, %v127_v13 }
  0x65   :  { %535 = vmatprep.subr.mxu0 %v5638_v14  ;;  %604 = vmatprep.subr.mxu1 %v5640_v15  ;;  %v6181_v15 = vsub.s32 3, %v5360_v8 }
  0x66   :  { %395 = vmatprep.mubr.f32.mxu1 %v9707_v26  ;;  %536 = vmatpush1.msra.mxu0 %v5644_v16 }
  0x67   :  { %605 = vmatpush1.msra.mxu1 %v5648_v17  ;;  %537 = vmatprep.subr.mxu0 %v5650_v18  ;;  %v6053_v18 = vld [vmem:[#allocation5 + $0x260] sm:$0xff]  ;;  %9890 = vst [vmem:[#allocation216_spill] sm:$0xff] %v6181_v15 }
  0x68   :  { %4228 = vmatmul.mubr.msk.f32.gmra.mxu1 %vm148_vm1, %v127_v13  ;;  %606 = vmatprep.subr.mxu1 %v5654_v49  ;;  %v5684_v13 = vld [vmem:[#allocation3 + $0x8] sm:$0xff]  ;;  %9843 = vst [vmem:[#allocation169_spill] sm:$0xff] %v6053_v18 }
  0x69   :  { %288 = vmatprep.mubr.f32.mxu0 %v9707_v26  ;;  %538 = vmatpush1.msra.mxu0 %v5658_v19  ;;  %9723 = vst [vmem:[#allocation49_spill] sm:$0xff] %v5684_v13  ;;  %v5696_v19 = vld [vmem:[#allocation3 + $0x30] sm:$0xff] }
  0x6a   :  { %607 = vmatpush1.msra.mxu1 %v5667_v22  ;;  %4219 = vmatmul.mubr.msk.f32.gmra.mxu0 %vm148_vm1, %v5663_v20  ;;  %9726 = vst [vmem:[#allocation52_spill] sm:$0xff] %v5696_v19 }
  0x6b   :  { %539 = vmatprep.subr.mxu0 %v5671_v23  ;;  %608 = vmatprep.subr.mxu1 %v5673_v24  ;;  %v5701_v23 = vld [vmem:[#allocation3 + $0x18] sm:$0xff] }
  0x6c   :  { %401 = vmatprep.mubr.f32.mxu1 %v9707_v26  ;;  %540 = vmatpush1.msra.mxu0 %v5677_v25  ;;  %9727 = vst [vmem:[#allocation53_spill] sm:$0xff] %v5701_v23  ;;  %v5705_v25 = vld [vmem:[#allocation3 + $0x10] sm:$0xff]  ;;  %v6037_v24 = vld [vmem:[#allocation5 + $0x298] sm:$0xff] }
  0x6d   :  { %609 = vmatpush1.msra.mxu1 %v5682_v5  ;;  %541 = vmatprep.subr.mxu0 %v5684_v13  ;;  %9728 = vst [vmem:[#allocation54_spill] sm:$0xff] %v5705_v25  ;;  %v5719_v13 = vld [vmem:[#allocation5 + $0x1e0] sm:$0xff]  ;;  %9838 = vst [vmem:[#allocation164_spill] sm:$0xff] %v6037_v24 }
  0x6e   :  { %4229 = vmatmul.mubr.msk.f32.gmra.mxu1 %vm148_vm1, %v5663_v20  ;;  %610 = vmatprep.subr.mxu1 %v5688_v21  ;;  %v5715_v20 = vld [vmem:[#allocation5 + $0x1e8] sm:$0xff]  ;;  %9731 = vst [vmem:[#allocation57_spill] sm:$0xff] %v5719_v13  ;;  %v5735_v21 = vld [vmem:[#allocation5 + $0x1d0] sm:$0xff]  ;;  %v6029_v5 = vld [vmem:[#allocation5 + $0x2a0] sm:$0xff] }
  0x6f   :  { %542 = vmatpush1.msra.mxu0 %v5692_v4  ;;  %575 = vmatprep.mubr.f32.mxu0 %v9707_v26  ;;  %9729 = vst [vmem:[#allocation55_spill] sm:$0xff] %v5715_v20  ;;  %v5717_v4 = vld [vmem:[#allocation5 + $0x1f8] sm:$0xff]  ;;  %9736 = vst [vmem:[#allocation62_spill] sm:$0xff] %v5735_v21 }
  0x70   :  { %611 = vmatpush1.msra.mxu1 %v5696_v19  ;;  %576 = vmatmul.mubr.f32.vlgmr.msra.gmra.mxu0 %v9707_v26  ;;  %9730 = vst [vmem:[#allocation56_spill] sm:$0xff] %v5717_v4  ;;  %v5729_v19 = vld [vmem:[#allocation5 + $0x1d8] sm:$0xff]  ;;  %9835 = vst [vmem:[#allocation161_spill] sm:$0xff] %v6029_v5 }
  0x71   :  { %612 = vmatprep.subr.mxu1 %v5701_v23  ;;  %646 = vmatprep.mubr.f32.mxu1 %v9707_v26  ;;  %v5723_v23 = vld [vmem:[#allocation5 + $0x1f0] sm:$0xff]  ;;  %9734 = vst [vmem:[#allocation60_spill] sm:$0xff] %v5729_v19 }
  0x72   :  { %613 = vmatpush1.msra.mxu1 %v5705_v25  ;;  %913 = vmatprep.mubr.f32.mxu0 %v9707_v26  ;;  %9732 = vst [vmem:[#allocation58_spill] sm:$0xff] %v5723_v23  ;;  %v5727_v25 = vld [vmem:[#allocation5 + $0x1c8] sm:$0xff] }
  0x73   :  { %647 = vmatmul.mubr.f32.vlgmr.msra.gmra.mxu1 %v9707_v26  ;;  %849 = vmatprep.subr.mxu0 %v5715_v20  ;;  %9733 = vst [vmem:[#allocation59_spill] sm:$0xff] %v5727_v25  ;;  %v5747_v20 = vld [vmem:[#allocation5 + $0x1b0] sm:$0xff] }
  0x74   :  { %984 = vmatprep.mubr.f32.mxu1 %v9707_v26  ;;  %920 = vmatprep.subr.mxu1 %v5717_v4  ;;  %v5731_v26 = vld [vmem:[#allocation5 + $0x1c0] sm:$0xff]  ;;  %v5739_v4 = vld [vmem:[#allocation5 + $0x1a8] sm:$0xff]  ;;  %9740 = vst [vmem:[#allocation66_spill] sm:$0xff] %v5747_v20 }
  0x75   :  { %850 = vmatpush1.msra.mxu0 %v5719_v13  ;;  %921 = vmatpush1.msra.mxu1 %v5723_v23  ;;  %9735 = vst [vmem:[#allocation61_spill] sm:$0xff] %v5731_v26  ;;  %9737 = vst [vmem:[#allocation63_spill] sm:$0xff] %v5739_v4  ;;  %v5741_v13 = vld [vmem:[#allocation5 + $0x1b8] sm:$0xff]  ;;  %v5743_v23 = vld [vmem:[#allocation5 + $0x1a0] sm:$0xff] }
  0x76   :  { %851 = vmatprep.subr.mxu0 %v5727_v25  ;;  %922 = vmatprep.subr.mxu1 %v5729_v19  ;;  %9738 = vst [vmem:[#allocation64_spill] sm:$0xff] %v5741_v13  ;;  %9739 = vst [vmem:[#allocation65_spill] sm:$0xff] %v5743_v23  ;;  %v5751_v19 = vld [vmem:[#allocation5 + $0x188] sm:$0xff]  ;;  %v5759_v25 = vld [vmem:[#allocation5 + $0x190] sm:$0xff] }
  0x77   :  { %852 = vmatpush1.msra.mxu0 %v5731_v26  ;;  %923 = vmatpush1.msra.mxu1 %v5735_v21  ;;  %9741 = vst [vmem:[#allocation67_spill] sm:$0xff] %v5751_v19  ;;  %v5753_v26 = vld [vmem:[#allocation5 + $0x198] sm:$0xff]  ;;  %v5755_v21 = vld [vmem:[#allocation5 + $0x180] sm:$0xff]  ;;  %9744 = vst [vmem:[#allocation70_spill] sm:$0xff] %v5759_v25 }
  0x78   :  { %853 = vmatprep.subr.mxu0 %v5739_v4  ;;  %924 = vmatprep.subr.mxu1 %v5741_v13  ;;  %9742 = vst [vmem:[#allocation68_spill] sm:$0xff] %v5753_v26  ;;  %9743 = vst [vmem:[#allocation69_spill] sm:$0xff] %v5755_v21  ;;  %v5763_v13 = vld [vmem:[#allocation5 + $0x168] sm:$0xff]  ;;  %v5771_v4 = vld [vmem:[#allocation5 + $0x170] sm:$0xff] }
  0x79   :  { %854 = vmatpush1.msra.mxu0 %v5743_v23  ;;  %925 = vmatpush1.msra.mxu1 %v5747_v20  ;;  %9745 = vst [vmem:[#allocation71_spill] sm:$0xff] %v5763_v13  ;;  %v5765_v23 = vld [vmem:[#allocation5 + $0x178] sm:$0xff]  ;;  %v5767_v20 = vld [vmem:[#allocation5 + $0x160] sm:$0xff]  ;;  %9748 = vst [vmem:[#allocation74_spill] sm:$0xff] %v5771_v4 }
  0x7a   :  { %855 = vmatprep.subr.mxu0 %v5751_v19  ;;  %926 = vmatprep.subr.mxu1 %v5753_v26  ;;  %9746 = vst [vmem:[#allocation72_spill] sm:$0xff] %v5765_v23  ;;  %9747 = vst [vmem:[#allocation73_spill] sm:$0xff] %v5767_v20  ;;  %v5775_v26 = vld [vmem:[#allocation5 + $0x148] sm:$0xff]  ;;  %v5783_v19 = vld [vmem:[#allocation5 + $0x150] sm:$0xff] }
  0x7b   :  { %856 = vmatpush1.msra.mxu0 %v5755_v21  ;;  %927 = vmatpush1.msra.mxu1 %v5759_v25  ;;  %9749 = vst [vmem:[#allocation75_spill] sm:$0xff] %v5775_v26  ;;  %v5777_v21 = vld [vmem:[#allocation5 + $0x158] sm:$0xff]  ;;  %v5779_v25 = vld [vmem:[#allocation5 + $0x140] sm:$0xff]  ;;  %9752 = vst [vmem:[#allocation78_spill] sm:$0xff] %v5783_v19 }
  0x7c   :  { %857 = vmatprep.subr.mxu0 %v5763_v13  ;;  %928 = vmatprep.subr.mxu1 %v5765_v23  ;;  %9750 = vst [vmem:[#allocation76_spill] sm:$0xff] %v5777_v21  ;;  %9751 = vst [vmem:[#allocation77_spill] sm:$0xff] %v5779_v25  ;;  %v5787_v23 = vld [vmem:[#allocation5 + $0x128] sm:$0xff]  ;;  %v5795_v13 = vld [vmem:[#allocation5 + $0x130] sm:$0xff] }
  0x7d   :  { %858 = vmatpush1.msra.mxu0 %v5767_v20  ;;  %929 = vmatpush1.msra.mxu1 %v5771_v4  ;;  %9753 = vst [vmem:[#allocation79_spill] sm:$0xff] %v5787_v23  ;;  %v5789_v20 = vld [vmem:[#allocation5 + $0x138] sm:$0xff]  ;;  %v5791_v4 = vld [vmem:[#allocation5 + $0x120] sm:$0xff]  ;;  %9756 = vst [vmem:[#allocation82_spill] sm:$0xff] %v5795_v13 }
  0x7e   :  { %859 = vmatprep.subr.mxu0 %v5775_v26  ;;  %930 = vmatprep.subr.mxu1 %v5777_v21  ;;  %9754 = vst [vmem:[#allocation80_spill] sm:$0xff] %v5789_v20  ;;  %9755 = vst [vmem:[#allocation81_spill] sm:$0xff] %v5791_v4  ;;  %v5799_v21 = vld [vmem:[#allocation5 + $0x108] sm:$0xff]  ;;  %v5807_v26 = vld [vmem:[#allocation5 + $0x110] sm:$0xff] }
  0x7f   :  { %860 = vmatpush1.msra.mxu0 %v5779_v25  ;;  %931 = vmatpush1.msra.mxu1 %v5783_v19  ;;  %9757 = vst [vmem:[#allocation83_spill] sm:$0xff] %v5799_v21  ;;  %v5801_v25 = vld [vmem:[#allocation5 + $0x118] sm:$0xff]  ;;  %v5803_v19 = vld [vmem:[#allocation5 + $0x100] sm:$0xff]  ;;  %9760 = vst [vmem:[#allocation86_spill] sm:$0xff] %v5807_v26 }
  0x80   :  { %861 = vmatprep.subr.mxu0 %v5787_v23  ;;  %932 = vmatprep.subr.mxu1 %v5789_v20  ;;  %9758 = vst [vmem:[#allocation84_spill] sm:$0xff] %v5801_v25  ;;  %9759 = vst [vmem:[#allocation85_spill] sm:$0xff] %v5803_v19  ;;  %v5811_v20 = vld [vmem:[#allocation5 + $0xe8] sm:$0xff]  ;;  %v5819_v23 = vld [vmem:[#allocation5 + $0xf0] sm:$0xff] }
  0x81   :  { %862 = vmatpush1.msra.mxu0 %v5791_v4  ;;  %933 = vmatpush1.msra.mxu1 %v5795_v13  ;;  %9761 = vst [vmem:[#allocation87_spill] sm:$0xff] %v5811_v20  ;;  %v5813_v4 = vld [vmem:[#allocation5 + $0xf8] sm:$0xff]  ;;  %v5815_v13 = vld [vmem:[#allocation5 + $0xe0] sm:$0xff]  ;;  %9764 = vst [vmem:[#allocation90_spill] sm:$0xff] %v5819_v23 }
  0x82   :  { %863 = vmatprep.subr.mxu0 %v5799_v21  ;;  %934 = vmatprep.subr.mxu1 %v5801_v25  ;;  %9762 = vst [vmem:[#allocation88_spill] sm:$0xff] %v5813_v4  ;;  %9763 = vst [vmem:[#allocation89_spill] sm:$0xff] %v5815_v13  ;;  %v5823_v25 = vld [vmem:[#allocation5 + $0xc8] sm:$0xff]  ;;  %v5831_v21 = vld [vmem:[#allocation5 + $0xd0] sm:$0xff] }
  0x83   :  { %864 = vmatpush1.msra.mxu0 %v5803_v19  ;;  %935 = vmatpush1.msra.mxu1 %v5807_v26  ;;  %9765 = vst [vmem:[#allocation91_spill] sm:$0xff] %v5823_v25  ;;  %v5825_v19 = vld [vmem:[#allocation5 + $0xd8] sm:$0xff]  ;;  %v5829_v26 = vld [vmem:[#allocation5 + $0xc0] sm:$0xff]  ;;  %9768 = vst [vmem:[#allocation94_spill] sm:$0xff] %v5831_v21 }
  0x84   :  { %865 = vmatprep.subr.mxu0 %v5811_v20  ;;  %936 = vmatprep.subr.mxu1 %v5813_v4  ;;  %9766 = vst [vmem:[#allocation92_spill] sm:$0xff] %v5825_v19  ;;  %9767 = vst [vmem:[#allocation93_spill] sm:$0xff] %v5829_v26  ;;  %v5835_v4 = vld [vmem:[#allocation5 + $0xa8] sm:$0xff]  ;;  %v6021_v20 = vld [vmem:[#allocation5 + $0x2d0] sm:$0xff] }
  0x85   :  { %866 = vmatpush1.msra.mxu0 %v5815_v13  ;;  %937 = vmatpush1.msra.mxu1 %v5819_v23  ;;  %9769 = vst [vmem:[#allocation95_spill] sm:$0xff] %v5835_v4  ;;  %v5837_v13 = vld [vmem:[#allocation5 + $0xb8] sm:$0xff]  ;;  %v5841_v23 = vld [vmem:[#allocation5 + $0xa0] sm:$0xff]  ;;  %9832 = vst [vmem:[#allocation158_spill] sm:$0xff] %v6021_v20 }
  0x86   :  { %867 = vmatprep.subr.mxu0 %v5823_v25  ;;  %938 = vmatprep.subr.mxu1 %v5825_v19  ;;  %9770 = vst [vmem:[#allocation96_spill] sm:$0xff] %v5837_v13  ;;  %9771 = vst [vmem:[#allocation97_spill] sm:$0xff] %v5841_v23  ;;  %v5843_v25 = vld [vmem:[#allocation5 + $0xb0] sm:$0xff]  ;;  %v5847_v19 = vld [vmem:[#allocation5 + $0x88] sm:$0xff] }
  0x87   :  { %868 = vmatpush1.msra.mxu0 %v5829_v26  ;;  %939 = vmatpush1.msra.mxu1 %v5831_v21  ;;  %9772 = vst [vmem:[#allocation98_spill] sm:$0xff] %v5843_v25  ;;  %9773 = vst [vmem:[#allocation99_spill] sm:$0xff] %v5847_v19  ;;  %v5849_v26 = vld [vmem:[#allocation5 + $0x98] sm:$0xff]  ;;  %v5853_v21 = vld [vmem:[#allocation5 + $0x80] sm:$0xff] }
  0x88   :  { %869 = vmatprep.subr.mxu0 %v5835_v4  ;;  %940 = vmatprep.subr.mxu1 %v5837_v13  ;;  %9774 = vst [vmem:[#allocation100_spill] sm:$0xff] %v5849_v26  ;;  %9775 = vst [vmem:[#allocation101_spill] sm:$0xff] %v5853_v21  ;;  %v5855_v4 = vld [vmem:[#allocation5 + $0x90] sm:$0xff]  ;;  %v5859_v13 = vld [vmem:[#allocation5 + $0x68] sm:$0xff] }
  0x89   :  { %870 = vmatpush1.msra.mxu0 %v5841_v23  ;;  %941 = vmatpush1.msra.mxu1 %v5843_v25  ;;  %9776 = vst [vmem:[#allocation102_spill] sm:$0xff] %v5855_v4  ;;  %9777 = vst [vmem:[#allocation103_spill] sm:$0xff] %v5859_v13  ;;  %v5861_v23 = vld [vmem:[#allocation5 + $0x78] sm:$0xff]  ;;  %v5865_v25 = vld [vmem:[#allocation5 + $0x60] sm:$0xff] }
  0x8a   :  { %871 = vmatprep.subr.mxu0 %v5847_v19  ;;  %942 = vmatprep.subr.mxu1 %v5849_v26  ;;  %9778 = vst [vmem:[#allocation104_spill] sm:$0xff] %v5861_v23  ;;  %9779 = vst [vmem:[#allocation105_spill] sm:$0xff] %v5865_v25  ;;  %v5867_v19 = vld [vmem:[#allocation5 + $0x70] sm:$0xff]  ;;  %v5871_v26 = vld [vmem:[#allocation5 + $0x48] sm:$0xff] }
  0x8b   :  { %872 = vmatpush1.msra.mxu0 %v5853_v21  ;;  %943 = vmatpush1.msra.mxu1 %v5855_v4  ;;  %9780 = vst [vmem:[#allocation106_spill] sm:$0xff] %v5867_v19  ;;  %9781 = vst [vmem:[#allocation107_spill] sm:$0xff] %v5871_v26  ;;  %v5873_v21 = vld [vmem:[#allocation5 + $0x58] sm:$0xff]  ;;  %v5877_v4 = vld [vmem:[#allocation5 + $0x40] sm:$0xff] }
  0x8c   :  { %873 = vmatprep.subr.mxu0 %v5859_v13  ;;  %944 = vmatprep.subr.mxu1 %v5861_v23  ;;  %9782 = vst [vmem:[#allocation108_spill] sm:$0xff] %v5873_v21  ;;  %9783 = vst [vmem:[#allocation109_spill] sm:$0xff] %v5877_v4  ;;  %v5879_v13 = vld [vmem:[#allocation5 + $0x50] sm:$0xff]  ;;  %v5883_v23 = vld [vmem:[#allocation5 + $0x28] sm:$0xff] }
  0x8d   :  { %874 = vmatpush1.msra.mxu0 %v5865_v25  ;;  %945 = vmatpush1.msra.mxu1 %v5867_v19  ;;  %9784 = vst [vmem:[#allocation110_spill] sm:$0xff] %v5879_v13  ;;  %9785 = vst [vmem:[#allocation111_spill] sm:$0xff] %v5883_v23  ;;  %v5885_v25 = vld [vmem:[#allocation5 + $0x38] sm:$0xff]  ;;  %v5889_v19 = vld [vmem:[#allocation5 + $0x20] sm:$0xff] }
  0x8e   :  { %875 = vmatprep.subr.mxu0 %v5871_v26  ;;  %946 = vmatprep.subr.mxu1 %v5873_v21  ;;  %9786 = vst [vmem:[#allocation112_spill] sm:$0xff] %v5885_v25  ;;  %9787 = vst [vmem:[#allocation113_spill] sm:$0xff] %v5889_v19  ;;  %v5891_v26 = vld [vmem:[#allocation5 + $0x30] sm:$0xff]  ;;  %v5895_v21 = vld [vmem:[#allocation5 + $0x8] sm:$0xff] }
  0x8f   :  { %876 = vmatpush1.msra.mxu0 %v5877_v4  ;;  %947 = vmatpush1.msra.mxu1 %v5879_v13  ;;  %9788 = vst [vmem:[#allocation114_spill] sm:$0xff] %v5891_v26  ;;  %9789 = vst [vmem:[#allocation115_spill] sm:$0xff] %v5895_v21  ;;  %v5897_v4 = vld [vmem:[#allocation5 + $0x18] sm:$0xff]  ;;  %v5901_v13 = vld [vmem:[#allocation5] sm:$0xff] }
  0x90   :  { %877 = vmatprep.subr.mxu0 %v5883_v23  ;;  %948 = vmatprep.subr.mxu1 %v5885_v25  ;;  %9790 = vst [vmem:[#allocation116_spill] sm:$0xff] %v5897_v4  ;;  %9791 = vst [vmem:[#allocation117_spill] sm:$0xff] %v5901_v13  ;;  %v5903_v23 = vld [vmem:[#allocation5 + $0x10] sm:$0xff]  ;;  %v5907_v25 = vld [vmem:[#allocation5 + $0x3e8] sm:$0xff] }
  0x91   :  { %878 = vmatpush1.msra.mxu0 %v5889_v19  ;;  %949 = vmatpush1.msra.mxu1 %v5891_v26  ;;  %9792 = vst [vmem:[#allocation118_spill] sm:$0xff] %v5903_v23  ;;  %9793 = vst [vmem:[#allocation119_spill] sm:$0xff] %v5907_v25  ;;  %v5909_v19 = vld [vmem:[#allocation5 + $0x3f8] sm:$0xff]  ;;  %v5913_v26 = vld [vmem:[#allocation5 + $0x3e0] sm:$0xff] }
  0x92   :  { %879 = vmatprep.subr.mxu0 %v5895_v21  ;;  %950 = vmatprep.subr.mxu1 %v5897_v4  ;;  %9794 = vst [vmem:[#allocation120_spill] sm:$0xff] %v5909_v19  ;;  %9795 = vst [vmem:[#allocation121_spill] sm:$0xff] %v5913_v26  ;;  %v5915_v21 = vld [vmem:[#allocation5 + $0x3f0] sm:$0xff]  ;;  %v5919_v4 = vld [vmem:[#allocation5 + $0x3c8] sm:$0xff] }
  0x93   :  { %880 = vmatpush1.msra.mxu0 %v5901_v13  ;;  %951 = vmatpush1.msra.mxu1 %v5903_v23  ;;  %9796 = vst [vmem:[#allocation122_spill] sm:$0xff] %v5915_v21  ;;  %9797 = vst [vmem:[#allocation123_spill] sm:$0xff] %v5919_v4  ;;  %v5921_v13 = vld [vmem:[#allocation5 + $0x3d8] sm:$0xff]  ;;  %v5925_v23 = vld [vmem:[#allocation5 + $0x3c0] sm:$0xff] }
  0x94   :  { %881 = vmatprep.subr.mxu0 %v5907_v25  ;;  %952 = vmatprep.subr.mxu1 %v5909_v19  ;;  %9798 = vst [vmem:[#allocation124_spill] sm:$0xff] %v5921_v13  ;;  %9799 = vst [vmem:[#allocation125_spill] sm:$0xff] %v5925_v23  ;;  %v5927_v25 = vld [vmem:[#allocation5 + $0x3d0] sm:$0xff]  ;;  %v5931_v19 = vld [vmem:[#allocation5 + $0x3a8] sm:$0xff] }
  0x95   :  { %882 = vmatpush2.msra.mxu0 %v5913_v26  ;;  %953 = vmatpush2.msra.mxu1 %v5915_v21  ;;  %9800 = vst [vmem:[#allocation126_spill] sm:$0xff] %v5927_v25  ;;  %9801 = vst [vmem:[#allocation127_spill] sm:$0xff] %v5931_v19  ;;  %v5933_v26 = vld [vmem:[#allocation5 + $0x3b8] sm:$0xff]  ;;  %v5937_v21 = vld [vmem:[#allocation5 + $0x3a0] sm:$0xff] }
  0x96   :  { %883 = vmatprep.subr.mxu0 %v5919_v4  ;;  %954 = vmatprep.subr.mxu1 %v5921_v13  ;;  %9802 = vst [vmem:[#allocation128_spill] sm:$0xff] %v5933_v26  ;;  %9803 = vst [vmem:[#allocation129_spill] sm:$0xff] %v5937_v21  ;;  %v5939_v4 = vld [vmem:[#allocation5 + $0x3b0] sm:$0xff]  ;;  %v5943_v13 = vld [vmem:[#allocation5 + $0x388] sm:$0xff] }
  0x97   :  { %884 = vmatpush2.msra.mxu0 %v5925_v23  ;;  %955 = vmatpush2.msra.mxu1 %v5927_v25  ;;  %9804 = vst [vmem:[#allocation130_spill] sm:$0xff] %v5939_v4  ;;  %9805 = vst [vmem:[#allocation131_spill] sm:$0xff] %v5943_v13  ;;  %v5945_v23 = vld [vmem:[#allocation5 + $0x398] sm:$0xff]  ;;  %v5949_v25 = vld [vmem:[#allocation5 + $0x380] sm:$0xff] }
  0x98   :  { %885 = vmatprep.subr.mxu0 %v5931_v19  ;;  %956 = vmatprep.subr.mxu1 %v5933_v26  ;;  %9806 = vst [vmem:[#allocation132_spill] sm:$0xff] %v5945_v23  ;;  %9807 = vst [vmem:[#allocation133_spill] sm:$0xff] %v5949_v25  ;;  %v5951_v19 = vld [vmem:[#allocation5 + $0x390] sm:$0xff]  ;;  %v5955_v26 = vld [vmem:[#allocation5 + $0x368] sm:$0xff] }
  0x99   :  { %886 = vmatpush2.msra.mxu0 %v5937_v21  ;;  %957 = vmatpush2.msra.mxu1 %v5939_v4  ;;  %9808 = vst [vmem:[#allocation134_spill] sm:$0xff] %v5951_v19  ;;  %9809 = vst [vmem:[#allocation135_spill] sm:$0xff] %v5955_v26  ;;  %v5957_v21 = vld [vmem:[#allocation5 + $0x378] sm:$0xff]  ;;  %v5961_v4 = vld [vmem:[#allocation5 + $0x360] sm:$0xff] }
  0x9a   :  { %887 = vmatprep.subr.mxu0 %v5943_v13  ;;  %958 = vmatprep.subr.mxu1 %v5945_v23  ;;  %9810 = vst [vmem:[#allocation136_spill] sm:$0xff] %v5957_v21  ;;  %9811 = vst [vmem:[#allocation137_spill] sm:$0xff] %v5961_v4  ;;  %v5963_v13 = vld [vmem:[#allocation5 + $0x370] sm:$0xff]  ;;  %v5967_v23 = vld [vmem:[#allocation5 + $0x348] sm:$0xff] }
  0x9b   :  { %888 = vmatpush2.msra.mxu0 %v5949_v25  ;;  %959 = vmatpush2.msra.mxu1 %v5951_v19  ;;  %9812 = vst [vmem:[#allocation138_spill] sm:$0xff] %v5963_v13  ;;  %9813 = vst [vmem:[#allocation139_spill] sm:$0xff] %v5967_v23  ;;  %v5969_v25 = vld [vmem:[#allocation5 + $0x358] sm:$0xff]  ;;  %v5973_v19 = vld [vmem:[#allocation5 + $0x340] sm:$0xff] }
  0x9c   :  { %889 = vmatprep.subr.mxu0 %v5955_v26  ;;  %960 = vmatprep.subr.mxu1 %v5957_v21  ;;  %9814 = vst [vmem:[#allocation140_spill] sm:$0xff] %v5969_v25  ;;  %9815 = vst [vmem:[#allocation141_spill] sm:$0xff] %v5973_v19  ;;  %v5975_v26 = vld [vmem:[#allocation5 + $0x350] sm:$0xff]  ;;  %v5979_v21 = vld [vmem:[#allocation5 + $0x328] sm:$0xff] }
  0x9d   :  { %890 = vmatpush2.msra.mxu0 %v5961_v4  ;;  %961 = vmatpush2.msra.mxu1 %v5963_v13  ;;  %9816 = vst [vmem:[#allocation142_spill] sm:$0xff] %v5975_v26  ;;  %9817 = vst [vmem:[#allocation143_spill] sm:$0xff] %v5979_v21  ;;  %v5981_v4 = vld [vmem:[#allocation5 + $0x338] sm:$0xff]  ;;  %v5985_v13 = vld [vmem:[#allocation5 + $0x320] sm:$0xff] }
  0x9e   :  { %891 = vmatprep.subr.mxu0 %v5967_v23  ;;  %962 = vmatprep.subr.mxu1 %v5969_v25  ;;  %9818 = vst [vmem:[#allocation144_spill] sm:$0xff] %v5981_v4  ;;  %9819 = vst [vmem:[#allocation145_spill] sm:$0xff] %v5985_v13  ;;  %v5987_v23 = vld [vmem:[#allocation5 + $0x330] sm:$0xff]  ;;  %v5991_v25 = vld [vmem:[#allocation5 + $0x308] sm:$0xff] }
  0x9f   :  { %892 = vmatpush2.msra.mxu0 %v5973_v19  ;;  %963 = vmatpush2.msra.mxu1 %v5975_v26  ;;  %9820 = vst [vmem:[#allocation146_spill] sm:$0xff] %v5987_v23  ;;  %9821 = vst [vmem:[#allocation147_spill] sm:$0xff] %v5991_v25  ;;  %v5993_v19 = vld [vmem:[#allocation5 + $0x318] sm:$0xff]  ;;  %v5997_v26 = vld [vmem:[#allocation5 + $0x300] sm:$0xff] }
  0xa0   :  { %893 = vmatprep.subr.mxu0 %v5979_v21  ;;  %964 = vmatprep.subr.mxu1 %v5981_v4  ;;  %9822 = vst [vmem:[#allocation148_spill] sm:$0xff] %v5993_v19  ;;  %9823 = vst [vmem:[#allocation149_spill] sm:$0xff] %v5997_v26  ;;  %v5999_v21 = vld [vmem:[#allocation5 + $0x310] sm:$0xff]  ;;  %v6003_v4 = vld [vmem:[#allocation5 + $0x2e8] sm:$0xff] }
  0xa1   :  { %894 = vmatpush2.msra.mxu0 %v5985_v13  ;;  %965 = vmatpush2.msra.mxu1 %v5987_v23  ;;  %9824 = vst [vmem:[#allocation150_spill] sm:$0xff] %v5999_v21  ;;  %9825 = vst [vmem:[#allocation151_spill] sm:$0xff] %v6003_v4  ;;  %v6005_v13 = vld [vmem:[#allocation5 + $0x2f8] sm:$0xff]  ;;  %v6009_v23 = vld [vmem:[#allocation5 + $0x2e0] sm:$0xff] }
  0xa2   :  { %895 = vmatprep.subr.mxu0 %v5991_v25  ;;  %966 = vmatprep.subr.mxu1 %v5993_v19  ;;  %9826 = vst [vmem:[#allocation152_spill] sm:$0xff] %v6005_v13  ;;  %9827 = vst [vmem:[#allocation153_spill] sm:$0xff] %v6009_v23  ;;  %v6011_v25 = vld [vmem:[#allocation5 + $0x2f0] sm:$0xff]  ;;  %v6013_v19 = vld [vmem:[#allocation5 + $0x2c8] sm:$0xff] }
  0xa3   :  { %896 = vmatpush2.msra.mxu0 %v5997_v26  ;;  %967 = vmatpush2.msra.mxu1 %v5999_v21  ;;  %9828 = vst [vmem:[#allocation154_spill] sm:$0xff] %v6011_v25  ;;  %9829 = vst [vmem:[#allocation155_spill] sm:$0xff] %v6013_v19  ;;  %v6017_v26 = vld [vmem:[#allocation5 + $0x2d8] sm:$0xff]  ;;  %v6019_v21 = vld [vmem:[#allocation5 + $0x2c0] sm:$0xff] }
  0xa4   :  { %897 = vmatprep.subr.mxu0 %v6003_v4  ;;  %968 = vmatprep.subr.mxu1 %v6005_v13  ;;  %9830 = vst [vmem:[#allocation156_spill] sm:$0xff] %v6017_v26  ;;  %9831 = vst [vmem:[#allocation157_spill] sm:$0xff] %v6019_v21  ;;  %v6025_v13 = vld [vmem:[#allocation5 + $0x2a8] sm:$0xff]  ;;  %v6027_v4 = vld [vmem:[#allocation5 + $0x2b8] sm:$0xff] }
  0xa5   :  { %898 = vmatpush2.msra.mxu0 %v6009_v23  ;;  %969 = vmatpush2.msra.mxu1 %v6011_v25  ;;  %9833 = vst [vmem:[#allocation159_spill] sm:$0xff] %v6025_v13  ;;  %9834 = vst [vmem:[#allocation160_spill] sm:$0xff] %v6027_v4  ;;  %v6033_v25 = vld [vmem:[#allocation5 + $0x2b0] sm:$0xff]  ;;  %v6035_v23 = vld [vmem:[#allocation5 + $0x288] sm:$0xff] }
  0xa6   :  { %899 = vmatprep.subr.mxu0 %v6013_v19  ;;  %970 = vmatprep.subr.mxu1 %v6017_v26  ;;  %9836 = vst [vmem:[#allocation162_spill] sm:$0xff] %v6033_v25  ;;  %9837 = vst [vmem:[#allocation163_spill] sm:$0xff] %v6035_v23  ;;  %v6041_v26 = vld [vmem:[#allocation5 + $0x280] sm:$0xff]  ;;  %v6043_v19 = vld [vmem:[#allocation5 + $0x290] sm:$0xff] }
  0xa7   :  { %900 = vmatpush2.msra.mxu0 %v6019_v21  ;;  %971 = vmatpush2.msra.mxu1 %v6021_v20  ;;  %9839 = vst [vmem:[#allocation165_spill] sm:$0xff] %v6041_v26  ;;  %9840 = vst [vmem:[#allocation166_spill] sm:$0xff] %v6043_v19  ;;  %v6047_v21 = vld [vmem:[#allocation5 + $0x268] sm:$0xff]  ;;  %v6049_v20 = vld [vmem:[#allocation5 + $0x278] sm:$0xff] }
  0xa8   :  { %901 = vmatprep.subr.mxu0 %v6025_v13  ;;  %972 = vmatprep.subr.mxu1 %v6027_v4  ;;  %9841 = vst [vmem:[#allocation167_spill] sm:$0xff] %v6047_v21  ;;  %9842 = vst [vmem:[#allocation168_spill] sm:$0xff] %v6049_v20  ;;  %v6055_v13 = vld [vmem:[#allocation5 + $0x270] sm:$0xff]  ;;  %v6059_v4 = vld [vmem:[#allocation5 + $0x248] sm:$0xff] }
  0xa9   :  { %902 = vmatpush2.msra.mxu0 %v6029_v5  ;;  %973 = vmatpush2.msra.mxu1 %v6033_v25  ;;  %9844 = vst [vmem:[#allocation170_spill] sm:$0xff] %v6055_v13  ;;  %9845 = vst [vmem:[#allocation171_spill] sm:$0xff] %v6059_v4  ;;  %v6061_v5 = vld [vmem:[#allocation5 + $0x258] sm:$0xff]  ;;  %v6065_v25 = vld [vmem:[#allocation5 + $0x240] sm:$0xff] }
  0xaa   :  { %903 = vmatprep.subr.mxu0 %v6035_v23  ;;  %974 = vmatprep.subr.mxu1 %v6037_v24  ;;  %9846 = vst [vmem:[#allocation172_spill] sm:$0xff] %v6061_v5  ;;  %9847 = vst [vmem:[#allocation173_spill] sm:$0xff] %v6065_v25  ;;  %v6067_v23 = vld [vmem:[#allocation5 + $0x250] sm:$0xff]  ;;  %v6071_v24 = vld [vmem:[#allocation5 + $0x228] sm:$0xff] }
  0xab   :  { %904 = vmatpush2.msra.mxu0 %v6041_v26  ;;  %975 = vmatpush2.msra.mxu1 %v6043_v19  ;;  %9848 = vst [vmem:[#allocation174_spill] sm:$0xff] %v6067_v23  ;;  %9849 = vst [vmem:[#allocation175_spill] sm:$0xff] %v6071_v24  ;;  %v6073_v26 = vld [vmem:[#allocation5 + $0x238] sm:$0xff]  ;;  %v6077_v19 = vld [vmem:[#allocation5 + $0x220] sm:$0xff] }
  0xac   :  { %905 = vmatprep.subr.mxu0 %v6047_v21  ;;  %976 = vmatprep.subr.mxu1 %v6049_v20  ;;  %9850 = vst [vmem:[#allocation176_spill] sm:$0xff] %v6073_v26  ;;  %9851 = vst [vmem:[#allocation177_spill] sm:$0xff] %v6077_v19  ;;  %v6079_v21 = vld [vmem:[#allocation5 + $0x230] sm:$0xff]  ;;  %v6083_v20 = vld [vmem:[#allocation5 + $0x208] sm:$0xff] }
  0xad   :  { %906 = vmatpush2.msra.mxu0 %v6053_v18  ;;  %977 = vmatpush2.msra.mxu1 %v6055_v13  ;;  %9852 = vst [vmem:[#allocation178_spill] sm:$0xff] %v6079_v21  ;;  %9853 = vst [vmem:[#allocation179_spill] sm:$0xff] %v6083_v20  ;;  %v6085_v18 = vld [vmem:[#allocation5 + $0x218] sm:$0xff]  ;;  %v6089_v13 = vld [vmem:[#allocation5 + $0x200] sm:$0xff] }
  0xae   :  { %907 = vmatprep.subr.mxu0 %v6059_v4  ;;  %978 = vmatprep.subr.mxu1 %v6061_v5  ;;  %9854 = vst [vmem:[#allocation180_spill] sm:$0xff] %v6085_v18  ;;  %9855 = vst [vmem:[#allocation181_spill] sm:$0xff] %v6089_v13  ;;  %v6091_v4 = vld [vmem:[#allocation5 + $0x210] sm:$0xff] }
  0xaf   :  { %908 = vmatpush2.msra.mxu0 %v6065_v25  ;;  %979 = vmatpush2.msra.mxu1 %v6067_v23  ;;  %9856 = vst [vmem:[#allocation182_spill] sm:$0xff] %v6091_v4 }
  0xb0   :  { %909 = vmatprep.subr.mxu0 %v6071_v24  ;;  %980 = vmatprep.subr.mxu1 %v6073_v26 }
  0xb1   :  { %910 = vmatpush2.msra.mxu0 %v6077_v19  ;;  %981 = vmatpush2.msra.mxu1 %v6079_v21 }
  0xb2   :  { %911 = vmatprep.subr.mxu0 %v6083_v20  ;;  %982 = vmatprep.subr.mxu1 %v6085_v18 }
  0xb3   :  { %912 = vmatpush2.msra.mxu0 %v6089_v13  ;;  %983 = vmatpush2.msra.mxu1 %v6091_v4 }
  0xb4   :  { %1016 = vmatprep.subr.mxu0 %v5458_v33  ;;  %1087 = vmatprep.subr.mxu1 %v5468_v37 }
 0x101   :  { %v248_v26 = vpop.f32.mrf.mxu0 }
 0x103   :  { %v250_v24 = vpop.f32.mrf.mxu0 }
 0x104   :  { %v361_v23 = vpop.f32.mrf.mxu1 }
 0x106   :  { %v6101_v25 = vpop.f32.mrf.mxu0  ;;  %v363_v19 = vpop.f32.mrf.mxu1 }
 0x107   :  { %9857 = vst [vmem:[#allocation183_spill] sm:$0xff] %v6101_v25 }
 0x108   :  { %v6103_v5 = vpop.f32.mrf.mxu0 }
 0x109   :  { %9858 = vst [vmem:[#allocation184_spill] sm:$0xff] %v6103_v5 }
 0x10a   :  { %v6105_v21 = vpop.f32.mrf.mxu1 }
 0x10b   :  { %9859 = vst [vmem:[#allocation185_spill] sm:$0xff] %v6105_v21 }
 0x10c   :  { %v6107_v20 = vpop.f32.mrf.mxu0  ;;  %v6109_v18 = vpop.f32.mrf.mxu1 }
 0x10d   :  { %9860 = vst [vmem:[#allocation186_spill] sm:$0xff] %v6107_v20  ;;  %9861 = vst [vmem:[#allocation187_spill] sm:$0xff] %v6109_v18 }
 0x10e   :  { %v6111_v13 = vpop.f32.mrf.mxu0 }
 0x10f   :  { %9862 = vst [vmem:[#allocation188_spill] sm:$0xff] %v6111_v13 }
 0x110   :  { %v6113_v4 = vpop.f32.mrf.mxu1 }
 0x111   :  { %9863 = vst [vmem:[#allocation189_spill] sm:$0xff] %v6113_v4 }
 0x112   :  { %v6115_v33 = vpop.f32.mrf.mxu0  ;;  %v6117_v37 = vpop.f32.mrf.mxu1 }
 0x113   :  { %9864 = vst [vmem:[#allocation190_spill] sm:$0xff] %v6115_v33  ;;  %9865 = vst [vmem:[#allocation191_spill] sm:$0xff] %v6117_v37 }
 0x114   :  { %v6119_v22 = vpop.f32.mrf.mxu0 }
 0x115   :  { %9866 = vst [vmem:[#allocation192_spill] sm:$0xff] %v6119_v22 }
 0x116   :  { %v6121_v25 = vpop.f32.mrf.mxu1 }
 0x117   :  { %9867 = vst [vmem:[#allocation193_spill] sm:$0xff] %v6121_v25 }
 0x118   :  { %v6123_v16 = vpop.f32.mrf.mxu0  ;;  %v6125_v5 = vpop.f32.mrf.mxu1 }
 0x119   :  { %9868 = vst [vmem:[#allocation194_spill] sm:$0xff] %v6123_v16  ;;  %9869 = vst [vmem:[#allocation195_spill] sm:$0xff] %v6125_v5 }
 0x11a   :  { %v6127_v21 = vpop.f32.mrf.mxu0 }
 0x11b   :  { %9870 = vst [vmem:[#allocation196_spill] sm:$0xff] %v6127_v21 }
 0x11c   :  { %v6129_v20 = vpop.f32.mrf.mxu1 }
 0x11d   :  { %9871 = vst [vmem:[#allocation197_spill] sm:$0xff] %v6129_v20 }
 0x11e   :  { %v6131_v18 = vpop.f32.mrf.mxu0  ;;  %v6133_v13 = vpop.f32.mrf.mxu1 }
 0x11f   :  { %9872 = vst [vmem:[#allocation198_spill] sm:$0xff] %v6131_v18  ;;  %9873 = vst [vmem:[#allocation199_spill] sm:$0xff] %v6133_v13  ;;  %v6152_v18 = vsub.s32 0, %v5360_v8  ;;  %v6173_v13 = vsub.s32 2, %v5360_v8 }
 0x120   :  { %v6135_v4 = vpop.f32.mrf.mxu0 }
 0x121   :  { %9874 = vst [vmem:[#allocation200_spill] sm:$0xff] %v6135_v4  ;;  %9882 = vst [vmem:[#allocation208_spill] sm:$0xff] %v6152_v18  ;;  %v99_v4 = vld [vmem:[%s9031_s3] sm:$0xf] }
 0x122   :  { %v6137_v33 = vpop.f32.mrf.mxu1  ;;  %9889 = vst [vmem:[#allocation215_spill] sm:$0xff] %v6173_v13 }
 0x123   :  { %9875 = vst [vmem:[#allocation201_spill] sm:$0xff] %v6137_v33 }
 0x124   :  { %v6139_v37 = vpop.f32.mrf.mxu0  ;;  %v6141_v22 = vpop.f32.mrf.mxu1 }
 0x125   :  { %9876 = vst [vmem:[#allocation202_spill] sm:$0xff] %v6139_v37  ;;  %9877 = vst [vmem:[#allocation203_spill] sm:$0xff] %v6141_v22  ;;  %v6160_v37 = vsub.s32 1, %v5360_v8 }
 0x126   :  { %v6143_v25 = vpop.f32.mrf.mxu0 }
 0x127   :  { %9878 = vst [vmem:[#allocation204_spill] sm:$0xff] %v6143_v25  ;;  %9884 = vst [vmem:[#allocation210_spill] sm:$0xff] %v6160_v37  ;;  %v6170_v25 = vrot.slane %v99_v4, %v6160_v37 }
 0x128   :  { %v6145_v16 = vpop.f32.mrf.mxu1 }
 0x129   :  { %9879 = vst [vmem:[#allocation205_spill] sm:$0xff] %v6145_v16  ;;  %v6165_v16 = vrot.slane %v99_v4, %v6152_v18  ;;  %9888 = vst [vmem:[#allocation214_spill] sm:$0xff] %v6170_v25 }
 0x12a   :  { %v6147_v5 = vpop.f32.mrf.mxu0  ;;  %v6149_v21 = vpop.f32.mrf.mxu1 }
 0x12b   :  { %9880 = vst [vmem:[#allocation206_spill] sm:$0xff] %v6147_v5  ;;  %9881 = vst [vmem:[#allocation207_spill] sm:$0xff] %v6149_v21 }
 0x12c   :  { %v6157_v33 = vpop.f32.mrf.mxu0  ;;  %9886 = vst [vmem:[#allocation212_spill] sm:$0xff] %v6165_v16 }
 0x12d   :  { %9883 = vst [vmem:[#allocation209_spill] sm:$0xff] %v6157_v33 }
 0x12e   :  { %v6162_v22 = vpop.f32.mrf.mxu1 }
 0x12f   :  { %9885 = vst [vmem:[#allocation211_spill] sm:$0xff] %v6162_v22  ;;  %v6177_v22 = vrot.slane %v99_v4, %v6173_v13 }
 0x130   :  { %v6167_v5 = vpop.f32.mrf.mxu1  ;;  %v577_v21 = vpop.f32.mrf.mxu0 }
 0x131   :  { %9887 = vst [vmem:[#allocation213_spill] sm:$0xff] %v6167_v5  ;;  %v653_v20 = vadd.f32 %v577_v21, %v248_v26 }
 0x132   :  { %v579_v49 = vpop.f32.mrf.mxu0 }
 0x133   :  { %v678_v33 = vadd.f32 %v6165_v16, %v653_v20  ;;  %v654_v14 = vadd.f32 %v579_v49, %v250_v24  ;;  %v648_v17 = vpop.f32.mrf.mxu1  ;;  %v6185_v20 = vrot.slane %v99_v4, %v6181_v15 }
 0x134   :  { %v655_v5 = vadd.f32 %v648_v17, %v361_v23 }
 0x135   :  { %v682_v18 = vmul.f32 0.5, %v678_v33  ;;  %v679_v11 = vadd.f32 %v6170_v25, %v654_v14  ;;  %v650_v10 = vpop.f32.mrf.mxu1 }
 0x136   :  { %v680_v21 = vadd.f32 %v6177_v22, %v655_v5  ;;  %v656_v24 = vadd.f32 %v650_v10, %v363_v19 }
 0x137   :  { %4349 = vtanh.f32 %v682_v18  ;;  %v686_v37 = vmul.f32 0.5, %v679_v11 }
 0x138   :  { %v681_v26 = vadd.f32 %v6185_v20, %v656_v24  ;;  %v9934_v24 = vld [vmem:[#allocation77_spill] sm:$0xff] }
 0x139   :  { %4351 = vtanh.f32 %v686_v37 }
 0x13a   :  { %4353 = vtanh.f32 %v680_v21  ;;  %v691_v49 = vmul.f32 0.5, %v681_v26  ;;  %v9935_v26 = vld [vmem:[#allocation78_spill] sm:$0xff] }
 0x13c   :  { %4355 = vtanh.f32 %v691_v49  ;;  %v9936_v49 = vld [vmem:[#allocation79_spill] sm:$0xff] }
 0x144   :  { %v4350_v33 = vpop.eup %4349 }
 0x145   :  { %v684_v14 = vadd.f32 1.0, %v4350_v33  ;;  %v9937_v33 = vld [vmem:[#allocation80_spill] sm:$0xff] }
 0x146   :  { %v4352_v17 = vpop.eup %4351 }
 0x147   :  { %v685_v23 = vmul.f32 0.5, %v684_v14  ;;  %v688_v8 = vadd.f32 1.0, %v4352_v17  ;;  %v4354_v11 = vpop.eup %4353  ;;  %v9938_v14 = vld [vmem:[#allocation81_spill] sm:$0xff]  ;;  %v9939_v17 = vld [vmem:[#allocation82_spill] sm:$0xff] }
 0x149   :  { %v689_v18 = vmul.f32 0.5, %v688_v8  ;;  %v696_v37 = vmul.f32 %v4354_v11, %v685_v23  ;;  %v4356_v4 = vpop.eup %4355  ;;  %v9940_v23 = vld [vmem:[#allocation83_spill] sm:$0xff]  ;;  %v9941_v8 = vld [vmem:[#allocation84_spill] sm:$0xff]  ;;  %v9943_v11 = vld [vmem:[#allocation86_spill] sm:$0xff] }
 0x14a   :  { %v693_v5 = vadd.f32 1.0, %v4356_v4  ;;  %v9945_v4 = vld [vmem:[#allocation88_spill] sm:$0xff] }
 0x14b   :  { %v695_v25 = vmul.f32 0.0, %v689_v18  ;;  %v9942_v18 = vld [vmem:[#allocation85_spill] sm:$0xff] }
 0x14c   :  { %v694_v10 = vmul.f32 0.5, %v693_v5  ;;  %v9946_v5 = vld [vmem:[#allocation89_spill] sm:$0xff] }
 0x14d   :  { %v6188_v16 = vadd.f32 %v696_v37, %v695_v25  ;;  %v9891_v25 = vld [vmem:[#allocation34_spill] sm:$0xff]  ;;  %v9944_v37 = vld [vmem:[#allocation87_spill] sm:$0xff] }
 0x14f   :  { %4357 = vtanh.f32 %v6188_v16 }
 0x15c   :  { %v4358_v19 = vpop.eup %4357 }
 0x15d   :  { %v6191_v21 = vmul.f32 %v4358_v19, %v694_v10  ;;  %v9947_v10 = vld [vmem:[#allocation90_spill] sm:$0xff]  ;;  %v9948_v19 = vld [vmem:[#allocation91_spill] sm:$0xff] }
 0x15f   :  { %914 = vmatmul.mubr.f32.vlgmr.msra.gmra.mxu0 %v6191_v21  ;;  %985 = vmatmul.mubr.f32.vlgmr.msra.gmra.mxu1 %v6191_v21 }
 0x160   :  { %1017 = vmatpush1.msra.mxu0 %v5461_v34  ;;  %1088 = vmatpush1.msra.mxu1 %v5476_v39  ;;  %v9892_v34 = vld [vmem:[#allocation37_spill] sm:$0xff] }
 0x161   :  { %1018 = vmatprep.subr.mxu0 %v5464_v36  ;;  %1089 = vmatprep.subr.mxu1 %v5485_v42  ;;  %v9893_v36 = vld [vmem:[#allocation35_spill] sm:$0xff]  ;;  %v9896_v39 = vld [vmem:[#allocation41_spill] sm:$0xff]  ;;  %v9899_v42 = vld [vmem:[#allocation40_spill] sm:$0xff] }
 0x162   :  { %1019 = vmatpush1.msra.mxu0 %v5472_v38  ;;  %1090 = vmatpush1.msra.mxu1 %v5493_v44  ;;  %v9894_v38 = vld [vmem:[#allocation39_spill] sm:$0xff]  ;;  %v9903_v44 = vld [vmem:[#allocation45_spill] sm:$0xff] }
 0x163   :  { %1020 = vmatprep.subr.mxu0 %v5483_v41  ;;  %1091 = vmatprep.subr.mxu1 %v5499_v46  ;;  %v9898_v41 = vld [vmem:[#allocation44_spill] sm:$0xff]  ;;  %v9905_v46 = vld [vmem:[#allocation47_spill] sm:$0xff] }
 0x164   :  { %1021 = vmatpush1.msra.mxu0 %v5489_v43  ;;  %1092 = vmatpush1.msra.mxu1 %v5507_v48  ;;  %v9902_v43 = vld [vmem:[#allocation48_spill] sm:$0xff]  ;;  %v9907_v48 = vld [vmem:[#allocation49_spill] sm:$0xff] }
 0x165   :  { %1022 = vmatprep.subr.mxu0 %v5495_v45  ;;  %1093 = vmatprep.subr.mxu1 %v5516_v51  ;;  %v9904_v45 = vld [vmem:[#allocation50_spill] sm:$0xff]  ;;  %v9909_v51 = vld [vmem:[#allocation51_spill] sm:$0xff] }
 0x166   :  { %1023 = vmatpush1.msra.mxu0 %v5503_v47  ;;  %1094 = vmatpush1.msra.mxu1 %v5524_v53  ;;  %v9906_v47 = vld [vmem:[#allocation52_spill] sm:$0xff]  ;;  %v9911_v53 = vld [vmem:[#allocation54_spill] sm:$0xff] }
 0x167   :  { %1024 = vmatprep.subr.mxu0 %v5514_v50  ;;  %1095 = vmatprep.subr.mxu1 %v5530_v55  ;;  %v9908_v50 = vld [vmem:[#allocation53_spill] sm:$0xff]  ;;  %v9913_v55 = vld [vmem:[#allocation56_spill] sm:$0xff] }
 0x168   :  { %1025 = vmatpush1.msra.mxu0 %v5520_v52  ;;  %1096 = vmatpush1.msra.mxu1 %v5538_v57  ;;  %v9910_v52 = vmov 0.0   ;;  %v9915_v57 = vld [vmem:[#allocation58_spill] sm:$0xff] }
 0x169   :  { %1026 = vmatprep.subr.mxu0 %v5526_v54  ;;  %1097 = vmatprep.subr.mxu1 %v5547_v60  ;;  %v9912_v54 = vld [vmem:[#allocation55_spill] sm:$0xff]  ;;  %v9917_v60 = vld [vmem:[#allocation60_spill] sm:$0xff] }
 0x16a   :  { %1027 = vmatpush1.msra.mxu0 %v5534_v56  ;;  %1098 = vmatpush1.msra.mxu1 %v5555_v62  ;;  %v9914_v56 = vld [vmem:[#allocation57_spill] sm:$0xff]  ;;  %v9919_v62 = vld [vmem:[#allocation62_spill] sm:$0xff] }
 0x16b   :  { %1028 = vmatprep.subr.mxu0 %v5545_v59  ;;  %1099 = vmatprep.subr.mxu1 %v5561_v1  ;;  %v9916_v59 = vld [vmem:[#allocation59_spill] sm:$0xff]  ;;  %v9921_v1 = vld [vmem:[#allocation64_spill] sm:$0xff] }
 0x16c   :  { %1029 = vmatpush1.msra.mxu0 %v5551_v61  ;;  %1100 = vmatpush1.msra.mxu1 %v5569_v3  ;;  %v9918_v61 = vld [vmem:[#allocation61_spill] sm:$0xff]  ;;  %v9923_v3 = vld [vmem:[#allocation66_spill] sm:$0xff] }
 0x16d   :  { %1030 = vmatprep.subr.mxu0 %v5557_v63  ;;  %1101 = vmatprep.subr.mxu1 %v5578_v28  ;;  %v9920_v63 = vld [vmem:[#allocation63_spill] sm:$0xff]  ;;  %v9925_v28 = vld [vmem:[#allocation68_spill] sm:$0xff] }
 0x16e   :  { %1031 = vmatpush1.msra.mxu0 %v5565_v2  ;;  %1102 = vmatpush1.msra.mxu1 %v5586_v30  ;;  %v9922_v2 = vld [vmem:[#allocation65_spill] sm:$0xff]  ;;  %v9927_v30 = vld [vmem:[#allocation70_spill] sm:$0xff] }
 0x16f   :  { %1032 = vmatprep.subr.mxu0 %v5576_v27  ;;  %1103 = vmatprep.subr.mxu1 %v5592_v32  ;;  %v9924_v27 = vld [vmem:[#allocation67_spill] sm:$0xff]  ;;  %v9929_v32 = vld [vmem:[#allocation72_spill] sm:$0xff] }
 0x170   :  { %1033 = vmatpush1.msra.mxu0 %v5582_v29  ;;  %1104 = vmatpush1.msra.mxu1 %v5600_v40  ;;  %v9926_v29 = vld [vmem:[#allocation69_spill] sm:$0xff]  ;;  %v9931_v40 = vld [vmem:[#allocation74_spill] sm:$0xff] }
 0x171   :  { %1034 = vmatprep.subr.mxu0 %v5588_v31  ;;  %1105 = vmatprep.subr.mxu1 %v5609_v0  ;;  %v9895_v0 = vld [vmem:[#allocation36_spill] sm:$0xff]  ;;  %v9928_v31 = vld [vmem:[#allocation71_spill] sm:$0xff] }
 0x172   :  { %1035 = vmatpush1.msra.mxu0 %v5596_v35  ;;  %1106 = vmatpush1.msra.mxu1 %v5617_v9  ;;  %v9897_v9 = vld [vmem:[#allocation38_spill] sm:$0xff]  ;;  %v9930_v35 = vld [vmem:[#allocation73_spill] sm:$0xff] }
 0x173   :  { %1036 = vmatprep.subr.mxu0 %v5607_v58  ;;  %1107 = vmatprep.subr.mxu1 %v5623_v7  ;;  %v9932_v58 = vld [vmem:[#allocation75_spill] sm:$0xff]  ;;  %v9933_v7 = vld [vmem:[#allocation76_spill] sm:$0xff] }
 0x174   :  { %1037 = vmatpush1.msra.mxu0 %v5613_v6  ;;  %1108 = vmatpush1.msra.mxu1 %v5631_v12  ;;  %v9900_v6 = vld [vmem:[#allocation46_spill] sm:$0xff] }
 0x175   :  { %1038 = vmatprep.subr.mxu0 %v9891_v25  ;;  %1109 = vmatprep.subr.mxu1 %v9892_v34  ;;  %v9901_v12 = vld [vmem:[#allocation42_spill] sm:$0xff]  ;;  %v9950_v25 = vld [vmem:[#allocation93_spill] sm:$0xff] }
 0x176   :  { %1039 = vmatpush1.msra.mxu0 %v9893_v36  ;;  %1110 = vmatpush1.msra.mxu1 %v9894_v38  ;;  %v9951_v34 = vld [vmem:[#allocation94_spill] sm:$0xff]  ;;  %v9952_v36 = vld [vmem:[#allocation95_spill] sm:$0xff]  ;;  %v9953_v38 = vld [vmem:[#allocation96_spill] sm:$0xff] }
 0x177   :  { %1040 = vmatprep.subr.mxu0 %v9895_v0  ;;  %1111 = vmatprep.subr.mxu1 %v9896_v39  ;;  %v9954_v0 = vld [vmem:[#allocation97_spill] sm:$0xff]  ;;  %v9955_v39 = vld [vmem:[#allocation98_spill] sm:$0xff] }
 0x178   :  { %1041 = vmatpush1.msra.mxu0 %v9897_v9  ;;  %1112 = vmatpush1.msra.mxu1 %v9898_v41  ;;  %v9956_v9 = vld [vmem:[#allocation99_spill] sm:$0xff]  ;;  %v9957_v41 = vld [vmem:[#allocation100_spill] sm:$0xff] }
 0x179   :  { %1042 = vmatprep.subr.mxu0 %v9899_v42  ;;  %1113 = vmatprep.subr.mxu1 %v9900_v6  ;;  %v9958_v42 = vld [vmem:[#allocation101_spill] sm:$0xff]  ;;  %v9959_v6 = vld [vmem:[#allocation102_spill] sm:$0xff] }
 0x17a   :  { %1043 = vmatpush1.msra.mxu0 %v9901_v12  ;;  %1114 = vmatpush1.msra.mxu1 %v9902_v43  ;;  %v9960_v12 = vld [vmem:[#allocation103_spill] sm:$0xff]  ;;  %v9961_v43 = vld [vmem:[#allocation104_spill] sm:$0xff] }
 0x17b   :  { %1044 = vmatprep.subr.mxu0 %v9903_v44  ;;  %1115 = vmatprep.subr.mxu1 %v9904_v45  ;;  %v9962_v44 = vld [vmem:[#allocation105_spill] sm:$0xff]  ;;  %v9963_v45 = vld [vmem:[#allocation106_spill] sm:$0xff] }
 0x17c   :  { %1045 = vmatpush1.msra.mxu0 %v9905_v46  ;;  %1116 = vmatpush1.msra.mxu1 %v9906_v47  ;;  %v9964_v46 = vld [vmem:[#allocation107_spill] sm:$0xff]  ;;  %v9965_v47 = vld [vmem:[#allocation108_spill] sm:$0xff] }
 0x17d   :  { %1046 = vmatprep.subr.mxu0 %v9907_v48  ;;  %1117 = vmatprep.subr.mxu1 %v9908_v50  ;;  %v9966_v48 = vld [vmem:[#allocation109_spill] sm:$0xff]  ;;  %v9967_v50 = vld [vmem:[#allocation110_spill] sm:$0xff] }
 0x17e   :  { %1047 = vmatpush1.msra.mxu0 %v9909_v51  ;;  %1080 = vmatprep.mubr.f32.mxu0 %v9910_v52  ;;  %v9968_v51 = vld [vmem:[#allocation111_spill] sm:$0xff] }
 0x17f   :  { %1118 = vmatpush1.msra.mxu1 %v9911_v53  ;;  %1151 = vmatprep.mubr.f32.mxu1 %v9910_v52  ;;  %v9969_v53 = vld [vmem:[#allocation112_spill] sm:$0xff] }
 0x180   :  { %1081 = vmatmul.mubr.f32.vlgmr.msra.gmra.mxu0 %v6191_v21  ;;  %1152 = vmatmul.mubr.f32.vlgmr.msra.gmra.mxu1 %v6191_v21  ;;  %v9949_v21 = vld [vmem:[#allocation92_spill] sm:$0xff] }
 0x181   :  { %1184 = vmatprep.subr.mxu0 %v9912_v54  ;;  %1255 = vmatprep.subr.mxu1 %v9913_v55  ;;  %v9970_v54 = vld [vmem:[#allocation113_spill] sm:$0xff]  ;;  %v9971_v55 = vld [vmem:[#allocation114_spill] sm:$0xff] }
 0x182   :  { %1185 = vmatpush1.msra.mxu0 %v9914_v56  ;;  %1256 = vmatpush1.msra.mxu1 %v9915_v57  ;;  %v9972_v56 = vld [vmem:[#allocation115_spill] sm:$0xff]  ;;  %v9973_v57 = vld [vmem:[#allocation116_spill] sm:$0xff] }
 0x183   :  { %1186 = vmatprep.subr.mxu0 %v9916_v59  ;;  %1257 = vmatprep.subr.mxu1 %v9917_v60  ;;  %v9974_v59 = vld [vmem:[#allocation117_spill] sm:$0xff]  ;;  %v9975_v60 = vld [vmem:[#allocation118_spill] sm:$0xff] }
 0x184   :  { %1187 = vmatpush1.msra.mxu0 %v9918_v61  ;;  %1258 = vmatpush1.msra.mxu1 %v9919_v62  ;;  %v9976_v61 = vld [vmem:[#allocation119_spill] sm:$0xff]  ;;  %v9977_v62 = vld [vmem:[#allocation120_spill] sm:$0xff] }
 0x185   :  { %1188 = vmatprep.subr.mxu0 %v9920_v63  ;;  %1259 = vmatprep.subr.mxu1 %v9921_v1  ;;  %v9978_v63 = vld [vmem:[#allocation121_spill] sm:$0xff]  ;;  %v9979_v1 = vld [vmem:[#allocation122_spill] sm:$0xff] }
 0x186   :  { %1189 = vmatpush1.msra.mxu0 %v9922_v2  ;;  %1260 = vmatpush1.msra.mxu1 %v9923_v3  ;;  %v9980_v2 = vld [vmem:[#allocation123_spill] sm:$0xff]  ;;  %v9981_v3 = vld [vmem:[#allocation124_spill] sm:$0xff] }
 0x187   :  { %1190 = vmatprep.subr.mxu0 %v9924_v27  ;;  %1261 = vmatprep.subr.mxu1 %v9925_v28  ;;  %v9982_v27 = vld [vmem:[#allocation125_spill] sm:$0xff]  ;;  %v9983_v28 = vld [vmem:[#allocation126_spill] sm:$0xff] }
 0x188   :  { %1191 = vmatpush1.msra.mxu0 %v9926_v29  ;;  %1262 = vmatpush1.msra.mxu1 %v9927_v30  ;;  %v9984_v29 = vld [vmem:[#allocation127_spill] sm:$0xff]  ;;  %v9985_v30 = vld [vmem:[#allocation128_spill] sm:$0xff] }
 0x189   :  { %1192 = vmatprep.subr.mxu0 %v9928_v31  ;;  %1263 = vmatprep.subr.mxu1 %v9929_v32  ;;  %v9986_v31 = vld [vmem:[#allocation129_spill] sm:$0xff]  ;;  %v9987_v32 = vld [vmem:[#allocation130_spill] sm:$0xff] }
 0x18a   :  { %1193 = vmatpush1.msra.mxu0 %v9930_v35  ;;  %1264 = vmatpush1.msra.mxu1 %v9931_v40  ;;  %v9988_v35 = vld [vmem:[#allocation131_spill] sm:$0xff]  ;;  %v9989_v40 = vld [vmem:[#allocation132_spill] sm:$0xff] }
 0x18b   :  { %1194 = vmatprep.subr.mxu0 %v9932_v58  ;;  %1265 = vmatprep.subr.mxu1 %v9933_v7  ;;  %v9990_v58 = vld [vmem:[#allocation133_spill] sm:$0xff]  ;;  %v9991_v7 = vld [vmem:[#allocation134_spill] sm:$0xff] }
 0x18c   :  { %1195 = vmatpush1.msra.mxu0 %v9934_v24  ;;  %1266 = vmatpush1.msra.mxu1 %v9935_v26  ;;  %v9992_v24 = vld [vmem:[#allocation135_spill] sm:$0xff]  ;;  %v9993_v26 = vld [vmem:[#allocation136_spill] sm:$0xff] }
 0x18d   :  { %1196 = vmatprep.subr.mxu0 %v9936_v49  ;;  %1267 = vmatprep.subr.mxu1 %v9937_v33  ;;  %v9994_v49 = vld [vmem:[#allocation137_spill] sm:$0xff]  ;;  %v9995_v33 = vld [vmem:[#allocation138_spill] sm:$0xff] }
 0x18e   :  { %1197 = vmatpush1.msra.mxu0 %v9938_v14  ;;  %1268 = vmatpush1.msra.mxu1 %v9939_v17  ;;  %v9996_v14 = vld [vmem:[#allocation139_spill] sm:$0xff]  ;;  %v9997_v17 = vld [vmem:[#allocation140_spill] sm:$0xff] }
 0x18f   :  { %1198 = vmatprep.subr.mxu0 %v9940_v23  ;;  %1269 = vmatprep.subr.mxu1 %v9941_v8  ;;  %v9998_v23 = vld [vmem:[#allocation141_spill] sm:$0xff]  ;;  %v9999_v8 = vld [vmem:[#allocation142_spill] sm:$0xff] }
 0x190   :  { %1199 = vmatpush1.msra.mxu0 %v9942_v18  ;;  %1270 = vmatpush1.msra.mxu1 %v9943_v11  ;;  %v10000_v18 = vld [vmem:[#allocation143_spill] sm:$0xff]  ;;  %v10001_v11 = vld [vmem:[#allocation144_spill] sm:$0xff] }
 0x191   :  { %1200 = vmatprep.subr.mxu0 %v9944_v37  ;;  %1271 = vmatprep.subr.mxu1 %v9945_v4  ;;  %v10002_v37 = vld [vmem:[#allocation145_spill] sm:$0xff]  ;;  %v10003_v4 = vld [vmem:[#allocation146_spill] sm:$0xff] }
 0x192   :  { %1201 = vmatpush1.msra.mxu0 %v9946_v5  ;;  %1272 = vmatpush1.msra.mxu1 %v9947_v10  ;;  %v10004_v5 = vld [vmem:[#allocation147_spill] sm:$0xff]  ;;  %v10005_v10 = vld [vmem:[#allocation148_spill] sm:$0xff] }
 0x193   :  { %1202 = vmatprep.subr.mxu0 %v9948_v19  ;;  %1273 = vmatprep.subr.mxu1 %v9949_v21  ;;  %v10006_v19 = vld [vmem:[#allocation149_spill] sm:$0xff]  ;;  %v10007_v21 = vld [vmem:[#allocation150_spill] sm:$0xff] }
 0x194   :  { %1203 = vmatpush1.msra.mxu0 %v9950_v25  ;;  %1274 = vmatpush1.msra.mxu1 %v9951_v34  ;;  %v10008_v25 = vld [vmem:[#allocation151_spill] sm:$0xff]  ;;  %v10009_v34 = vld [vmem:[#allocation152_spill] sm:$0xff] }
 0x195   :  { %1204 = vmatprep.subr.mxu0 %v9952_v36  ;;  %1275 = vmatprep.subr.mxu1 %v9953_v38  ;;  %v10010_v36 = vld [vmem:[#allocation153_spill] sm:$0xff]  ;;  %v10011_v38 = vld [vmem:[#allocation154_spill] sm:$0xff] }
 0x196   :  { %1205 = vmatpush1.msra.mxu0 %v9954_v0  ;;  %1276 = vmatpush1.msra.mxu1 %v9955_v39  ;;  %v10012_v0 = vld [vmem:[#allocation155_spill] sm:$0xff]  ;;  %v10013_v39 = vld [vmem:[#allocation156_spill] sm:$0xff] }
 0x197   :  { %1206 = vmatprep.subr.mxu0 %v9956_v9  ;;  %1277 = vmatprep.subr.mxu1 %v9957_v41  ;;  %v10014_v9 = vld [vmem:[#allocation157_spill] sm:$0xff]  ;;  %v10015_v41 = vld [vmem:[#allocation158_spill] sm:$0xff] }
 0x198   :  { %1207 = vmatpush1.msra.mxu0 %v9958_v42  ;;  %1278 = vmatpush1.msra.mxu1 %v9959_v6  ;;  %v10016_v42 = vld [vmem:[#allocation159_spill] sm:$0xff]  ;;  %v10017_v6 = vld [vmem:[#allocation160_spill] sm:$0xff] }
 0x199   :  { %1208 = vmatprep.subr.mxu0 %v9960_v12  ;;  %1279 = vmatprep.subr.mxu1 %v9961_v43  ;;  %v10018_v12 = vld [vmem:[#allocation161_spill] sm:$0xff]  ;;  %v10019_v43 = vld [vmem:[#allocation162_spill] sm:$0xff] }
 0x19a   :  { %1209 = vmatpush1.msra.mxu0 %v9962_v44  ;;  %1280 = vmatpush1.msra.mxu1 %v9963_v45  ;;  %v10020_v44 = vld [vmem:[#allocation163_spill] sm:$0xff]  ;;  %v10021_v45 = vld [vmem:[#allocation164_spill] sm:$0xff] }
 0x19b   :  { %1210 = vmatprep.subr.mxu0 %v9964_v46  ;;  %1281 = vmatprep.subr.mxu1 %v9965_v47  ;;  %v10022_v46 = vld [vmem:[#allocation165_spill] sm:$0xff]  ;;  %v10023_v47 = vld [vmem:[#allocation166_spill] sm:$0xff] }
 0x19c   :  { %1211 = vmatpush1.msra.mxu0 %v9966_v48  ;;  %1282 = vmatpush1.msra.mxu1 %v9967_v50  ;;  %v10024_v48 = vld [vmem:[#allocation167_spill] sm:$0xff]  ;;  %v10025_v50 = vld [vmem:[#allocation168_spill] sm:$0xff] }
 0x19d   :  { %1212 = vmatprep.subr.mxu0 %v9968_v51  ;;  %1283 = vmatprep.subr.mxu1 %v9969_v53  ;;  %v10026_v51 = vld [vmem:[#allocation169_spill] sm:$0xff]  ;;  %v10027_v53 = vld [vmem:[#allocation170_spill] sm:$0xff] }
 0x19e   :  { %1213 = vmatpush1.msra.mxu0 %v9970_v54  ;;  %1284 = vmatpush1.msra.mxu1 %v9971_v55  ;;  %v10028_v54 = vld [vmem:[#allocation171_spill] sm:$0xff]  ;;  %v10029_v55 = vld [vmem:[#allocation172_spill] sm:$0xff] }
 0x19f   :  { %1214 = vmatprep.subr.mxu0 %v9972_v56  ;;  %1285 = vmatprep.subr.mxu1 %v9973_v57  ;;  %v10030_v56 = vld [vmem:[#allocation173_spill] sm:$0xff]  ;;  %v10031_v57 = vld [vmem:[#allocation174_spill] sm:$0xff] }
 0x1a0   :  { %1215 = vmatpush1.msra.mxu0 %v9974_v59  ;;  %1286 = vmatpush1.msra.mxu1 %v9975_v60  ;;  %v10032_v59 = vld [vmem:[#allocation175_spill] sm:$0xff]  ;;  %v10033_v60 = vld [vmem:[#allocation176_spill] sm:$0xff] }
 0x1a1   :  { %1216 = vmatprep.subr.mxu0 %v9976_v61  ;;  %1287 = vmatprep.subr.mxu1 %v9977_v62  ;;  %v10034_v61 = vld [vmem:[#allocation177_spill] sm:$0xff]  ;;  %v10035_v62 = vld [vmem:[#allocation178_spill] sm:$0xff] }
 0x1a2   :  { %1217 = vmatpush2.msra.mxu0 %v9978_v63  ;;  %1288 = vmatpush2.msra.mxu1 %v9979_v1  ;;  %v10036_v63 = vld [vmem:[#allocation179_spill] sm:$0xff]  ;;  %v10037_v1 = vld [vmem:[#allocation180_spill] sm:$0xff] }
 0x1a3   :  { %1218 = vmatprep.subr.mxu0 %v9980_v2  ;;  %1289 = vmatprep.subr.mxu1 %v9981_v3  ;;  %v10038_v2 = vld [vmem:[#allocation181_spill] sm:$0xff]  ;;  %v10039_v3 = vld [vmem:[#allocation182_spill] sm:$0xff] }
 0x1a4   :  { %1219 = vmatpush2.msra.mxu0 %v9982_v27  ;;  %1290 = vmatpush2.msra.mxu1 %v9983_v28  ;;  %v6389_v27 = vld [vmem:[#allocation3 + $0x1e8] sm:$0xff]  ;;  %v6392_v28 = vld [vmem:[#allocation3 + $0x1f8] sm:$0xff] }
 0x1a5   :  { %1220 = vmatprep.subr.mxu0 %v9984_v29  ;;  %1291 = vmatprep.subr.mxu1 %v9985_v30  ;;  %v100_v29 = vld [vmem:[%s9033_s5] sm:$0xf]  ;;  %v10040_v30 = vld [vmem:[#allocation208_spill] sm:$0xff]  ;;  %s8908_s5 = smov 0  }
 0x1a6   :  { %1221 = vmatpush2.msra.mxu0 %v9986_v31  ;;  %1292 = vmatpush2.msra.mxu1 %v9987_v32  ;;  %v6399_v31 = vrot.slane %v100_v29, %v10040_v30  ;;  %v10042_v32 = vld [vmem:[#allocation210_spill] sm:$0xff] }
 0x1a7   :  { %1222 = vmatprep.subr.mxu0 %v9988_v35  ;;  %1293 = vmatprep.subr.mxu1 %v9989_v40  ;;  %v6402_v35 = vrot.slane %v100_v29, %v10042_v32 }
 0x1a8   :  { %1223 = vmatpush2.msra.mxu0 %v9990_v58  ;;  %1294 = vmatpush2.msra.mxu1 %v9991_v7  ;;  %10041 = vst [vmem:[#allocation34_spill] sm:$0xff] %v6399_v31 }
 0x1a9   :  { %1224 = vmatprep.subr.mxu0 %v9992_v24  ;;  %1295 = vmatprep.subr.mxu1 %v9993_v26  ;;  %10043 = vst [vmem:[#allocation37_spill] sm:$0xff] %v6402_v35  ;;  %v6406_v26 = vrot.slane %v100_v29, %v6173_v13  ;;  %v6580_v13 = vld [vmem:[#allocation3 + $0x70] sm:$0xff] }
 0x1aa   :  { %1225 = vmatpush2.msra.mxu0 %v9994_v49  ;;  %1296 = vmatpush2.msra.mxu1 %v9995_v33  ;;  %10062 = vst [vmem:[#allocation47_spill] sm:$0xff] %v6580_v13 }
 0x1ab   :  { %1226 = vmatprep.subr.mxu0 %v9996_v14  ;;  %1297 = vmatprep.subr.mxu1 %v9997_v17  ;;  %10044 = vst [vmem:[#allocation35_spill] sm:$0xff] %v6406_v26 }
 0x1ac   :  { %1227 = vmatpush2.msra.mxu0 %v9998_v23  ;;  %1298 = vmatpush2.msra.mxu1 %v9999_v8  ;;  %v6411_v23 = vrot.slane %v100_v29, %v6181_v15  ;;  %v6577_v15 = vld [vmem:[#allocation3 + $0x60] sm:$0xff] }
 0x1ad   :  { %1228 = vmatprep.subr.mxu0 %v10000_v18  ;;  %1299 = vmatprep.subr.mxu1 %v10001_v11  ;;  %10061 = vst [vmem:[#allocation50_spill] sm:$0xff] %v6577_v15 }
 0x1ae   :  { %1229 = vmatpush2.msra.mxu0 %v10002_v37  ;;  %1300 = vmatpush2.msra.mxu1 %v10003_v4  ;;  %10045 = vst [vmem:[#allocation39_spill] sm:$0xff] %v6411_v23 }
 0x1af   :  { %1230 = vmatprep.subr.mxu0 %v10004_v5  ;;  %1301 = vmatprep.subr.mxu1 %v10005_v10 }
 0x1b0   :  { %1231 = vmatpush2.msra.mxu0 %v10006_v19  ;;  %1302 = vmatpush2.msra.mxu1 %v10007_v21 }
 0x1b1   :  { %1232 = vmatprep.subr.mxu0 %v10008_v25  ;;  %1303 = vmatprep.subr.mxu1 %v10009_v34 }
 0x1b2   :  { %1233 = vmatpush2.msra.mxu0 %v10010_v36  ;;  %1304 = vmatpush2.msra.mxu1 %v10011_v38 }
 0x1b3   :  { %1234 = vmatprep.subr.mxu0 %v10012_v0  ;;  %1305 = vmatprep.subr.mxu1 %v10013_v39 }
 0x1b4   :  { %1235 = vmatpush2.msra.mxu0 %v10014_v9  ;;  %1306 = vmatpush2.msra.mxu1 %v10015_v41  ;;  %v10046_v9 = vld [vmem:[#allocation183_spill] sm:$0xff] }
 0x1b5   :  { %1236 = vmatprep.subr.mxu0 %v10016_v42  ;;  %1307 = vmatprep.subr.mxu1 %v10017_v6 }
 0x1b6   :  { %1237 = vmatpush2.msra.mxu0 %v10018_v12  ;;  %1308 = vmatpush2.msra.mxu1 %v10019_v43  ;;  %v10047_v12 = vld [vmem:[#allocation212_spill] sm:$0xff] }
 0x1b7   :  { %1238 = vmatprep.subr.mxu0 %v10020_v44  ;;  %1309 = vmatprep.subr.mxu1 %v10021_v45  ;;  %v10048_v44 = vld [vmem:[#allocation184_spill] sm:$0xff] }
 0x1b8   :  { %1239 = vmatpush2.msra.mxu0 %v10022_v46  ;;  %1310 = vmatpush2.msra.mxu1 %v10023_v47 }
 0x1b9   :  { %1240 = vmatprep.subr.mxu0 %v10024_v48  ;;  %1311 = vmatprep.subr.mxu1 %v10025_v50  ;;  %v10049_v48 = vld [vmem:[#allocation185_spill] sm:$0xff] }
 0x1ba   :  { %1241 = vmatpush2.msra.mxu0 %v10026_v51  ;;  %1312 = vmatpush2.msra.mxu1 %v10027_v53  ;;  %v10050_v51 = vld [vmem:[#allocation214_spill] sm:$0xff] }
 0x1bb   :  { %1242 = vmatprep.subr.mxu0 %v10028_v54  ;;  %1313 = vmatprep.subr.mxu1 %v10029_v55 }
 0x1bc   :  { %1243 = vmatpush2.msra.mxu0 %v10030_v56  ;;  %1314 = vmatpush2.msra.mxu1 %v10031_v57 }
 0x1bd   :  { %1244 = vmatprep.subr.mxu0 %v10032_v59  ;;  %1315 = vmatprep.subr.mxu1 %v10033_v60 }
 0x1be   :  { %1245 = vmatpush2.msra.mxu0 %v10034_v61  ;;  %1316 = vmatpush2.msra.mxu1 %v10035_v62  ;;  %v10051_v61 = vld [vmem:[#allocation187_spill] sm:$0xff] }
 0x1bf   :  { %1246 = vmatprep.subr.mxu0 %v10036_v63  ;;  %1317 = vmatprep.subr.mxu1 %v10037_v1 }
 0x1c0   :  { %1247 = vmatpush2.msra.mxu0 %v10038_v2  ;;  %1318 = vmatpush2.msra.mxu1 %v10039_v3 }
 0x1c1   :  { %1351 = vmatprep.subr.mxu0 %v6389_v27  ;;  %1422 = vmatprep.subr.mxu1 %v6392_v28 }
 0x21f   :  { %v915_v40 = vpop.f32.mrf.mxu0  ;;  %v986_v33 = vpop.f32.mrf.mxu1 }
 0x220   :  { %v916_v58 = vadd.f32 %v915_v40, %v6399_v31  ;;  %v987_v17 = vadd.f32 %v986_v33, %v6406_v26 }
 0x221   :  { %v917_v7 = vpop.f32.mrf.mxu0  ;;  %v988_v8 = vpop.f32.mrf.mxu1 }
 0x222   :  { %v991_v24 = vmul.f32 0.5, %v916_v58  ;;  %v918_v49 = vadd.f32 %v917_v7, %v6402_v35  ;;  %v989_v18 = vadd.f32 %v988_v8, %v6411_v23 }
 0x224   :  { %4359 = vtanh.f32 %v991_v24  ;;  %v995_v14 = vmul.f32 0.5, %v918_v49  ;;  %v1000_v11 = vmul.f32 0.5, %v989_v18 }
 0x226   :  { %4361 = vtanh.f32 %v995_v14 }
 0x227   :  { %4363 = vtanh.f32 %v987_v17 }
 0x228   :  { %4365 = vtanh.f32 %v1000_v11  ;;  %v6433_v11 = vld [vmem:[#allocation3 + $0x1e0] sm:$0xff] }
 0x231   :  { %v4360_v37 = vpop.eup %4359 }
 0x232   :  { %v993_v4 = vadd.f32 1.0, %v4360_v37  ;;  %v6439_v37 = vld [vmem:[#allocation3 + $0x1c8] sm:$0xff] }
 0x233   :  { %v4362_v5 = vpop.eup %4361 }
 0x234   :  { %v994_v10 = vmul.f32 0.5, %v993_v4  ;;  %v997_v19 = vadd.f32 1.0, %v4362_v5  ;;  %v4364_v25 = vpop.eup %4363  ;;  %v6442_v4 = vld [vmem:[#allocation3 + $0x1d8] sm:$0xff]  ;;  %v6445_v5 = vld [vmem:[#allocation3 + $0x1c0] sm:$0xff] }
 0x235   :  { %v4366_v39 = vpop.eup %4365 }
 0x236   :  { %v998_v21 = vmul.f32 0.5, %v997_v19  ;;  %v1005_v36 = vmul.f32 %v4364_v25, %v994_v10  ;;  %v1002_v46 = vadd.f32 1.0, %v4366_v39  ;;  %v6448_v10 = vld [vmem:[#allocation3 + $0x1d0] sm:$0xff]  ;;  %v6451_v19 = vld [vmem:[#allocation3 + $0x1a8] sm:$0xff]  ;;  %v6457_v25 = vld [vmem:[#allocation3 + $0x1a0] sm:$0xff] }
 0x237   :  { %v6469_v39 = vld [vmem:[#allocation3 + $0x180] sm:$0xff] }
 0x238   :  { %v1004_v34 = vmul.f32 0.0, %v998_v21  ;;  %v1003_v55 = vmul.f32 0.5, %v1002_v46  ;;  %v6454_v21 = vld [vmem:[#allocation3 + $0x1b8] sm:$0xff]  ;;  %v6493_v46 = vld [vmem:[#allocation3 + $0x140] sm:$0xff] }
 0x23a   :  { %v6414_v38 = vadd.f32 %v1005_v36, %v1004_v34  ;;  %v6460_v34 = vld [vmem:[#allocation3 + $0x1b0] sm:$0xff]  ;;  %v6463_v36 = vld [vmem:[#allocation3 + $0x188] sm:$0xff] }
 0x23c   :  { %4367 = vtanh.f32 %v6414_v38 }
 0x240   :  { %v1082_v0 = vpop.f32.mrf.mxu0  ;;  %v1153_v42 = vpop.f32.mrf.mxu1 }
 0x241   :  { %v1158_v41 = vadd.f32 %v1082_v0, %v10046_v9  ;;  %v1160_v50 = vadd.f32 %v1153_v42, %v10049_v48  ;;  %v6466_v0 = vld [vmem:[#allocation3 + $0x198] sm:$0xff]  ;;  %v6472_v9 = vld [vmem:[#allocation3 + $0x190] sm:$0xff]  ;;  %v6499_v48 = vld [vmem:[#allocation3 + $0x128] sm:$0xff] }
 0x242   :  { %v1084_v6 = vpop.f32.mrf.mxu0  ;;  %v1155_v56 = vpop.f32.mrf.mxu1  ;;  %v6478_v42 = vld [vmem:[#allocation3 + $0x178] sm:$0xff] }
 0x243   :  { %v1162_v43 = vadd.f32 %v1158_v41, %v10047_v12  ;;  %v1159_v45 = vadd.f32 %v1084_v6, %v10048_v44  ;;  %v1164_v59 = vadd.f32 %v1160_v50, %v6177_v22  ;;  %v1161_v62 = vadd.f32 %v1155_v56, %v10051_v61  ;;  %v6475_v41 = vld [vmem:[#allocation3 + $0x168] sm:$0xff]  ;;  %v6481_v6 = vld [vmem:[#allocation3 + $0x160] sm:$0xff]  ;;  %v6502_v50 = vld [vmem:[#allocation3 + $0x138] sm:$0xff] }
 0x244   :  { %v6487_v44 = vld [vmem:[#allocation3 + $0x148] sm:$0xff]  ;;  %v6514_v56 = vld [vmem:[#allocation3 + $0x118] sm:$0xff] }
 0x245   :  { %v1166_v47 = vmul.f32 0.5, %v1162_v43  ;;  %v1163_v53 = vadd.f32 %v1159_v45, %v10050_v51  ;;  %v1165_v63 = vadd.f32 %v1161_v62, %v6185_v20  ;;  %v6484_v43 = vld [vmem:[#allocation3 + $0x170] sm:$0xff]  ;;  %v6490_v45 = vld [vmem:[#allocation3 + $0x158] sm:$0xff]  ;;  %v6529_v62 = vld [vmem:[#allocation3 + $0xe0] sm:$0xff] }
 0x246   :  { %v6526_v61 = vld [vmem:[#allocation3 + $0xf8] sm:$0xff] }
 0x247   :  { %4369 = vtanh.f32 %v1166_v47  ;;  %v1170_v54 = vmul.f32 0.5, %v1163_v53  ;;  %v1175_v1 = vmul.f32 0.5, %v1165_v63  ;;  %v6496_v47 = vld [vmem:[#allocation3 + $0x150] sm:$0xff]  ;;  %v6505_v53 = vld [vmem:[#allocation3 + $0x120] sm:$0xff] }
 0x248   :  { %v6532_v63 = vld [vmem:[#allocation3 + $0xf0] sm:$0xff] }
 0x249   :  { %v4368_v57 = vpop.eup %4367  ;;  %4371 = vtanh.f32 %v1170_v54  ;;  %v6508_v54 = vld [vmem:[#allocation3 + $0x130] sm:$0xff] }
 0x24a   :  { %v1008_v60 = vmul.f32 %v4368_v57, %v1003_v55  ;;  %4373 = vtanh.f32 %v1164_v59  ;;  %v6511_v55 = vld [vmem:[#allocation3 + $0x108] sm:$0xff]  ;;  %v6517_v57 = vld [vmem:[#allocation3 + $0x100] sm:$0xff]  ;;  %v6520_v59 = vld [vmem:[#allocation3 + $0x110] sm:$0xff] }
 0x24b   :  { %4375 = vtanh.f32 %v1175_v1  ;;  %v6535_v1 = vld [vmem:[#allocation3 + $0xc8] sm:$0xff] }
 0x24c   :  { %1248 = vmatprep.mubr.f32.mxu0 %v1008_v60  ;;  %1319 = vmatprep.mubr.f32.mxu1 %v1008_v60  ;;  %v6523_v60 = vld [vmem:[#allocation3 + $0xe8] sm:$0xff] }
 0x254   :  { %v4370_v2 = vpop.eup %4369 }
 0x255   :  { %v1168_v3 = vadd.f32 1.0, %v4370_v2  ;;  %v6538_v2 = vld [vmem:[#allocation3 + $0xd8] sm:$0xff] }
 0x256   :  { %v4372_v29 = vpop.eup %4371 }
 0x257   :  { %v1169_v30 = vmul.f32 0.5, %v1168_v3  ;;  %v1172_v32 = vadd.f32 1.0, %v4372_v29  ;;  %v4374_v58 = vpop.eup %4373  ;;  %v6541_v3 = vld [vmem:[#allocation3 + $0xc0] sm:$0xff]  ;;  %v6544_v29 = vld [vmem:[#allocation3 + $0xd0] sm:$0xff] }
 0x258   :  { %v4376_v33 = vpop.eup %4375 }
 0x259   :  { %v1173_v40 = vmul.f32 0.5, %v1172_v32  ;;  %v1180_v24 = vmul.f32 %v4374_v58, %v1169_v30  ;;  %v1177_v14 = vadd.f32 1.0, %v4376_v33  ;;  %v6547_v30 = vld [vmem:[#allocation3 + $0xa8] sm:$0xff]  ;;  %v6550_v32 = vld [vmem:[#allocation3 + $0xb8] sm:$0xff]  ;;  %v6556_v58 = vld [vmem:[#allocation3 + $0xb0] sm:$0xff] }
 0x25a   :  { %10052 = vst [vmem:[#allocation36_spill] sm:$0xff] %v6550_v32  ;;  %10054 = vst [vmem:[#allocation38_spill] sm:$0xff] %v6556_v58  ;;  %v6565_v33 = vld [vmem:[#allocation3 + $0x80] sm:$0xff] }
 0x25b   :  { %v1179_v7 = vmul.f32 %v1173_v40, %v6188_v16  ;;  %v1178_v17 = vmul.f32 0.5, %v1177_v14  ;;  %v6436_v16 = vld [vmem:[#allocation3 + $0x1f0] sm:$0xff]  ;;  %v6553_v40 = vld [vmem:[#allocation3 + $0xa0] sm:$0xff]  ;;  %10057 = vst [vmem:[#allocation46_spill] sm:$0xff] %v6565_v33 }
 0x25c   :  { %10053 = vst [vmem:[#allocation41_spill] sm:$0xff] %v6553_v40  ;;  %v6568_v14 = vld [vmem:[#allocation3 + $0x90] sm:$0xff] }
 0x25d   :  { %v6426_v49 = vadd.f32 %v1180_v24, %v1179_v7  ;;  %v6559_v7 = vld [vmem:[#allocation3 + $0x88] sm:$0xff]  ;;  %v6562_v24 = vld [vmem:[#allocation3 + $0x98] sm:$0xff]  ;;  %10058 = vst [vmem:[#allocation42_spill] sm:$0xff] %v6568_v14 }
 0x25e   :  { %10055 = vst [vmem:[#allocation44_spill] sm:$0xff] %v6559_v7  ;;  %10056 = vst [vmem:[#allocation40_spill] sm:$0xff] %v6562_v24 }
 0x25f   :  { %4377 = vtanh.f32 %v6426_v49 }
 0x26c   :  { %v4378_v8 = vpop.eup %4377 }
 0x26d   :  { %v6429_v18 = vmul.f32 %v4378_v8, %v1178_v17  ;;  %v6571_v17 = vld [vmem:[#allocation3 + $0x68] sm:$0xff]  ;;  %v6574_v8 = vld [vmem:[#allocation3 + $0x78] sm:$0xff] }
 0x26e   :  { %10059 = vst [vmem:[#allocation48_spill] sm:$0xff] %v6571_v17  ;;  %10060 = vst [vmem:[#allocation45_spill] sm:$0xff] %v6574_v8 }
 0x26f   :  { %1249 = vmatmul.mubr.f32.vlgmr.msra.gmra.mxu0 %v6429_v18  ;;  %1320 = vmatmul.mubr.f32.vlgmr.msra.gmra.mxu1 %v6429_v18 }
 0x270   :  { %1352 = vmatpush1.msra.mxu0 %v6433_v11  ;;  %1423 = vmatpush1.msra.mxu1 %v6436_v16 }
 0x271   :  { %1353 = vmatprep.subr.mxu0 %v6439_v37  ;;  %1424 = vmatprep.subr.mxu1 %v6442_v4 }
 0x272   :  { %1354 = vmatpush1.msra.mxu0 %v6445_v5  ;;  %1425 = vmatpush1.msra.mxu1 %v6448_v10 }
 0x273   :  { %1355 = vmatprep.subr.mxu0 %v6451_v19  ;;  %1426 = vmatprep.subr.mxu1 %v6454_v21 }
 0x274   :  { %1356 = vmatpush1.msra.mxu0 %v6457_v25  ;;  %1427 = vmatpush1.msra.mxu1 %v6460_v34 }
 0x275   :  { %1357 = vmatprep.subr.mxu0 %v6463_v36  ;;  %1428 = vmatprep.subr.mxu1 %v6466_v0 }
 0x276   :  { %1358 = vmatpush1.msra.mxu0 %v6469_v39  ;;  %1429 = vmatpush1.msra.mxu1 %v6472_v9 }
 0x277   :  { %1359 = vmatprep.subr.mxu0 %v6475_v41  ;;  %1430 = vmatprep.subr.mxu1 %v6478_v42 }
 0x278   :  { %1360 = vmatpush1.msra.mxu0 %v6481_v6  ;;  %1431 = vmatpush1.msra.mxu1 %v6484_v43 }
 0x279   :  { %1361 = vmatprep.subr.mxu0 %v6487_v44  ;;  %1432 = vmatprep.subr.mxu1 %v6490_v45 }
 0x27a   :  { %1362 = vmatpush1.msra.mxu0 %v6493_v46  ;;  %1433 = vmatpush1.msra.mxu1 %v6496_v47 }
 0x27b   :  { %1363 = vmatprep.subr.mxu0 %v6499_v48  ;;  %1434 = vmatprep.subr.mxu1 %v6502_v50 }
 0x27c   :  { %1364 = vmatpush1.msra.mxu0 %v6505_v53  ;;  %1435 = vmatpush1.msra.mxu1 %v6508_v54 }
 0x27d   :  { %1365 = vmatprep.subr.mxu0 %v6511_v55  ;;  %1436 = vmatprep.subr.mxu1 %v6514_v56 }
 0x27e   :  { %1366 = vmatpush1.msra.mxu0 %v6517_v57  ;;  %1437 = vmatpush1.msra.mxu1 %v6520_v59 }
 0x27f   :  { %1367 = vmatprep.subr.mxu0 %v6523_v60  ;;  %1438 = vmatprep.subr.mxu1 %v6526_v61 }
 0x280   :  { %1368 = vmatpush1.msra.mxu0 %v6529_v62  ;;  %1439 = vmatpush1.msra.mxu1 %v6532_v63 }
 0x281   :  { %1369 = vmatprep.subr.mxu0 %v6535_v1  ;;  %1440 = vmatprep.subr.mxu1 %v6538_v2 }
 0x282   :  { %1370 = vmatpush1.msra.mxu0 %v6541_v3  ;;  %1441 = vmatpush1.msra.mxu1 %v6544_v29 }
 0x283   :  { %1371 = vmatprep.subr.mxu0 %v6547_v30  ;;  %1442 = vmatprep.subr.mxu1 %v6550_v32 }
 0x284   :  { %1372 = vmatpush1.msra.mxu0 %v6553_v40  ;;  %1443 = vmatpush1.msra.mxu1 %v6556_v58 }
 0x285   :  { %1373 = vmatprep.subr.mxu0 %v6559_v7  ;;  %1444 = vmatprep.subr.mxu1 %v6562_v24 }
 0x286   :  { %1374 = vmatpush1.msra.mxu0 %v6565_v33  ;;  %1445 = vmatpush1.msra.mxu1 %v6568_v14  ;;  %v6583_v33 = vld [vmem:[#allocation3 + $0x48] sm:$0xff]  ;;  %v6586_v14 = vld [vmem:[#allocation3 + $0x58] sm:$0xff] }
 0x287   :  { %1375 = vmatprep.subr.mxu0 %v6571_v17  ;;  %1446 = vmatprep.subr.mxu1 %v6574_v8  ;;  %10063 = vst [vmem:[#allocation52_spill] sm:$0xff] %v6583_v33  ;;  %10064 = vst [vmem:[#allocation49_spill] sm:$0xff] %v6586_v14  ;;  %v6589_v17 = vld [vmem:[#allocation3 + $0x40] sm:$0xff]  ;;  %v6592_v8 = vld [vmem:[#allocation3 + $0x50] sm:$0xff] }
 0x288   :  { %1376 = vmatpush1.msra.mxu0 %v6577_v15  ;;  %1447 = vmatpush1.msra.mxu1 %v6580_v13  ;;  %10065 = vst [vmem:[#allocation53_spill] sm:$0xff] %v6589_v17  ;;  %10066 = vst [vmem:[#allocation51_spill] sm:$0xff] %v6592_v8  ;;  %v6595_v15 = vld [vmem:[#allocation3 + $0x28] sm:$0xff]  ;;  %v6598_v13 = vld [vmem:[#allocation3 + $0x38] sm:$0xff] }
 0x289   :  { %1377 = vmatprep.subr.mxu0 %v6583_v33  ;;  %1448 = vmatprep.subr.mxu1 %v6586_v14  ;;  %10067 = vst [vmem:[#allocation54_spill] sm:$0xff] %v6595_v15  ;;  %10068 = vst [vmem:[#allocation55_spill] sm:$0xff] %v6598_v13  ;;  %v6601_v33 = vld [vmem:[#allocation3 + $0x20] sm:$0xff]  ;;  %v6604_v14 = vld [vmem:[#allocation3 + $0x30] sm:$0xff] }
 0x28a   :  { %1378 = vmatpush1.msra.mxu0 %v6589_v17  ;;  %1449 = vmatpush1.msra.mxu1 %v6592_v8  ;;  %10069 = vst [vmem:[#allocation56_spill] sm:$0xff] %v6601_v33  ;;  %10070 = vst [vmem:[#allocation57_spill] sm:$0xff] %v6604_v14  ;;  %v6607_v17 = vld [vmem:[#allocation3 + $0x8] sm:$0xff]  ;;  %v6610_v8 = vld [vmem:[#allocation3 + $0x18] sm:$0xff] }
 0x28b   :  { %1379 = vmatprep.subr.mxu0 %v6595_v15  ;;  %1450 = vmatprep.subr.mxu1 %v6598_v13  ;;  %10071 = vst [vmem:[#allocation58_spill] sm:$0xff] %v6607_v17  ;;  %10072 = vst [vmem:[#allocation59_spill] sm:$0xff] %v6610_v8  ;;  %v6613_v15 = vld [vmem:[#allocation3] sm:$0xff]  ;;  %v6617_v13 = vld [vmem:[#allocation3 + $0x10] sm:$0xff] }
 0x28c   :  { %1380 = vmatpush1.msra.mxu0 %v6601_v33  ;;  %1451 = vmatpush1.msra.mxu1 %v6604_v14  ;;  %10073 = vst [vmem:[#allocation60_spill] sm:$0xff] %v6613_v15  ;;  %10074 = vst [vmem:[#allocation61_spill] sm:$0xff] %v6617_v13  ;;  %v6632_v14 = vld [vmem:[#allocation5 + $0x1f0] sm:$0xff] }
 0x28d   :  { %1381 = vmatprep.subr.mxu0 %v6607_v17  ;;  %1452 = vmatprep.subr.mxu1 %v6610_v8  ;;  %v6623_v17 = vld [vmem:[#allocation5 + $0x1e8] sm:$0xff]  ;;  %v6626_v8 = vld [vmem:[#allocation5 + $0x1f8] sm:$0xff]  ;;  %10078 = vst [vmem:[#allocation65_spill] sm:$0xff] %v6632_v14 }
 0x28e   :  { %1382 = vmatpush1.msra.mxu0 %v6613_v15  ;;  %1415 = vmatprep.mubr.f32.mxu0 %v9910_v52  ;;  %10075 = vst [vmem:[#allocation62_spill] sm:$0xff] %v6623_v17  ;;  %10076 = vst [vmem:[#allocation63_spill] sm:$0xff] %v6626_v8  ;;  %v6629_v15 = vld [vmem:[#allocation5 + $0x1e0] sm:$0xff] }
 0x28f   :  { %1453 = vmatpush1.msra.mxu1 %v6617_v13  ;;  %1486 = vmatprep.mubr.f32.mxu1 %v9910_v52  ;;  %10077 = vst [vmem:[#allocation64_spill] sm:$0xff] %v6629_v15  ;;  %v6635_v13 = vld [vmem:[#allocation5 + $0x1c8] sm:$0xff] }
 0x290   :  { %1416 = vmatmul.mubr.f32.vlgmr.msra.gmra.mxu0 %v6429_v18  ;;  %1487 = vmatmul.mubr.f32.vlgmr.msra.gmra.mxu1 %v6429_v18  ;;  %10079 = vst [vmem:[#allocation66_spill] sm:$0xff] %v6635_v13  ;;  %v6638_v18 = vld [vmem:[#allocation5 + $0x1d8] sm:$0xff] }
 0x291   :  { %1519 = vmatprep.subr.mxu0 %v6623_v17  ;;  %1590 = vmatprep.subr.mxu1 %v6626_v8  ;;  %10080 = vst [vmem:[#allocation67_spill] sm:$0xff] %v6638_v18  ;;  %v6641_v17 = vld [vmem:[#allocation5 + $0x1c0] sm:$0xff]  ;;  %v6644_v8 = vld [vmem:[#allocation5 + $0x1d0] sm:$0xff] }
 0x292   :  { %1520 = vmatpush1.msra.mxu0 %v6629_v15  ;;  %1591 = vmatpush1.msra.mxu1 %v6632_v14  ;;  %10081 = vst [vmem:[#allocation68_spill] sm:$0xff] %v6641_v17  ;;  %10082 = vst [vmem:[#allocation69_spill] sm:$0xff] %v6644_v8  ;;  %v6647_v15 = vld [vmem:[#allocation5 + $0x1a8] sm:$0xff]  ;;  %v6650_v14 = vld [vmem:[#allocation5 + $0x1b8] sm:$0xff] }
 0x293   :  { %1521 = vmatprep.subr.mxu0 %v6635_v13  ;;  %1592 = vmatprep.subr.mxu1 %v6638_v18  ;;  %10083 = vst [vmem:[#allocation70_spill] sm:$0xff] %v6647_v15  ;;  %10084 = vst [vmem:[#allocation71_spill] sm:$0xff] %v6650_v14  ;;  %v6653_v13 = vld [vmem:[#allocation5 + $0x1a0] sm:$0xff]  ;;  %v6656_v18 = vld [vmem:[#allocation5 + $0x1b0] sm:$0xff] }
 0x294   :  { %1522 = vmatpush1.msra.mxu0 %v6641_v17  ;;  %1593 = vmatpush1.msra.mxu1 %v6644_v8  ;;  %10085 = vst [vmem:[#allocation72_spill] sm:$0xff] %v6653_v13  ;;  %10086 = vst [vmem:[#allocation73_spill] sm:$0xff] %v6656_v18  ;;  %v6659_v17 = vld [vmem:[#allocation5 + $0x188] sm:$0xff]  ;;  %v6662_v8 = vld [vmem:[#allocation5 + $0x198] sm:$0xff] }
 0x295   :  { %1523 = vmatprep.subr.mxu0 %v6647_v15  ;;  %1594 = vmatprep.subr.mxu1 %v6650_v14  ;;  %10087 = vst [vmem:[#allocation74_spill] sm:$0xff] %v6659_v17  ;;  %10088 = vst [vmem:[#allocation75_spill] sm:$0xff] %v6662_v8  ;;  %v6665_v15 = vld [vmem:[#allocation5 + $0x180] sm:$0xff]  ;;  %v6668_v14 = vld [vmem:[#allocation5 + $0x190] sm:$0xff] }
 0x296   :  { %1524 = vmatpush1.msra.mxu0 %v6653_v13  ;;  %1595 = vmatpush1.msra.mxu1 %v6656_v18  ;;  %10089 = vst [vmem:[#allocation76_spill] sm:$0xff] %v6665_v15  ;;  %10090 = vst [vmem:[#allocation77_spill] sm:$0xff] %v6668_v14  ;;  %v6671_v13 = vld [vmem:[#allocation5 + $0x168] sm:$0xff]  ;;  %v6674_v18 = vld [vmem:[#allocation5 + $0x178] sm:$0xff] }
 0x297   :  { %1525 = vmatprep.subr.mxu0 %v6659_v17  ;;  %1596 = vmatprep.subr.mxu1 %v6662_v8  ;;  %10091 = vst [vmem:[#allocation78_spill] sm:$0xff] %v6671_v13  ;;  %10092 = vst [vmem:[#allocation79_spill] sm:$0xff] %v6674_v18  ;;  %v6677_v17 = vld [vmem:[#allocation5 + $0x160] sm:$0xff]  ;;  %v6680_v8 = vld [vmem:[#allocation5 + $0x170] sm:$0xff] }
 0x298   :  { %1526 = vmatpush1.msra.mxu0 %v6665_v15  ;;  %1597 = vmatpush1.msra.mxu1 %v6668_v14  ;;  %10093 = vst [vmem:[#allocation80_spill] sm:$0xff] %v6677_v17  ;;  %10094 = vst [vmem:[#allocation81_spill] sm:$0xff] %v6680_v8  ;;  %v6683_v15 = vld [vmem:[#allocation5 + $0x148] sm:$0xff]  ;;  %v6686_v14 = vld [vmem:[#allocation5 + $0x158] sm:$0xff] }
 0x299   :  { %1527 = vmatprep.subr.mxu0 %v6671_v13  ;;  %1598 = vmatprep.subr.mxu1 %v6674_v18  ;;  %10095 = vst [vmem:[#allocation82_spill] sm:$0xff] %v6683_v15  ;;  %10096 = vst [vmem:[#allocation83_spill] sm:$0xff] %v6686_v14  ;;  %v6689_v13 = vld [vmem:[#allocation5 + $0x140] sm:$0xff]  ;;  %v6692_v18 = vld [vmem:[#allocation5 + $0x150] sm:$0xff] }
 0x29a   :  { %1528 = vmatpush1.msra.mxu0 %v6677_v17  ;;  %1599 = vmatpush1.msra.mxu1 %v6680_v8  ;;  %10097 = vst [vmem:[#allocation84_spill] sm:$0xff] %v6689_v13  ;;  %10098 = vst [vmem:[#allocation85_spill] sm:$0xff] %v6692_v18  ;;  %v6695_v17 = vld [vmem:[#allocation5 + $0x128] sm:$0xff]  ;;  %v6698_v8 = vld [vmem:[#allocation5 + $0x138] sm:$0xff] }
 0x29b   :  { %1529 = vmatprep.subr.mxu0 %v6683_v15  ;;  %1600 = vmatprep.subr.mxu1 %v6686_v14  ;;  %10099 = vst [vmem:[#allocation86_spill] sm:$0xff] %v6695_v17  ;;  %10100 = vst [vmem:[#allocation87_spill] sm:$0xff] %v6698_v8  ;;  %v6701_v15 = vld [vmem:[#allocation5 + $0x120] sm:$0xff]  ;;  %v6704_v14 = vld [vmem:[#allocation5 + $0x130] sm:$0xff] }
 0x29c   :  { %1530 = vmatpush1.msra.mxu0 %v6689_v13  ;;  %1601 = vmatpush1.msra.mxu1 %v6692_v18  ;;  %10101 = vst [vmem:[#allocation88_spill] sm:$0xff] %v6701_v15  ;;  %10102 = vst [vmem:[#allocation89_spill] sm:$0xff] %v6704_v14  ;;  %v6707_v13 = vld [vmem:[#allocation5 + $0x108] sm:$0xff]  ;;  %v6710_v18 = vld [vmem:[#allocation5 + $0x118] sm:$0xff] }
 0x29d   :  { %1531 = vmatprep.subr.mxu0 %v6695_v17  ;;  %1602 = vmatprep.subr.mxu1 %v6698_v8  ;;  %10103 = vst [vmem:[#allocation90_spill] sm:$0xff] %v6707_v13  ;;  %10104 = vst [vmem:[#allocation91_spill] sm:$0xff] %v6710_v18  ;;  %v6713_v17 = vld [vmem:[#allocation5 + $0x100] sm:$0xff]  ;;  %v6716_v8 = vld [vmem:[#allocation5 + $0x110] sm:$0xff] }
 0x29e   :  { %1532 = vmatpush1.msra.mxu0 %v6701_v15  ;;  %1603 = vmatpush1.msra.mxu1 %v6704_v14  ;;  %10105 = vst [vmem:[#allocation92_spill] sm:$0xff] %v6713_v17  ;;  %10106 = vst [vmem:[#allocation93_spill] sm:$0xff] %v6716_v8  ;;  %v6719_v15 = vld [vmem:[#allocation5 + $0xe8] sm:$0xff]  ;;  %v6722_v14 = vld [vmem:[#allocation5 + $0xf8] sm:$0xff] }
 0x29f   :  { %1533 = vmatprep.subr.mxu0 %v6707_v13  ;;  %1604 = vmatprep.subr.mxu1 %v6710_v18  ;;  %10107 = vst [vmem:[#allocation94_spill] sm:$0xff] %v6719_v15  ;;  %10108 = vst [vmem:[#allocation95_spill] sm:$0xff] %v6722_v14  ;;  %v6725_v13 = vld [vmem:[#allocation5 + $0xe0] sm:$0xff]  ;;  %v6728_v18 = vld [vmem:[#allocation5 + $0xf0] sm:$0xff] }
 0x2a0   :  { %1534 = vmatpush1.msra.mxu0 %v6713_v17  ;;  %1605 = vmatpush1.msra.mxu1 %v6716_v8  ;;  %10109 = vst [vmem:[#allocation96_spill] sm:$0xff] %v6725_v13  ;;  %10110 = vst [vmem:[#allocation97_spill] sm:$0xff] %v6728_v18  ;;  %v6731_v17 = vld [vmem:[#allocation5 + $0xc8] sm:$0xff]  ;;  %v6734_v8 = vld [vmem:[#allocation5 + $0xd8] sm:$0xff] }
 0x2a1   :  { %1535 = vmatprep.subr.mxu0 %v6719_v15  ;;  %1606 = vmatprep.subr.mxu1 %v6722_v14  ;;  %10111 = vst [vmem:[#allocation98_spill] sm:$0xff] %v6731_v17  ;;  %10112 = vst [vmem:[#allocation99_spill] sm:$0xff] %v6734_v8  ;;  %v6737_v15 = vld [vmem:[#allocation5 + $0xc0] sm:$0xff]  ;;  %v6740_v14 = vld [vmem:[#allocation5 + $0xd0] sm:$0xff] }
 0x2a2   :  { %1536 = vmatpush1.msra.mxu0 %v6725_v13  ;;  %1607 = vmatpush1.msra.mxu1 %v6728_v18  ;;  %10113 = vst [vmem:[#allocation100_spill] sm:$0xff] %v6737_v15  ;;  %10114 = vst [vmem:[#allocation101_spill] sm:$0xff] %v6740_v14  ;;  %v6743_v13 = vld [vmem:[#allocation5 + $0xa8] sm:$0xff]  ;;  %v6746_v18 = vld [vmem:[#allocation5 + $0xb8] sm:$0xff] }
 0x2a3   :  { %1537 = vmatprep.subr.mxu0 %v6731_v17  ;;  %1608 = vmatprep.subr.mxu1 %v6734_v8  ;;  %10115 = vst [vmem:[#allocation102_spill] sm:$0xff] %v6743_v13  ;;  %10116 = vst [vmem:[#allocation103_spill] sm:$0xff] %v6746_v18  ;;  %v6749_v17 = vld [vmem:[#allocation5 + $0xa0] sm:$0xff]  ;;  %v6752_v8 = vld [vmem:[#allocation5 + $0xb0] sm:$0xff] }
 0x2a4   :  { %1538 = vmatpush1.msra.mxu0 %v6737_v15  ;;  %1609 = vmatpush1.msra.mxu1 %v6740_v14  ;;  %10117 = vst [vmem:[#allocation104_spill] sm:$0xff] %v6749_v17  ;;  %10118 = vst [vmem:[#allocation105_spill] sm:$0xff] %v6752_v8  ;;  %v6755_v15 = vld [vmem:[#allocation5 + $0x88] sm:$0xff]  ;;  %v6758_v14 = vld [vmem:[#allocation5 + $0x98] sm:$0xff] }
 0x2a5   :  { %1539 = vmatprep.subr.mxu0 %v6743_v13  ;;  %1610 = vmatprep.subr.mxu1 %v6746_v18  ;;  %10119 = vst [vmem:[#allocation106_spill] sm:$0xff] %v6755_v15  ;;  %10120 = vst [vmem:[#allocation107_spill] sm:$0xff] %v6758_v14  ;;  %v6761_v13 = vld [vmem:[#allocation5 + $0x80] sm:$0xff]  ;;  %v6764_v18 = vld [vmem:[#allocation5 + $0x90] sm:$0xff] }
 0x2a6   :  { %1540 = vmatpush1.msra.mxu0 %v6749_v17  ;;  %1611 = vmatpush1.msra.mxu1 %v6752_v8  ;;  %10121 = vst [vmem:[#allocation108_spill] sm:$0xff] %v6761_v13  ;;  %10122 = vst [vmem:[#allocation109_spill] sm:$0xff] %v6764_v18  ;;  %v6767_v17 = vld [vmem:[#allocation5 + $0x68] sm:$0xff]  ;;  %v6770_v8 = vld [vmem:[#allocation5 + $0x78] sm:$0xff] }
 0x2a7   :  { %1541 = vmatprep.subr.mxu0 %v6755_v15  ;;  %1612 = vmatprep.subr.mxu1 %v6758_v14  ;;  %10123 = vst [vmem:[#allocation110_spill] sm:$0xff] %v6767_v17  ;;  %10124 = vst [vmem:[#allocation111_spill] sm:$0xff] %v6770_v8  ;;  %v6773_v15 = vld [vmem:[#allocation5 + $0x60] sm:$0xff]  ;;  %v6776_v14 = vld [vmem:[#allocation5 + $0x70] sm:$0xff] }
 0x2a8   :  { %1542 = vmatpush1.msra.mxu0 %v6761_v13  ;;  %1613 = vmatpush1.msra.mxu1 %v6764_v18  ;;  %10125 = vst [vmem:[#allocation112_spill] sm:$0xff] %v6773_v15  ;;  %10126 = vst [vmem:[#allocation113_spill] sm:$0xff] %v6776_v14  ;;  %v6779_v13 = vld [vmem:[#allocation5 + $0x48] sm:$0xff]  ;;  %v6782_v18 = vld [vmem:[#allocation5 + $0x58] sm:$0xff] }
 0x2a9   :  { %1543 = vmatprep.subr.mxu0 %v6767_v17  ;;  %1614 = vmatprep.subr.mxu1 %v6770_v8  ;;  %10127 = vst [vmem:[#allocation114_spill] sm:$0xff] %v6779_v13  ;;  %10128 = vst [vmem:[#allocation115_spill] sm:$0xff] %v6782_v18  ;;  %v6785_v17 = vld [vmem:[#allocation5 + $0x40] sm:$0xff]  ;;  %v6788_v8 = vld [vmem:[#allocation5 + $0x50] sm:$0xff] }
 0x2aa   :  { %1544 = vmatpush1.msra.mxu0 %v6773_v15  ;;  %1615 = vmatpush1.msra.mxu1 %v6776_v14  ;;  %10129 = vst [vmem:[#allocation116_spill] sm:$0xff] %v6785_v17  ;;  %10130 = vst [vmem:[#allocation117_spill] sm:$0xff] %v6788_v8  ;;  %v6791_v15 = vld [vmem:[#allocation5 + $0x28] sm:$0xff]  ;;  %v6794_v14 = vld [vmem:[#allocation5 + $0x38] sm:$0xff] }
 0x2ab   :  { %1545 = vmatprep.subr.mxu0 %v6779_v13  ;;  %1616 = vmatprep.subr.mxu1 %v6782_v18  ;;  %10131 = vst [vmem:[#allocation118_spill] sm:$0xff] %v6791_v15  ;;  %10132 = vst [vmem:[#allocation119_spill] sm:$0xff] %v6794_v14  ;;  %v6797_v13 = vld [vmem:[#allocation5 + $0x20] sm:$0xff]  ;;  %v6800_v18 = vld [vmem:[#allocation5 + $0x30] sm:$0xff] }
 0x2ac   :  { %1546 = vmatpush1.msra.mxu0 %v6785_v17  ;;  %1617 = vmatpush1.msra.mxu1 %v6788_v8  ;;  %10133 = vst [vmem:[#allocation120_spill] sm:$0xff] %v6797_v13  ;;  %10134 = vst [vmem:[#allocation121_spill] sm:$0xff] %v6800_v18  ;;  %v6803_v17 = vld [vmem:[#allocation5 + $0x8] sm:$0xff]  ;;  %v6806_v8 = vld [vmem:[#allocation5 + $0x18] sm:$0xff] }
 0x2ad   :  { %1547 = vmatprep.subr.mxu0 %v6791_v15  ;;  %1618 = vmatprep.subr.mxu1 %v6794_v14  ;;  %10135 = vst [vmem:[#allocation122_spill] sm:$0xff] %v6803_v17  ;;  %10136 = vst [vmem:[#allocation123_spill] sm:$0xff] %v6806_v8  ;;  %v6809_v15 = vld [vmem:[#allocation5] sm:$0xff]  ;;  %v6812_v14 = vld [vmem:[#allocation5 + $0x10] sm:$0xff] }
 0x2ae   :  { %1548 = vmatpush1.msra.mxu0 %v6797_v13  ;;  %1619 = vmatpush1.msra.mxu1 %v6800_v18  ;;  %10137 = vst [vmem:[#allocation124_spill] sm:$0xff] %v6809_v15  ;;  %10138 = vst [vmem:[#allocation125_spill] sm:$0xff] %v6812_v14  ;;  %v6815_v13 = vld [vmem:[#allocation5 + $0x3e8] sm:$0xff]  ;;  %v6818_v18 = vld [vmem:[#allocation5 + $0x3f8] sm:$0xff] }
 0x2af   :  { %1549 = vmatprep.subr.mxu0 %v6803_v17  ;;  %1620 = vmatprep.subr.mxu1 %v6806_v8  ;;  %10139 = vst [vmem:[#allocation126_spill] sm:$0xff] %v6815_v13  ;;  %10140 = vst [vmem:[#allocation127_spill] sm:$0xff] %v6818_v18  ;;  %v6821_v17 = vld [vmem:[#allocation5 + $0x3e0] sm:$0xff]  ;;  %v6824_v8 = vld [vmem:[#allocation5 + $0x3f0] sm:$0xff] }
 0x2b0   :  { %1550 = vmatpush1.msra.mxu0 %v6809_v15  ;;  %1621 = vmatpush1.msra.mxu1 %v6812_v14  ;;  %10141 = vst [vmem:[#allocation128_spill] sm:$0xff] %v6821_v17  ;;  %10142 = vst [vmem:[#allocation129_spill] sm:$0xff] %v6824_v8  ;;  %v6827_v15 = vld [vmem:[#allocation5 + $0x3c8] sm:$0xff]  ;;  %v6830_v14 = vld [vmem:[#allocation5 + $0x3d8] sm:$0xff] }
 0x2b1   :  { %1551 = vmatprep.subr.mxu0 %v6815_v13  ;;  %1622 = vmatprep.subr.mxu1 %v6818_v18  ;;  %10143 = vst [vmem:[#allocation130_spill] sm:$0xff] %v6827_v15  ;;  %10144 = vst [vmem:[#allocation131_spill] sm:$0xff] %v6830_v14  ;;  %v6833_v13 = vld [vmem:[#allocation5 + $0x3c0] sm:$0xff]  ;;  %v6836_v18 = vld [vmem:[#allocation5 + $0x3d0] sm:$0xff] }
 0x2b2   :  { %1552 = vmatpush2.msra.mxu0 %v6821_v17  ;;  %1623 = vmatpush2.msra.mxu1 %v6824_v8  ;;  %10145 = vst [vmem:[#allocation132_spill] sm:$0xff] %v6833_v13  ;;  %10146 = vst [vmem:[#allocation133_spill] sm:$0xff] %v6836_v18  ;;  %v6839_v17 = vld [vmem:[#allocation5 + $0x3a8] sm:$0xff]  ;;  %v6842_v8 = vld [vmem:[#allocation5 + $0x3b8] sm:$0xff] }
 0x2b3   :  { %1553 = vmatprep.subr.mxu0 %v6827_v15  ;;  %1624 = vmatprep.subr.mxu1 %v6830_v14  ;;  %10147 = vst [vmem:[#allocation134_spill] sm:$0xff] %v6839_v17  ;;  %10148 = vst [vmem:[#allocation135_spill] sm:$0xff] %v6842_v8  ;;  %v6845_v15 = vld [vmem:[#allocation5 + $0x3a0] sm:$0xff]  ;;  %v6848_v14 = vld [vmem:[#allocation5 + $0x3b0] sm:$0xff] }
 0x2b4   :  { %1554 = vmatpush2.msra.mxu0 %v6833_v13  ;;  %1625 = vmatpush2.msra.mxu1 %v6836_v18  ;;  %10149 = vst [vmem:[#allocation136_spill] sm:$0xff] %v6845_v15  ;;  %10150 = vst [vmem:[#allocation137_spill] sm:$0xff] %v6848_v14  ;;  %v6851_v13 = vld [vmem:[#allocation5 + $0x388] sm:$0xff]  ;;  %v6854_v18 = vld [vmem:[#allocation5 + $0x398] sm:$0xff] }
 0x2b5   :  { %1555 = vmatprep.subr.mxu0 %v6839_v17  ;;  %1626 = vmatprep.subr.mxu1 %v6842_v8  ;;  %10151 = vst [vmem:[#allocation138_spill] sm:$0xff] %v6851_v13  ;;  %10152 = vst [vmem:[#allocation139_spill] sm:$0xff] %v6854_v18  ;;  %v6857_v17 = vld [vmem:[#allocation5 + $0x380] sm:$0xff]  ;;  %v6860_v8 = vld [vmem:[#allocation5 + $0x390] sm:$0xff] }
 0x2b6   :  { %1556 = vmatpush2.msra.mxu0 %v6845_v15  ;;  %1627 = vmatpush2.msra.mxu1 %v6848_v14  ;;  %10153 = vst [vmem:[#allocation140_spill] sm:$0xff] %v6857_v17  ;;  %10154 = vst [vmem:[#allocation141_spill] sm:$0xff] %v6860_v8  ;;  %v6863_v15 = vld [vmem:[#allocation5 + $0x368] sm:$0xff]  ;;  %v6866_v14 = vld [vmem:[#allocation5 + $0x378] sm:$0xff] }
 0x2b7   :  { %1557 = vmatprep.subr.mxu0 %v6851_v13  ;;  %1628 = vmatprep.subr.mxu1 %v6854_v18  ;;  %10155 = vst [vmem:[#allocation142_spill] sm:$0xff] %v6863_v15  ;;  %10156 = vst [vmem:[#allocation143_spill] sm:$0xff] %v6866_v14  ;;  %v6869_v13 = vld [vmem:[#allocation5 + $0x360] sm:$0xff]  ;;  %v6872_v18 = vld [vmem:[#allocation5 + $0x370] sm:$0xff] }
 0x2b8   :  { %1558 = vmatpush2.msra.mxu0 %v6857_v17  ;;  %1629 = vmatpush2.msra.mxu1 %v6860_v8  ;;  %10157 = vst [vmem:[#allocation144_spill] sm:$0xff] %v6869_v13  ;;  %10158 = vst [vmem:[#allocation145_spill] sm:$0xff] %v6872_v18  ;;  %v6875_v17 = vld [vmem:[#allocation5 + $0x348] sm:$0xff]  ;;  %v6878_v8 = vld [vmem:[#allocation5 + $0x358] sm:$0xff] }
 0x2b9   :  { %1559 = vmatprep.subr.mxu0 %v6863_v15  ;;  %1630 = vmatprep.subr.mxu1 %v6866_v14  ;;  %10159 = vst [vmem:[#allocation146_spill] sm:$0xff] %v6875_v17  ;;  %10160 = vst [vmem:[#allocation147_spill] sm:$0xff] %v6878_v8  ;;  %v6881_v15 = vld [vmem:[#allocation5 + $0x340] sm:$0xff]  ;;  %v6884_v14 = vld [vmem:[#allocation5 + $0x350] sm:$0xff] }
 0x2ba   :  { %1560 = vmatpush2.msra.mxu0 %v6869_v13  ;;  %1631 = vmatpush2.msra.mxu1 %v6872_v18  ;;  %10161 = vst [vmem:[#allocation148_spill] sm:$0xff] %v6881_v15  ;;  %10162 = vst [vmem:[#allocation149_spill] sm:$0xff] %v6884_v14  ;;  %v6887_v13 = vld [vmem:[#allocation5 + $0x328] sm:$0xff]  ;;  %v6890_v18 = vld [vmem:[#allocation5 + $0x338] sm:$0xff] }
 0x2bb   :  { %1561 = vmatprep.subr.mxu0 %v6875_v17  ;;  %1632 = vmatprep.subr.mxu1 %v6878_v8  ;;  %10163 = vst [vmem:[#allocation150_spill] sm:$0xff] %v6887_v13  ;;  %10164 = vst [vmem:[#allocation151_spill] sm:$0xff] %v6890_v18  ;;  %v6893_v17 = vld [vmem:[#allocation5 + $0x320] sm:$0xff]  ;;  %v6896_v8 = vld [vmem:[#allocation5 + $0x330] sm:$0xff] }
 0x2bc   :  { %1562 = vmatpush2.msra.mxu0 %v6881_v15  ;;  %1633 = vmatpush2.msra.mxu1 %v6884_v14  ;;  %10165 = vst [vmem:[#allocation152_spill] sm:$0xff] %v6893_v17  ;;  %10166 = vst [vmem:[#allocation153_spill] sm:$0xff] %v6896_v8  ;;  %v6899_v15 = vld [vmem:[#allocation5 + $0x308] sm:$0xff]  ;;  %v6902_v14 = vld [vmem:[#allocation5 + $0x318] sm:$0xff] }
 0x2bd   :  { %1563 = vmatprep.subr.mxu0 %v6887_v13  ;;  %1634 = vmatprep.subr.mxu1 %v6890_v18  ;;  %10167 = vst [vmem:[#allocation154_spill] sm:$0xff] %v6899_v15  ;;  %10168 = vst [vmem:[#allocation155_spill] sm:$0xff] %v6902_v14  ;;  %v6905_v13 = vld [vmem:[#allocation5 + $0x300] sm:$0xff]  ;;  %v6908_v18 = vld [vmem:[#allocation5 + $0x310] sm:$0xff] }
 0x2be   :  { %1564 = vmatpush2.msra.mxu0 %v6893_v17  ;;  %1635 = vmatpush2.msra.mxu1 %v6896_v8  ;;  %10169 = vst [vmem:[#allocation156_spill] sm:$0xff] %v6905_v13  ;;  %10170 = vst [vmem:[#allocation157_spill] sm:$0xff] %v6908_v18  ;;  %v6911_v17 = vld [vmem:[#allocation5 + $0x2e8] sm:$0xff]  ;;  %v6914_v8 = vld [vmem:[#allocation5 + $0x2f8] sm:$0xff] }
 0x2bf   :  { %1565 = vmatprep.subr.mxu0 %v6899_v15  ;;  %1636 = vmatprep.subr.mxu1 %v6902_v14  ;;  %10171 = vst [vmem:[#allocation158_spill] sm:$0xff] %v6911_v17  ;;  %10172 = vst [vmem:[#allocation159_spill] sm:$0xff] %v6914_v8  ;;  %v6917_v15 = vld [vmem:[#allocation5 + $0x2e0] sm:$0xff]  ;;  %v6920_v14 = vld [vmem:[#allocation5 + $0x2f0] sm:$0xff] }
 0x2c0   :  { %1566 = vmatpush2.msra.mxu0 %v6905_v13  ;;  %1637 = vmatpush2.msra.mxu1 %v6908_v18  ;;  %10173 = vst [vmem:[#allocation160_spill] sm:$0xff] %v6917_v15  ;;  %10174 = vst [vmem:[#allocation161_spill] sm:$0xff] %v6920_v14  ;;  %v6923_v13 = vld [vmem:[#allocation5 + $0x2c8] sm:$0xff]  ;;  %v6926_v18 = vld [vmem:[#allocation5 + $0x2d8] sm:$0xff] }
 0x2c1   :  { %1567 = vmatprep.subr.mxu0 %v6911_v17  ;;  %1638 = vmatprep.subr.mxu1 %v6914_v8  ;;  %10175 = vst [vmem:[#allocation162_spill] sm:$0xff] %v6923_v13  ;;  %10176 = vst [vmem:[#allocation163_spill] sm:$0xff] %v6926_v18  ;;  %v6929_v17 = vld [vmem:[#allocation5 + $0x2c0] sm:$0xff]  ;;  %v6932_v8 = vld [vmem:[#allocation5 + $0x2d0] sm:$0xff] }
 0x2c2   :  { %1568 = vmatpush2.msra.mxu0 %v6917_v15  ;;  %1639 = vmatpush2.msra.mxu1 %v6920_v14  ;;  %10177 = vst [vmem:[#allocation164_spill] sm:$0xff] %v6929_v17  ;;  %10178 = vst [vmem:[#allocation165_spill] sm:$0xff] %v6932_v8  ;;  %v6935_v15 = vld [vmem:[#allocation5 + $0x2a8] sm:$0xff]  ;;  %v6938_v14 = vld [vmem:[#allocation5 + $0x2b8] sm:$0xff] }
 0x2c3   :  { %1569 = vmatprep.subr.mxu0 %v6923_v13  ;;  %1640 = vmatprep.subr.mxu1 %v6926_v18  ;;  %10179 = vst [vmem:[#allocation166_spill] sm:$0xff] %v6935_v15  ;;  %10180 = vst [vmem:[#allocation167_spill] sm:$0xff] %v6938_v14  ;;  %v6941_v13 = vld [vmem:[#allocation5 + $0x2a0] sm:$0xff]  ;;  %v6944_v18 = vld [vmem:[#allocation5 + $0x2b0] sm:$0xff] }
 0x2c4   :  { %1570 = vmatpush2.msra.mxu0 %v6929_v17  ;;  %1641 = vmatpush2.msra.mxu1 %v6932_v8  ;;  %10181 = vst [vmem:[#allocation168_spill] sm:$0xff] %v6941_v13  ;;  %10182 = vst [vmem:[#allocation169_spill] sm:$0xff] %v6944_v18  ;;  %v6947_v17 = vld [vmem:[#allocation5 + $0x288] sm:$0xff]  ;;  %v6950_v8 = vld [vmem:[#allocation5 + $0x298] sm:$0xff] }
 0x2c5   :  { %1571 = vmatprep.subr.mxu0 %v6935_v15  ;;  %1642 = vmatprep.subr.mxu1 %v6938_v14  ;;  %10183 = vst [vmem:[#allocation170_spill] sm:$0xff] %v6947_v17  ;;  %10184 = vst [vmem:[#allocation171_spill] sm:$0xff] %v6950_v8  ;;  %v6953_v15 = vld [vmem:[#allocation5 + $0x280] sm:$0xff]  ;;  %v6956_v14 = vld [vmem:[#allocation5 + $0x290] sm:$0xff] }
 0x2c6   :  { %1572 = vmatpush2.msra.mxu0 %v6941_v13  ;;  %1643 = vmatpush2.msra.mxu1 %v6944_v18  ;;  %10185 = vst [vmem:[#allocation172_spill] sm:$0xff] %v6953_v15  ;;  %10186 = vst [vmem:[#allocation173_spill] sm:$0xff] %v6956_v14  ;;  %v6959_v13 = vld [vmem:[#allocation5 + $0x268] sm:$0xff]  ;;  %v6962_v18 = vld [vmem:[#allocation5 + $0x278] sm:$0xff] }
 0x2c7   :  { %1573 = vmatprep.subr.mxu0 %v6947_v17  ;;  %1644 = vmatprep.subr.mxu1 %v6950_v8  ;;  %10187 = vst [vmem:[#allocation174_spill] sm:$0xff] %v6959_v13  ;;  %10188 = vst [vmem:[#allocation175_spill] sm:$0xff] %v6962_v18  ;;  %v6965_v17 = vld [vmem:[#allocation5 + $0x260] sm:$0xff]  ;;  %v6968_v8 = vld [vmem:[#allocation5 + $0x270] sm:$0xff] }
 0x2c8   :  { %1574 = vmatpush2.msra.mxu0 %v6953_v15  ;;  %1645 = vmatpush2.msra.mxu1 %v6956_v14  ;;  %10189 = vst [vmem:[#allocation176_spill] sm:$0xff] %v6965_v17  ;;  %10190 = vst [vmem:[#allocation177_spill] sm:$0xff] %v6968_v8  ;;  %v6971_v15 = vld [vmem:[#allocation5 + $0x248] sm:$0xff]  ;;  %v6974_v14 = vld [vmem:[#allocation5 + $0x258] sm:$0xff] }
 0x2c9   :  { %1575 = vmatprep.subr.mxu0 %v6959_v13  ;;  %1646 = vmatprep.subr.mxu1 %v6962_v18  ;;  %10191 = vst [vmem:[#allocation178_spill] sm:$0xff] %v6971_v15  ;;  %10192 = vst [vmem:[#allocation179_spill] sm:$0xff] %v6974_v14  ;;  %v6977_v13 = vld [vmem:[#allocation5 + $0x240] sm:$0xff]  ;;  %v6980_v18 = vld [vmem:[#allocation5 + $0x250] sm:$0xff] }
 0x2ca   :  { %1576 = vmatpush2.msra.mxu0 %v6965_v17  ;;  %1647 = vmatpush2.msra.mxu1 %v6968_v8  ;;  %10193 = vst [vmem:[#allocation180_spill] sm:$0xff] %v6977_v13  ;;  %10194 = vst [vmem:[#allocation181_spill] sm:$0xff] %v6980_v18  ;;  %v6983_v17 = vld [vmem:[#allocation5 + $0x228] sm:$0xff]  ;;  %v6986_v8 = vld [vmem:[#allocation5 + $0x238] sm:$0xff] }
 0x2cb   :  { %1577 = vmatprep.subr.mxu0 %v6971_v15  ;;  %1648 = vmatprep.subr.mxu1 %v6974_v14  ;;  %10195 = vst [vmem:[#allocation182_spill] sm:$0xff] %v6983_v17  ;;  %10196 = vst [vmem:[#allocation183_spill] sm:$0xff] %v6986_v8  ;;  %v6989_v15 = vld [vmem:[#allocation5 + $0x220] sm:$0xff]  ;;  %v6992_v14 = vld [vmem:[#allocation5 + $0x230] sm:$0xff] }
 0x2cc   :  { %1578 = vmatpush2.msra.mxu0 %v6977_v13  ;;  %1649 = vmatpush2.msra.mxu1 %v6980_v18  ;;  %10197 = vst [vmem:[#allocation212_spill] sm:$0xff] %v6989_v15  ;;  %10198 = vst [vmem:[#allocation184_spill] sm:$0xff] %v6992_v14  ;;  %v6995_v13 = vld [vmem:[#allocation5 + $0x208] sm:$0xff]  ;;  %v6998_v18 = vld [vmem:[#allocation5 + $0x218] sm:$0xff] }
 0x2cd   :  { %1579 = vmatprep.subr.mxu0 %v6983_v17  ;;  %1650 = vmatprep.subr.mxu1 %v6986_v8  ;;  %10199 = vst [vmem:[#allocation185_spill] sm:$0xff] %v6995_v13  ;;  %10200 = vst [vmem:[#allocation214_spill] sm:$0xff] %v6998_v18  ;;  %v7001_v17 = vld [vmem:[#allocation5 + $0x200] sm:$0xff]  ;;  %v7004_v8 = vld [vmem:[#allocation5 + $0x210] sm:$0xff] }
 0x2ce   :  { %1580 = vmatpush2.msra.mxu0 %v6989_v15  ;;  %1651 = vmatpush2.msra.mxu1 %v6992_v14  ;;  %10201 = vst [vmem:[#allocation187_spill] sm:$0xff] %v7001_v17  ;;  %10202 = vst [vmem:[#allocation217_spill] sm:$0xff] %v7004_v8 }
 0x2cf   :  { %1581 = vmatprep.subr.mxu0 %v6995_v13  ;;  %1652 = vmatprep.subr.mxu1 %v6998_v18 }
 0x2d0   :  { %1582 = vmatpush2.msra.mxu0 %v7001_v17  ;;  %1653 = vmatpush2.msra.mxu1 %v7004_v8 }
 0x2d1   :  { %1686 = vmatprep.subr.mxu0 %v6389_v27  ;;  %1757 = vmatprep.subr.mxu1 %v6392_v28 }
 0x32f   :  { %v1250_v14 = vpop.f32.mrf.mxu0  ;;  %v1321_v18 = vpop.f32.mrf.mxu1 }
 0x330   :  { %v1251_v15 = vadd.f32 %v1250_v14, %v6399_v31  ;;  %v1322_v17 = vadd.f32 %v1321_v18, %v6406_v26  ;;  %v10204_v18 = vld [vmem:[#allocation186_spill] sm:$0xff]  ;;  %v10206_v26 = vld [vmem:[#allocation189_spill] sm:$0xff] }
 0x331   :  { %v1252_v13 = vpop.f32.mrf.mxu0  ;;  %v1323_v7 = vpop.f32.mrf.mxu1 }
 0x332   :  { %v1326_v52 = vmul.f32 0.5, %v1251_v15  ;;  %v1253_v33 = vadd.f32 %v1252_v13, %v6402_v35  ;;  %v1324_v8 = vadd.f32 %v1323_v7, %v6411_v23 }
 0x334   :  { %4379 = vtanh.f32 %v1326_v52  ;;  %v1330_v24 = vmul.f32 0.5, %v1253_v33  ;;  %v1335_v27 = vmul.f32 0.5, %v1324_v8 }
 0x336   :  { %4381 = vtanh.f32 %v1330_v24 }
 0x337   :  { %4383 = vtanh.f32 %v1322_v17 }
 0x338   :  { %4385 = vtanh.f32 %v1335_v27 }
 0x341   :  { %v4380_v58 = vpop.eup %4379 }
 0x342   :  { %v1328_v28 = vadd.f32 1.0, %v4380_v58 }
 0x343   :  { %v4382_v40 = vpop.eup %4381 }
 0x344   :  { %v1329_v32 = vmul.f32 0.5, %v1328_v28  ;;  %v1332_v14 = vadd.f32 1.0, %v4382_v40  ;;  %v4384_v31 = vpop.eup %4383  ;;  %v10205_v28 = vld [vmem:[#allocation188_spill] sm:$0xff] }
 0x345   :  { %v4386_v17 = vpop.eup %4385 }
 0x346   :  { %v1333_v15 = vmul.f32 0.5, %v1332_v14  ;;  %v1340_v52 = vmul.f32 %v4384_v31, %v1329_v32  ;;  %v1337_v27 = vadd.f32 1.0, %v4386_v17 }
 0x348   :  { %v1339_v13 = vmul.f32 %v1333_v15, %v6414_v38  ;;  %v1338_v32 = vmul.f32 0.5, %v1337_v27 }
 0x34a   :  { %v7014_v33 = vadd.f32 %v1340_v52, %v1339_v13 }
 0x34c   :  { %10203 = vst [vmem:[#allocation218_spill] sm:$0xff] %v7014_v33  ;;  %4387 = vtanh.f32 %v7014_v33 }
 0x350   :  { %v1417_v24 = vpop.f32.mrf.mxu0  ;;  %v1488_v8 = vpop.f32.mrf.mxu1 }
 0x351   :  { %v1493_v7 = vadd.f32 %v1417_v24, %v10204_v18  ;;  %v1495_v35 = vadd.f32 %v1488_v8, %v10206_v26  ;;  %v10207_v18 = vld [vmem:[#allocation191_spill] sm:$0xff] }
 0x352   :  { %v1419_v23 = vpop.f32.mrf.mxu0  ;;  %v1490_v15 = vpop.f32.mrf.mxu1 }
 0x353   :  { %v1497_v58 = vadd.f32 %v1493_v7, %v10047_v12  ;;  %v1494_v40 = vadd.f32 %v1419_v23, %v10205_v28  ;;  %v1499_v52 = vadd.f32 %v1495_v35, %v6177_v22  ;;  %v1496_v33 = vadd.f32 %v1490_v15, %v10207_v18  ;;  %v10250_v18 = vld [vmem:[#allocation80_spill] sm:$0xff] }
 0x355   :  { %v1501_v14 = vmul.f32 0.5, %v1497_v58  ;;  %v1498_v31 = vadd.f32 %v1494_v40, %v10050_v51  ;;  %v1500_v23 = vadd.f32 %v1496_v33, %v6185_v20 }
 0x357   :  { %4389 = vtanh.f32 %v1501_v14  ;;  %v1505_v38 = vmul.f32 0.5, %v1498_v31  ;;  %v1510_v17 = vmul.f32 0.5, %v1500_v23  ;;  %v10251_v23 = vld [vmem:[#allocation81_spill] sm:$0xff] }
 0x359   :  { %v4388_v13 = vpop.eup %4387  ;;  %4391 = vtanh.f32 %v1505_v38 }
 0x35a   :  { %v1343_v24 = vmul.f32 %v4388_v13, %v1338_v32  ;;  %4393 = vtanh.f32 %v1499_v52  ;;  %v10248_v52 = vld [vmem:[#allocation78_spill] sm:$0xff] }
 0x35b   :  { %4395 = vtanh.f32 %v1510_v17  ;;  %v10252_v17 = vld [vmem:[#allocation82_spill] sm:$0xff] }
 0x35c   :  { %1583 = vmatprep.mubr.f32.mxu0 %v1343_v24  ;;  %1654 = vmatprep.mubr.f32.mxu1 %v1343_v24  ;;  %v10249_v24 = vld [vmem:[#allocation79_spill] sm:$0xff] }
 0x364   :  { %v4390_v26 = vpop.eup %4389 }
 0x365   :  { %v1503_v7 = vadd.f32 1.0, %v4390_v26  ;;  %v10253_v26 = vld [vmem:[#allocation83_spill] sm:$0xff] }
 0x366   :  { %v4392_v8 = vpop.eup %4391 }
 0x367   :  { %v1504_v58 = vmul.f32 0.5, %v1503_v7  ;;  %v1507_v28 = vadd.f32 1.0, %v4392_v8  ;;  %v4394_v27 = vpop.eup %4393  ;;  %v10254_v7 = vld [vmem:[#allocation84_spill] sm:$0xff]  ;;  %v10255_v8 = vld [vmem:[#allocation85_spill] sm:$0xff] }
 0x368   :  { %v4396_v38 = vpop.eup %4395 }
 0x369   :  { %v1508_v40 = vmul.f32 0.5, %v1507_v28  ;;  %v1515_v14 = vmul.f32 %v4394_v27, %v1504_v58  ;;  %v1512_v32 = vadd.f32 1.0, %v4396_v38  ;;  %v10256_v58 = vld [vmem:[#allocation86_spill] sm:$0xff]  ;;  %v10257_v28 = vld [vmem:[#allocation87_spill] sm:$0xff]  ;;  %v10259_v27 = vld [vmem:[#allocation89_spill] sm:$0xff] }
 0x36a   :  { %v10262_v38 = vld [vmem:[#allocation92_spill] sm:$0xff] }
 0x36b   :  { %v1514_v35 = vmul.f32 %v1508_v40, %v6426_v49  ;;  %v1513_v15 = vmul.f32 0.5, %v1512_v32  ;;  %v10208_v49 = vld [vmem:[#allocation36_spill] sm:$0xff]  ;;  %v10263_v32 = vld [vmem:[#allocation93_spill] sm:$0xff] }
 0x36c   :  { %v10258_v40 = vld [vmem:[#allocation88_spill] sm:$0xff] }
 0x36d   :  { %v7026_v31 = vadd.f32 %v1515_v14, %v1514_v35  ;;  %v10260_v35 = vld [vmem:[#allocation90_spill] sm:$0xff]  ;;  %v10261_v14 = vld [vmem:[#allocation91_spill] sm:$0xff] }
 0x36f   :  { %4397 = vtanh.f32 %v7026_v31 }
 0x37c   :  { %v4398_v33 = vpop.eup %4397 }
 0x37d   :  { %v7029_v13 = vmul.f32 %v4398_v33, %v1513_v15  ;;  %v10264_v15 = vld [vmem:[#allocation94_spill] sm:$0xff]  ;;  %v10265_v33 = vld [vmem:[#allocation95_spill] sm:$0xff] }
 0x37f   :  { %1584 = vmatmul.mubr.f32.vlgmr.msra.gmra.mxu0 %v7029_v13  ;;  %1655 = vmatmul.mubr.f32.vlgmr.msra.gmra.mxu1 %v7029_v13 }
 0x380   :  { %1687 = vmatpush1.msra.mxu0 %v6433_v11  ;;  %1758 = vmatpush1.msra.mxu1 %v6436_v16  ;;  %v10209_v11 = vld [vmem:[#allocation41_spill] sm:$0xff]  ;;  %v10210_v16 = vld [vmem:[#allocation38_spill] sm:$0xff] }
 0x381   :  { %1688 = vmatprep.subr.mxu0 %v6439_v37  ;;  %1759 = vmatprep.subr.mxu1 %v6442_v4  ;;  %v10211_v37 = vld [vmem:[#allocation44_spill] sm:$0xff] }
 0x382   :  { %1689 = vmatpush1.msra.mxu0 %v6445_v5  ;;  %1760 = vmatpush1.msra.mxu1 %v6448_v10  ;;  %v10212_v4 = vld [vmem:[#allocation40_spill] sm:$0xff]  ;;  %v10213_v5 = vld [vmem:[#allocation46_spill] sm:$0xff] }
 0x383   :  { %1690 = vmatprep.subr.mxu0 %v6451_v19  ;;  %1761 = vmatprep.subr.mxu1 %v6454_v21  ;;  %v10214_v10 = vld [vmem:[#allocation42_spill] sm:$0xff]  ;;  %v10215_v19 = vld [vmem:[#allocation48_spill] sm:$0xff]  ;;  %v10216_v21 = vld [vmem:[#allocation45_spill] sm:$0xff] }
 0x384   :  { %1691 = vmatpush1.msra.mxu0 %v6457_v25  ;;  %1762 = vmatpush1.msra.mxu1 %v6460_v34  ;;  %v10217_v25 = vld [vmem:[#allocation50_spill] sm:$0xff]  ;;  %v10218_v34 = vld [vmem:[#allocation47_spill] sm:$0xff] }
 0x385   :  { %1692 = vmatprep.subr.mxu0 %v6463_v36  ;;  %1763 = vmatprep.subr.mxu1 %v6466_v0  ;;  %v10219_v36 = vld [vmem:[#allocation52_spill] sm:$0xff]  ;;  %v10220_v0 = vld [vmem:[#allocation49_spill] sm:$0xff] }
 0x386   :  { %1693 = vmatpush1.msra.mxu0 %v6469_v39  ;;  %1764 = vmatpush1.msra.mxu1 %v6472_v9  ;;  %v10221_v39 = vld [vmem:[#allocation53_spill] sm:$0xff]  ;;  %v10222_v9 = vld [vmem:[#allocation51_spill] sm:$0xff] }
 0x387   :  { %1694 = vmatprep.subr.mxu0 %v6475_v41  ;;  %1765 = vmatprep.subr.mxu1 %v6478_v42  ;;  %v10223_v41 = vld [vmem:[#allocation54_spill] sm:$0xff]  ;;  %v10224_v42 = vld [vmem:[#allocation55_spill] sm:$0xff] }
 0x388   :  { %1695 = vmatpush1.msra.mxu0 %v6481_v6  ;;  %1766 = vmatpush1.msra.mxu1 %v6484_v43  ;;  %v10225_v6 = vld [vmem:[#allocation56_spill] sm:$0xff]  ;;  %v10226_v43 = vld [vmem:[#allocation57_spill] sm:$0xff] }
 0x389   :  { %1696 = vmatprep.subr.mxu0 %v6487_v44  ;;  %1767 = vmatprep.subr.mxu1 %v6490_v45  ;;  %v10227_v44 = vld [vmem:[#allocation58_spill] sm:$0xff]  ;;  %v10228_v45 = vld [vmem:[#allocation59_spill] sm:$0xff] }
 0x38a   :  { %1697 = vmatpush1.msra.mxu0 %v6493_v46  ;;  %1768 = vmatpush1.msra.mxu1 %v6496_v47  ;;  %v10229_v46 = vld [vmem:[#allocation60_spill] sm:$0xff]  ;;  %v10230_v47 = vmov 0.0  }
 0x38b   :  { %1698 = vmatprep.subr.mxu0 %v6499_v48  ;;  %1769 = vmatprep.subr.mxu1 %v6502_v50  ;;  %v10231_v48 = vld [vmem:[#allocation61_spill] sm:$0xff]  ;;  %v10232_v50 = vld [vmem:[#allocation62_spill] sm:$0xff] }
 0x38c   :  { %1699 = vmatpush1.msra.mxu0 %v6505_v53  ;;  %1770 = vmatpush1.msra.mxu1 %v6508_v54  ;;  %v10233_v53 = vld [vmem:[#allocation63_spill] sm:$0xff]  ;;  %v10234_v54 = vld [vmem:[#allocation64_spill] sm:$0xff] }
 0x38d   :  { %1700 = vmatprep.subr.mxu0 %v6511_v55  ;;  %1771 = vmatprep.subr.mxu1 %v6514_v56  ;;  %v10235_v55 = vld [vmem:[#allocation65_spill] sm:$0xff]  ;;  %v10236_v56 = vld [vmem:[#allocation66_spill] sm:$0xff] }
 0x38e   :  { %1701 = vmatpush1.msra.mxu0 %v6517_v57  ;;  %1772 = vmatpush1.msra.mxu1 %v6520_v59  ;;  %v10237_v57 = vld [vmem:[#allocation67_spill] sm:$0xff]  ;;  %v10238_v59 = vld [vmem:[#allocation68_spill] sm:$0xff] }
 0x38f   :  { %1702 = vmatprep.subr.mxu0 %v6523_v60  ;;  %1773 = vmatprep.subr.mxu1 %v6526_v61  ;;  %v10239_v60 = vld [vmem:[#allocation69_spill] sm:$0xff]  ;;  %v10240_v61 = vld [vmem:[#allocation70_spill] sm:$0xff] }
 0x390   :  { %1703 = vmatpush1.msra.mxu0 %v6529_v62  ;;  %1774 = vmatpush1.msra.mxu1 %v6532_v63  ;;  %v10241_v62 = vld [vmem:[#allocation71_spill] sm:$0xff]  ;;  %v10242_v63 = vld [vmem:[#allocation72_spill] sm:$0xff] }
 0x391   :  { %1704 = vmatprep.subr.mxu0 %v6535_v1  ;;  %1775 = vmatprep.subr.mxu1 %v6538_v2  ;;  %v10243_v1 = vld [vmem:[#allocation73_spill] sm:$0xff]  ;;  %v10244_v2 = vld [vmem:[#allocation74_spill] sm:$0xff] }
 0x392   :  { %1705 = vmatpush1.msra.mxu0 %v6541_v3  ;;  %1776 = vmatpush1.msra.mxu1 %v6544_v29  ;;  %v10245_v3 = vld [vmem:[#allocation75_spill] sm:$0xff]  ;;  %v10246_v29 = vld [vmem:[#allocation76_spill] sm:$0xff] }
 0x393   :  { %1706 = vmatprep.subr.mxu0 %v6547_v30  ;;  %1777 = vmatprep.subr.mxu1 %v10208_v49  ;;  %v10247_v30 = vld [vmem:[#allocation77_spill] sm:$0xff] }
 0x394   :  { %1707 = vmatpush1.msra.mxu0 %v10209_v11  ;;  %1778 = vmatpush1.msra.mxu1 %v10210_v16  ;;  %v10267_v49 = vld [vmem:[#allocation97_spill] sm:$0xff]  ;;  %v10268_v11 = vld [vmem:[#allocation98_spill] sm:$0xff]  ;;  %v10269_v16 = vld [vmem:[#allocation99_spill] sm:$0xff] }
 0x395   :  { %1708 = vmatprep.subr.mxu0 %v10211_v37  ;;  %1779 = vmatprep.subr.mxu1 %v10212_v4  ;;  %v10270_v37 = vld [vmem:[#allocation100_spill] sm:$0xff]  ;;  %v10271_v4 = vld [vmem:[#allocation101_spill] sm:$0xff] }
 0x396   :  { %1709 = vmatpush1.msra.mxu0 %v10213_v5  ;;  %1780 = vmatpush1.msra.mxu1 %v10214_v10  ;;  %v10272_v5 = vld [vmem:[#allocation102_spill] sm:$0xff]  ;;  %v10273_v10 = vld [vmem:[#allocation103_spill] sm:$0xff] }
 0x397   :  { %1710 = vmatprep.subr.mxu0 %v10215_v19  ;;  %1781 = vmatprep.subr.mxu1 %v10216_v21  ;;  %v10274_v19 = vld [vmem:[#allocation104_spill] sm:$0xff]  ;;  %v10275_v21 = vld [vmem:[#allocation105_spill] sm:$0xff] }
 0x398   :  { %1711 = vmatpush1.msra.mxu0 %v10217_v25  ;;  %1782 = vmatpush1.msra.mxu1 %v10218_v34  ;;  %v10276_v25 = vld [vmem:[#allocation106_spill] sm:$0xff]  ;;  %v10277_v34 = vld [vmem:[#allocation107_spill] sm:$0xff] }
 0x399   :  { %1712 = vmatprep.subr.mxu0 %v10219_v36  ;;  %1783 = vmatprep.subr.mxu1 %v10220_v0  ;;  %v10278_v36 = vld [vmem:[#allocation108_spill] sm:$0xff]  ;;  %v10279_v0 = vld [vmem:[#allocation109_spill] sm:$0xff] }
 0x39a   :  { %1713 = vmatpush1.msra.mxu0 %v10221_v39  ;;  %1784 = vmatpush1.msra.mxu1 %v10222_v9  ;;  %v10280_v39 = vld [vmem:[#allocation110_spill] sm:$0xff]  ;;  %v10281_v9 = vld [vmem:[#allocation111_spill] sm:$0xff] }
 0x39b   :  { %1714 = vmatprep.subr.mxu0 %v10223_v41  ;;  %1785 = vmatprep.subr.mxu1 %v10224_v42  ;;  %v10282_v41 = vld [vmem:[#allocation112_spill] sm:$0xff]  ;;  %v10283_v42 = vld [vmem:[#allocation113_spill] sm:$0xff] }
 0x39c   :  { %1715 = vmatpush1.msra.mxu0 %v10225_v6  ;;  %1786 = vmatpush1.msra.mxu1 %v10226_v43  ;;  %v10284_v6 = vld [vmem:[#allocation114_spill] sm:$0xff]  ;;  %v10285_v43 = vld [vmem:[#allocation115_spill] sm:$0xff] }
 0x39d   :  { %1716 = vmatprep.subr.mxu0 %v10227_v44  ;;  %1787 = vmatprep.subr.mxu1 %v10228_v45  ;;  %v10286_v44 = vld [vmem:[#allocation116_spill] sm:$0xff]  ;;  %v10287_v45 = vld [vmem:[#allocation117_spill] sm:$0xff] }
 0x39e   :  { %1717 = vmatpush1.msra.mxu0 %v10229_v46  ;;  %1750 = vmatprep.mubr.f32.mxu0 %v10230_v47  ;;  %v10288_v46 = vld [vmem:[#allocation118_spill] sm:$0xff] }
 0x39f   :  { %1788 = vmatpush1.msra.mxu1 %v10231_v48  ;;  %1821 = vmatprep.mubr.f32.mxu1 %v10230_v47  ;;  %v10289_v48 = vld [vmem:[#allocation119_spill] sm:$0xff] }
 0x3a0   :  { %1751 = vmatmul.mubr.f32.vlgmr.msra.gmra.mxu0 %v7029_v13  ;;  %1822 = vmatmul.mubr.f32.vlgmr.msra.gmra.mxu1 %v7029_v13  ;;  %v10266_v13 = vld [vmem:[#allocation96_spill] sm:$0xff] }
 0x3a1   :  { %1854 = vmatprep.subr.mxu0 %v10232_v50  ;;  %1925 = vmatprep.subr.mxu1 %v10233_v53  ;;  %v10290_v50 = vld [vmem:[#allocation120_spill] sm:$0xff]  ;;  %v10291_v53 = vld [vmem:[#allocation121_spill] sm:$0xff] }
 0x3a2   :  { %1855 = vmatpush1.msra.mxu0 %v10234_v54  ;;  %1926 = vmatpush1.msra.mxu1 %v10235_v55  ;;  %v10292_v54 = vld [vmem:[#allocation122_spill] sm:$0xff]  ;;  %v10293_v55 = vld [vmem:[#allocation123_spill] sm:$0xff] }
 0x3a3   :  { %1856 = vmatprep.subr.mxu0 %v10236_v56  ;;  %1927 = vmatprep.subr.mxu1 %v10237_v57  ;;  %v10294_v56 = vld [vmem:[#allocation124_spill] sm:$0xff]  ;;  %v10295_v57 = vld [vmem:[#allocation125_spill] sm:$0xff] }
 0x3a4   :  { %1857 = vmatpush1.msra.mxu0 %v10238_v59  ;;  %1928 = vmatpush1.msra.mxu1 %v10239_v60  ;;  %v10296_v59 = vld [vmem:[#allocation126_spill] sm:$0xff]  ;;  %v10297_v60 = vld [vmem:[#allocation127_spill] sm:$0xff] }
 0x3a5   :  { %1858 = vmatprep.subr.mxu0 %v10240_v61  ;;  %1929 = vmatprep.subr.mxu1 %v10241_v62  ;;  %v10298_v61 = vld [vmem:[#allocation128_spill] sm:$0xff]  ;;  %v10299_v62 = vld [vmem:[#allocation129_spill] sm:$0xff] }
 0x3a6   :  { %1859 = vmatpush1.msra.mxu0 %v10242_v63  ;;  %1930 = vmatpush1.msra.mxu1 %v10243_v1  ;;  %v10300_v63 = vld [vmem:[#allocation130_spill] sm:$0xff]  ;;  %v10301_v1 = vld [vmem:[#allocation131_spill] sm:$0xff] }
 0x3a7   :  { %1860 = vmatprep.subr.mxu0 %v10244_v2  ;;  %1931 = vmatprep.subr.mxu1 %v10245_v3  ;;  %v10302_v2 = vld [vmem:[#allocation132_spill] sm:$0xff]  ;;  %v10303_v3 = vld [vmem:[#allocation133_spill] sm:$0xff] }
 0x3a8   :  { %1861 = vmatpush1.msra.mxu0 %v10246_v29  ;;  %1932 = vmatpush1.msra.mxu1 %v10247_v30  ;;  %v10304_v29 = vld [vmem:[#allocation134_spill] sm:$0xff]  ;;  %v10305_v30 = vld [vmem:[#allocation135_spill] sm:$0xff] }
 0x3a9   :  { %1862 = vmatprep.subr.mxu0 %v10248_v52  ;;  %1933 = vmatprep.subr.mxu1 %v10249_v24  ;;  %v10306_v52 = vld [vmem:[#allocation136_spill] sm:$0xff]  ;;  %v10307_v24 = vld [vmem:[#allocation137_spill] sm:$0xff] }
 0x3aa   :  { %1863 = vmatpush1.msra.mxu0 %v10250_v18  ;;  %1934 = vmatpush1.msra.mxu1 %v10251_v23  ;;  %v10308_v18 = vld [vmem:[#allocation138_spill] sm:$0xff]  ;;  %v10309_v23 = vld [vmem:[#allocation139_spill] sm:$0xff] }
 0x3ab   :  { %1864 = vmatprep.subr.mxu0 %v10252_v17  ;;  %1935 = vmatprep.subr.mxu1 %v10253_v26  ;;  %v10310_v17 = vld [vmem:[#allocation140_spill] sm:$0xff]  ;;  %v10311_v26 = vld [vmem:[#allocation141_spill] sm:$0xff] }
 0x3ac   :  { %1865 = vmatpush1.msra.mxu0 %v10254_v7  ;;  %1936 = vmatpush1.msra.mxu1 %v10255_v8  ;;  %v10312_v7 = vld [vmem:[#allocation142_spill] sm:$0xff]  ;;  %v10313_v8 = vld [vmem:[#allocation143_spill] sm:$0xff] }
 0x3ad   :  { %1866 = vmatprep.subr.mxu0 %v10256_v58  ;;  %1937 = vmatprep.subr.mxu1 %v10257_v28  ;;  %v10314_v58 = vld [vmem:[#allocation144_spill] sm:$0xff]  ;;  %v10315_v28 = vld [vmem:[#allocation145_spill] sm:$0xff] }
 0x3ae   :  { %1867 = vmatpush1.msra.mxu0 %v10258_v40  ;;  %1938 = vmatpush1.msra.mxu1 %v10259_v27  ;;  %v10316_v40 = vld [vmem:[#allocation146_spill] sm:$0xff]  ;;  %v10317_v27 = vld [vmem:[#allocation147_spill] sm:$0xff] }
 0x3af   :  { %1868 = vmatprep.subr.mxu0 %v10260_v35  ;;  %1939 = vmatprep.subr.mxu1 %v10261_v14  ;;  %v10318_v35 = vld [vmem:[#allocation148_spill] sm:$0xff]  ;;  %v10319_v14 = vld [vmem:[#allocation149_spill] sm:$0xff] }
 0x3b0   :  { %1869 = vmatpush1.msra.mxu0 %v10262_v38  ;;  %1940 = vmatpush1.msra.mxu1 %v10263_v32  ;;  %v10320_v38 = vld [vmem:[#allocation150_spill] sm:$0xff]  ;;  %v10321_v32 = vld [vmem:[#allocation151_spill] sm:$0xff] }
 0x3b1   :  { %1870 = vmatprep.subr.mxu0 %v10264_v15  ;;  %1941 = vmatprep.subr.mxu1 %v10265_v33  ;;  %v10322_v15 = vld [vmem:[#allocation152_spill] sm:$0xff]  ;;  %v10323_v33 = vld [vmem:[#allocation153_spill] sm:$0xff] }
 0x3b2   :  { %1871 = vmatpush1.msra.mxu0 %v10266_v13  ;;  %1942 = vmatpush1.msra.mxu1 %v10267_v49  ;;  %v10324_v13 = vld [vmem:[#allocation154_spill] sm:$0xff]  ;;  %v10325_v49 = vld [vmem:[#allocation155_spill] sm:$0xff] }
 0x3b3   :  { %1872 = vmatprep.subr.mxu0 %v10268_v11  ;;  %1943 = vmatprep.subr.mxu1 %v10269_v16  ;;  %v10326_v11 = vld [vmem:[#allocation156_spill] sm:$0xff]  ;;  %v10327_v16 = vld [vmem:[#allocation157_spill] sm:$0xff] }
 0x3b4   :  { %1873 = vmatpush1.msra.mxu0 %v10270_v37  ;;  %1944 = vmatpush1.msra.mxu1 %v10271_v4  ;;  %v10328_v37 = vld [vmem:[#allocation158_spill] sm:$0xff]  ;;  %v10329_v4 = vld [vmem:[#allocation159_spill] sm:$0xff] }
 0x3b5   :  { %1874 = vmatprep.subr.mxu0 %v10272_v5  ;;  %1945 = vmatprep.subr.mxu1 %v10273_v10  ;;  %v10330_v5 = vld [vmem:[#allocation160_spill] sm:$0xff]  ;;  %v10331_v10 = vld [vmem:[#allocation161_spill] sm:$0xff] }
 0x3b6   :  { %1875 = vmatpush1.msra.mxu0 %v10274_v19  ;;  %1946 = vmatpush1.msra.mxu1 %v10275_v21  ;;  %v10332_v19 = vld [vmem:[#allocation162_spill] sm:$0xff]  ;;  %v10333_v21 = vld [vmem:[#allocation163_spill] sm:$0xff] }
 0x3b7   :  { %1876 = vmatprep.subr.mxu0 %v10276_v25  ;;  %1947 = vmatprep.subr.mxu1 %v10277_v34  ;;  %v10334_v25 = vld [vmem:[#allocation164_spill] sm:$0xff]  ;;  %v10335_v34 = vld [vmem:[#allocation165_spill] sm:$0xff] }
 0x3b8   :  { %1877 = vmatpush1.msra.mxu0 %v10278_v36  ;;  %1948 = vmatpush1.msra.mxu1 %v10279_v0  ;;  %v10336_v36 = vld [vmem:[#allocation166_spill] sm:$0xff]  ;;  %v10337_v0 = vld [vmem:[#allocation167_spill] sm:$0xff] }
 0x3b9   :  { %1878 = vmatprep.subr.mxu0 %v10280_v39  ;;  %1949 = vmatprep.subr.mxu1 %v10281_v9  ;;  %v10338_v39 = vld [vmem:[#allocation168_spill] sm:$0xff]  ;;  %v10339_v9 = vld [vmem:[#allocation169_spill] sm:$0xff] }
 0x3ba   :  { %1879 = vmatpush1.msra.mxu0 %v10282_v41  ;;  %1950 = vmatpush1.msra.mxu1 %v10283_v42  ;;  %v10340_v41 = vld [vmem:[#allocation170_spill] sm:$0xff]  ;;  %v10341_v42 = vld [vmem:[#allocation171_spill] sm:$0xff] }
 0x3bb   :  { %1880 = vmatprep.subr.mxu0 %v10284_v6  ;;  %1951 = vmatprep.subr.mxu1 %v10285_v43  ;;  %v10342_v6 = vld [vmem:[#allocation172_spill] sm:$0xff]  ;;  %v10343_v43 = vld [vmem:[#allocation173_spill] sm:$0xff] }
 0x3bc   :  { %1881 = vmatpush1.msra.mxu0 %v10286_v44  ;;  %1952 = vmatpush1.msra.mxu1 %v10287_v45  ;;  %v10344_v44 = vld [vmem:[#allocation174_spill] sm:$0xff]  ;;  %v10345_v45 = vld [vmem:[#allocation175_spill] sm:$0xff] }
 0x3bd   :  { %1882 = vmatprep.subr.mxu0 %v10288_v46  ;;  %1953 = vmatprep.subr.mxu1 %v10289_v48  ;;  %v10346_v46 = vld [vmem:[#allocation176_spill] sm:$0xff]  ;;  %v10347_v48 = vld [vmem:[#allocation177_spill] sm:$0xff] }
 0x3be   :  { %1883 = vmatpush1.msra.mxu0 %v10290_v50  ;;  %1954 = vmatpush1.msra.mxu1 %v10291_v53  ;;  %v10348_v50 = vld [vmem:[#allocation178_spill] sm:$0xff]  ;;  %v10349_v53 = vld [vmem:[#allocation179_spill] sm:$0xff] }
 0x3bf   :  { %1884 = vmatprep.subr.mxu0 %v10292_v54  ;;  %1955 = vmatprep.subr.mxu1 %v10293_v55  ;;  %v10350_v54 = vld [vmem:[#allocation180_spill] sm:$0xff]  ;;  %v10351_v55 = vld [vmem:[#allocation181_spill] sm:$0xff] }
 0x3c0   :  { %1885 = vmatpush1.msra.mxu0 %v10294_v56  ;;  %1956 = vmatpush1.msra.mxu1 %v10295_v57  ;;  %v10352_v56 = vld [vmem:[#allocation182_spill] sm:$0xff]  ;;  %v10353_v57 = vld [vmem:[#allocation183_spill] sm:$0xff] }
 0x3c1   :  { %1886 = vmatprep.subr.mxu0 %v10296_v59  ;;  %1957 = vmatprep.subr.mxu1 %v10297_v60  ;;  %v10354_v59 = vld [vmem:[#allocation212_spill] sm:$0xff] }
 0x3c2   :  { %1887 = vmatpush2.msra.mxu0 %v10298_v61  ;;  %1958 = vmatpush2.msra.mxu1 %v10299_v62  ;;  %v10355_v60 = vld [vmem:[#allocation184_spill] sm:$0xff]  ;;  %v10356_v61 = vld [vmem:[#allocation185_spill] sm:$0xff]  ;;  %v10357_v62 = vld [vmem:[#allocation214_spill] sm:$0xff] }
 0x3c3   :  { %1888 = vmatprep.subr.mxu0 %v10300_v63  ;;  %1959 = vmatprep.subr.mxu1 %v10301_v1  ;;  %v10358_v63 = vld [vmem:[#allocation187_spill] sm:$0xff]  ;;  %v10359_v1 = vld [vmem:[#allocation217_spill] sm:$0xff] }
 0x3c4   :  { %1889 = vmatpush2.msra.mxu0 %v10302_v2  ;;  %1960 = vmatpush2.msra.mxu1 %v10303_v3  ;;  %v7227_v2 = vld [vmem:[#allocation3 + $0x1e8] sm:$0xff]  ;;  %v7230_v3 = vld [vmem:[#allocation3 + $0x1f8] sm:$0xff] }
 0x3c5   :  { %1890 = vmatprep.subr.mxu0 %v10304_v29  ;;  %1961 = vmatprep.subr.mxu1 %v10305_v30  ;;  %v10360_v30 = vld [vmem:[#allocation34_spill] sm:$0xff] }
 0x3c6   :  { %1891 = vmatpush2.msra.mxu0 %v10306_v52  ;;  %1962 = vmatpush2.msra.mxu1 %v10307_v24 }
 0x3c7   :  { %1892 = vmatprep.subr.mxu0 %v10308_v18  ;;  %1963 = vmatprep.subr.mxu1 %v10309_v23  ;;  %v10361_v23 = vld [vmem:[#allocation37_spill] sm:$0xff] }
 0x3c8   :  { %1893 = vmatpush2.msra.mxu0 %v10310_v17  ;;  %1964 = vmatpush2.msra.mxu1 %v10311_v26 }
 0x3c9   :  { %1894 = vmatprep.subr.mxu0 %v10312_v7  ;;  %1965 = vmatprep.subr.mxu1 %v10313_v8  ;;  %v10362_v8 = vld [vmem:[#allocation35_spill] sm:$0xff] }
 0x3ca   :  { %1895 = vmatpush2.msra.mxu0 %v10314_v58  ;;  %1966 = vmatpush2.msra.mxu1 %v10315_v28 }
 0x3cb   :  { %1896 = vmatprep.subr.mxu0 %v10316_v40  ;;  %1967 = vmatprep.subr.mxu1 %v10317_v27  ;;  %v10363_v40 = vld [vmem:[#allocation39_spill] sm:$0xff] }
 0x3cc   :  { %1897 = vmatpush2.msra.mxu0 %v10318_v35  ;;  %1968 = vmatpush2.msra.mxu1 %v10319_v14 }
 0x3cd   :  { %1898 = vmatprep.subr.mxu0 %v10320_v38  ;;  %1969 = vmatprep.subr.mxu1 %v10321_v32 }
 0x3ce   :  { %1899 = vmatpush2.msra.mxu0 %v10322_v15  ;;  %1970 = vmatpush2.msra.mxu1 %v10323_v33 }
 0x3cf   :  { %1900 = vmatprep.subr.mxu0 %v10324_v13  ;;  %1971 = vmatprep.subr.mxu1 %v10325_v49 }
 0x3d0   :  { %1901 = vmatpush2.msra.mxu0 %v10326_v11  ;;  %1972 = vmatpush2.msra.mxu1 %v10327_v16  ;;  %v10364_v11 = vld [vmem:[#allocation218_spill] sm:$0xff] }
 0x3d1   :  { %1902 = vmatprep.subr.mxu0 %v10328_v37  ;;  %1973 = vmatprep.subr.mxu1 %v10329_v4 }
 0x3d2   :  { %1903 = vmatpush2.msra.mxu0 %v10330_v5  ;;  %1974 = vmatpush2.msra.mxu1 %v10331_v10 }
 0x3d3   :  { %1904 = vmatprep.subr.mxu0 %v10332_v19  ;;  %1975 = vmatprep.subr.mxu1 %v10333_v21  ;;  %v10365_v19 = vld [vmem:[#allocation190_spill] sm:$0xff] }
 0x3d4   :  { %1905 = vmatpush2.msra.mxu0 %v10334_v25  ;;  %1976 = vmatpush2.msra.mxu1 %v10335_v34 }
 0x3d5   :  { %1906 = vmatprep.subr.mxu0 %v10336_v36  ;;  %1977 = vmatprep.subr.mxu1 %v10337_v0  ;;  %v10366_v0 = vld [vmem:[#allocation192_spill] sm:$0xff] }
 0x3d6   :  { %1907 = vmatpush2.msra.mxu0 %v10338_v39  ;;  %1978 = vmatpush2.msra.mxu1 %v10339_v9 }
 0x3d7   :  { %1908 = vmatprep.subr.mxu0 %v10340_v41  ;;  %1979 = vmatprep.subr.mxu1 %v10341_v42  ;;  %v10367_v42 = vld [vmem:[#allocation193_spill] sm:$0xff] }
 0x3d8   :  { %1909 = vmatpush2.msra.mxu0 %v10342_v6  ;;  %1980 = vmatpush2.msra.mxu1 %v10343_v43 }
 0x3d9   :  { %1910 = vmatprep.subr.mxu0 %v10344_v44  ;;  %1981 = vmatprep.subr.mxu1 %v10345_v45 }
 0x3da   :  { %1911 = vmatpush2.msra.mxu0 %v10346_v46  ;;  %1982 = vmatpush2.msra.mxu1 %v10347_v48 }
 0x3db   :  { %1912 = vmatprep.subr.mxu0 %v10348_v50  ;;  %1983 = vmatprep.subr.mxu1 %v10349_v53 }
 0x3dc   :  { %1913 = vmatpush2.msra.mxu0 %v10350_v54  ;;  %1984 = vmatpush2.msra.mxu1 %v10351_v55  ;;  %v10368_v54 = vld [vmem:[#allocation195_spill] sm:$0xff] }
 0x3dd   :  { %1914 = vmatprep.subr.mxu0 %v10352_v56  ;;  %1985 = vmatprep.subr.mxu1 %v10353_v57 }
 0x3de   :  { %1915 = vmatpush2.msra.mxu0 %v10354_v59  ;;  %1986 = vmatpush2.msra.mxu1 %v10355_v60 }
 0x3df   :  { %1916 = vmatprep.subr.mxu0 %v10356_v61  ;;  %1987 = vmatprep.subr.mxu1 %v10357_v62 }
 0x3e0   :  { %1917 = vmatpush2.msra.mxu0 %v10358_v63  ;;  %1988 = vmatpush2.msra.mxu1 %v10359_v1 }
 0x3e1   :  { %2021 = vmatprep.subr.mxu0 %v7227_v2  ;;  %2092 = vmatprep.subr.mxu1 %v7230_v3 }
 0x43f   :  { %v1585_v29 = vpop.f32.mrf.mxu0  ;;  %v1656_v26 = vpop.f32.mrf.mxu1 }
 0x440   :  { %v1586_v52 = vadd.f32 %v1585_v29, %v10360_v30  ;;  %v1657_v58 = vadd.f32 %v1656_v26, %v10362_v8 }
 0x441   :  { %v1587_v24 = vpop.f32.mrf.mxu0  ;;  %v1658_v28 = vpop.f32.mrf.mxu1 }
 0x442   :  { %v1661_v18 = vmul.f32 0.5, %v1586_v52  ;;  %v1588_v17 = vadd.f32 %v1587_v24, %v10361_v23  ;;  %v1659_v27 = vadd.f32 %v1658_v28, %v10363_v40 }
 0x444   :  { %4399 = vtanh.f32 %v1661_v18  ;;  %v1665_v7 = vmul.f32 0.5, %v1588_v17  ;;  %v1670_v35 = vmul.f32 0.5, %v1659_v27  ;;  %v7257_v27 = vld [vmem:[#allocation3 + $0x1e0] sm:$0xff] }
 0x446   :  { %4401 = vtanh.f32 %v1665_v7 }
 0x447   :  { %4403 = vtanh.f32 %v1657_v58 }
 0x448   :  { %4405 = vtanh.f32 %v1670_v35  ;;  %v7263_v35 = vld [vmem:[#allocation3 + $0x1c8] sm:$0xff] }
 0x451   :  { %v4400_v14 = vpop.eup %4399 }
 0x452   :  { %v1663_v38 = vadd.f32 1.0, %v4400_v14  ;;  %v7266_v14 = vld [vmem:[#allocation3 + $0x1d8] sm:$0xff] }
 0x453   :  { %v4402_v32 = vpop.eup %4401 }
 0x454   :  { %v1664_v15 = vmul.f32 0.5, %v1663_v38  ;;  %v1667_v33 = vadd.f32 1.0, %v4402_v32  ;;  %v4404_v49 = vpop.eup %4403  ;;  %v7269_v38 = vld [vmem:[#allocation3 + $0x1c0] sm:$0xff]  ;;  %v7272_v32 = vld [vmem:[#allocation3 + $0x1d0] sm:$0xff] }
 0x455   :  { %v4406_v10 = vpop.eup %4405 }
 0x456   :  { %v1668_v13 = vmul.f32 0.5, %v1667_v33  ;;  %v1675_v37 = vmul.f32 %v4404_v49, %v1664_v15  ;;  %v1672_v9 = vadd.f32 1.0, %v4406_v10  ;;  %v7275_v15 = vld [vmem:[#allocation3 + $0x1a8] sm:$0xff]  ;;  %v7278_v33 = vld [vmem:[#allocation3 + $0x1b8] sm:$0xff]  ;;  %v7284_v49 = vld [vmem:[#allocation3 + $0x1b0] sm:$0xff] }
 0x457   :  { %v7299_v10 = vld [vmem:[#allocation3 + $0x168] sm:$0xff] }
 0x458   :  { %v1674_v16 = vmul.f32 %v1668_v13, %v10364_v11  ;;  %v1673_v45 = vmul.f32 0.5, %v1672_v9  ;;  %v7281_v13 = vld [vmem:[#allocation3 + $0x1a0] sm:$0xff]  ;;  %v7287_v11 = vld [vmem:[#allocation3 + $0x188] sm:$0xff] }
 0x459   :  { %v7323_v9 = vld [vmem:[#allocation3 + $0x128] sm:$0xff] }
 0x45a   :  { %v7238_v4 = vadd.f32 %v1675_v37, %v1674_v16  ;;  %v7290_v16 = vld [vmem:[#allocation3 + $0x198] sm:$0xff]  ;;  %v7293_v37 = vld [vmem:[#allocation3 + $0x180] sm:$0xff] }
 0x45c   :  { %4407 = vtanh.f32 %v7238_v4 }
 0x460   :  { %v1752_v5 = vpop.f32.mrf.mxu0  ;;  %v1823_v25 = vpop.f32.mrf.mxu1 }
 0x461   :  { %v1828_v21 = vadd.f32 %v1752_v5, %v10365_v19  ;;  %v1830_v6 = vadd.f32 %v1823_v25, %v10367_v42  ;;  %v7296_v5 = vld [vmem:[#allocation3 + $0x190] sm:$0xff]  ;;  %v7302_v19 = vld [vmem:[#allocation3 + $0x178] sm:$0xff]  ;;  %v7329_v42 = vld [vmem:[#allocation3 + $0x120] sm:$0xff] }
 0x462   :  { %v1754_v34 = vpop.f32.mrf.mxu0  ;;  %v1825_v46 = vpop.f32.mrf.mxu1  ;;  %v7308_v25 = vld [vmem:[#allocation3 + $0x170] sm:$0xff] }
 0x463   :  { %v1832_v36 = vadd.f32 %v1828_v21, %v10047_v12  ;;  %v1829_v39 = vadd.f32 %v1754_v34, %v10366_v0  ;;  %v1834_v50 = vadd.f32 %v1830_v6, %v6177_v22  ;;  %v1831_v55 = vadd.f32 %v1825_v46, %v10368_v54  ;;  %v7305_v21 = vld [vmem:[#allocation3 + $0x160] sm:$0xff]  ;;  %v7311_v34 = vld [vmem:[#allocation3 + $0x148] sm:$0xff]  ;;  %v7332_v6 = vld [vmem:[#allocation3 + $0x130] sm:$0xff] }
 0x464   :  { %v7317_v0 = vld [vmem:[#allocation3 + $0x140] sm:$0xff]  ;;  %v7344_v46 = vld [vmem:[#allocation3 + $0x110] sm:$0xff] }
 0x465   :  { %v1836_v41 = vmul.f32 0.5, %v1832_v36  ;;  %v1833_v43 = vadd.f32 %v1829_v39, %v10050_v51  ;;  %v1835_v56 = vadd.f32 %v1831_v55, %v6185_v20  ;;  %v7314_v36 = vld [vmem:[#allocation3 + $0x158] sm:$0xff]  ;;  %v7320_v39 = vld [vmem:[#allocation3 + $0x150] sm:$0xff]  ;;  %v7359_v55 = vld [vmem:[#allocation3 + $0xc8] sm:$0xff] }
 0x466   :  { %v7356_v54 = vld [vmem:[#allocation3 + $0xf0] sm:$0xff] }
 0x467   :  { %4409 = vtanh.f32 %v1836_v41  ;;  %v1840_v44 = vmul.f32 0.5, %v1833_v43  ;;  %v1845_v57 = vmul.f32 0.5, %v1835_v56  ;;  %v7326_v41 = vld [vmem:[#allocation3 + $0x138] sm:$0xff]  ;;  %v7335_v43 = vld [vmem:[#allocation3 + $0x108] sm:$0xff] }
 0x468   :  { %v7362_v56 = vld [vmem:[#allocation3 + $0xd8] sm:$0xff] }
 0x469   :  { %v4408_v48 = vpop.eup %4407  ;;  %4411 = vtanh.f32 %v1840_v44  ;;  %v7338_v44 = vld [vmem:[#allocation3 + $0x118] sm:$0xff] }
 0x46a   :  { %v1678_v53 = vmul.f32 %v4408_v48, %v1673_v45  ;;  %4413 = vtanh.f32 %v1834_v50  ;;  %v7341_v45 = vld [vmem:[#allocation3 + $0x100] sm:$0xff]  ;;  %v7347_v48 = vld [vmem:[#allocation3 + $0xe8] sm:$0xff]  ;;  %v7350_v50 = vld [vmem:[#allocation3 + $0xf8] sm:$0xff] }
 0x46b   :  { %4415 = vtanh.f32 %v1845_v57  ;;  %v7365_v57 = vld [vmem:[#allocation3 + $0xc0] sm:$0xff] }
 0x46c   :  { %1918 = vmatprep.mubr.f32.mxu0 %v1678_v53  ;;  %1989 = vmatprep.mubr.f32.mxu1 %v1678_v53  ;;  %v7353_v53 = vld [vmem:[#allocation3 + $0xe0] sm:$0xff] }
 0x474   :  { %v4410_v59 = vpop.eup %4409 }
 0x475   :  { %v1838_v60 = vadd.f32 1.0, %v4410_v59  ;;  %v7368_v59 = vld [vmem:[#allocation3 + $0xd0] sm:$0xff] }
 0x476   :  { %v4412_v61 = vpop.eup %4411 }
 0x477   :  { %v1839_v62 = vmul.f32 0.5, %v1838_v60  ;;  %v1842_v63 = vadd.f32 1.0, %v4412_v61  ;;  %v4414_v29 = vpop.eup %4413  ;;  %v7371_v60 = vld [vmem:[#allocation3 + $0xa8] sm:$0xff]  ;;  %v7374_v61 = vld [vmem:[#allocation3 + $0xb8] sm:$0xff] }
 0x478   :  { %v4416_v17 = vpop.eup %4415  ;;  %10369 = vst [vmem:[#allocation186_spill] sm:$0xff] %v7374_v61 }
 0x479   :  { %v1843_v1 = vmul.f32 0.5, %v1842_v63  ;;  %v1850_v24 = vmul.f32 %v4414_v29, %v1839_v62  ;;  %v1847_v26 = vadd.f32 1.0, %v4416_v17  ;;  %v7377_v62 = vld [vmem:[#allocation3 + $0xa0] sm:$0xff]  ;;  %v7380_v63 = vld [vmem:[#allocation3 + $0xb0] sm:$0xff]  ;;  %v7386_v29 = vld [vmem:[#allocation3 + $0x98] sm:$0xff] }
 0x47a   :  { %10370 = vst [vmem:[#allocation188_spill] sm:$0xff] %v7377_v62  ;;  %10371 = vst [vmem:[#allocation189_spill] sm:$0xff] %v7380_v63  ;;  %v7395_v17 = vld [vmem:[#allocation3 + $0x68] sm:$0xff] }
 0x47b   :  { %v1849_v52 = vmul.f32 %v1843_v1, %v7026_v31  ;;  %v1848_v7 = vmul.f32 0.5, %v1847_v26  ;;  %v7260_v31 = vld [vmem:[#allocation3 + $0x1f0] sm:$0xff]  ;;  %v7383_v1 = vld [vmem:[#allocation3 + $0x88] sm:$0xff]  ;;  %10373 = vst [vmem:[#allocation36_spill] sm:$0xff] %v7386_v29  ;;  %10376 = vst [vmem:[#allocation44_spill] sm:$0xff] %v7395_v17 }
 0x47c   :  { %10372 = vst [vmem:[#allocation191_spill] sm:$0xff] %v7383_v1  ;;  %v7398_v26 = vld [vmem:[#allocation3 + $0x78] sm:$0xff] }
 0x47d   :  { %v7250_v18 = vadd.f32 %v1850_v24, %v1849_v52  ;;  %v7389_v52 = vld [vmem:[#allocation3 + $0x80] sm:$0xff]  ;;  %v7392_v24 = vld [vmem:[#allocation3 + $0x90] sm:$0xff]  ;;  %10377 = vst [vmem:[#allocation40_spill] sm:$0xff] %v7398_v26 }
 0x47e   :  { %10374 = vst [vmem:[#allocation41_spill] sm:$0xff] %v7389_v52  ;;  %10375 = vst [vmem:[#allocation38_spill] sm:$0xff] %v7392_v24 }
 0x47f   :  { %4417 = vtanh.f32 %v7250_v18 }
 0x48c   :  { %v4418_v58 = vpop.eup %4417 }
 0x48d   :  { %v7253_v28 = vmul.f32 %v4418_v58, %v1848_v7  ;;  %v7401_v7 = vld [vmem:[#allocation3 + $0x60] sm:$0xff]  ;;  %v7404_v58 = vld [vmem:[#allocation3 + $0x70] sm:$0xff] }
 0x48e   :  { %10378 = vst [vmem:[#allocation46_spill] sm:$0xff] %v7401_v7  ;;  %10379 = vst [vmem:[#allocation42_spill] sm:$0xff] %v7404_v58 }
 0x48f   :  { %1919 = vmatmul.mubr.f32.vlgmr.msra.gmra.mxu0 %v7253_v28  ;;  %1990 = vmatmul.mubr.f32.vlgmr.msra.gmra.mxu1 %v7253_v28 }
 0x490   :  { %2022 = vmatpush1.msra.mxu0 %v7257_v27  ;;  %2093 = vmatpush1.msra.mxu1 %v7260_v31 }
 0x491   :  { %2023 = vmatprep.subr.mxu0 %v7263_v35  ;;  %2094 = vmatprep.subr.mxu1 %v7266_v14 }
 0x492   :  { %2024 = vmatpush1.msra.mxu0 %v7269_v38  ;;  %2095 = vmatpush1.msra.mxu1 %v7272_v32 }
 0x493   :  { %2025 = vmatprep.subr.mxu0 %v7275_v15  ;;  %2096 = vmatprep.subr.mxu1 %v7278_v33 }
 0x494   :  { %2026 = vmatpush1.msra.mxu0 %v7281_v13  ;;  %2097 = vmatpush1.msra.mxu1 %v7284_v49 }
 0x495   :  { %2027 = vmatprep.subr.mxu0 %v7287_v11  ;;  %2098 = vmatprep.subr.mxu1 %v7290_v16 }
 0x496   :  { %2028 = vmatpush1.msra.mxu0 %v7293_v37  ;;  %2099 = vmatpush1.msra.mxu1 %v7296_v5 }
 0x497   :  { %2029 = vmatprep.subr.mxu0 %v7299_v10  ;;  %2100 = vmatprep.subr.mxu1 %v7302_v19 }
 0x498   :  { %2030 = vmatpush1.msra.mxu0 %v7305_v21  ;;  %2101 = vmatpush1.msra.mxu1 %v7308_v25 }
 0x499   :  { %2031 = vmatprep.subr.mxu0 %v7311_v34  ;;  %2102 = vmatprep.subr.mxu1 %v7314_v36 }
 0x49a   :  { %2032 = vmatpush1.msra.mxu0 %v7317_v0  ;;  %2103 = vmatpush1.msra.mxu1 %v7320_v39 }
 0x49b   :  { %2033 = vmatprep.subr.mxu0 %v7323_v9  ;;  %2104 = vmatprep.subr.mxu1 %v7326_v41 }
 0x49c   :  { %2034 = vmatpush1.msra.mxu0 %v7329_v42  ;;  %2105 = vmatpush1.msra.mxu1 %v7332_v6 }
 0x49d   :  { %2035 = vmatprep.subr.mxu0 %v7335_v43  ;;  %2106 = vmatprep.subr.mxu1 %v7338_v44 }
 0x49e   :  { %2036 = vmatpush1.msra.mxu0 %v7341_v45  ;;  %2107 = vmatpush1.msra.mxu1 %v7344_v46 }
 0x49f   :  { %2037 = vmatprep.subr.mxu0 %v7347_v48  ;;  %2108 = vmatprep.subr.mxu1 %v7350_v50 }
 0x4a0   :  { %2038 = vmatpush1.msra.mxu0 %v7353_v53  ;;  %2109 = vmatpush1.msra.mxu1 %v7356_v54 }
 0x4a1   :  { %2039 = vmatprep.subr.mxu0 %v7359_v55  ;;  %2110 = vmatprep.subr.mxu1 %v7362_v56 }
 0x4a2   :  { %2040 = vmatpush1.msra.mxu0 %v7365_v57  ;;  %2111 = vmatpush1.msra.mxu1 %v7368_v59 }
 0x4a3   :  { %2041 = vmatprep.subr.mxu0 %v7371_v60  ;;  %2112 = vmatprep.subr.mxu1 %v7374_v61 }
 0x4a4   :  { %2042 = vmatpush1.msra.mxu0 %v7377_v62  ;;  %2113 = vmatpush1.msra.mxu1 %v7380_v63 }
 0x4a5   :  { %2043 = vmatprep.subr.mxu0 %v7383_v1  ;;  %2114 = vmatprep.subr.mxu1 %v7386_v29 }
 0x4a6   :  { %2044 = vmatpush1.msra.mxu0 %v7389_v52  ;;  %2115 = vmatpush1.msra.mxu1 %v7392_v24  ;;  %v7407_v52 = vld [vmem:[#allocation3 + $0x48] sm:$0xff]  ;;  %v7410_v24 = vld [vmem:[#allocation3 + $0x58] sm:$0xff] }
 0x4a7   :  { %2045 = vmatprep.subr.mxu0 %v7395_v17  ;;  %2116 = vmatprep.subr.mxu1 %v7398_v26  ;;  %10380 = vst [vmem:[#allocation48_spill] sm:$0xff] %v7407_v52  ;;  %10381 = vst [vmem:[#allocation45_spill] sm:$0xff] %v7410_v24  ;;  %v7413_v17 = vld [vmem:[#allocation3 + $0x40] sm:$0xff]  ;;  %v7416_v26 = vld [vmem:[#allocation3 + $0x50] sm:$0xff] }
 0x4a8   :  { %2046 = vmatpush1.msra.mxu0 %v7401_v7  ;;  %2117 = vmatpush1.msra.mxu1 %v7404_v58  ;;  %10382 = vst [vmem:[#allocation50_spill] sm:$0xff] %v7413_v17  ;;  %10383 = vst [vmem:[#allocation47_spill] sm:$0xff] %v7416_v26  ;;  %v7419_v7 = vld [vmem:[#allocation3 + $0x28] sm:$0xff]  ;;  %v7422_v58 = vld [vmem:[#allocation3 + $0x38] sm:$0xff] }
 0x4a9   :  { %2047 = vmatprep.subr.mxu0 %v7407_v52  ;;  %2118 = vmatprep.subr.mxu1 %v7410_v24  ;;  %10384 = vst [vmem:[#allocation52_spill] sm:$0xff] %v7419_v7  ;;  %10385 = vst [vmem:[#allocation49_spill] sm:$0xff] %v7422_v58  ;;  %v7425_v52 = vld [vmem:[#allocation3 + $0x20] sm:$0xff]  ;;  %v7428_v24 = vld [vmem:[#allocation3 + $0x30] sm:$0xff] }
 0x4aa   :  { %2048 = vmatpush1.msra.mxu0 %v7413_v17  ;;  %2119 = vmatpush1.msra.mxu1 %v7416_v26  ;;  %10386 = vst [vmem:[#allocation53_spill] sm:$0xff] %v7425_v52  ;;  %10387 = vst [vmem:[#allocation51_spill] sm:$0xff] %v7428_v24  ;;  %v7431_v17 = vld [vmem:[#allocation3 + $0x8] sm:$0xff]  ;;  %v7434_v26 = vld [vmem:[#allocation3 + $0x18] sm:$0xff] }
 0x4ab   :  { %2049 = vmatprep.subr.mxu0 %v7419_v7  ;;  %2120 = vmatprep.subr.mxu1 %v7422_v58  ;;  %10388 = vst [vmem:[#allocation54_spill] sm:$0xff] %v7431_v17  ;;  %10389 = vst [vmem:[#allocation55_spill] sm:$0xff] %v7434_v26  ;;  %v7437_v7 = vld [vmem:[#allocation3] sm:$0xff]  ;;  %v7441_v58 = vld [vmem:[#allocation3 + $0x10] sm:$0xff] }
 0x4ac   :  { %2050 = vmatpush1.msra.mxu0 %v7425_v52  ;;  %2121 = vmatpush1.msra.mxu1 %v7428_v24  ;;  %10390 = vst [vmem:[#allocation56_spill] sm:$0xff] %v7437_v7  ;;  %10391 = vst [vmem:[#allocation57_spill] sm:$0xff] %v7441_v58  ;;  %v7456_v24 = vld [vmem:[#allocation5 + $0x1f0] sm:$0xff] }
 0x4ad   :  { %2051 = vmatprep.subr.mxu0 %v7431_v17  ;;  %2122 = vmatprep.subr.mxu1 %v7434_v26  ;;  %v7447_v17 = vld [vmem:[#allocation5 + $0x1e8] sm:$0xff]  ;;  %v7450_v26 = vld [vmem:[#allocation5 + $0x1f8] sm:$0xff]  ;;  %10395 = vst [vmem:[#allocation61_spill] sm:$0xff] %v7456_v24 }
 0x4ae   :  { %2052 = vmatpush1.msra.mxu0 %v7437_v7  ;;  %2085 = vmatprep.mubr.f32.mxu0 %v10230_v47  ;;  %10392 = vst [vmem:[#allocation58_spill] sm:$0xff] %v7447_v17  ;;  %10393 = vst [vmem:[#allocation59_spill] sm:$0xff] %v7450_v26  ;;  %v7453_v7 = vld [vmem:[#allocation5 + $0x1e0] sm:$0xff] }
 0x4af   :  { %2123 = vmatpush1.msra.mxu1 %v7441_v58  ;;  %2156 = vmatprep.mubr.f32.mxu1 %v10230_v47  ;;  %10394 = vst [vmem:[#allocation60_spill] sm:$0xff] %v7453_v7  ;;  %v7459_v58 = vld [vmem:[#allocation5 + $0x1c8] sm:$0xff] }
 0x4b0   :  { %2086 = vmatmul.mubr.f32.vlgmr.msra.gmra.mxu0 %v7253_v28  ;;  %2157 = vmatmul.mubr.f32.vlgmr.msra.gmra.mxu1 %v7253_v28  ;;  %10396 = vst [vmem:[#allocation62_spill] sm:$0xff] %v7459_v58  ;;  %v7462_v28 = vld [vmem:[#allocation5 + $0x1d8] sm:$0xff] }
 0x4b1   :  { %2189 = vmatprep.subr.mxu0 %v7447_v17  ;;  %2260 = vmatprep.subr.mxu1 %v7450_v26  ;;  %10397 = vst [vmem:[#allocation63_spill] sm:$0xff] %v7462_v28  ;;  %v7465_v17 = vld [vmem:[#allocation5 + $0x1c0] sm:$0xff]  ;;  %v7468_v26 = vld [vmem:[#allocation5 + $0x1d0] sm:$0xff] }
 0x4b2   :  { %2190 = vmatpush1.msra.mxu0 %v7453_v7  ;;  %2261 = vmatpush1.msra.mxu1 %v7456_v24  ;;  %10398 = vst [vmem:[#allocation64_spill] sm:$0xff] %v7465_v17  ;;  %10399 = vst [vmem:[#allocation65_spill] sm:$0xff] %v7468_v26  ;;  %v7471_v7 = vld [vmem:[#allocation5 + $0x1a8] sm:$0xff]  ;;  %v7474_v24 = vld [vmem:[#allocation5 + $0x1b8] sm:$0xff] }
 0x4b3   :  { %2191 = vmatprep.subr.mxu0 %v7459_v58  ;;  %2262 = vmatprep.subr.mxu1 %v7462_v28  ;;  %10400 = vst [vmem:[#allocation66_spill] sm:$0xff] %v7471_v7  ;;  %10401 = vst [vmem:[#allocation67_spill] sm:$0xff] %v7474_v24  ;;  %v7477_v58 = vld [vmem:[#allocation5 + $0x1a0] sm:$0xff]  ;;  %v7480_v28 = vld [vmem:[#allocation5 + $0x1b0] sm:$0xff] }
 0x4b4   :  { %2192 = vmatpush1.msra.mxu0 %v7465_v17  ;;  %2263 = vmatpush1.msra.mxu1 %v7468_v26  ;;  %10402 = vst [vmem:[#allocation68_spill] sm:$0xff] %v7477_v58  ;;  %10403 = vst [vmem:[#allocation69_spill] sm:$0xff] %v7480_v28  ;;  %v7483_v17 = vld [vmem:[#allocation5 + $0x188] sm:$0xff]  ;;  %v7486_v26 = vld [vmem:[#allocation5 + $0x198] sm:$0xff] }
 0x4b5   :  { %2193 = vmatprep.subr.mxu0 %v7471_v7  ;;  %2264 = vmatprep.subr.mxu1 %v7474_v24  ;;  %10404 = vst [vmem:[#allocation70_spill] sm:$0xff] %v7483_v17  ;;  %10405 = vst [vmem:[#allocation71_spill] sm:$0xff] %v7486_v26  ;;  %v7489_v7 = vld [vmem:[#allocation5 + $0x180] sm:$0xff]  ;;  %v7492_v24 = vld [vmem:[#allocation5 + $0x190] sm:$0xff] }
 0x4b6   :  { %2194 = vmatpush1.msra.mxu0 %v7477_v58  ;;  %2265 = vmatpush1.msra.mxu1 %v7480_v28  ;;  %10406 = vst [vmem:[#allocation72_spill] sm:$0xff] %v7489_v7  ;;  %10407 = vst [vmem:[#allocation73_spill] sm:$0xff] %v7492_v24  ;;  %v7495_v58 = vld [vmem:[#allocation5 + $0x168] sm:$0xff]  ;;  %v7498_v28 = vld [vmem:[#allocation5 + $0x178] sm:$0xff] }
 0x4b7   :  { %2195 = vmatprep.subr.mxu0 %v7483_v17  ;;  %2266 = vmatprep.subr.mxu1 %v7486_v26  ;;  %10408 = vst [vmem:[#allocation74_spill] sm:$0xff] %v7495_v58  ;;  %10409 = vst [vmem:[#allocation75_spill] sm:$0xff] %v7498_v28  ;;  %v7501_v17 = vld [vmem:[#allocation5 + $0x160] sm:$0xff]  ;;  %v7504_v26 = vld [vmem:[#allocation5 + $0x170] sm:$0xff] }
 0x4b8   :  { %2196 = vmatpush1.msra.mxu0 %v7489_v7  ;;  %2267 = vmatpush1.msra.mxu1 %v7492_v24  ;;  %10410 = vst [vmem:[#allocation76_spill] sm:$0xff] %v7501_v17  ;;  %10411 = vst [vmem:[#allocation77_spill] sm:$0xff] %v7504_v26  ;;  %v7507_v7 = vld [vmem:[#allocation5 + $0x148] sm:$0xff]  ;;  %v7510_v24 = vld [vmem:[#allocation5 + $0x158] sm:$0xff] }
 0x4b9   :  { %2197 = vmatprep.subr.mxu0 %v7495_v58  ;;  %2268 = vmatprep.subr.mxu1 %v7498_v28  ;;  %10412 = vst [vmem:[#allocation78_spill] sm:$0xff] %v7507_v7  ;;  %10413 = vst [vmem:[#allocation79_spill] sm:$0xff] %v7510_v24  ;;  %v7513_v58 = vld [vmem:[#allocation5 + $0x140] sm:$0xff]  ;;  %v7516_v28 = vld [vmem:[#allocation5 + $0x150] sm:$0xff] }
 0x4ba   :  { %2198 = vmatpush1.msra.mxu0 %v7501_v17  ;;  %2269 = vmatpush1.msra.mxu1 %v7504_v26  ;;  %10414 = vst [vmem:[#allocation80_spill] sm:$0xff] %v7513_v58  ;;  %10415 = vst [vmem:[#allocation81_spill] sm:$0xff] %v7516_v28  ;;  %v7519_v17 = vld [vmem:[#allocation5 + $0x128] sm:$0xff]  ;;  %v7522_v26 = vld [vmem:[#allocation5 + $0x138] sm:$0xff] }
 0x4bb   :  { %2199 = vmatprep.subr.mxu0 %v7507_v7  ;;  %2270 = vmatprep.subr.mxu1 %v7510_v24  ;;  %10416 = vst [vmem:[#allocation82_spill] sm:$0xff] %v7519_v17  ;;  %10417 = vst [vmem:[#allocation83_spill] sm:$0xff] %v7522_v26  ;;  %v7525_v7 = vld [vmem:[#allocation5 + $0x120] sm:$0xff]  ;;  %v7528_v24 = vld [vmem:[#allocation5 + $0x130] sm:$0xff] }
 0x4bc   :  { %2200 = vmatpush1.msra.mxu0 %v7513_v58  ;;  %2271 = vmatpush1.msra.mxu1 %v7516_v28  ;;  %10418 = vst [vmem:[#allocation84_spill] sm:$0xff] %v7525_v7  ;;  %10419 = vst [vmem:[#allocation85_spill] sm:$0xff] %v7528_v24  ;;  %v7531_v58 = vld [vmem:[#allocation5 + $0x108] sm:$0xff]  ;;  %v7534_v28 = vld [vmem:[#allocation5 + $0x118] sm:$0xff] }
 0x4bd   :  { %2201 = vmatprep.subr.mxu0 %v7519_v17  ;;  %2272 = vmatprep.subr.mxu1 %v7522_v26  ;;  %10420 = vst [vmem:[#allocation86_spill] sm:$0xff] %v7531_v58  ;;  %10421 = vst [vmem:[#allocation87_spill] sm:$0xff] %v7534_v28  ;;  %v7537_v17 = vld [vmem:[#allocation5 + $0x100] sm:$0xff]  ;;  %v7540_v26 = vld [vmem:[#allocation5 + $0x110] sm:$0xff] }
 0x4be   :  { %2202 = vmatpush1.msra.mxu0 %v7525_v7  ;;  %2273 = vmatpush1.msra.mxu1 %v7528_v24  ;;  %10422 = vst [vmem:[#allocation88_spill] sm:$0xff] %v7537_v17  ;;  %10423 = vst [vmem:[#allocation89_spill] sm:$0xff] %v7540_v26  ;;  %v7543_v7 = vld [vmem:[#allocation5 + $0xe8] sm:$0xff]  ;;  %v7546_v24 = vld [vmem:[#allocation5 + $0xf8] sm:$0xff] }
 0x4bf   :  { %2203 = vmatprep.subr.mxu0 %v7531_v58  ;;  %2274 = vmatprep.subr.mxu1 %v7534_v28  ;;  %10424 = vst [vmem:[#allocation90_spill] sm:$0xff] %v7543_v7  ;;  %10425 = vst [vmem:[#allocation91_spill] sm:$0xff] %v7546_v24  ;;  %v7549_v58 = vld [vmem:[#allocation5 + $0xe0] sm:$0xff]  ;;  %v7552_v28 = vld [vmem:[#allocation5 + $0xf0] sm:$0xff] }
 0x4c0   :  { %2204 = vmatpush1.msra.mxu0 %v7537_v17  ;;  %2275 = vmatpush1.msra.mxu1 %v7540_v26  ;;  %10426 = vst [vmem:[#allocation92_spill] sm:$0xff] %v7549_v58  ;;  %10427 = vst [vmem:[#allocation93_spill] sm:$0xff] %v7552_v28  ;;  %v7555_v17 = vld [vmem:[#allocation5 + $0xc8] sm:$0xff]  ;;  %v7558_v26 = vld [vmem:[#allocation5 + $0xd8] sm:$0xff] }
 0x4c1   :  { %2205 = vmatprep.subr.mxu0 %v7543_v7  ;;  %2276 = vmatprep.subr.mxu1 %v7546_v24  ;;  %10428 = vst [vmem:[#allocation94_spill] sm:$0xff] %v7555_v17  ;;  %10429 = vst [vmem:[#allocation95_spill] sm:$0xff] %v7558_v26  ;;  %v7561_v7 = vld [vmem:[#allocation5 + $0xc0] sm:$0xff]  ;;  %v7564_v24 = vld [vmem:[#allocation5 + $0xd0] sm:$0xff] }
 0x4c2   :  { %2206 = vmatpush1.msra.mxu0 %v7549_v58  ;;  %2277 = vmatpush1.msra.mxu1 %v7552_v28  ;;  %10430 = vst [vmem:[#allocation96_spill] sm:$0xff] %v7561_v7  ;;  %10431 = vst [vmem:[#allocation97_spill] sm:$0xff] %v7564_v24  ;;  %v7567_v58 = vld [vmem:[#allocation5 + $0xa8] sm:$0xff]  ;;  %v7570_v28 = vld [vmem:[#allocation5 + $0xb8] sm:$0xff] }
 0x4c3   :  { %2207 = vmatprep.subr.mxu0 %v7555_v17  ;;  %2278 = vmatprep.subr.mxu1 %v7558_v26  ;;  %10432 = vst [vmem:[#allocation98_spill] sm:$0xff] %v7567_v58  ;;  %10433 = vst [vmem:[#allocation99_spill] sm:$0xff] %v7570_v28  ;;  %v7573_v17 = vld [vmem:[#allocation5 + $0xa0] sm:$0xff]  ;;  %v7576_v26 = vld [vmem:[#allocation5 + $0xb0] sm:$0xff] }
 0x4c4   :  { %2208 = vmatpush1.msra.mxu0 %v7561_v7  ;;  %2279 = vmatpush1.msra.mxu1 %v7564_v24  ;;  %10434 = vst [vmem:[#allocation100_spill] sm:$0xff] %v7573_v17  ;;  %10435 = vst [vmem:[#allocation101_spill] sm:$0xff] %v7576_v26  ;;  %v7579_v7 = vld [vmem:[#allocation5 + $0x88] sm:$0xff]  ;;  %v7582_v24 = vld [vmem:[#allocation5 + $0x98] sm:$0xff] }
 0x4c5   :  { %2209 = vmatprep.subr.mxu0 %v7567_v58  ;;  %2280 = vmatprep.subr.mxu1 %v7570_v28  ;;  %10436 = vst [vmem:[#allocation102_spill] sm:$0xff] %v7579_v7  ;;  %10437 = vst [vmem:[#allocation103_spill] sm:$0xff] %v7582_v24  ;;  %v7585_v58 = vld [vmem:[#allocation5 + $0x80] sm:$0xff]  ;;  %v7588_v28 = vld [vmem:[#allocation5 + $0x90] sm:$0xff] }
 0x4c6   :  { %2210 = vmatpush1.msra.mxu0 %v7573_v17  ;;  %2281 = vmatpush1.msra.mxu1 %v7576_v26  ;;  %10438 = vst [vmem:[#allocation104_spill] sm:$0xff] %v7585_v58  ;;  %10439 = vst [vmem:[#allocation105_spill] sm:$0xff] %v7588_v28  ;;  %v7591_v17 = vld [vmem:[#allocation5 + $0x68] sm:$0xff]  ;;  %v7594_v26 = vld [vmem:[#allocation5 + $0x78] sm:$0xff] }
 0x4c7   :  { %2211 = vmatprep.subr.mxu0 %v7579_v7  ;;  %2282 = vmatprep.subr.mxu1 %v7582_v24  ;;  %10440 = vst [vmem:[#allocation106_spill] sm:$0xff] %v7591_v17  ;;  %10441 = vst [vmem:[#allocation107_spill] sm:$0xff] %v7594_v26  ;;  %v7597_v7 = vld [vmem:[#allocation5 + $0x60] sm:$0xff]  ;;  %v7600_v24 = vld [vmem:[#allocation5 + $0x70] sm:$0xff] }
 0x4c8   :  { %2212 = vmatpush1.msra.mxu0 %v7585_v58  ;;  %2283 = vmatpush1.msra.mxu1 %v7588_v28  ;;  %10442 = vst [vmem:[#allocation108_spill] sm:$0xff] %v7597_v7  ;;  %10443 = vst [vmem:[#allocation109_spill] sm:$0xff] %v7600_v24  ;;  %v7603_v58 = vld [vmem:[#allocation5 + $0x48] sm:$0xff]  ;;  %v7606_v28 = vld [vmem:[#allocation5 + $0x58] sm:$0xff] }
 0x4c9   :  { %2213 = vmatprep.subr.mxu0 %v7591_v17  ;;  %2284 = vmatprep.subr.mxu1 %v7594_v26  ;;  %10444 = vst [vmem:[#allocation110_spill] sm:$0xff] %v7603_v58  ;;  %10445 = vst [vmem:[#allocation111_spill] sm:$0xff] %v7606_v28  ;;  %v7609_v17 = vld [vmem:[#allocation5 + $0x40] sm:$0xff]  ;;  %v7612_v26 = vld [vmem:[#allocation5 + $0x50] sm:$0xff] }
 0x4ca   :  { %2214 = vmatpush1.msra.mxu0 %v7597_v7  ;;  %2285 = vmatpush1.msra.mxu1 %v7600_v24  ;;  %10446 = vst [vmem:[#allocation112_spill] sm:$0xff] %v7609_v17  ;;  %10447 = vst [vmem:[#allocation113_spill] sm:$0xff] %v7612_v26  ;;  %v7615_v7 = vld [vmem:[#allocation5 + $0x28] sm:$0xff]  ;;  %v7618_v24 = vld [vmem:[#allocation5 + $0x38] sm:$0xff] }
 0x4cb   :  { %2215 = vmatprep.subr.mxu0 %v7603_v58  ;;  %2286 = vmatprep.subr.mxu1 %v7606_v28  ;;  %10448 = vst [vmem:[#allocation114_spill] sm:$0xff] %v7615_v7  ;;  %10449 = vst [vmem:[#allocation115_spill] sm:$0xff] %v7618_v24  ;;  %v7621_v58 = vld [vmem:[#allocation5 + $0x20] sm:$0xff]  ;;  %v7624_v28 = vld [vmem:[#allocation5 + $0x30] sm:$0xff] }
 0x4cc   :  { %2216 = vmatpush1.msra.mxu0 %v7609_v17  ;;  %2287 = vmatpush1.msra.mxu1 %v7612_v26  ;;  %10450 = vst [vmem:[#allocation116_spill] sm:$0xff] %v7621_v58  ;;  %10451 = vst [vmem:[#allocation117_spill] sm:$0xff] %v7624_v28  ;;  %v7627_v17 = vld [vmem:[#allocation5 + $0x8] sm:$0xff]  ;;  %v7630_v26 = vld [vmem:[#allocation5 + $0x18] sm:$0xff] }
 0x4cd   :  { %2217 = vmatprep.subr.mxu0 %v7615_v7  ;;  %2288 = vmatprep.subr.mxu1 %v7618_v24  ;;  %10452 = vst [vmem:[#allocation118_spill] sm:$0xff] %v7627_v17  ;;  %10453 = vst [vmem:[#allocation119_spill] sm:$0xff] %v7630_v26  ;;  %v7633_v7 = vld [vmem:[#allocation5] sm:$0xff]  ;;  %v7636_v24 = vld [vmem:[#allocation5 + $0x10] sm:$0xff] }
 0x4ce   :  { %2218 = vmatpush1.msra.mxu0 %v7621_v58  ;;  %2289 = vmatpush1.msra.mxu1 %v7624_v28  ;;  %10454 = vst [vmem:[#allocation120_spill] sm:$0xff] %v7633_v7  ;;  %10455 = vst [vmem:[#allocation121_spill] sm:$0xff] %v7636_v24  ;;  %v7639_v58 = vld [vmem:[#allocation5 + $0x3e8] sm:$0xff]  ;;  %v7642_v28 = vld [vmem:[#allocation5 + $0x3f8] sm:$0xff] }
 0x4cf   :  { %2219 = vmatprep.subr.mxu0 %v7627_v17  ;;  %2290 = vmatprep.subr.mxu1 %v7630_v26  ;;  %10456 = vst [vmem:[#allocation122_spill] sm:$0xff] %v7639_v58  ;;  %10457 = vst [vmem:[#allocation123_spill] sm:$0xff] %v7642_v28  ;;  %v7645_v17 = vld [vmem:[#allocation5 + $0x3e0] sm:$0xff]  ;;  %v7648_v26 = vld [vmem:[#allocation5 + $0x3f0] sm:$0xff] }
 0x4d0   :  { %2220 = vmatpush1.msra.mxu0 %v7633_v7  ;;  %2291 = vmatpush1.msra.mxu1 %v7636_v24  ;;  %10458 = vst [vmem:[#allocation124_spill] sm:$0xff] %v7645_v17  ;;  %10459 = vst [vmem:[#allocation125_spill] sm:$0xff] %v7648_v26  ;;  %v7651_v7 = vld [vmem:[#allocation5 + $0x3c8] sm:$0xff]  ;;  %v7654_v24 = vld [vmem:[#allocation5 + $0x3d8] sm:$0xff] }
 0x4d1   :  { %2221 = vmatprep.subr.mxu0 %v7639_v58  ;;  %2292 = vmatprep.subr.mxu1 %v7642_v28  ;;  %10460 = vst [vmem:[#allocation126_spill] sm:$0xff] %v7651_v7  ;;  %10461 = vst [vmem:[#allocation127_spill] sm:$0xff] %v7654_v24  ;;  %v7657_v58 = vld [vmem:[#allocation5 + $0x3c0] sm:$0xff]  ;;  %v7660_v28 = vld [vmem:[#allocation5 + $0x3d0] sm:$0xff] }
 0x4d2   :  { %2222 = vmatpush2.msra.mxu0 %v7645_v17  ;;  %2293 = vmatpush2.msra.mxu1 %v7648_v26  ;;  %10462 = vst [vmem:[#allocation128_spill] sm:$0xff] %v7657_v58  ;;  %10463 = vst [vmem:[#allocation129_spill] sm:$0xff] %v7660_v28  ;;  %v7663_v17 = vld [vmem:[#allocation5 + $0x3a8] sm:$0xff]  ;;  %v7666_v26 = vld [vmem:[#allocation5 + $0x3b8] sm:$0xff] }
 0x4d3   :  { %2223 = vmatprep.subr.mxu0 %v7651_v7  ;;  %2294 = vmatprep.subr.mxu1 %v7654_v24  ;;  %10464 = vst [vmem:[#allocation130_spill] sm:$0xff] %v7663_v17  ;;  %10465 = vst [vmem:[#allocation131_spill] sm:$0xff] %v7666_v26  ;;  %v7669_v7 = vld [vmem:[#allocation5 + $0x3a0] sm:$0xff]  ;;  %v7672_v24 = vld [vmem:[#allocation5 + $0x3b0] sm:$0xff] }
 0x4d4   :  { %2224 = vmatpush2.msra.mxu0 %v7657_v58  ;;  %2295 = vmatpush2.msra.mxu1 %v7660_v28  ;;  %10466 = vst [vmem:[#allocation132_spill] sm:$0xff] %v7669_v7  ;;  %10467 = vst [vmem:[#allocation133_spill] sm:$0xff] %v7672_v24  ;;  %v7675_v58 = vld [vmem:[#allocation5 + $0x388] sm:$0xff]  ;;  %v7678_v28 = vld [vmem:[#allocation5 + $0x398] sm:$0xff] }
 0x4d5   :  { %2225 = vmatprep.subr.mxu0 %v7663_v17  ;;  %2296 = vmatprep.subr.mxu1 %v7666_v26  ;;  %10468 = vst [vmem:[#allocation134_spill] sm:$0xff] %v7675_v58  ;;  %10469 = vst [vmem:[#allocation135_spill] sm:$0xff] %v7678_v28  ;;  %v7681_v17 = vld [vmem:[#allocation5 + $0x380] sm:$0xff]  ;;  %v7684_v26 = vld [vmem:[#allocation5 + $0x390] sm:$0xff] }
 0x4d6   :  { %2226 = vmatpush2.msra.mxu0 %v7669_v7  ;;  %2297 = vmatpush2.msra.mxu1 %v7672_v24  ;;  %10470 = vst [vmem:[#allocation136_spill] sm:$0xff] %v7681_v17  ;;  %10471 = vst [vmem:[#allocation137_spill] sm:$0xff] %v7684_v26  ;;  %v7687_v7 = vld [vmem:[#allocation5 + $0x368] sm:$0xff]  ;;  %v7690_v24 = vld [vmem:[#allocation5 + $0x378] sm:$0xff] }
 0x4d7   :  { %2227 = vmatprep.subr.mxu0 %v7675_v58  ;;  %2298 = vmatprep.subr.mxu1 %v7678_v28  ;;  %10472 = vst [vmem:[#allocation138_spill] sm:$0xff] %v7687_v7  ;;  %10473 = vst [vmem:[#allocation139_spill] sm:$0xff] %v7690_v24  ;;  %v7693_v58 = vld [vmem:[#allocation5 + $0x360] sm:$0xff]  ;;  %v7696_v28 = vld [vmem:[#allocation5 + $0x370] sm:$0xff] }
 0x4d8   :  { %2228 = vmatpush2.msra.mxu0 %v7681_v17  ;;  %2299 = vmatpush2.msra.mxu1 %v7684_v26  ;;  %10474 = vst [vmem:[#allocation140_spill] sm:$0xff] %v7693_v58  ;;  %10475 = vst [vmem:[#allocation141_spill] sm:$0xff] %v7696_v28  ;;  %v7699_v17 = vld [vmem:[#allocation5 + $0x348] sm:$0xff]  ;;  %v7702_v26 = vld [vmem:[#allocation5 + $0x358] sm:$0xff] }
 0x4d9   :  { %2229 = vmatprep.subr.mxu0 %v7687_v7  ;;  %2300 = vmatprep.subr.mxu1 %v7690_v24  ;;  %10476 = vst [vmem:[#allocation142_spill] sm:$0xff] %v7699_v17  ;;  %10477 = vst [vmem:[#allocation143_spill] sm:$0xff] %v7702_v26  ;;  %v7705_v7 = vld [vmem:[#allocation5 + $0x340] sm:$0xff]  ;;  %v7708_v24 = vld [vmem:[#allocation5 + $0x350] sm:$0xff] }
 0x4da   :  { %2230 = vmatpush2.msra.mxu0 %v7693_v58  ;;  %2301 = vmatpush2.msra.mxu1 %v7696_v28  ;;  %10478 = vst [vmem:[#allocation144_spill] sm:$0xff] %v7705_v7  ;;  %10479 = vst [vmem:[#allocation145_spill] sm:$0xff] %v7708_v24  ;;  %v7711_v58 = vld [vmem:[#allocation5 + $0x328] sm:$0xff]  ;;  %v7714_v28 = vld [vmem:[#allocation5 + $0x338] sm:$0xff] }
 0x4db   :  { %2231 = vmatprep.subr.mxu0 %v7699_v17  ;;  %2302 = vmatprep.subr.mxu1 %v7702_v26  ;;  %10480 = vst [vmem:[#allocation146_spill] sm:$0xff] %v7711_v58  ;;  %10481 = vst [vmem:[#allocation147_spill] sm:$0xff] %v7714_v28  ;;  %v7717_v17 = vld [vmem:[#allocation5 + $0x320] sm:$0xff]  ;;  %v7720_v26 = vld [vmem:[#allocation5 + $0x330] sm:$0xff] }
 0x4dc   :  { %2232 = vmatpush2.msra.mxu0 %v7705_v7  ;;  %2303 = vmatpush2.msra.mxu1 %v7708_v24  ;;  %10482 = vst [vmem:[#allocation148_spill] sm:$0xff] %v7717_v17  ;;  %10483 = vst [vmem:[#allocation149_spill] sm:$0xff] %v7720_v26  ;;  %v7723_v7 = vld [vmem:[#allocation5 + $0x308] sm:$0xff]  ;;  %v7726_v24 = vld [vmem:[#allocation5 + $0x318] sm:$0xff] }
 0x4dd   :  { %2233 = vmatprep.subr.mxu0 %v7711_v58  ;;  %2304 = vmatprep.subr.mxu1 %v7714_v28  ;;  %10484 = vst [vmem:[#allocation150_spill] sm:$0xff] %v7723_v7  ;;  %10485 = vst [vmem:[#allocation151_spill] sm:$0xff] %v7726_v24  ;;  %v7729_v58 = vld [vmem:[#allocation5 + $0x300] sm:$0xff]  ;;  %v7732_v28 = vld [vmem:[#allocation5 + $0x310] sm:$0xff] }
 0x4de   :  { %2234 = vmatpush2.msra.mxu0 %v7717_v17  ;;  %2305 = vmatpush2.msra.mxu1 %v7720_v26  ;;  %10486 = vst [vmem:[#allocation152_spill] sm:$0xff] %v7729_v58  ;;  %10487 = vst [vmem:[#allocation153_spill] sm:$0xff] %v7732_v28  ;;  %v7735_v17 = vld [vmem:[#allocation5 + $0x2e8] sm:$0xff]  ;;  %v7738_v26 = vld [vmem:[#allocation5 + $0x2f8] sm:$0xff] }
 0x4df   :  { %2235 = vmatprep.subr.mxu0 %v7723_v7  ;;  %2306 = vmatprep.subr.mxu1 %v7726_v24  ;;  %10488 = vst [vmem:[#allocation154_spill] sm:$0xff] %v7735_v17  ;;  %10489 = vst [vmem:[#allocation155_spill] sm:$0xff] %v7738_v26  ;;  %v7741_v7 = vld [vmem:[#allocation5 + $0x2e0] sm:$0xff]  ;;  %v7744_v24 = vld [vmem:[#allocation5 + $0x2f0] sm:$0xff] }
 0x4e0   :  { %2236 = vmatpush2.msra.mxu0 %v7729_v58  ;;  %2307 = vmatpush2.msra.mxu1 %v7732_v28  ;;  %10490 = vst [vmem:[#allocation156_spill] sm:$0xff] %v7741_v7  ;;  %10491 = vst [vmem:[#allocation157_spill] sm:$0xff] %v7744_v24  ;;  %v7747_v58 = vld [vmem:[#allocation5 + $0x2c8] sm:$0xff]  ;;  %v7750_v28 = vld [vmem:[#allocation5 + $0x2d8] sm:$0xff] }
 0x4e1   :  { %2237 = vmatprep.subr.mxu0 %v7735_v17  ;;  %2308 = vmatprep.subr.mxu1 %v7738_v26  ;;  %10492 = vst [vmem:[#allocation158_spill] sm:$0xff] %v7747_v58  ;;  %10493 = vst [vmem:[#allocation159_spill] sm:$0xff] %v7750_v28  ;;  %v7753_v17 = vld [vmem:[#allocation5 + $0x2c0] sm:$0xff]  ;;  %v7756_v26 = vld [vmem:[#allocation5 + $0x2d0] sm:$0xff] }
 0x4e2   :  { %2238 = vmatpush2.msra.mxu0 %v7741_v7  ;;  %2309 = vmatpush2.msra.mxu1 %v7744_v24  ;;  %10494 = vst [vmem:[#allocation160_spill] sm:$0xff] %v7753_v17  ;;  %10495 = vst [vmem:[#allocation161_spill] sm:$0xff] %v7756_v26  ;;  %v7759_v7 = vld [vmem:[#allocation5 + $0x2a8] sm:$0xff]  ;;  %v7762_v24 = vld [vmem:[#allocation5 + $0x2b8] sm:$0xff] }
 0x4e3   :  { %2239 = vmatprep.subr.mxu0 %v7747_v58  ;;  %2310 = vmatprep.subr.mxu1 %v7750_v28  ;;  %10496 = vst [vmem:[#allocation162_spill] sm:$0xff] %v7759_v7  ;;  %10497 = vst [vmem:[#allocation163_spill] sm:$0xff] %v7762_v24  ;;  %v7765_v58 = vld [vmem:[#allocation5 + $0x2a0] sm:$0xff]  ;;  %v7768_v28 = vld [vmem:[#allocation5 + $0x2b0] sm:$0xff] }
 0x4e4   :  { %2240 = vmatpush2.msra.mxu0 %v7753_v17  ;;  %2311 = vmatpush2.msra.mxu1 %v7756_v26  ;;  %10498 = vst [vmem:[#allocation164_spill] sm:$0xff] %v7765_v58  ;;  %10499 = vst [vmem:[#allocation165_spill] sm:$0xff] %v7768_v28  ;;  %v7771_v17 = vld [vmem:[#allocation5 + $0x288] sm:$0xff]  ;;  %v7774_v26 = vld [vmem:[#allocation5 + $0x298] sm:$0xff] }
 0x4e5   :  { %2241 = vmatprep.subr.mxu0 %v7759_v7  ;;  %2312 = vmatprep.subr.mxu1 %v7762_v24  ;;  %10500 = vst [vmem:[#allocation166_spill] sm:$0xff] %v7771_v17  ;;  %10501 = vst [vmem:[#allocation167_spill] sm:$0xff] %v7774_v26  ;;  %v7777_v7 = vld [vmem:[#allocation5 + $0x280] sm:$0xff]  ;;  %v7780_v24 = vld [vmem:[#allocation5 + $0x290] sm:$0xff] }
 0x4e6   :  { %2242 = vmatpush2.msra.mxu0 %v7765_v58  ;;  %2313 = vmatpush2.msra.mxu1 %v7768_v28  ;;  %10502 = vst [vmem:[#allocation168_spill] sm:$0xff] %v7777_v7  ;;  %10503 = vst [vmem:[#allocation169_spill] sm:$0xff] %v7780_v24  ;;  %v7783_v58 = vld [vmem:[#allocation5 + $0x268] sm:$0xff]  ;;  %v7786_v28 = vld [vmem:[#allocation5 + $0x278] sm:$0xff] }
 0x4e7   :  { %2243 = vmatprep.subr.mxu0 %v7771_v17  ;;  %2314 = vmatprep.subr.mxu1 %v7774_v26  ;;  %10504 = vst [vmem:[#allocation170_spill] sm:$0xff] %v7783_v58  ;;  %10505 = vst [vmem:[#allocation171_spill] sm:$0xff] %v7786_v28  ;;  %v7789_v17 = vld [vmem:[#allocation5 + $0x260] sm:$0xff]  ;;  %v7792_v26 = vld [vmem:[#allocation5 + $0x270] sm:$0xff] }
 0x4e8   :  { %2244 = vmatpush2.msra.mxu0 %v7777_v7  ;;  %2315 = vmatpush2.msra.mxu1 %v7780_v24  ;;  %10506 = vst [vmem:[#allocation172_spill] sm:$0xff] %v7789_v17  ;;  %10507 = vst [vmem:[#allocation173_spill] sm:$0xff] %v7792_v26  ;;  %v7795_v7 = vld [vmem:[#allocation5 + $0x248] sm:$0xff]  ;;  %v7798_v24 = vld [vmem:[#allocation5 + $0x258] sm:$0xff] }
 0x4e9   :  { %2245 = vmatprep.subr.mxu0 %v7783_v58  ;;  %2316 = vmatprep.subr.mxu1 %v7786_v28  ;;  %10508 = vst [vmem:[#allocation174_spill] sm:$0xff] %v7795_v7  ;;  %10509 = vst [vmem:[#allocation175_spill] sm:$0xff] %v7798_v24  ;;  %v7801_v58 = vld [vmem:[#allocation5 + $0x240] sm:$0xff]  ;;  %v7804_v28 = vld [vmem:[#allocation5 + $0x250] sm:$0xff] }
 0x4ea   :  { %2246 = vmatpush2.msra.mxu0 %v7789_v17  ;;  %2317 = vmatpush2.msra.mxu1 %v7792_v26  ;;  %10510 = vst [vmem:[#allocation176_spill] sm:$0xff] %v7801_v58  ;;  %10511 = vst [vmem:[#allocation177_spill] sm:$0xff] %v7804_v28  ;;  %v7807_v17 = vld [vmem:[#allocation5 + $0x228] sm:$0xff]  ;;  %v7810_v26 = vld [vmem:[#allocation5 + $0x238] sm:$0xff] }
 0x4eb   :  { %2247 = vmatprep.subr.mxu0 %v7795_v7  ;;  %2318 = vmatprep.subr.mxu1 %v7798_v24  ;;  %10512 = vst [vmem:[#allocation178_spill] sm:$0xff] %v7807_v17  ;;  %10513 = vst [vmem:[#allocation179_spill] sm:$0xff] %v7810_v26  ;;  %v7813_v7 = vld [vmem:[#allocation5 + $0x220] sm:$0xff]  ;;  %v7816_v24 = vld [vmem:[#allocation5 + $0x230] sm:$0xff] }
 0x4ec   :  { %2248 = vmatpush2.msra.mxu0 %v7801_v58  ;;  %2319 = vmatpush2.msra.mxu1 %v7804_v28  ;;  %10514 = vst [vmem:[#allocation180_spill] sm:$0xff] %v7813_v7  ;;  %10515 = vst [vmem:[#allocation181_spill] sm:$0xff] %v7816_v24  ;;  %v7819_v58 = vld [vmem:[#allocation5 + $0x208] sm:$0xff]  ;;  %v7822_v28 = vld [vmem:[#allocation5 + $0x218] sm:$0xff] }
 0x4ed   :  { %2249 = vmatprep.subr.mxu0 %v7807_v17  ;;  %2320 = vmatprep.subr.mxu1 %v7810_v26  ;;  %10516 = vst [vmem:[#allocation182_spill] sm:$0xff] %v7819_v58  ;;  %10517 = vst [vmem:[#allocation183_spill] sm:$0xff] %v7822_v28  ;;  %v7825_v17 = vld [vmem:[#allocation5 + $0x200] sm:$0xff]  ;;  %v7828_v26 = vld [vmem:[#allocation5 + $0x210] sm:$0xff] }
 0x4ee   :  { %2250 = vmatpush2.msra.mxu0 %v7813_v7  ;;  %2321 = vmatpush2.msra.mxu1 %v7816_v24  ;;  %10518 = vst [vmem:[#allocation212_spill] sm:$0xff] %v7825_v17  ;;  %10519 = vst [vmem:[#allocation184_spill] sm:$0xff] %v7828_v26 }
 0x4ef   :  { %2251 = vmatprep.subr.mxu0 %v7819_v58  ;;  %2322 = vmatprep.subr.mxu1 %v7822_v28 }
 0x4f0   :  { %2252 = vmatpush2.msra.mxu0 %v7825_v17  ;;  %2323 = vmatpush2.msra.mxu1 %v7828_v26 }
 0x4f1   :  { %2356 = vmatprep.subr.mxu0 %v7227_v2  ;;  %2427 = vmatprep.subr.mxu1 %v7230_v3 }
 0x54f   :  { %v1920_v24 = vpop.f32.mrf.mxu0  ;;  %v1991_v28 = vpop.f32.mrf.mxu1 }
 0x550   :  { %v1921_v7 = vadd.f32 %v1920_v24, %v10360_v30  ;;  %v1992_v17 = vadd.f32 %v1991_v28, %v10362_v8  ;;  %v10521_v28 = vld [vmem:[#allocation194_spill] sm:$0xff]  ;;  %v10523_v8 = vld [vmem:[#allocation197_spill] sm:$0xff] }
 0x551   :  { %v1922_v58 = vpop.f32.mrf.mxu0  ;;  %v1993_v1 = vpop.f32.mrf.mxu1 }
 0x552   :  { %v1996_v47 = vmul.f32 0.5, %v1921_v7  ;;  %v1923_v52 = vadd.f32 %v1922_v58, %v10361_v23  ;;  %v1994_v26 = vadd.f32 %v1993_v1, %v10363_v40 }
 0x554   :  { %4419 = vtanh.f32 %v1996_v47  ;;  %v2000_v29 = vmul.f32 0.5, %v1923_v52  ;;  %v2005_v2 = vmul.f32 0.5, %v1994_v26 }
 0x556   :  { %4421 = vtanh.f32 %v2000_v29 }
 0x557   :  { %4423 = vtanh.f32 %v1992_v17 }
 0x558   :  { %4425 = vtanh.f32 %v2005_v2 }
 0x561   :  { %v4420_v63 = vpop.eup %4419 }
 0x562   :  { %v1998_v3 = vadd.f32 1.0, %v4420_v63 }
 0x563   :  { %v4422_v62 = vpop.eup %4421 }
 0x564   :  { %v1999_v61 = vmul.f32 0.5, %v1998_v3  ;;  %v2002_v24 = vadd.f32 1.0, %v4422_v62  ;;  %v4424_v30 = vpop.eup %4423  ;;  %v10522_v3 = vld [vmem:[#allocation196_spill] sm:$0xff] }
 0x565   :  { %v4426_v17 = vpop.eup %4425 }
 0x566   :  { %v2003_v7 = vmul.f32 0.5, %v2002_v24  ;;  %v2010_v47 = vmul.f32 %v4424_v30, %v1999_v61  ;;  %v2007_v2 = vadd.f32 1.0, %v4426_v17 }
 0x568   :  { %v2009_v58 = vmul.f32 %v2003_v7, %v7238_v4  ;;  %v2008_v61 = vmul.f32 0.5, %v2007_v2 }
 0x56a   :  { %v7838_v52 = vadd.f32 %v2010_v47, %v2009_v58 }
 0x56c   :  { %10520 = vst [vmem:[#allocation185_spill] sm:$0xff] %v7838_v52  ;;  %4427 = vtanh.f32 %v7838_v52 }
 0x570   :  { %v2087_v29 = vpop.f32.mrf.mxu0  ;;  %v2158_v26 = vpop.f32.mrf.mxu1 }
 0x571   :  { %v2163_v1 = vadd.f32 %v2087_v29, %v10521_v28  ;;  %v2165_v23 = vadd.f32 %v2158_v26, %v10523_v8  ;;  %v10524_v28 = vld [vmem:[#allocation199_spill] sm:$0xff] }
 0x572   :  { %v2089_v40 = vpop.f32.mrf.mxu0  ;;  %v2160_v7 = vpop.f32.mrf.mxu1 }
 0x573   :  { %v2167_v63 = vadd.f32 %v2163_v1, %v10047_v12  ;;  %v2164_v62 = vadd.f32 %v2089_v40, %v10522_v3  ;;  %v2169_v47 = vadd.f32 %v2165_v23, %v6177_v22  ;;  %v2166_v52 = vadd.f32 %v2160_v7, %v10524_v28  ;;  %v10567_v28 = vld [vmem:[#allocation76_spill] sm:$0xff] }
 0x575   :  { %v2171_v24 = vmul.f32 0.5, %v2167_v63  ;;  %v2168_v30 = vadd.f32 %v2164_v62, %v10050_v51  ;;  %v2170_v40 = vadd.f32 %v2166_v52, %v6185_v20 }
 0x577   :  { %4429 = vtanh.f32 %v2171_v24  ;;  %v2175_v4 = vmul.f32 0.5, %v2168_v30  ;;  %v2180_v17 = vmul.f32 0.5, %v2170_v40  ;;  %v10568_v40 = vld [vmem:[#allocation77_spill] sm:$0xff] }
 0x579   :  { %v4428_v58 = vpop.eup %4427  ;;  %4431 = vtanh.f32 %v2175_v4 }
 0x57a   :  { %v2013_v29 = vmul.f32 %v4428_v58, %v2008_v61  ;;  %4433 = vtanh.f32 %v2169_v47  ;;  %v10565_v47 = vld [vmem:[#allocation74_spill] sm:$0xff] }
 0x57b   :  { %4435 = vtanh.f32 %v2180_v17  ;;  %v10569_v17 = vld [vmem:[#allocation78_spill] sm:$0xff] }
 0x57c   :  { %2253 = vmatprep.mubr.f32.mxu0 %v2013_v29  ;;  %2324 = vmatprep.mubr.f32.mxu1 %v2013_v29  ;;  %v10566_v29 = vld [vmem:[#allocation75_spill] sm:$0xff] }
 0x584   :  { %v4430_v8 = vpop.eup %4429 }
 0x585   :  { %v2173_v1 = vadd.f32 1.0, %v4430_v8  ;;  %v10570_v8 = vld [vmem:[#allocation79_spill] sm:$0xff] }
 0x586   :  { %v4432_v26 = vpop.eup %4431 }
 0x587   :  { %v2174_v63 = vmul.f32 0.5, %v2173_v1  ;;  %v2177_v3 = vadd.f32 1.0, %v4432_v26  ;;  %v4434_v2 = vpop.eup %4433  ;;  %v10571_v1 = vld [vmem:[#allocation80_spill] sm:$0xff]  ;;  %v10572_v26 = vld [vmem:[#allocation81_spill] sm:$0xff] }
 0x588   :  { %v4436_v4 = vpop.eup %4435 }
 0x589   :  { %v2178_v62 = vmul.f32 0.5, %v2177_v3  ;;  %v2185_v24 = vmul.f32 %v4434_v2, %v2174_v63  ;;  %v2182_v61 = vadd.f32 1.0, %v4436_v4  ;;  %v10573_v63 = vld [vmem:[#allocation82_spill] sm:$0xff]  ;;  %v10574_v3 = vld [vmem:[#allocation83_spill] sm:$0xff]  ;;  %v10576_v2 = vld [vmem:[#allocation85_spill] sm:$0xff] }
 0x58a   :  { %v10579_v4 = vld [vmem:[#allocation88_spill] sm:$0xff] }
 0x58b   :  { %v2184_v23 = vmul.f32 %v2178_v62, %v7250_v18  ;;  %v2183_v7 = vmul.f32 0.5, %v2182_v61  ;;  %v10525_v18 = vld [vmem:[#allocation186_spill] sm:$0xff]  ;;  %v10575_v62 = vld [vmem:[#allocation84_spill] sm:$0xff]  ;;  %v10580_v61 = vld [vmem:[#allocation89_spill] sm:$0xff] }
 0x58d   :  { %v7850_v30 = vadd.f32 %v2185_v24, %v2184_v23  ;;  %v10577_v23 = vld [vmem:[#allocation86_spill] sm:$0xff]  ;;  %v10578_v24 = vld [vmem:[#allocation87_spill] sm:$0xff] }
 0x58f   :  { %4437 = vtanh.f32 %v7850_v30 }
 0x59c   :  { %v4438_v52 = vpop.eup %4437 }
 0x59d   :  { %v7853_v58 = vmul.f32 %v4438_v52, %v2183_v7  ;;  %v10581_v7 = vld [vmem:[#allocation90_spill] sm:$0xff]  ;;  %v10582_v52 = vld [vmem:[#allocation91_spill] sm:$0xff] }
 0x59f   :  { %2254 = vmatmul.mubr.f32.vlgmr.msra.gmra.mxu0 %v7853_v58  ;;  %2325 = vmatmul.mubr.f32.vlgmr.msra.gmra.mxu1 %v7853_v58 }
 0x5a0   :  { %2357 = vmatpush1.msra.mxu0 %v7257_v27  ;;  %2428 = vmatpush1.msra.mxu1 %v7260_v31  ;;  %v10526_v27 = vld [vmem:[#allocation188_spill] sm:$0xff]  ;;  %v10527_v31 = vld [vmem:[#allocation189_spill] sm:$0xff] }
 0x5a1   :  { %2358 = vmatprep.subr.mxu0 %v7263_v35  ;;  %2429 = vmatprep.subr.mxu1 %v7266_v14  ;;  %v10528_v35 = vld [vmem:[#allocation191_spill] sm:$0xff]  ;;  %v10529_v14 = vld [vmem:[#allocation36_spill] sm:$0xff] }
 0x5a2   :  { %2359 = vmatpush1.msra.mxu0 %v7269_v38  ;;  %2430 = vmatpush1.msra.mxu1 %v7272_v32  ;;  %v10530_v38 = vld [vmem:[#allocation41_spill] sm:$0xff]  ;;  %v10531_v32 = vld [vmem:[#allocation38_spill] sm:$0xff] }
 0x5a3   :  { %2360 = vmatprep.subr.mxu0 %v7275_v15  ;;  %2431 = vmatprep.subr.mxu1 %v7278_v33  ;;  %v10532_v15 = vld [vmem:[#allocation44_spill] sm:$0xff] }
 0x5a4   :  { %2361 = vmatpush1.msra.mxu0 %v7281_v13  ;;  %2432 = vmatpush1.msra.mxu1 %v7284_v49  ;;  %v10533_v33 = vld [vmem:[#allocation40_spill] sm:$0xff]  ;;  %v10534_v13 = vld [vmem:[#allocation46_spill] sm:$0xff] }
 0x5a5   :  { %2362 = vmatprep.subr.mxu0 %v7287_v11  ;;  %2433 = vmatprep.subr.mxu1 %v7290_v16  ;;  %v10535_v49 = vld [vmem:[#allocation42_spill] sm:$0xff]  ;;  %v10536_v11 = vld [vmem:[#allocation48_spill] sm:$0xff]  ;;  %v10537_v16 = vld [vmem:[#allocation45_spill] sm:$0xff] }
 0x5a6   :  { %2363 = vmatpush1.msra.mxu0 %v7293_v37  ;;  %2434 = vmatpush1.msra.mxu1 %v7296_v5  ;;  %v10538_v37 = vld [vmem:[#allocation50_spill] sm:$0xff]  ;;  %v10539_v5 = vld [vmem:[#allocation47_spill] sm:$0xff] }
 0x5a7   :  { %2364 = vmatprep.subr.mxu0 %v7299_v10  ;;  %2435 = vmatprep.subr.mxu1 %v7302_v19  ;;  %v10540_v10 = vld [vmem:[#allocation52_spill] sm:$0xff]  ;;  %v10541_v19 = vld [vmem:[#allocation49_spill] sm:$0xff] }
 0x5a8   :  { %2365 = vmatpush1.msra.mxu0 %v7305_v21  ;;  %2436 = vmatpush1.msra.mxu1 %v7308_v25  ;;  %v10542_v21 = vld [vmem:[#allocation53_spill] sm:$0xff]  ;;  %v10543_v25 = vld [vmem:[#allocation51_spill] sm:$0xff] }
 0x5a9   :  { %2366 = vmatprep.subr.mxu0 %v7311_v34  ;;  %2437 = vmatprep.subr.mxu1 %v7314_v36  ;;  %v10544_v34 = vld [vmem:[#allocation54_spill] sm:$0xff]  ;;  %v10545_v36 = vld [vmem:[#allocation55_spill] sm:$0xff] }
 0x5aa   :  { %2367 = vmatpush1.msra.mxu0 %v7317_v0  ;;  %2438 = vmatpush1.msra.mxu1 %v7320_v39  ;;  %v10546_v0 = vld [vmem:[#allocation56_spill] sm:$0xff]  ;;  %v10547_v39 = vmov 0.0  }
 0x5ab   :  { %2368 = vmatprep.subr.mxu0 %v7323_v9  ;;  %2439 = vmatprep.subr.mxu1 %v7326_v41  ;;  %v10548_v9 = vld [vmem:[#allocation57_spill] sm:$0xff]  ;;  %v10549_v41 = vld [vmem:[#allocation58_spill] sm:$0xff] }
 0x5ac   :  { %2369 = vmatpush1.msra.mxu0 %v7329_v42  ;;  %2440 = vmatpush1.msra.mxu1 %v7332_v6  ;;  %v10550_v42 = vld [vmem:[#allocation59_spill] sm:$0xff]  ;;  %v10551_v6 = vld [vmem:[#allocation60_spill] sm:$0xff] }
 0x5ad   :  { %2370 = vmatprep.subr.mxu0 %v7335_v43  ;;  %2441 = vmatprep.subr.mxu1 %v7338_v44  ;;  %v10552_v43 = vld [vmem:[#allocation61_spill] sm:$0xff]  ;;  %v10553_v44 = vld [vmem:[#allocation62_spill] sm:$0xff] }
 0x5ae   :  { %2371 = vmatpush1.msra.mxu0 %v7341_v45  ;;  %2442 = vmatpush1.msra.mxu1 %v7344_v46  ;;  %v10554_v45 = vld [vmem:[#allocation63_spill] sm:$0xff]  ;;  %v10555_v46 = vld [vmem:[#allocation64_spill] sm:$0xff] }
 0x5af   :  { %2372 = vmatprep.subr.mxu0 %v7347_v48  ;;  %2443 = vmatprep.subr.mxu1 %v7350_v50  ;;  %v10556_v48 = vld [vmem:[#allocation65_spill] sm:$0xff]  ;;  %v10557_v50 = vld [vmem:[#allocation66_spill] sm:$0xff] }
 0x5b0   :  { %2373 = vmatpush1.msra.mxu0 %v7353_v53  ;;  %2444 = vmatpush1.msra.mxu1 %v7356_v54  ;;  %v10558_v53 = vld [vmem:[#allocation67_spill] sm:$0xff]  ;;  %v10559_v54 = vld [vmem:[#allocation68_spill] sm:$0xff] }
 0x5b1   :  { %2374 = vmatprep.subr.mxu0 %v7359_v55  ;;  %2445 = vmatprep.subr.mxu1 %v7362_v56  ;;  %v10560_v55 = vld [vmem:[#allocation69_spill] sm:$0xff]  ;;  %v10561_v56 = vld [vmem:[#allocation70_spill] sm:$0xff] }
 0x5b2   :  { %2375 = vmatpush1.msra.mxu0 %v7365_v57  ;;  %2446 = vmatpush1.msra.mxu1 %v7368_v59  ;;  %v10562_v57 = vld [vmem:[#allocation71_spill] sm:$0xff]  ;;  %v10563_v59 = vld [vmem:[#allocation72_spill] sm:$0xff] }
 0x5b3   :  { %2376 = vmatprep.subr.mxu0 %v7371_v60  ;;  %2447 = vmatprep.subr.mxu1 %v10525_v18  ;;  %v10564_v60 = vld [vmem:[#allocation73_spill] sm:$0xff] }
 0x5b4   :  { %2377 = vmatpush1.msra.mxu0 %v10526_v27  ;;  %2448 = vmatpush1.msra.mxu1 %v10527_v31  ;;  %v10584_v18 = vld [vmem:[#allocation93_spill] sm:$0xff]  ;;  %v10585_v27 = vld [vmem:[#allocation94_spill] sm:$0xff]  ;;  %v10586_v31 = vld [vmem:[#allocation95_spill] sm:$0xff] }
 0x5b5   :  { %2378 = vmatprep.subr.mxu0 %v10528_v35  ;;  %2449 = vmatprep.subr.mxu1 %v10529_v14  ;;  %v10587_v35 = vld [vmem:[#allocation96_spill] sm:$0xff]  ;;  %v10588_v14 = vld [vmem:[#allocation97_spill] sm:$0xff] }
 0x5b6   :  { %2379 = vmatpush1.msra.mxu0 %v10530_v38  ;;  %2450 = vmatpush1.msra.mxu1 %v10531_v32  ;;  %v10589_v38 = vld [vmem:[#allocation98_spill] sm:$0xff]  ;;  %v10590_v32 = vld [vmem:[#allocation99_spill] sm:$0xff] }
 0x5b7   :  { %2380 = vmatprep.subr.mxu0 %v10532_v15  ;;  %2451 = vmatprep.subr.mxu1 %v10533_v33  ;;  %v10591_v15 = vld [vmem:[#allocation100_spill] sm:$0xff]  ;;  %v10592_v33 = vld [vmem:[#allocation101_spill] sm:$0xff] }
 0x5b8   :  { %2381 = vmatpush1.msra.mxu0 %v10534_v13  ;;  %2452 = vmatpush1.msra.mxu1 %v10535_v49  ;;  %v10593_v13 = vld [vmem:[#allocation102_spill] sm:$0xff]  ;;  %v10594_v49 = vld [vmem:[#allocation103_spill] sm:$0xff] }
 0x5b9   :  { %2382 = vmatprep.subr.mxu0 %v10536_v11  ;;  %2453 = vmatprep.subr.mxu1 %v10537_v16  ;;  %v10595_v11 = vld [vmem:[#allocation104_spill] sm:$0xff]  ;;  %v10596_v16 = vld [vmem:[#allocation105_spill] sm:$0xff] }
 0x5ba   :  { %2383 = vmatpush1.msra.mxu0 %v10538_v37  ;;  %2454 = vmatpush1.msra.mxu1 %v10539_v5  ;;  %v10597_v37 = vld [vmem:[#allocation106_spill] sm:$0xff]  ;;  %v10598_v5 = vld [vmem:[#allocation107_spill] sm:$0xff] }
 0x5bb   :  { %2384 = vmatprep.subr.mxu0 %v10540_v10  ;;  %2455 = vmatprep.subr.mxu1 %v10541_v19  ;;  %v10599_v10 = vld [vmem:[#allocation108_spill] sm:$0xff]  ;;  %v10600_v19 = vld [vmem:[#allocation109_spill] sm:$0xff] }
 0x5bc   :  { %2385 = vmatpush1.msra.mxu0 %v10542_v21  ;;  %2456 = vmatpush1.msra.mxu1 %v10543_v25  ;;  %v10601_v21 = vld [vmem:[#allocation110_spill] sm:$0xff]  ;;  %v10602_v25 = vld [vmem:[#allocation111_spill] sm:$0xff] }
 0x5bd   :  { %2386 = vmatprep.subr.mxu0 %v10544_v34  ;;  %2457 = vmatprep.subr.mxu1 %v10545_v36  ;;  %v10603_v34 = vld [vmem:[#allocation112_spill] sm:$0xff]  ;;  %v10604_v36 = vld [vmem:[#allocation113_spill] sm:$0xff] }
 0x5be   :  { %2387 = vmatpush1.msra.mxu0 %v10546_v0  ;;  %2420 = vmatprep.mubr.f32.mxu0 %v10547_v39  ;;  %v10605_v0 = vld [vmem:[#allocation114_spill] sm:$0xff] }
 0x5bf   :  { %2458 = vmatpush1.msra.mxu1 %v10548_v9  ;;  %2491 = vmatprep.mubr.f32.mxu1 %v10547_v39  ;;  %v10606_v9 = vld [vmem:[#allocation115_spill] sm:$0xff] }
 0x5c0   :  { %2421 = vmatmul.mubr.f32.vlgmr.msra.gmra.mxu0 %v7853_v58  ;;  %2492 = vmatmul.mubr.f32.vlgmr.msra.gmra.mxu1 %v7853_v58  ;;  %v10583_v58 = vld [vmem:[#allocation92_spill] sm:$0xff] }
 0x5c1   :  { %2524 = vmatprep.subr.mxu0 %v10549_v41  ;;  %2595 = vmatprep.subr.mxu1 %v10550_v42  ;;  %v10607_v41 = vld [vmem:[#allocation116_spill] sm:$0xff]  ;;  %v10608_v42 = vld [vmem:[#allocation117_spill] sm:$0xff] }
 0x5c2   :  { %2525 = vmatpush1.msra.mxu0 %v10551_v6  ;;  %2596 = vmatpush1.msra.mxu1 %v10552_v43  ;;  %v10609_v6 = vld [vmem:[#allocation118_spill] sm:$0xff]  ;;  %v10610_v43 = vld [vmem:[#allocation119_spill] sm:$0xff] }
 0x5c3   :  { %2526 = vmatprep.subr.mxu0 %v10553_v44  ;;  %2597 = vmatprep.subr.mxu1 %v10554_v45  ;;  %v10611_v44 = vld [vmem:[#allocation120_spill] sm:$0xff]  ;;  %v10612_v45 = vld [vmem:[#allocation121_spill] sm:$0xff] }
 0x5c4   :  { %2527 = vmatpush1.msra.mxu0 %v10555_v46  ;;  %2598 = vmatpush1.msra.mxu1 %v10556_v48  ;;  %v10613_v46 = vld [vmem:[#allocation122_spill] sm:$0xff]  ;;  %v10614_v48 = vld [vmem:[#allocation123_spill] sm:$0xff] }
 0x5c5   :  { %2528 = vmatprep.subr.mxu0 %v10557_v50  ;;  %2599 = vmatprep.subr.mxu1 %v10558_v53  ;;  %v10615_v50 = vld [vmem:[#allocation124_spill] sm:$0xff]  ;;  %v10616_v53 = vld [vmem:[#allocation125_spill] sm:$0xff] }
 0x5c6   :  { %2529 = vmatpush1.msra.mxu0 %v10559_v54  ;;  %2600 = vmatpush1.msra.mxu1 %v10560_v55  ;;  %v10617_v54 = vld [vmem:[#allocation126_spill] sm:$0xff]  ;;  %v10618_v55 = vld [vmem:[#allocation127_spill] sm:$0xff] }
 0x5c7   :  { %2530 = vmatprep.subr.mxu0 %v10561_v56  ;;  %2601 = vmatprep.subr.mxu1 %v10562_v57  ;;  %v10619_v56 = vld [vmem:[#allocation128_spill] sm:$0xff]  ;;  %v10620_v57 = vld [vmem:[#allocation129_spill] sm:$0xff] }
 0x5c8   :  { %2531 = vmatpush1.msra.mxu0 %v10563_v59  ;;  %2602 = vmatpush1.msra.mxu1 %v10564_v60  ;;  %v10621_v59 = vld [vmem:[#allocation130_spill] sm:$0xff]  ;;  %v10622_v60 = vld [vmem:[#allocation131_spill] sm:$0xff] }
 0x5c9   :  { %2532 = vmatprep.subr.mxu0 %v10565_v47  ;;  %2603 = vmatprep.subr.mxu1 %v10566_v29  ;;  %v10623_v47 = vld [vmem:[#allocation132_spill] sm:$0xff]  ;;  %v10624_v29 = vld [vmem:[#allocation133_spill] sm:$0xff] }
 0x5ca   :  { %2533 = vmatpush1.msra.mxu0 %v10567_v28  ;;  %2604 = vmatpush1.msra.mxu1 %v10568_v40  ;;  %v10625_v28 = vld [vmem:[#allocation134_spill] sm:$0xff]  ;;  %v10626_v40 = vld [vmem:[#allocation135_spill] sm:$0xff] }
 0x5cb   :  { %2534 = vmatprep.subr.mxu0 %v10569_v17  ;;  %2605 = vmatprep.subr.mxu1 %v10570_v8  ;;  %v10627_v17 = vld [vmem:[#allocation136_spill] sm:$0xff]  ;;  %v10628_v8 = vld [vmem:[#allocation137_spill] sm:$0xff] }
 0x5cc   :  { %2535 = vmatpush1.msra.mxu0 %v10571_v1  ;;  %2606 = vmatpush1.msra.mxu1 %v10572_v26  ;;  %v10629_v1 = vld [vmem:[#allocation138_spill] sm:$0xff]  ;;  %v10630_v26 = vld [vmem:[#allocation139_spill] sm:$0xff] }
 0x5cd   :  { %2536 = vmatprep.subr.mxu0 %v10573_v63  ;;  %2607 = vmatprep.subr.mxu1 %v10574_v3  ;;  %v10631_v63 = vld [vmem:[#allocation140_spill] sm:$0xff]  ;;  %v10632_v3 = vld [vmem:[#allocation141_spill] sm:$0xff] }
 0x5ce   :  { %2537 = vmatpush1.msra.mxu0 %v10575_v62  ;;  %2608 = vmatpush1.msra.mxu1 %v10576_v2  ;;  %v10633_v62 = vld [vmem:[#allocation142_spill] sm:$0xff]  ;;  %v10634_v2 = vld [vmem:[#allocation143_spill] sm:$0xff] }
 0x5cf   :  { %2538 = vmatprep.subr.mxu0 %v10577_v23  ;;  %2609 = vmatprep.subr.mxu1 %v10578_v24  ;;  %v10635_v23 = vld [vmem:[#allocation144_spill] sm:$0xff]  ;;  %v10636_v24 = vld [vmem:[#allocation145_spill] sm:$0xff] }
 0x5d0   :  { %2539 = vmatpush1.msra.mxu0 %v10579_v4  ;;  %2610 = vmatpush1.msra.mxu1 %v10580_v61  ;;  %v10637_v4 = vld [vmem:[#allocation146_spill] sm:$0xff]  ;;  %v10638_v61 = vld [vmem:[#allocation147_spill] sm:$0xff] }
 0x5d1   :  { %2540 = vmatprep.subr.mxu0 %v10581_v7  ;;  %2611 = vmatprep.subr.mxu1 %v10582_v52  ;;  %v10639_v7 = vld [vmem:[#allocation148_spill] sm:$0xff]  ;;  %v10640_v52 = vld [vmem:[#allocation149_spill] sm:$0xff] }
 0x5d2   :  { %2541 = vmatpush1.msra.mxu0 %v10583_v58  ;;  %2612 = vmatpush1.msra.mxu1 %v10584_v18  ;;  %v10641_v58 = vld [vmem:[#allocation150_spill] sm:$0xff]  ;;  %v10642_v18 = vld [vmem:[#allocation151_spill] sm:$0xff] }
 0x5d3   :  { %2542 = vmatprep.subr.mxu0 %v10585_v27  ;;  %2613 = vmatprep.subr.mxu1 %v10586_v31  ;;  %v10643_v27 = vld [vmem:[#allocation152_spill] sm:$0xff]  ;;  %v10644_v31 = vld [vmem:[#allocation153_spill] sm:$0xff] }
 0x5d4   :  { %2543 = vmatpush1.msra.mxu0 %v10587_v35  ;;  %2614 = vmatpush1.msra.mxu1 %v10588_v14  ;;  %v10645_v35 = vld [vmem:[#allocation154_spill] sm:$0xff]  ;;  %v10646_v14 = vld [vmem:[#allocation155_spill] sm:$0xff] }
 0x5d5   :  { %2544 = vmatprep.subr.mxu0 %v10589_v38  ;;  %2615 = vmatprep.subr.mxu1 %v10590_v32  ;;  %v10647_v38 = vld [vmem:[#allocation156_spill] sm:$0xff]  ;;  %v10648_v32 = vld [vmem:[#allocation157_spill] sm:$0xff] }
 0x5d6   :  { %2545 = vmatpush1.msra.mxu0 %v10591_v15  ;;  %2616 = vmatpush1.msra.mxu1 %v10592_v33  ;;  %v10649_v15 = vld [vmem:[#allocation158_spill] sm:$0xff]  ;;  %v10650_v33 = vld [vmem:[#allocation159_spill] sm:$0xff] }
 0x5d7   :  { %2546 = vmatprep.subr.mxu0 %v10593_v13  ;;  %2617 = vmatprep.subr.mxu1 %v10594_v49  ;;  %v10651_v13 = vld [vmem:[#allocation160_spill] sm:$0xff]  ;;  %v10652_v49 = vld [vmem:[#allocation161_spill] sm:$0xff] }
 0x5d8   :  { %2547 = vmatpush1.msra.mxu0 %v10595_v11  ;;  %2618 = vmatpush1.msra.mxu1 %v10596_v16  ;;  %v10653_v11 = vld [vmem:[#allocation162_spill] sm:$0xff]  ;;  %v10654_v16 = vld [vmem:[#allocation163_spill] sm:$0xff] }
 0x5d9   :  { %2548 = vmatprep.subr.mxu0 %v10597_v37  ;;  %2619 = vmatprep.subr.mxu1 %v10598_v5  ;;  %v10655_v37 = vld [vmem:[#allocation164_spill] sm:$0xff]  ;;  %v10656_v5 = vld [vmem:[#allocation165_spill] sm:$0xff] }
 0x5da   :  { %2549 = vmatpush1.msra.mxu0 %v10599_v10  ;;  %2620 = vmatpush1.msra.mxu1 %v10600_v19  ;;  %v10657_v10 = vld [vmem:[#allocation166_spill] sm:$0xff]  ;;  %v10658_v19 = vld [vmem:[#allocation167_spill] sm:$0xff] }
 0x5db   :  { %2550 = vmatprep.subr.mxu0 %v10601_v21  ;;  %2621 = vmatprep.subr.mxu1 %v10602_v25  ;;  %v10659_v21 = vld [vmem:[#allocation168_spill] sm:$0xff]  ;;  %v10660_v25 = vld [vmem:[#allocation169_spill] sm:$0xff] }
 0x5dc   :  { %2551 = vmatpush1.msra.mxu0 %v10603_v34  ;;  %2622 = vmatpush1.msra.mxu1 %v10604_v36  ;;  %v10661_v34 = vld [vmem:[#allocation170_spill] sm:$0xff]  ;;  %v10662_v36 = vld [vmem:[#allocation171_spill] sm:$0xff] }
 0x5dd   :  { %2552 = vmatprep.subr.mxu0 %v10605_v0  ;;  %2623 = vmatprep.subr.mxu1 %v10606_v9  ;;  %v10663_v0 = vld [vmem:[#allocation172_spill] sm:$0xff]  ;;  %v10664_v9 = vld [vmem:[#allocation173_spill] sm:$0xff] }
 0x5de   :  { %2553 = vmatpush1.msra.mxu0 %v10607_v41  ;;  %2624 = vmatpush1.msra.mxu1 %v10608_v42  ;;  %v10665_v41 = vld [vmem:[#allocation174_spill] sm:$0xff]  ;;  %v10666_v42 = vld [vmem:[#allocation175_spill] sm:$0xff] }
 0x5df   :  { %2554 = vmatprep.subr.mxu0 %v10609_v6  ;;  %2625 = vmatprep.subr.mxu1 %v10610_v43  ;;  %v10667_v6 = vld [vmem:[#allocation176_spill] sm:$0xff]  ;;  %v10668_v43 = vld [vmem:[#allocation177_spill] sm:$0xff] }
 0x5e0   :  { %2555 = vmatpush1.msra.mxu0 %v10611_v44  ;;  %2626 = vmatpush1.msra.mxu1 %v10612_v45  ;;  %v10669_v44 = vld [vmem:[#allocation178_spill] sm:$0xff]  ;;  %v10670_v45 = vld [vmem:[#allocation179_spill] sm:$0xff] }
 0x5e1   :  { %2556 = vmatprep.subr.mxu0 %v10613_v46  ;;  %2627 = vmatprep.subr.mxu1 %v10614_v48  ;;  %v10671_v46 = vld [vmem:[#allocation180_spill] sm:$0xff]  ;;  %v10672_v48 = vld [vmem:[#allocation181_spill] sm:$0xff] }
 0x5e2   :  { %2557 = vmatpush2.msra.mxu0 %v10615_v50  ;;  %2628 = vmatpush2.msra.mxu1 %v10616_v53  ;;  %v10673_v50 = vld [vmem:[#allocation182_spill] sm:$0xff]  ;;  %v10674_v53 = vld [vmem:[#allocation183_spill] sm:$0xff] }
 0x5e3   :  { %2558 = vmatprep.subr.mxu0 %v10617_v54  ;;  %2629 = vmatprep.subr.mxu1 %v10618_v55  ;;  %v10675_v54 = vld [vmem:[#allocation212_spill] sm:$0xff] }
 0x5e4   :  { %2559 = vmatpush2.msra.mxu0 %v10619_v56  ;;  %2630 = vmatpush2.msra.mxu1 %v10620_v57  ;;  %v10676_v55 = vld [vmem:[#allocation184_spill] sm:$0xff]  ;;  %v8051_v56 = vld [vmem:[#allocation3 + $0x1e8] sm:$0xff] }
 0x5e5   :  { %2560 = vmatprep.subr.mxu0 %v10621_v59  ;;  %2631 = vmatprep.subr.mxu1 %v10622_v60  ;;  %v8054_v57 = vld [vmem:[#allocation3 + $0x1f8] sm:$0xff]  ;;  %v10677_v60 = vld [vmem:[#allocation34_spill] sm:$0xff] }
 0x5e6   :  { %2561 = vmatpush2.msra.mxu0 %v10623_v47  ;;  %2632 = vmatpush2.msra.mxu1 %v10624_v29 }
 0x5e7   :  { %2562 = vmatprep.subr.mxu0 %v10625_v28  ;;  %2633 = vmatprep.subr.mxu1 %v10626_v40  ;;  %v10678_v40 = vld [vmem:[#allocation37_spill] sm:$0xff] }
 0x5e8   :  { %2563 = vmatpush2.msra.mxu0 %v10627_v17  ;;  %2634 = vmatpush2.msra.mxu1 %v10628_v8 }
 0x5e9   :  { %2564 = vmatprep.subr.mxu0 %v10629_v1  ;;  %2635 = vmatprep.subr.mxu1 %v10630_v26  ;;  %v10679_v26 = vld [vmem:[#allocation35_spill] sm:$0xff] }
 0x5ea   :  { %2565 = vmatpush2.msra.mxu0 %v10631_v63  ;;  %2636 = vmatpush2.msra.mxu1 %v10632_v3 }
 0x5eb   :  { %2566 = vmatprep.subr.mxu0 %v10633_v62  ;;  %2637 = vmatprep.subr.mxu1 %v10634_v2  ;;  %v10680_v62 = vld [vmem:[#allocation39_spill] sm:$0xff] }
 0x5ec   :  { %2567 = vmatpush2.msra.mxu0 %v10635_v23  ;;  %2638 = vmatpush2.msra.mxu1 %v10636_v24 }
 0x5ed   :  { %2568 = vmatprep.subr.mxu0 %v10637_v4  ;;  %2639 = vmatprep.subr.mxu1 %v10638_v61 }
 0x5ee   :  { %2569 = vmatpush2.msra.mxu0 %v10639_v7  ;;  %2640 = vmatpush2.msra.mxu1 %v10640_v52 }
 0x5ef   :  { %2570 = vmatprep.subr.mxu0 %v10641_v58  ;;  %2641 = vmatprep.subr.mxu1 %v10642_v18 }
 0x5f0   :  { %2571 = vmatpush2.msra.mxu0 %v10643_v27  ;;  %2642 = vmatpush2.msra.mxu1 %v10644_v31  ;;  %v10681_v27 = vld [vmem:[#allocation185_spill] sm:$0xff] }
 0x5f1   :  { %2572 = vmatprep.subr.mxu0 %v10645_v35  ;;  %2643 = vmatprep.subr.mxu1 %v10646_v14 }
 0x5f2   :  { %2573 = vmatpush2.msra.mxu0 %v10647_v38  ;;  %2644 = vmatpush2.msra.mxu1 %v10648_v32 }
 0x5f3   :  { %2574 = vmatprep.subr.mxu0 %v10649_v15  ;;  %2645 = vmatprep.subr.mxu1 %v10650_v33  ;;  %v10682_v15 = vld [vmem:[#allocation198_spill] sm:$0xff] }
 0x5f4   :  { %2575 = vmatpush2.msra.mxu0 %v10651_v13  ;;  %2646 = vmatpush2.msra.mxu1 %v10652_v49 }
 0x5f5   :  { %2576 = vmatprep.subr.mxu0 %v10653_v11  ;;  %2647 = vmatprep.subr.mxu1 %v10654_v16  ;;  %v10683_v16 = vld [vmem:[#allocation200_spill] sm:$0xff] }
 0x5f6   :  { %2577 = vmatpush2.msra.mxu0 %v10655_v37  ;;  %2648 = vmatpush2.msra.mxu1 %v10656_v5 }
 0x5f7   :  { %2578 = vmatprep.subr.mxu0 %v10657_v10  ;;  %2649 = vmatprep.subr.mxu1 %v10658_v19  ;;  %v10684_v19 = vld [vmem:[#allocation201_spill] sm:$0xff] }
 0x5f8   :  { %2579 = vmatpush2.msra.mxu0 %v10659_v21  ;;  %2650 = vmatpush2.msra.mxu1 %v10660_v25 }
 0x5f9   :  { %2580 = vmatprep.subr.mxu0 %v10661_v34  ;;  %2651 = vmatprep.subr.mxu1 %v10662_v36 }
 0x5fa   :  { %2581 = vmatpush2.msra.mxu0 %v10663_v0  ;;  %2652 = vmatpush2.msra.mxu1 %v10664_v9 }
 0x5fb   :  { %2582 = vmatprep.subr.mxu0 %v10665_v41  ;;  %2653 = vmatprep.subr.mxu1 %v10666_v42 }
 0x5fc   :  { %2583 = vmatpush2.msra.mxu0 %v10667_v6  ;;  %2654 = vmatpush2.msra.mxu1 %v10668_v43  ;;  %v10685_v6 = vld [vmem:[#allocation203_spill] sm:$0xff] }
 0x5fd   :  { %2584 = vmatprep.subr.mxu0 %v10669_v44  ;;  %2655 = vmatprep.subr.mxu1 %v10670_v45 }
 0x5fe   :  { %2585 = vmatpush2.msra.mxu0 %v10671_v46  ;;  %2656 = vmatpush2.msra.mxu1 %v10672_v48 }
 0x5ff   :  { %2586 = vmatprep.subr.mxu0 %v10673_v50  ;;  %2657 = vmatprep.subr.mxu1 %v10674_v53 }
 0x600   :  { %2587 = vmatpush2.msra.mxu0 %v10675_v54  ;;  %2658 = vmatpush2.msra.mxu1 %v10676_v55 }
 0x601   :  { %2691 = vmatprep.subr.mxu0 %v8051_v56  ;;  %2762 = vmatprep.subr.mxu1 %v8054_v57 }
 0x65f   :  { %v2255_v59 = vpop.f32.mrf.mxu0  ;;  %v2326_v8 = vpop.f32.mrf.mxu1 }
 0x660   :  { %v2256_v47 = vadd.f32 %v2255_v59, %v10677_v60  ;;  %v2327_v63 = vadd.f32 %v2326_v8, %v10679_v26 }
 0x661   :  { %v2257_v29 = vpop.f32.mrf.mxu0  ;;  %v2328_v3 = vpop.f32.mrf.mxu1 }
 0x662   :  { %v2331_v28 = vmul.f32 0.5, %v2256_v47  ;;  %v2258_v17 = vadd.f32 %v2257_v29, %v10678_v40  ;;  %v2329_v2 = vadd.f32 %v2328_v3, %v10680_v62 }
 0x664   :  { %4439 = vtanh.f32 %v2331_v28  ;;  %v2335_v1 = vmul.f32 0.5, %v2258_v17  ;;  %v2340_v23 = vmul.f32 0.5, %v2329_v2  ;;  %v8081_v2 = vld [vmem:[#allocation3 + $0x1e0] sm:$0xff] }
 0x666   :  { %4441 = vtanh.f32 %v2335_v1 }
 0x667   :  { %4443 = vtanh.f32 %v2327_v63 }
 0x668   :  { %4445 = vtanh.f32 %v2340_v23  ;;  %v8087_v23 = vld [vmem:[#allocation3 + $0x1c8] sm:$0xff] }
 0x671   :  { %v4440_v24 = vpop.eup %4439 }
 0x672   :  { %v2333_v4 = vadd.f32 1.0, %v4440_v24  ;;  %v8090_v24 = vld [vmem:[#allocation3 + $0x1d8] sm:$0xff] }
 0x673   :  { %v4442_v61 = vpop.eup %4441 }
 0x674   :  { %v2334_v7 = vmul.f32 0.5, %v2333_v4  ;;  %v2337_v52 = vadd.f32 1.0, %v4442_v61  ;;  %v4444_v18 = vpop.eup %4443  ;;  %v8093_v4 = vld [vmem:[#allocation3 + $0x1c0] sm:$0xff]  ;;  %v8096_v61 = vld [vmem:[#allocation3 + $0x1d0] sm:$0xff] }
 0x675   :  { %v4446_v32 = vpop.eup %4445 }
 0x676   :  { %v2338_v58 = vmul.f32 0.5, %v2337_v52  ;;  %v2345_v35 = vmul.f32 %v4444_v18, %v2334_v7  ;;  %v2342_v5 = vadd.f32 1.0, %v4446_v32  ;;  %v8099_v7 = vld [vmem:[#allocation3 + $0x1a8] sm:$0xff]  ;;  %v8102_v52 = vld [vmem:[#allocation3 + $0x1b8] sm:$0xff]  ;;  %v8108_v18 = vld [vmem:[#allocation3 + $0x1b0] sm:$0xff] }
 0x677   :  { %v8123_v32 = vld [vmem:[#allocation3 + $0x168] sm:$0xff] }
 0x678   :  { %v2344_v31 = vmul.f32 %v2338_v58, %v10681_v27  ;;  %v2343_v36 = vmul.f32 0.5, %v2342_v5  ;;  %v8105_v58 = vld [vmem:[#allocation3 + $0x1a0] sm:$0xff]  ;;  %v8111_v27 = vld [vmem:[#allocation3 + $0x188] sm:$0xff] }
 0x679   :  { %v8147_v5 = vld [vmem:[#allocation3 + $0x128] sm:$0xff] }
 0x67a   :  { %v8062_v14 = vadd.f32 %v2345_v35, %v2344_v31  ;;  %v8114_v31 = vld [vmem:[#allocation3 + $0x198] sm:$0xff]  ;;  %v8117_v35 = vld [vmem:[#allocation3 + $0x180] sm:$0xff] }
 0x67c   :  { %4447 = vtanh.f32 %v8062_v14 }
 0x680   :  { %v2422_v38 = vpop.f32.mrf.mxu0  ;;  %v2493_v13 = vpop.f32.mrf.mxu1 }
 0x681   :  { %v2498_v33 = vadd.f32 %v2422_v38, %v10682_v15  ;;  %v2500_v21 = vadd.f32 %v2493_v13, %v10684_v19  ;;  %v8120_v38 = vld [vmem:[#allocation3 + $0x190] sm:$0xff]  ;;  %v8126_v15 = vld [vmem:[#allocation3 + $0x178] sm:$0xff]  ;;  %v8153_v19 = vld [vmem:[#allocation3 + $0x120] sm:$0xff] }
 0x682   :  { %v2424_v49 = vpop.f32.mrf.mxu0  ;;  %v2495_v0 = vpop.f32.mrf.mxu1  ;;  %v8132_v13 = vld [vmem:[#allocation3 + $0x170] sm:$0xff] }
 0x683   :  { %v2502_v11 = vadd.f32 %v2498_v33, %v10047_v12  ;;  %v2499_v37 = vadd.f32 %v2424_v49, %v10683_v16  ;;  %v2504_v41 = vadd.f32 %v2500_v21, %v6177_v22  ;;  %v2501_v43 = vadd.f32 %v2495_v0, %v10685_v6  ;;  %v8129_v33 = vld [vmem:[#allocation3 + $0x160] sm:$0xff]  ;;  %v8135_v49 = vld [vmem:[#allocation3 + $0x148] sm:$0xff]  ;;  %v8156_v21 = vld [vmem:[#allocation3 + $0x130] sm:$0xff] }
 0x684   :  { %v8141_v16 = vld [vmem:[#allocation3 + $0x140] sm:$0xff]  ;;  %v8168_v0 = vld [vmem:[#allocation3 + $0x110] sm:$0xff] }
 0x685   :  { %v2506_v10 = vmul.f32 0.5, %v2502_v11  ;;  %v2503_v25 = vadd.f32 %v2499_v37, %v10050_v51  ;;  %v2505_v44 = vadd.f32 %v2501_v43, %v6185_v20  ;;  %v8138_v11 = vld [vmem:[#allocation3 + $0x158] sm:$0xff]  ;;  %v8144_v37 = vld [vmem:[#allocation3 + $0x150] sm:$0xff]  ;;  %v8183_v43 = vld [vmem:[#allocation3 + $0xc8] sm:$0xff] }
 0x686   :  { %v8180_v6 = vld [vmem:[#allocation3 + $0xf0] sm:$0xff] }
 0x687   :  { %4449 = vtanh.f32 %v2506_v10  ;;  %v2510_v34 = vmul.f32 0.5, %v2503_v25  ;;  %v2515_v45 = vmul.f32 0.5, %v2505_v44  ;;  %v8150_v10 = vld [vmem:[#allocation3 + $0x138] sm:$0xff]  ;;  %v8159_v25 = vld [vmem:[#allocation3 + $0x108] sm:$0xff] }
 0x688   :  { %v8186_v44 = vld [vmem:[#allocation3 + $0xd8] sm:$0xff] }
 0x689   :  { %v4448_v9 = vpop.eup %4447  ;;  %4451 = vtanh.f32 %v2510_v34  ;;  %v8162_v34 = vld [vmem:[#allocation3 + $0x118] sm:$0xff] }
 0x68a   :  { %v2348_v42 = vmul.f32 %v4448_v9, %v2343_v36  ;;  %4453 = vtanh.f32 %v2504_v41  ;;  %v8165_v36 = vld [vmem:[#allocation3 + $0x100] sm:$0xff]  ;;  %v8171_v9 = vld [vmem:[#allocation3 + $0xe8] sm:$0xff]  ;;  %v8174_v41 = vld [vmem:[#allocation3 + $0xf8] sm:$0xff] }
 0x68b   :  { %4455 = vtanh.f32 %v2515_v45  ;;  %v8189_v45 = vld [vmem:[#allocation3 + $0xc0] sm:$0xff] }
 0x68c   :  { %2588 = vmatprep.mubr.f32.mxu0 %v2348_v42  ;;  %2659 = vmatprep.mubr.f32.mxu1 %v2348_v42  ;;  %v8177_v42 = vld [vmem:[#allocation3 + $0xe0] sm:$0xff] }
 0x694   :  { %v4450_v46 = vpop.eup %4449 }
 0x695   :  { %v2508_v48 = vadd.f32 1.0, %v4450_v46  ;;  %v8192_v46 = vld [vmem:[#allocation3 + $0xd0] sm:$0xff] }
 0x696   :  { %v4452_v50 = vpop.eup %4451 }
 0x697   :  { %v2509_v53 = vmul.f32 0.5, %v2508_v48  ;;  %v2512_v54 = vadd.f32 1.0, %v4452_v50  ;;  %v4454_v59 = vpop.eup %4453  ;;  %v8195_v48 = vld [vmem:[#allocation3 + $0xa8] sm:$0xff]  ;;  %v8198_v50 = vld [vmem:[#allocation3 + $0xb8] sm:$0xff] }
 0x698   :  { %v4456_v17 = vpop.eup %4455  ;;  %10686 = vst [vmem:[#allocation214_spill] sm:$0xff] %v8198_v50 }
 0x699   :  { %v2513_v55 = vmul.f32 0.5, %v2512_v54  ;;  %v2520_v29 = vmul.f32 %v4454_v59, %v2509_v53  ;;  %v2517_v8 = vadd.f32 1.0, %v4456_v17  ;;  %v8201_v53 = vld [vmem:[#allocation3 + $0xa0] sm:$0xff]  ;;  %v8204_v54 = vld [vmem:[#allocation3 + $0xb0] sm:$0xff]  ;;  %v8210_v59 = vld [vmem:[#allocation3 + $0x98] sm:$0xff] }
 0x69a   :  { %10687 = vst [vmem:[#allocation187_spill] sm:$0xff] %v8201_v53  ;;  %10688 = vst [vmem:[#allocation217_spill] sm:$0xff] %v8204_v54  ;;  %v8219_v17 = vld [vmem:[#allocation3 + $0x68] sm:$0xff] }
 0x69b   :  { %v2519_v47 = vmul.f32 %v2513_v55, %v7850_v30  ;;  %v2518_v1 = vmul.f32 0.5, %v2517_v8  ;;  %v8084_v30 = vld [vmem:[#allocation3 + $0x1f0] sm:$0xff]  ;;  %v8207_v55 = vld [vmem:[#allocation3 + $0x88] sm:$0xff]  ;;  %10690 = vst [vmem:[#allocation190_spill] sm:$0xff] %v8210_v59  ;;  %10693 = vst [vmem:[#allocation195_spill] sm:$0xff] %v8219_v17 }
 0x69c   :  { %10689 = vst [vmem:[#allocation218_spill] sm:$0xff] %v8207_v55  ;;  %v8222_v8 = vld [vmem:[#allocation3 + $0x78] sm:$0xff] }
 0x69d   :  { %v8074_v28 = vadd.f32 %v2520_v29, %v2519_v47  ;;  %v8213_v47 = vld [vmem:[#allocation3 + $0x80] sm:$0xff]  ;;  %v8216_v29 = vld [vmem:[#allocation3 + $0x90] sm:$0xff]  ;;  %10694 = vst [vmem:[#allocation194_spill] sm:$0xff] %v8222_v8 }
 0x69e   :  { %10691 = vst [vmem:[#allocation192_spill] sm:$0xff] %v8213_v47  ;;  %10692 = vst [vmem:[#allocation193_spill] sm:$0xff] %v8216_v29 }
 0x69f   :  { %4457 = vtanh.f32 %v8074_v28 }
 0x6ac   :  { %v4458_v63 = vpop.eup %4457 }
 0x6ad   :  { %v8077_v3 = vmul.f32 %v4458_v63, %v2518_v1  ;;  %v8225_v1 = vld [vmem:[#allocation3 + $0x60] sm:$0xff]  ;;  %v8228_v63 = vld [vmem:[#allocation3 + $0x70] sm:$0xff] }
 0x6ae   :  { %10695 = vst [vmem:[#allocation196_spill] sm:$0xff] %v8225_v1  ;;  %10696 = vst [vmem:[#allocation197_spill] sm:$0xff] %v8228_v63 }
 0x6af   :  { %2589 = vmatmul.mubr.f32.vlgmr.msra.gmra.mxu0 %v8077_v3  ;;  %2660 = vmatmul.mubr.f32.vlgmr.msra.gmra.mxu1 %v8077_v3 }
 0x6b0   :  { %2692 = vmatpush1.msra.mxu0 %v8081_v2  ;;  %2763 = vmatpush1.msra.mxu1 %v8084_v30 }
 0x6b1   :  { %2693 = vmatprep.subr.mxu0 %v8087_v23  ;;  %2764 = vmatprep.subr.mxu1 %v8090_v24 }
 0x6b2   :  { %2694 = vmatpush1.msra.mxu0 %v8093_v4  ;;  %2765 = vmatpush1.msra.mxu1 %v8096_v61 }
 0x6b3   :  { %2695 = vmatprep.subr.mxu0 %v8099_v7  ;;  %2766 = vmatprep.subr.mxu1 %v8102_v52 }
 0x6b4   :  { %2696 = vmatpush1.msra.mxu0 %v8105_v58  ;;  %2767 = vmatpush1.msra.mxu1 %v8108_v18 }
 0x6b5   :  { %2697 = vmatprep.subr.mxu0 %v8111_v27  ;;  %2768 = vmatprep.subr.mxu1 %v8114_v31 }
 0x6b6   :  { %2698 = vmatpush1.msra.mxu0 %v8117_v35  ;;  %2769 = vmatpush1.msra.mxu1 %v8120_v38 }
 0x6b7   :  { %2699 = vmatprep.subr.mxu0 %v8123_v32  ;;  %2770 = vmatprep.subr.mxu1 %v8126_v15 }
 0x6b8   :  { %2700 = vmatpush1.msra.mxu0 %v8129_v33  ;;  %2771 = vmatpush1.msra.mxu1 %v8132_v13 }
 0x6b9   :  { %2701 = vmatprep.subr.mxu0 %v8135_v49  ;;  %2772 = vmatprep.subr.mxu1 %v8138_v11 }
 0x6ba   :  { %2702 = vmatpush1.msra.mxu0 %v8141_v16  ;;  %2773 = vmatpush1.msra.mxu1 %v8144_v37 }
 0x6bb   :  { %2703 = vmatprep.subr.mxu0 %v8147_v5  ;;  %2774 = vmatprep.subr.mxu1 %v8150_v10 }
 0x6bc   :  { %2704 = vmatpush1.msra.mxu0 %v8153_v19  ;;  %2775 = vmatpush1.msra.mxu1 %v8156_v21 }
 0x6bd   :  { %2705 = vmatprep.subr.mxu0 %v8159_v25  ;;  %2776 = vmatprep.subr.mxu1 %v8162_v34 }
 0x6be   :  { %2706 = vmatpush1.msra.mxu0 %v8165_v36  ;;  %2777 = vmatpush1.msra.mxu1 %v8168_v0 }
 0x6bf   :  { %2707 = vmatprep.subr.mxu0 %v8171_v9  ;;  %2778 = vmatprep.subr.mxu1 %v8174_v41 }
 0x6c0   :  { %2708 = vmatpush1.msra.mxu0 %v8177_v42  ;;  %2779 = vmatpush1.msra.mxu1 %v8180_v6 }
 0x6c1   :  { %2709 = vmatprep.subr.mxu0 %v8183_v43  ;;  %2780 = vmatprep.subr.mxu1 %v8186_v44 }
 0x6c2   :  { %2710 = vmatpush1.msra.mxu0 %v8189_v45  ;;  %2781 = vmatpush1.msra.mxu1 %v8192_v46 }
 0x6c3   :  { %2711 = vmatprep.subr.mxu0 %v8195_v48  ;;  %2782 = vmatprep.subr.mxu1 %v8198_v50 }
 0x6c4   :  { %2712 = vmatpush1.msra.mxu0 %v8201_v53  ;;  %2783 = vmatpush1.msra.mxu1 %v8204_v54 }
 0x6c5   :  { %2713 = vmatprep.subr.mxu0 %v8207_v55  ;;  %2784 = vmatprep.subr.mxu1 %v8210_v59 }
 0x6c6   :  { %2714 = vmatpush1.msra.mxu0 %v8213_v47  ;;  %2785 = vmatpush1.msra.mxu1 %v8216_v29  ;;  %v8231_v47 = vld [vmem:[#allocation3 + $0x48] sm:$0xff]  ;;  %v8234_v29 = vld [vmem:[#allocation3 + $0x58] sm:$0xff] }
 0x6c7   :  { %2715 = vmatprep.subr.mxu0 %v8219_v17  ;;  %2786 = vmatprep.subr.mxu1 %v8222_v8  ;;  %10697 = vst [vmem:[#allocation199_spill] sm:$0xff] %v8231_v47  ;;  %10698 = vst [vmem:[#allocation186_spill] sm:$0xff] %v8234_v29  ;;  %v8237_v17 = vld [vmem:[#allocation3 + $0x40] sm:$0xff]  ;;  %v8240_v8 = vld [vmem:[#allocation3 + $0x50] sm:$0xff] }
 0x6c8   :  { %2716 = vmatpush1.msra.mxu0 %v8225_v1  ;;  %2787 = vmatpush1.msra.mxu1 %v8228_v63  ;;  %10699 = vst [vmem:[#allocation188_spill] sm:$0xff] %v8237_v17  ;;  %10700 = vst [vmem:[#allocation189_spill] sm:$0xff] %v8240_v8  ;;  %v8243_v1 = vld [vmem:[#allocation3 + $0x28] sm:$0xff]  ;;  %v8246_v63 = vld [vmem:[#allocation3 + $0x38] sm:$0xff] }
 0x6c9   :  { %2717 = vmatprep.subr.mxu0 %v8231_v47  ;;  %2788 = vmatprep.subr.mxu1 %v8234_v29  ;;  %10701 = vst [vmem:[#allocation191_spill] sm:$0xff] %v8243_v1  ;;  %10702 = vst [vmem:[#allocation36_spill] sm:$0xff] %v8246_v63  ;;  %v8249_v47 = vld [vmem:[#allocation3 + $0x20] sm:$0xff]  ;;  %v8252_v29 = vld [vmem:[#allocation3 + $0x30] sm:$0xff] }
 0x6ca   :  { %2718 = vmatpush1.msra.mxu0 %v8237_v17  ;;  %2789 = vmatpush1.msra.mxu1 %v8240_v8  ;;  %10703 = vst [vmem:[#allocation41_spill] sm:$0xff] %v8249_v47  ;;  %10704 = vst [vmem:[#allocation38_spill] sm:$0xff] %v8252_v29  ;;  %v8255_v17 = vld [vmem:[#allocation3 + $0x8] sm:$0xff]  ;;  %v8258_v8 = vld [vmem:[#allocation3 + $0x18] sm:$0xff] }
 0x6cb   :  { %2719 = vmatprep.subr.mxu0 %v8243_v1  ;;  %2790 = vmatprep.subr.mxu1 %v8246_v63  ;;  %10705 = vst [vmem:[#allocation44_spill] sm:$0xff] %v8255_v17  ;;  %10706 = vst [vmem:[#allocation40_spill] sm:$0xff] %v8258_v8  ;;  %v8261_v1 = vld [vmem:[#allocation3] sm:$0xff]  ;;  %v8265_v63 = vld [vmem:[#allocation3 + $0x10] sm:$0xff] }
 0x6cc   :  { %2720 = vmatpush1.msra.mxu0 %v8249_v47  ;;  %2791 = vmatpush1.msra.mxu1 %v8252_v29  ;;  %10707 = vst [vmem:[#allocation46_spill] sm:$0xff] %v8261_v1  ;;  %10708 = vst [vmem:[#allocation42_spill] sm:$0xff] %v8265_v63  ;;  %v8280_v29 = vld [vmem:[#allocation5 + $0x1f0] sm:$0xff] }
 0x6cd   :  { %2721 = vmatprep.subr.mxu0 %v8255_v17  ;;  %2792 = vmatprep.subr.mxu1 %v8258_v8  ;;  %v8271_v17 = vld [vmem:[#allocation5 + $0x1e8] sm:$0xff]  ;;  %v8274_v8 = vld [vmem:[#allocation5 + $0x1f8] sm:$0xff]  ;;  %10712 = vst [vmem:[#allocation47_spill] sm:$0xff] %v8280_v29 }
 0x6ce   :  { %2722 = vmatpush1.msra.mxu0 %v8261_v1  ;;  %2755 = vmatprep.mubr.f32.mxu0 %v10547_v39  ;;  %10709 = vst [vmem:[#allocation48_spill] sm:$0xff] %v8271_v17  ;;  %10710 = vst [vmem:[#allocation45_spill] sm:$0xff] %v8274_v8  ;;  %v8277_v1 = vld [vmem:[#allocation5 + $0x1e0] sm:$0xff] }
 0x6cf   :  { %2793 = vmatpush1.msra.mxu1 %v8265_v63  ;;  %2826 = vmatprep.mubr.f32.mxu1 %v10547_v39  ;;  %10711 = vst [vmem:[#allocation50_spill] sm:$0xff] %v8277_v1  ;;  %v8283_v63 = vld [vmem:[#allocation5 + $0x1c8] sm:$0xff] }
 0x6d0   :  { %2756 = vmatmul.mubr.f32.vlgmr.msra.gmra.mxu0 %v8077_v3  ;;  %2827 = vmatmul.mubr.f32.vlgmr.msra.gmra.mxu1 %v8077_v3  ;;  %10713 = vst [vmem:[#allocation52_spill] sm:$0xff] %v8283_v63  ;;  %v8286_v3 = vld [vmem:[#allocation5 + $0x1d8] sm:$0xff] }
 0x6d1   :  { %2859 = vmatprep.subr.mxu0 %v8271_v17  ;;  %2930 = vmatprep.subr.mxu1 %v8274_v8  ;;  %10714 = vst [vmem:[#allocation49_spill] sm:$0xff] %v8286_v3  ;;  %v8289_v17 = vld [vmem:[#allocation5 + $0x1c0] sm:$0xff]  ;;  %v8292_v8 = vld [vmem:[#allocation5 + $0x1d0] sm:$0xff] }
 0x6d2   :  { %2860 = vmatpush1.msra.mxu0 %v8277_v1  ;;  %2931 = vmatpush1.msra.mxu1 %v8280_v29  ;;  %10715 = vst [vmem:[#allocation53_spill] sm:$0xff] %v8289_v17  ;;  %10716 = vst [vmem:[#allocation51_spill] sm:$0xff] %v8292_v8  ;;  %v8295_v1 = vld [vmem:[#allocation5 + $0x1a8] sm:$0xff]  ;;  %v8298_v29 = vld [vmem:[#allocation5 + $0x1b8] sm:$0xff] }
 0x6d3   :  { %2861 = vmatprep.subr.mxu0 %v8283_v63  ;;  %2932 = vmatprep.subr.mxu1 %v8286_v3  ;;  %10717 = vst [vmem:[#allocation54_spill] sm:$0xff] %v8295_v1  ;;  %10718 = vst [vmem:[#allocation55_spill] sm:$0xff] %v8298_v29  ;;  %v8301_v63 = vld [vmem:[#allocation5 + $0x1a0] sm:$0xff]  ;;  %v8304_v3 = vld [vmem:[#allocation5 + $0x1b0] sm:$0xff] }
 0x6d4   :  { %2862 = vmatpush1.msra.mxu0 %v8289_v17  ;;  %2933 = vmatpush1.msra.mxu1 %v8292_v8  ;;  %10719 = vst [vmem:[#allocation56_spill] sm:$0xff] %v8301_v63  ;;  %10720 = vst [vmem:[#allocation57_spill] sm:$0xff] %v8304_v3  ;;  %v8307_v17 = vld [vmem:[#allocation5 + $0x188] sm:$0xff]  ;;  %v8310_v8 = vld [vmem:[#allocation5 + $0x198] sm:$0xff] }
 0x6d5   :  { %2863 = vmatprep.subr.mxu0 %v8295_v1  ;;  %2934 = vmatprep.subr.mxu1 %v8298_v29  ;;  %10721 = vst [vmem:[#allocation58_spill] sm:$0xff] %v8307_v17  ;;  %10722 = vst [vmem:[#allocation59_spill] sm:$0xff] %v8310_v8  ;;  %v8313_v1 = vld [vmem:[#allocation5 + $0x180] sm:$0xff]  ;;  %v8316_v29 = vld [vmem:[#allocation5 + $0x190] sm:$0xff] }
 0x6d6   :  { %2864 = vmatpush1.msra.mxu0 %v8301_v63  ;;  %2935 = vmatpush1.msra.mxu1 %v8304_v3  ;;  %10723 = vst [vmem:[#allocation60_spill] sm:$0xff] %v8313_v1  ;;  %10724 = vst [vmem:[#allocation61_spill] sm:$0xff] %v8316_v29  ;;  %v8319_v63 = vld [vmem:[#allocation5 + $0x168] sm:$0xff]  ;;  %v8322_v3 = vld [vmem:[#allocation5 + $0x178] sm:$0xff] }
 0x6d7   :  { %2865 = vmatprep.subr.mxu0 %v8307_v17  ;;  %2936 = vmatprep.subr.mxu1 %v8310_v8  ;;  %10725 = vst [vmem:[#allocation62_spill] sm:$0xff] %v8319_v63  ;;  %10726 = vst [vmem:[#allocation63_spill] sm:$0xff] %v8322_v3  ;;  %v8325_v17 = vld [vmem:[#allocation5 + $0x160] sm:$0xff]  ;;  %v8328_v8 = vld [vmem:[#allocation5 + $0x170] sm:$0xff] }
 0x6d8   :  { %2866 = vmatpush1.msra.mxu0 %v8313_v1  ;;  %2937 = vmatpush1.msra.mxu1 %v8316_v29  ;;  %10727 = vst [vmem:[#allocation64_spill] sm:$0xff] %v8325_v17  ;;  %10728 = vst [vmem:[#allocation65_spill] sm:$0xff] %v8328_v8  ;;  %v8331_v1 = vld [vmem:[#allocation5 + $0x148] sm:$0xff]  ;;  %v8334_v29 = vld [vmem:[#allocation5 + $0x158] sm:$0xff] }
 0x6d9   :  { %2867 = vmatprep.subr.mxu0 %v8319_v63  ;;  %2938 = vmatprep.subr.mxu1 %v8322_v3  ;;  %10729 = vst [vmem:[#allocation66_spill] sm:$0xff] %v8331_v1  ;;  %10730 = vst [vmem:[#allocation67_spill] sm:$0xff] %v8334_v29  ;;  %v8337_v63 = vld [vmem:[#allocation5 + $0x140] sm:$0xff]  ;;  %v8340_v3 = vld [vmem:[#allocation5 + $0x150] sm:$0xff] }
 0x6da   :  { %2868 = vmatpush1.msra.mxu0 %v8325_v17  ;;  %2939 = vmatpush1.msra.mxu1 %v8328_v8  ;;  %10731 = vst [vmem:[#allocation68_spill] sm:$0xff] %v8337_v63  ;;  %10732 = vst [vmem:[#allocation69_spill] sm:$0xff] %v8340_v3  ;;  %v8343_v17 = vld [vmem:[#allocation5 + $0x128] sm:$0xff]  ;;  %v8346_v8 = vld [vmem:[#allocation5 + $0x138] sm:$0xff] }
 0x6db   :  { %2869 = vmatprep.subr.mxu0 %v8331_v1  ;;  %2940 = vmatprep.subr.mxu1 %v8334_v29  ;;  %10733 = vst [vmem:[#allocation70_spill] sm:$0xff] %v8343_v17  ;;  %10734 = vst [vmem:[#allocation71_spill] sm:$0xff] %v8346_v8  ;;  %v8349_v1 = vld [vmem:[#allocation5 + $0x120] sm:$0xff]  ;;  %v8352_v29 = vld [vmem:[#allocation5 + $0x130] sm:$0xff] }
 0x6dc   :  { %2870 = vmatpush1.msra.mxu0 %v8337_v63  ;;  %2941 = vmatpush1.msra.mxu1 %v8340_v3  ;;  %10735 = vst [vmem:[#allocation72_spill] sm:$0xff] %v8349_v1  ;;  %10736 = vst [vmem:[#allocation73_spill] sm:$0xff] %v8352_v29  ;;  %v8355_v63 = vld [vmem:[#allocation5 + $0x108] sm:$0xff]  ;;  %v8358_v3 = vld [vmem:[#allocation5 + $0x118] sm:$0xff] }
 0x6dd   :  { %2871 = vmatprep.subr.mxu0 %v8343_v17  ;;  %2942 = vmatprep.subr.mxu1 %v8346_v8  ;;  %10737 = vst [vmem:[#allocation74_spill] sm:$0xff] %v8355_v63  ;;  %10738 = vst [vmem:[#allocation75_spill] sm:$0xff] %v8358_v3  ;;  %v8361_v17 = vld [vmem:[#allocation5 + $0x100] sm:$0xff]  ;;  %v8364_v8 = vld [vmem:[#allocation5 + $0x110] sm:$0xff] }
 0x6de   :  { %2872 = vmatpush1.msra.mxu0 %v8349_v1  ;;  %2943 = vmatpush1.msra.mxu1 %v8352_v29  ;;  %10739 = vst [vmem:[#allocation76_spill] sm:$0xff] %v8361_v17  ;;  %10740 = vst [vmem:[#allocation77_spill] sm:$0xff] %v8364_v8  ;;  %v8367_v1 = vld [vmem:[#allocation5 + $0xe8] sm:$0xff]  ;;  %v8370_v29 = vld [vmem:[#allocation5 + $0xf8] sm:$0xff] }
 0x6df   :  { %2873 = vmatprep.subr.mxu0 %v8355_v63  ;;  %2944 = vmatprep.subr.mxu1 %v8358_v3  ;;  %10741 = vst [vmem:[#allocation78_spill] sm:$0xff] %v8367_v1  ;;  %10742 = vst [vmem:[#allocation79_spill] sm:$0xff] %v8370_v29  ;;  %v8373_v63 = vld [vmem:[#allocation5 + $0xe0] sm:$0xff]  ;;  %v8376_v3 = vld [vmem:[#allocation5 + $0xf0] sm:$0xff] }
 0x6e0   :  { %2874 = vmatpush1.msra.mxu0 %v8361_v17  ;;  %2945 = vmatpush1.msra.mxu1 %v8364_v8  ;;  %10743 = vst [vmem:[#allocation80_spill] sm:$0xff] %v8373_v63  ;;  %10744 = vst [vmem:[#allocation81_spill] sm:$0xff] %v8376_v3  ;;  %v8379_v17 = vld [vmem:[#allocation5 + $0xc8] sm:$0xff]  ;;  %v8382_v8 = vld [vmem:[#allocation5 + $0xd8] sm:$0xff] }
 0x6e1   :  { %2875 = vmatprep.subr.mxu0 %v8367_v1  ;;  %2946 = vmatprep.subr.mxu1 %v8370_v29  ;;  %10745 = vst [vmem:[#allocation82_spill] sm:$0xff] %v8379_v17  ;;  %10746 = vst [vmem:[#allocation83_spill] sm:$0xff] %v8382_v8  ;;  %v8385_v1 = vld [vmem:[#allocation5 + $0xc0] sm:$0xff]  ;;  %v8388_v29 = vld [vmem:[#allocation5 + $0xd0] sm:$0xff] }
 0x6e2   :  { %2876 = vmatpush1.msra.mxu0 %v8373_v63  ;;  %2947 = vmatpush1.msra.mxu1 %v8376_v3  ;;  %10747 = vst [vmem:[#allocation84_spill] sm:$0xff] %v8385_v1  ;;  %10748 = vst [vmem:[#allocation85_spill] sm:$0xff] %v8388_v29  ;;  %v8391_v63 = vld [vmem:[#allocation5 + $0xa8] sm:$0xff]  ;;  %v8394_v3 = vld [vmem:[#allocation5 + $0xb8] sm:$0xff] }
 0x6e3   :  { %2877 = vmatprep.subr.mxu0 %v8379_v17  ;;  %2948 = vmatprep.subr.mxu1 %v8382_v8  ;;  %10749 = vst [vmem:[#allocation86_spill] sm:$0xff] %v8391_v63  ;;  %10750 = vst [vmem:[#allocation87_spill] sm:$0xff] %v8394_v3  ;;  %v8397_v17 = vld [vmem:[#allocation5 + $0xa0] sm:$0xff]  ;;  %v8400_v8 = vld [vmem:[#allocation5 + $0xb0] sm:$0xff] }
 0x6e4   :  { %2878 = vmatpush1.msra.mxu0 %v8385_v1  ;;  %2949 = vmatpush1.msra.mxu1 %v8388_v29  ;;  %10751 = vst [vmem:[#allocation88_spill] sm:$0xff] %v8397_v17  ;;  %10752 = vst [vmem:[#allocation89_spill] sm:$0xff] %v8400_v8  ;;  %v8403_v1 = vld [vmem:[#allocation5 + $0x88] sm:$0xff]  ;;  %v8406_v29 = vld [vmem:[#allocation5 + $0x98] sm:$0xff] }
 0x6e5   :  { %2879 = vmatprep.subr.mxu0 %v8391_v63  ;;  %2950 = vmatprep.subr.mxu1 %v8394_v3  ;;  %10753 = vst [vmem:[#allocation90_spill] sm:$0xff] %v8403_v1  ;;  %10754 = vst [vmem:[#allocation91_spill] sm:$0xff] %v8406_v29  ;;  %v8409_v63 = vld [vmem:[#allocation5 + $0x80] sm:$0xff]  ;;  %v8412_v3 = vld [vmem:[#allocation5 + $0x90] sm:$0xff] }
 0x6e6   :  { %2880 = vmatpush1.msra.mxu0 %v8397_v17  ;;  %2951 = vmatpush1.msra.mxu1 %v8400_v8  ;;  %10755 = vst [vmem:[#allocation92_spill] sm:$0xff] %v8409_v63  ;;  %10756 = vst [vmem:[#allocation93_spill] sm:$0xff] %v8412_v3  ;;  %v8415_v17 = vld [vmem:[#allocation5 + $0x68] sm:$0xff]  ;;  %v8418_v8 = vld [vmem:[#allocation5 + $0x78] sm:$0xff] }
 0x6e7   :  { %2881 = vmatprep.subr.mxu0 %v8403_v1  ;;  %2952 = vmatprep.subr.mxu1 %v8406_v29  ;;  %10757 = vst [vmem:[#allocation94_spill] sm:$0xff] %v8415_v17  ;;  %10758 = vst [vmem:[#allocation95_spill] sm:$0xff] %v8418_v8  ;;  %v8421_v1 = vld [vmem:[#allocation5 + $0x60] sm:$0xff]  ;;  %v8424_v29 = vld [vmem:[#allocation5 + $0x70] sm:$0xff] }
 0x6e8   :  { %2882 = vmatpush1.msra.mxu0 %v8409_v63  ;;  %2953 = vmatpush1.msra.mxu1 %v8412_v3  ;;  %10759 = vst [vmem:[#allocation96_spill] sm:$0xff] %v8421_v1  ;;  %10760 = vst [vmem:[#allocation97_spill] sm:$0xff] %v8424_v29  ;;  %v8427_v63 = vld [vmem:[#allocation5 + $0x48] sm:$0xff]  ;;  %v8430_v3 = vld [vmem:[#allocation5 + $0x58] sm:$0xff] }
 0x6e9   :  { %2883 = vmatprep.subr.mxu0 %v8415_v17  ;;  %2954 = vmatprep.subr.mxu1 %v8418_v8  ;;  %10761 = vst [vmem:[#allocation98_spill] sm:$0xff] %v8427_v63  ;;  %10762 = vst [vmem:[#allocation99_spill] sm:$0xff] %v8430_v3  ;;  %v8433_v17 = vld [vmem:[#allocation5 + $0x40] sm:$0xff]  ;;  %v8436_v8 = vld [vmem:[#allocation5 + $0x50] sm:$0xff] }
 0x6ea   :  { %2884 = vmatpush1.msra.mxu0 %v8421_v1  ;;  %2955 = vmatpush1.msra.mxu1 %v8424_v29  ;;  %10763 = vst [vmem:[#allocation100_spill] sm:$0xff] %v8433_v17  ;;  %10764 = vst [vmem:[#allocation101_spill] sm:$0xff] %v8436_v8  ;;  %v8439_v1 = vld [vmem:[#allocation5 + $0x28] sm:$0xff]  ;;  %v8442_v29 = vld [vmem:[#allocation5 + $0x38] sm:$0xff] }
 0x6eb   :  { %2885 = vmatprep.subr.mxu0 %v8427_v63  ;;  %2956 = vmatprep.subr.mxu1 %v8430_v3  ;;  %10765 = vst [vmem:[#allocation102_spill] sm:$0xff] %v8439_v1  ;;  %10766 = vst [vmem:[#allocation103_spill] sm:$0xff] %v8442_v29  ;;  %v8445_v63 = vld [vmem:[#allocation5 + $0x20] sm:$0xff]  ;;  %v8448_v3 = vld [vmem:[#allocation5 + $0x30] sm:$0xff] }
 0x6ec   :  { %2886 = vmatpush1.msra.mxu0 %v8433_v17  ;;  %2957 = vmatpush1.msra.mxu1 %v8436_v8  ;;  %10767 = vst [vmem:[#allocation104_spill] sm:$0xff] %v8445_v63  ;;  %10768 = vst [vmem:[#allocation105_spill] sm:$0xff] %v8448_v3  ;;  %v8451_v17 = vld [vmem:[#allocation5 + $0x8] sm:$0xff]  ;;  %v8454_v8 = vld [vmem:[#allocation5 + $0x18] sm:$0xff] }
 0x6ed   :  { %2887 = vmatprep.subr.mxu0 %v8439_v1  ;;  %2958 = vmatprep.subr.mxu1 %v8442_v29  ;;  %10769 = vst [vmem:[#allocation106_spill] sm:$0xff] %v8451_v17  ;;  %10770 = vst [vmem:[#allocation107_spill] sm:$0xff] %v8454_v8  ;;  %v8457_v1 = vld [vmem:[#allocation5] sm:$0xff]  ;;  %v8460_v29 = vld [vmem:[#allocation5 + $0x10] sm:$0xff] }
 0x6ee   :  { %2888 = vmatpush1.msra.mxu0 %v8445_v63  ;;  %2959 = vmatpush1.msra.mxu1 %v8448_v3  ;;  %10771 = vst [vmem:[#allocation108_spill] sm:$0xff] %v8457_v1  ;;  %10772 = vst [vmem:[#allocation109_spill] sm:$0xff] %v8460_v29  ;;  %v8463_v63 = vld [vmem:[#allocation5 + $0x3e8] sm:$0xff]  ;;  %v8466_v3 = vld [vmem:[#allocation5 + $0x3f8] sm:$0xff] }
 0x6ef   :  { %2889 = vmatprep.subr.mxu0 %v8451_v17  ;;  %2960 = vmatprep.subr.mxu1 %v8454_v8  ;;  %10773 = vst [vmem:[#allocation110_spill] sm:$0xff] %v8463_v63  ;;  %10774 = vst [vmem:[#allocation111_spill] sm:$0xff] %v8466_v3  ;;  %v8469_v17 = vld [vmem:[#allocation5 + $0x3e0] sm:$0xff]  ;;  %v8472_v8 = vld [vmem:[#allocation5 + $0x3f0] sm:$0xff] }
 0x6f0   :  { %2890 = vmatpush1.msra.mxu0 %v8457_v1  ;;  %2961 = vmatpush1.msra.mxu1 %v8460_v29  ;;  %10775 = vst [vmem:[#allocation112_spill] sm:$0xff] %v8469_v17  ;;  %10776 = vst [vmem:[#allocation113_spill] sm:$0xff] %v8472_v8  ;;  %v8475_v1 = vld [vmem:[#allocation5 + $0x3c8] sm:$0xff]  ;;  %v8478_v29 = vld [vmem:[#allocation5 + $0x3d8] sm:$0xff] }
 0x6f1   :  { %2891 = vmatprep.subr.mxu0 %v8463_v63  ;;  %2962 = vmatprep.subr.mxu1 %v8466_v3  ;;  %10777 = vst [vmem:[#allocation114_spill] sm:$0xff] %v8475_v1  ;;  %10778 = vst [vmem:[#allocation115_spill] sm:$0xff] %v8478_v29  ;;  %v8481_v63 = vld [vmem:[#allocation5 + $0x3c0] sm:$0xff]  ;;  %v8484_v3 = vld [vmem:[#allocation5 + $0x3d0] sm:$0xff] }
 0x6f2   :  { %2892 = vmatpush2.msra.mxu0 %v8469_v17  ;;  %2963 = vmatpush2.msra.mxu1 %v8472_v8  ;;  %10779 = vst [vmem:[#allocation116_spill] sm:$0xff] %v8481_v63  ;;  %10780 = vst [vmem:[#allocation117_spill] sm:$0xff] %v8484_v3  ;;  %v8487_v17 = vld [vmem:[#allocation5 + $0x3a8] sm:$0xff]  ;;  %v8490_v8 = vld [vmem:[#allocation5 + $0x3b8] sm:$0xff] }
 0x6f3   :  { %2893 = vmatprep.subr.mxu0 %v8475_v1  ;;  %2964 = vmatprep.subr.mxu1 %v8478_v29  ;;  %10781 = vst [vmem:[#allocation118_spill] sm:$0xff] %v8487_v17  ;;  %10782 = vst [vmem:[#allocation119_spill] sm:$0xff] %v8490_v8  ;;  %v8493_v1 = vld [vmem:[#allocation5 + $0x3a0] sm:$0xff]  ;;  %v8496_v29 = vld [vmem:[#allocation5 + $0x3b0] sm:$0xff] }
 0x6f4   :  { %2894 = vmatpush2.msra.mxu0 %v8481_v63  ;;  %2965 = vmatpush2.msra.mxu1 %v8484_v3  ;;  %10783 = vst [vmem:[#allocation120_spill] sm:$0xff] %v8493_v1  ;;  %10784 = vst [vmem:[#allocation121_spill] sm:$0xff] %v8496_v29  ;;  %v8499_v63 = vld [vmem:[#allocation5 + $0x388] sm:$0xff]  ;;  %v8502_v3 = vld [vmem:[#allocation5 + $0x398] sm:$0xff] }
 0x6f5   :  { %2895 = vmatprep.subr.mxu0 %v8487_v17  ;;  %2966 = vmatprep.subr.mxu1 %v8490_v8  ;;  %10785 = vst [vmem:[#allocation122_spill] sm:$0xff] %v8499_v63  ;;  %10786 = vst [vmem:[#allocation123_spill] sm:$0xff] %v8502_v3  ;;  %v8505_v17 = vld [vmem:[#allocation5 + $0x380] sm:$0xff]  ;;  %v8508_v8 = vld [vmem:[#allocation5 + $0x390] sm:$0xff] }
 0x6f6   :  { %2896 = vmatpush2.msra.mxu0 %v8493_v1  ;;  %2967 = vmatpush2.msra.mxu1 %v8496_v29  ;;  %10787 = vst [vmem:[#allocation124_spill] sm:$0xff] %v8505_v17  ;;  %10788 = vst [vmem:[#allocation125_spill] sm:$0xff] %v8508_v8  ;;  %v8511_v1 = vld [vmem:[#allocation5 + $0x368] sm:$0xff]  ;;  %v8514_v29 = vld [vmem:[#allocation5 + $0x378] sm:$0xff] }
 0x6f7   :  { %2897 = vmatprep.subr.mxu0 %v8499_v63  ;;  %2968 = vmatprep.subr.mxu1 %v8502_v3  ;;  %10789 = vst [vmem:[#allocation126_spill] sm:$0xff] %v8511_v1  ;;  %10790 = vst [vmem:[#allocation127_spill] sm:$0xff] %v8514_v29  ;;  %v8517_v63 = vld [vmem:[#allocation5 + $0x360] sm:$0xff]  ;;  %v8520_v3 = vld [vmem:[#allocation5 + $0x370] sm:$0xff] }
 0x6f8   :  { %2898 = vmatpush2.msra.mxu0 %v8505_v17  ;;  %2969 = vmatpush2.msra.mxu1 %v8508_v8  ;;  %10791 = vst [vmem:[#allocation128_spill] sm:$0xff] %v8517_v63  ;;  %10792 = vst [vmem:[#allocation129_spill] sm:$0xff] %v8520_v3  ;;  %v8523_v17 = vld [vmem:[#allocation5 + $0x348] sm:$0xff]  ;;  %v8526_v8 = vld [vmem:[#allocation5 + $0x358] sm:$0xff] }
 0x6f9   :  { %2899 = vmatprep.subr.mxu0 %v8511_v1  ;;  %2970 = vmatprep.subr.mxu1 %v8514_v29  ;;  %10793 = vst [vmem:[#allocation130_spill] sm:$0xff] %v8523_v17  ;;  %10794 = vst [vmem:[#allocation131_spill] sm:$0xff] %v8526_v8  ;;  %v8529_v1 = vld [vmem:[#allocation5 + $0x340] sm:$0xff]  ;;  %v8532_v29 = vld [vmem:[#allocation5 + $0x350] sm:$0xff] }
 0x6fa   :  { %2900 = vmatpush2.msra.mxu0 %v8517_v63  ;;  %2971 = vmatpush2.msra.mxu1 %v8520_v3  ;;  %10795 = vst [vmem:[#allocation132_spill] sm:$0xff] %v8529_v1  ;;  %10796 = vst [vmem:[#allocation133_spill] sm:$0xff] %v8532_v29  ;;  %v8535_v63 = vld [vmem:[#allocation5 + $0x328] sm:$0xff]  ;;  %v8538_v3 = vld [vmem:[#allocation5 + $0x338] sm:$0xff] }
 0x6fb   :  { %2901 = vmatprep.subr.mxu0 %v8523_v17  ;;  %2972 = vmatprep.subr.mxu1 %v8526_v8  ;;  %10797 = vst [vmem:[#allocation134_spill] sm:$0xff] %v8535_v63  ;;  %10798 = vst [vmem:[#allocation135_spill] sm:$0xff] %v8538_v3  ;;  %v8541_v17 = vld [vmem:[#allocation5 + $0x320] sm:$0xff]  ;;  %v8544_v8 = vld [vmem:[#allocation5 + $0x330] sm:$0xff] }
 0x6fc   :  { %2902 = vmatpush2.msra.mxu0 %v8529_v1  ;;  %2973 = vmatpush2.msra.mxu1 %v8532_v29  ;;  %10799 = vst [vmem:[#allocation136_spill] sm:$0xff] %v8541_v17  ;;  %10800 = vst [vmem:[#allocation137_spill] sm:$0xff] %v8544_v8  ;;  %v8547_v1 = vld [vmem:[#allocation5 + $0x308] sm:$0xff]  ;;  %v8550_v29 = vld [vmem:[#allocation5 + $0x318] sm:$0xff] }
 0x6fd   :  { %2903 = vmatprep.subr.mxu0 %v8535_v63  ;;  %2974 = vmatprep.subr.mxu1 %v8538_v3  ;;  %10801 = vst [vmem:[#allocation138_spill] sm:$0xff] %v8547_v1  ;;  %10802 = vst [vmem:[#allocation139_spill] sm:$0xff] %v8550_v29  ;;  %v8553_v63 = vld [vmem:[#allocation5 + $0x300] sm:$0xff]  ;;  %v8556_v3 = vld [vmem:[#allocation5 + $0x310] sm:$0xff] }
 0x6fe   :  { %2904 = vmatpush2.msra.mxu0 %v8541_v17  ;;  %2975 = vmatpush2.msra.mxu1 %v8544_v8  ;;  %10803 = vst [vmem:[#allocation140_spill] sm:$0xff] %v8553_v63  ;;  %10804 = vst [vmem:[#allocation141_spill] sm:$0xff] %v8556_v3  ;;  %v8559_v17 = vld [vmem:[#allocation5 + $0x2e8] sm:$0xff]  ;;  %v8562_v8 = vld [vmem:[#allocation5 + $0x2f8] sm:$0xff] }
 0x6ff   :  { %2905 = vmatprep.subr.mxu0 %v8547_v1  ;;  %2976 = vmatprep.subr.mxu1 %v8550_v29  ;;  %10805 = vst [vmem:[#allocation142_spill] sm:$0xff] %v8559_v17  ;;  %10806 = vst [vmem:[#allocation143_spill] sm:$0xff] %v8562_v8  ;;  %v8565_v1 = vld [vmem:[#allocation5 + $0x2e0] sm:$0xff]  ;;  %v8568_v29 = vld [vmem:[#allocation5 + $0x2f0] sm:$0xff] }
 0x700   :  { %2906 = vmatpush2.msra.mxu0 %v8553_v63  ;;  %2977 = vmatpush2.msra.mxu1 %v8556_v3  ;;  %10807 = vst [vmem:[#allocation144_spill] sm:$0xff] %v8565_v1  ;;  %10808 = vst [vmem:[#allocation145_spill] sm:$0xff] %v8568_v29  ;;  %v8571_v63 = vld [vmem:[#allocation5 + $0x2c8] sm:$0xff]  ;;  %v8574_v3 = vld [vmem:[#allocation5 + $0x2d8] sm:$0xff] }
 0x701   :  { %2907 = vmatprep.subr.mxu0 %v8559_v17  ;;  %2978 = vmatprep.subr.mxu1 %v8562_v8  ;;  %10809 = vst [vmem:[#allocation146_spill] sm:$0xff] %v8571_v63  ;;  %10810 = vst [vmem:[#allocation147_spill] sm:$0xff] %v8574_v3  ;;  %v8577_v17 = vld [vmem:[#allocation5 + $0x2c0] sm:$0xff]  ;;  %v8580_v8 = vld [vmem:[#allocation5 + $0x2d0] sm:$0xff] }
 0x702   :  { %2908 = vmatpush2.msra.mxu0 %v8565_v1  ;;  %2979 = vmatpush2.msra.mxu1 %v8568_v29  ;;  %10811 = vst [vmem:[#allocation148_spill] sm:$0xff] %v8577_v17  ;;  %10812 = vst [vmem:[#allocation149_spill] sm:$0xff] %v8580_v8  ;;  %v8583_v1 = vld [vmem:[#allocation5 + $0x2a8] sm:$0xff]  ;;  %v8586_v29 = vld [vmem:[#allocation5 + $0x2b8] sm:$0xff] }
 0x703   :  { %2909 = vmatprep.subr.mxu0 %v8571_v63  ;;  %2980 = vmatprep.subr.mxu1 %v8574_v3  ;;  %10813 = vst [vmem:[#allocation150_spill] sm:$0xff] %v8583_v1  ;;  %10814 = vst [vmem:[#allocation151_spill] sm:$0xff] %v8586_v29  ;;  %v8589_v63 = vld [vmem:[#allocation5 + $0x2a0] sm:$0xff]  ;;  %v8592_v3 = vld [vmem:[#allocation5 + $0x2b0] sm:$0xff] }
 0x704   :  { %2910 = vmatpush2.msra.mxu0 %v8577_v17  ;;  %2981 = vmatpush2.msra.mxu1 %v8580_v8  ;;  %10815 = vst [vmem:[#allocation152_spill] sm:$0xff] %v8589_v63  ;;  %10816 = vst [vmem:[#allocation153_spill] sm:$0xff] %v8592_v3  ;;  %v8595_v17 = vld [vmem:[#allocation5 + $0x288] sm:$0xff]  ;;  %v8598_v8 = vld [vmem:[#allocation5 + $0x298] sm:$0xff] }
 0x705   :  { %2911 = vmatprep.subr.mxu0 %v8583_v1  ;;  %2982 = vmatprep.subr.mxu1 %v8586_v29  ;;  %10817 = vst [vmem:[#allocation154_spill] sm:$0xff] %v8595_v17  ;;  %10818 = vst [vmem:[#allocation155_spill] sm:$0xff] %v8598_v8  ;;  %v8601_v1 = vld [vmem:[#allocation5 + $0x280] sm:$0xff]  ;;  %v8604_v29 = vld [vmem:[#allocation5 + $0x290] sm:$0xff] }
 0x706   :  { %2912 = vmatpush2.msra.mxu0 %v8589_v63  ;;  %2983 = vmatpush2.msra.mxu1 %v8592_v3  ;;  %10819 = vst [vmem:[#allocation156_spill] sm:$0xff] %v8601_v1  ;;  %10820 = vst [vmem:[#allocation157_spill] sm:$0xff] %v8604_v29  ;;  %v8607_v63 = vld [vmem:[#allocation5 + $0x268] sm:$0xff]  ;;  %v8610_v3 = vld [vmem:[#allocation5 + $0x278] sm:$0xff] }
 0x707   :  { %2913 = vmatprep.subr.mxu0 %v8595_v17  ;;  %2984 = vmatprep.subr.mxu1 %v8598_v8  ;;  %10821 = vst [vmem:[#allocation158_spill] sm:$0xff] %v8607_v63  ;;  %10822 = vst [vmem:[#allocation159_spill] sm:$0xff] %v8610_v3  ;;  %v8613_v17 = vld [vmem:[#allocation5 + $0x260] sm:$0xff]  ;;  %v8616_v8 = vld [vmem:[#allocation5 + $0x270] sm:$0xff] }
 0x708   :  { %2914 = vmatpush2.msra.mxu0 %v8601_v1  ;;  %2985 = vmatpush2.msra.mxu1 %v8604_v29  ;;  %10823 = vst [vmem:[#allocation160_spill] sm:$0xff] %v8613_v17  ;;  %10824 = vst [vmem:[#allocation161_spill] sm:$0xff] %v8616_v8  ;;  %v8619_v1 = vld [vmem:[#allocation5 + $0x248] sm:$0xff]  ;;  %v8622_v29 = vld [vmem:[#allocation5 + $0x258] sm:$0xff] }
 0x709   :  { %2915 = vmatprep.subr.mxu0 %v8607_v63  ;;  %2986 = vmatprep.subr.mxu1 %v8610_v3  ;;  %10825 = vst [vmem:[#allocation162_spill] sm:$0xff] %v8619_v1  ;;  %10826 = vst [vmem:[#allocation163_spill] sm:$0xff] %v8622_v29  ;;  %v8625_v63 = vld [vmem:[#allocation5 + $0x240] sm:$0xff]  ;;  %v8628_v3 = vld [vmem:[#allocation5 + $0x250] sm:$0xff] }
 0x70a   :  { %2916 = vmatpush2.msra.mxu0 %v8613_v17  ;;  %2987 = vmatpush2.msra.mxu1 %v8616_v8  ;;  %10827 = vst [vmem:[#allocation164_spill] sm:$0xff] %v8625_v63  ;;  %10828 = vst [vmem:[#allocation165_spill] sm:$0xff] %v8628_v3  ;;  %v8631_v17 = vld [vmem:[#allocation5 + $0x228] sm:$0xff]  ;;  %v8634_v8 = vld [vmem:[#allocation5 + $0x238] sm:$0xff] }
 0x70b   :  { %2917 = vmatprep.subr.mxu0 %v8619_v1  ;;  %2988 = vmatprep.subr.mxu1 %v8622_v29  ;;  %10829 = vst [vmem:[#allocation166_spill] sm:$0xff] %v8631_v17  ;;  %10830 = vst [vmem:[#allocation167_spill] sm:$0xff] %v8634_v8  ;;  %v8637_v1 = vld [vmem:[#allocation5 + $0x220] sm:$0xff]  ;;  %v8640_v29 = vld [vmem:[#allocation5 + $0x230] sm:$0xff] }
 0x70c   :  { %2918 = vmatpush2.msra.mxu0 %v8625_v63  ;;  %2989 = vmatpush2.msra.mxu1 %v8628_v3  ;;  %10831 = vst [vmem:[#allocation168_spill] sm:$0xff] %v8637_v1  ;;  %10832 = vst [vmem:[#allocation169_spill] sm:$0xff] %v8640_v29  ;;  %v8643_v63 = vld [vmem:[#allocation5 + $0x208] sm:$0xff]  ;;  %v8646_v3 = vld [vmem:[#allocation5 + $0x218] sm:$0xff] }
 0x70d   :  { %2919 = vmatprep.subr.mxu0 %v8631_v17  ;;  %2990 = vmatprep.subr.mxu1 %v8634_v8  ;;  %10833 = vst [vmem:[#allocation170_spill] sm:$0xff] %v8643_v63  ;;  %10834 = vst [vmem:[#allocation171_spill] sm:$0xff] %v8646_v3  ;;  %v8649_v17 = vld [vmem:[#allocation5 + $0x200] sm:$0xff]  ;;  %v8652_v8 = vld [vmem:[#allocation5 + $0x210] sm:$0xff] }
 0x70e   :  { %2920 = vmatpush2.msra.mxu0 %v8637_v1  ;;  %2991 = vmatpush2.msra.mxu1 %v8640_v29  ;;  %10835 = vst [vmem:[#allocation172_spill] sm:$0xff] %v8649_v17  ;;  %10836 = vst [vmem:[#allocation173_spill] sm:$0xff] %v8652_v8 }
 0x70f   :  { %2921 = vmatprep.subr.mxu0 %v8643_v63  ;;  %2992 = vmatprep.subr.mxu1 %v8646_v3 }
 0x710   :  { %2922 = vmatpush2.msra.mxu0 %v8649_v17  ;;  %2993 = vmatpush2.msra.mxu1 %v8652_v8 }
 0x711   :  { %3026 = vmatprep.subr.mxu0 %v8051_v56  ;;  %3097 = vmatprep.subr.mxu1 %v8054_v57 }
 0x76f   :  { %v2590_v29 = vpop.f32.mrf.mxu0  ;;  %v2661_v3 = vpop.f32.mrf.mxu1 }
 0x770   :  { %v2591_v1 = vadd.f32 %v2590_v29, %v10677_v60  ;;  %v2662_v17 = vadd.f32 %v2661_v3, %v10679_v26  ;;  %v10838_v3 = vld [vmem:[#allocation202_spill] sm:$0xff]  ;;  %v10840_v26 = vld [vmem:[#allocation205_spill] sm:$0xff] }
 0x771   :  { %v2592_v63 = vpop.f32.mrf.mxu0  ;;  %v2663_v55 = vpop.f32.mrf.mxu1 }
 0x772   :  { %v2666_v39 = vmul.f32 0.5, %v2591_v1  ;;  %v2593_v47 = vadd.f32 %v2592_v63, %v10678_v40  ;;  %v2664_v8 = vadd.f32 %v2663_v55, %v10680_v62 }
 0x774   :  { %4459 = vtanh.f32 %v2666_v39  ;;  %v2670_v59 = vmul.f32 0.5, %v2593_v47  ;;  %v2675_v56 = vmul.f32 0.5, %v2664_v8 }
 0x776   :  { %4461 = vtanh.f32 %v2670_v59 }
 0x777   :  { %4463 = vtanh.f32 %v2662_v17 }
 0x778   :  { %4465 = vtanh.f32 %v2675_v56 }
 0x781   :  { %v4460_v54 = vpop.eup %4459 }
 0x782   :  { %v2668_v57 = vadd.f32 1.0, %v4460_v54 }
 0x783   :  { %v4462_v53 = vpop.eup %4461 }
 0x784   :  { %v2669_v50 = vmul.f32 0.5, %v2668_v57  ;;  %v2672_v29 = vadd.f32 1.0, %v4462_v53  ;;  %v4464_v60 = vpop.eup %4463  ;;  %v10839_v57 = vld [vmem:[#allocation204_spill] sm:$0xff] }
 0x785   :  { %v4466_v17 = vpop.eup %4465 }
 0x786   :  { %v2673_v1 = vmul.f32 0.5, %v2672_v29  ;;  %v2680_v39 = vmul.f32 %v4464_v60, %v2669_v50  ;;  %v2677_v56 = vadd.f32 1.0, %v4466_v17 }
 0x788   :  { %v2679_v63 = vmul.f32 %v2673_v1, %v8062_v14  ;;  %v2678_v50 = vmul.f32 0.5, %v2677_v56 }
 0x78a   :  { %v8662_v47 = vadd.f32 %v2680_v39, %v2679_v63 }
 0x78c   :  { %10837 = vst [vmem:[#allocation174_spill] sm:$0xff] %v8662_v47  ;;  %4467 = vtanh.f32 %v8662_v47 }
 0x790   :  { %v2757_v59 = vpop.f32.mrf.mxu0  ;;  %v2828_v8 = vpop.f32.mrf.mxu1 }
 0x791   :  { %v2833_v55 = vadd.f32 %v2757_v59, %v10838_v3  ;;  %v2835_v40 = vadd.f32 %v2828_v8, %v10840_v26  ;;  %v10841_v3 = vld [vmem:[#allocation207_spill] sm:$0xff] }
 0x792   :  { %v2759_v62 = vpop.f32.mrf.mxu0  ;;  %v2830_v1 = vpop.f32.mrf.mxu1 }
 0x793   :  { %v2837_v54 = vadd.f32 %v2833_v55, %v10047_v12  ;;  %v2834_v53 = vadd.f32 %v2759_v62, %v10839_v57  ;;  %v2839_v39 = vadd.f32 %v2835_v40, %v6177_v22  ;;  %v2836_v47 = vadd.f32 %v2830_v1, %v10841_v3  ;;  %v10884_v3 = vld [vmem:[#allocation64_spill] sm:$0xff] }
 0x795   :  { %v2841_v29 = vmul.f32 0.5, %v2837_v54  ;;  %v2838_v60 = vadd.f32 %v2834_v53, %v10050_v51  ;;  %v2840_v62 = vadd.f32 %v2836_v47, %v6185_v20 }
 0x797   :  { %4469 = vtanh.f32 %v2841_v29  ;;  %v2845_v14 = vmul.f32 0.5, %v2838_v60  ;;  %v2850_v17 = vmul.f32 0.5, %v2840_v62  ;;  %v10885_v62 = vld [vmem:[#allocation65_spill] sm:$0xff] }
 0x799   :  { %v4468_v63 = vpop.eup %4467  ;;  %4471 = vtanh.f32 %v2845_v14 }
 0x79a   :  { %v2683_v59 = vmul.f32 %v4468_v63, %v2678_v50  ;;  %4473 = vtanh.f32 %v2839_v39  ;;  %v10882_v39 = vld [vmem:[#allocation62_spill] sm:$0xff] }
 0x79b   :  { %4475 = vtanh.f32 %v2850_v17  ;;  %v10886_v17 = vld [vmem:[#allocation66_spill] sm:$0xff] }
 0x79c   :  { %2923 = vmatprep.mubr.f32.mxu0 %v2683_v59  ;;  %2994 = vmatprep.mubr.f32.mxu1 %v2683_v59  ;;  %v10883_v59 = vld [vmem:[#allocation63_spill] sm:$0xff] }
 0x7a4   :  { %v4470_v26 = vpop.eup %4469 }
 0x7a5   :  { %v2843_v55 = vadd.f32 1.0, %v4470_v26  ;;  %v10887_v26 = vld [vmem:[#allocation67_spill] sm:$0xff] }
 0x7a6   :  { %v4472_v8 = vpop.eup %4471 }
 0x7a7   :  { %v2844_v54 = vmul.f32 0.5, %v2843_v55  ;;  %v2847_v57 = vadd.f32 1.0, %v4472_v8  ;;  %v4474_v56 = vpop.eup %4473  ;;  %v10888_v55 = vld [vmem:[#allocation68_spill] sm:$0xff]  ;;  %v10889_v8 = vld [vmem:[#allocation69_spill] sm:$0xff] }
 0x7a8   :  { %v4476_v14 = vpop.eup %4475 }
 0x7a9   :  { %v2848_v53 = vmul.f32 0.5, %v2847_v57  ;;  %v2855_v29 = vmul.f32 %v4474_v56, %v2844_v54  ;;  %v2852_v50 = vadd.f32 1.0, %v4476_v14  ;;  %v10890_v54 = vld [vmem:[#allocation70_spill] sm:$0xff]  ;;  %v10891_v57 = vld [vmem:[#allocation71_spill] sm:$0xff]  ;;  %v10893_v56 = vld [vmem:[#allocation73_spill] sm:$0xff] }
 0x7aa   :  { %v10896_v14 = vld [vmem:[#allocation76_spill] sm:$0xff] }
 0x7ab   :  { %v2854_v40 = vmul.f32 %v2848_v53, %v8074_v28  ;;  %v2853_v1 = vmul.f32 0.5, %v2852_v50  ;;  %v10842_v28 = vld [vmem:[#allocation214_spill] sm:$0xff]  ;;  %v10892_v53 = vld [vmem:[#allocation72_spill] sm:$0xff]  ;;  %v10897_v50 = vld [vmem:[#allocation77_spill] sm:$0xff] }
 0x7ad   :  { %v8674_v60 = vadd.f32 %v2855_v29, %v2854_v40  ;;  %v10894_v40 = vld [vmem:[#allocation74_spill] sm:$0xff]  ;;  %v10895_v29 = vld [vmem:[#allocation75_spill] sm:$0xff] }
 0x7af   :  { %4477 = vtanh.f32 %v8674_v60 }
 0x7bc   :  { %v4478_v47 = vpop.eup %4477 }
 0x7bd   :  { %v8677_v63 = vmul.f32 %v4478_v47, %v2853_v1  ;;  %v10898_v1 = vld [vmem:[#allocation78_spill] sm:$0xff]  ;;  %v10899_v47 = vld [vmem:[#allocation79_spill] sm:$0xff] }
 0x7bf   :  { %2924 = vmatmul.mubr.f32.vlgmr.msra.gmra.mxu0 %v8677_v63  ;;  %2995 = vmatmul.mubr.f32.vlgmr.msra.gmra.mxu1 %v8677_v63 }
 0x7c0   :  { %3027 = vmatpush1.msra.mxu0 %v8081_v2  ;;  %3098 = vmatpush1.msra.mxu1 %v8084_v30  ;;  %v10843_v2 = vld [vmem:[#allocation187_spill] sm:$0xff]  ;;  %v10844_v30 = vld [vmem:[#allocation217_spill] sm:$0xff] }
 0x7c1   :  { %3028 = vmatprep.subr.mxu0 %v8087_v23  ;;  %3099 = vmatprep.subr.mxu1 %v8090_v24  ;;  %v10845_v23 = vld [vmem:[#allocation218_spill] sm:$0xff] }
 0x7c2   :  { %3029 = vmatpush1.msra.mxu0 %v8093_v4  ;;  %3100 = vmatpush1.msra.mxu1 %v8096_v61  ;;  %v10846_v24 = vld [vmem:[#allocation190_spill] sm:$0xff]  ;;  %v10847_v4 = vld [vmem:[#allocation192_spill] sm:$0xff]  ;;  %v10848_v61 = vld [vmem:[#allocation193_spill] sm:$0xff] }
 0x7c3   :  { %3030 = vmatprep.subr.mxu0 %v8099_v7  ;;  %3101 = vmatprep.subr.mxu1 %v8102_v52  ;;  %v10849_v7 = vld [vmem:[#allocation195_spill] sm:$0xff]  ;;  %v10850_v52 = vld [vmem:[#allocation194_spill] sm:$0xff] }
 0x7c4   :  { %3031 = vmatpush1.msra.mxu0 %v8105_v58  ;;  %3102 = vmatpush1.msra.mxu1 %v8108_v18  ;;  %v10851_v58 = vld [vmem:[#allocation196_spill] sm:$0xff]  ;;  %v10852_v18 = vld [vmem:[#allocation197_spill] sm:$0xff] }
 0x7c5   :  { %3032 = vmatprep.subr.mxu0 %v8111_v27  ;;  %3103 = vmatprep.subr.mxu1 %v8114_v31  ;;  %v10853_v27 = vld [vmem:[#allocation199_spill] sm:$0xff]  ;;  %v10854_v31 = vld [vmem:[#allocation186_spill] sm:$0xff] }
 0x7c6   :  { %3033 = vmatpush1.msra.mxu0 %v8117_v35  ;;  %3104 = vmatpush1.msra.mxu1 %v8120_v38  ;;  %v10855_v35 = vld [vmem:[#allocation188_spill] sm:$0xff]  ;;  %v10856_v38 = vld [vmem:[#allocation189_spill] sm:$0xff] }
 0x7c7   :  { %3034 = vmatprep.subr.mxu0 %v8123_v32  ;;  %3105 = vmatprep.subr.mxu1 %v8126_v15  ;;  %v10857_v32 = vld [vmem:[#allocation191_spill] sm:$0xff]  ;;  %v10858_v15 = vld [vmem:[#allocation36_spill] sm:$0xff] }
 0x7c8   :  { %3035 = vmatpush1.msra.mxu0 %v8129_v33  ;;  %3106 = vmatpush1.msra.mxu1 %v8132_v13  ;;  %v10859_v33 = vld [vmem:[#allocation41_spill] sm:$0xff]  ;;  %v10860_v13 = vld [vmem:[#allocation38_spill] sm:$0xff] }
 0x7c9   :  { %3036 = vmatprep.subr.mxu0 %v8135_v49  ;;  %3107 = vmatprep.subr.mxu1 %v8138_v11  ;;  %v10861_v49 = vld [vmem:[#allocation44_spill] sm:$0xff] }
 0x7ca   :  { %3037 = vmatpush1.msra.mxu0 %v8141_v16  ;;  %3108 = vmatpush1.msra.mxu1 %v8144_v37  ;;  %v10862_v11 = vld [vmem:[#allocation40_spill] sm:$0xff]  ;;  %v10863_v16 = vld [vmem:[#allocation46_spill] sm:$0xff]  ;;  %v10864_v37 = vmov 0.0  }
 0x7cb   :  { %3038 = vmatprep.subr.mxu0 %v8147_v5  ;;  %3109 = vmatprep.subr.mxu1 %v8150_v10  ;;  %v10865_v5 = vld [vmem:[#allocation42_spill] sm:$0xff]  ;;  %v10866_v10 = vld [vmem:[#allocation48_spill] sm:$0xff] }
 0x7cc   :  { %3039 = vmatpush1.msra.mxu0 %v8153_v19  ;;  %3110 = vmatpush1.msra.mxu1 %v8156_v21  ;;  %v10867_v19 = vld [vmem:[#allocation45_spill] sm:$0xff]  ;;  %v10868_v21 = vld [vmem:[#allocation50_spill] sm:$0xff] }
 0x7cd   :  { %3040 = vmatprep.subr.mxu0 %v8159_v25  ;;  %3111 = vmatprep.subr.mxu1 %v8162_v34  ;;  %v10869_v25 = vld [vmem:[#allocation47_spill] sm:$0xff]  ;;  %v10870_v34 = vld [vmem:[#allocation52_spill] sm:$0xff] }
 0x7ce   :  { %3041 = vmatpush1.msra.mxu0 %v8165_v36  ;;  %3112 = vmatpush1.msra.mxu1 %v8168_v0  ;;  %v10871_v36 = vld [vmem:[#allocation49_spill] sm:$0xff] }
 0x7cf   :  { %3042 = vmatprep.subr.mxu0 %v8171_v9  ;;  %3113 = vmatprep.subr.mxu1 %v8174_v41  ;;  %v10872_v0 = vld [vmem:[#allocation53_spill] sm:$0xff]  ;;  %v10873_v9 = vld [vmem:[#allocation51_spill] sm:$0xff]  ;;  %v10874_v41 = vld [vmem:[#allocation54_spill] sm:$0xff] }
 0x7d0   :  { %3043 = vmatpush1.msra.mxu0 %v8177_v42  ;;  %3114 = vmatpush1.msra.mxu1 %v8180_v6  ;;  %v10875_v42 = vld [vmem:[#allocation55_spill] sm:$0xff]  ;;  %v10876_v6 = vld [vmem:[#allocation56_spill] sm:$0xff] }
 0x7d1   :  { %3044 = vmatprep.subr.mxu0 %v8183_v43  ;;  %3115 = vmatprep.subr.mxu1 %v8186_v44  ;;  %v10877_v43 = vld [vmem:[#allocation57_spill] sm:$0xff]  ;;  %v10878_v44 = vld [vmem:[#allocation58_spill] sm:$0xff] }
 0x7d2   :  { %3045 = vmatpush1.msra.mxu0 %v8189_v45  ;;  %3116 = vmatpush1.msra.mxu1 %v8192_v46  ;;  %v10879_v45 = vld [vmem:[#allocation59_spill] sm:$0xff]  ;;  %v10880_v46 = vld [vmem:[#allocation60_spill] sm:$0xff] }
 0x7d3   :  { %3046 = vmatprep.subr.mxu0 %v8195_v48  ;;  %3117 = vmatprep.subr.mxu1 %v10842_v28  ;;  %v10881_v48 = vld [vmem:[#allocation61_spill] sm:$0xff] }
 0x7d4   :  { %3047 = vmatpush1.msra.mxu0 %v10843_v2  ;;  %3118 = vmatpush1.msra.mxu1 %v10844_v30  ;;  %v10901_v28 = vld [vmem:[#allocation81_spill] sm:$0xff]  ;;  %v10902_v2 = vld [vmem:[#allocation82_spill] sm:$0xff]  ;;  %v10903_v30 = vld [vmem:[#allocation83_spill] sm:$0xff] }
 0x7d5   :  { %3048 = vmatprep.subr.mxu0 %v10845_v23  ;;  %3119 = vmatprep.subr.mxu1 %v10846_v24  ;;  %v10904_v23 = vld [vmem:[#allocation84_spill] sm:$0xff]  ;;  %v10905_v24 = vld [vmem:[#allocation85_spill] sm:$0xff] }
 0x7d6   :  { %3049 = vmatpush1.msra.mxu0 %v10847_v4  ;;  %3120 = vmatpush1.msra.mxu1 %v10848_v61  ;;  %v10906_v4 = vld [vmem:[#allocation86_spill] sm:$0xff]  ;;  %v10907_v61 = vld [vmem:[#allocation87_spill] sm:$0xff] }
 0x7d7   :  { %3050 = vmatprep.subr.mxu0 %v10849_v7  ;;  %3121 = vmatprep.subr.mxu1 %v10850_v52  ;;  %v10908_v7 = vld [vmem:[#allocation88_spill] sm:$0xff]  ;;  %v10909_v52 = vld [vmem:[#allocation89_spill] sm:$0xff] }
 0x7d8   :  { %3051 = vmatpush1.msra.mxu0 %v10851_v58  ;;  %3122 = vmatpush1.msra.mxu1 %v10852_v18  ;;  %v10910_v58 = vld [vmem:[#allocation90_spill] sm:$0xff]  ;;  %v10911_v18 = vld [vmem:[#allocation91_spill] sm:$0xff] }
 0x7d9   :  { %3052 = vmatprep.subr.mxu0 %v10853_v27  ;;  %3123 = vmatprep.subr.mxu1 %v10854_v31  ;;  %v10912_v27 = vld [vmem:[#allocation92_spill] sm:$0xff]  ;;  %v10913_v31 = vld [vmem:[#allocation93_spill] sm:$0xff] }
 0x7da   :  { %3053 = vmatpush1.msra.mxu0 %v10855_v35  ;;  %3124 = vmatpush1.msra.mxu1 %v10856_v38  ;;  %v10914_v35 = vld [vmem:[#allocation94_spill] sm:$0xff]  ;;  %v10915_v38 = vld [vmem:[#allocation95_spill] sm:$0xff] }
 0x7db   :  { %3054 = vmatprep.subr.mxu0 %v10857_v32  ;;  %3125 = vmatprep.subr.mxu1 %v10858_v15  ;;  %v10916_v32 = vld [vmem:[#allocation96_spill] sm:$0xff]  ;;  %v10917_v15 = vld [vmem:[#allocation97_spill] sm:$0xff] }
 0x7dc   :  { %3055 = vmatpush1.msra.mxu0 %v10859_v33  ;;  %3126 = vmatpush1.msra.mxu1 %v10860_v13  ;;  %v10918_v33 = vld [vmem:[#allocation98_spill] sm:$0xff]  ;;  %v10919_v13 = vld [vmem:[#allocation99_spill] sm:$0xff] }
 0x7dd   :  { %3056 = vmatprep.subr.mxu0 %v10861_v49  ;;  %3127 = vmatprep.subr.mxu1 %v10862_v11  ;;  %v10920_v49 = vld [vmem:[#allocation100_spill] sm:$0xff]  ;;  %v10921_v11 = vld [vmem:[#allocation101_spill] sm:$0xff] }
 0x7de   :  { %3057 = vmatpush1.msra.mxu0 %v10863_v16  ;;  %3090 = vmatprep.mubr.f32.mxu0 %v10864_v37  ;;  %v10922_v16 = vld [vmem:[#allocation102_spill] sm:$0xff] }
 0x7df   :  { %3128 = vmatpush1.msra.mxu1 %v10865_v5  ;;  %3161 = vmatprep.mubr.f32.mxu1 %v10864_v37  ;;  %v10923_v37 = vld [vmem:[#allocation103_spill] sm:$0xff]  ;;  %v10924_v5 = vld [vmem:[#allocation104_spill] sm:$0xff] }
 0x7e0   :  { %3091 = vmatmul.mubr.f32.vlgmr.msra.gmra.mxu0 %v8677_v63  ;;  %3162 = vmatmul.mubr.f32.vlgmr.msra.gmra.mxu1 %v8677_v63  ;;  %v10900_v63 = vld [vmem:[#allocation80_spill] sm:$0xff] }
 0x7e1   :  { %3194 = vmatprep.subr.mxu0 %v10866_v10  ;;  %3265 = vmatprep.subr.mxu1 %v10867_v19  ;;  %v10925_v10 = vld [vmem:[#allocation105_spill] sm:$0xff]  ;;  %v10926_v19 = vld [vmem:[#allocation106_spill] sm:$0xff] }
 0x7e2   :  { %3195 = vmatpush1.msra.mxu0 %v10868_v21  ;;  %3266 = vmatpush1.msra.mxu1 %v10869_v25  ;;  %v10927_v21 = vld [vmem:[#allocation107_spill] sm:$0xff]  ;;  %v10928_v25 = vld [vmem:[#allocation108_spill] sm:$0xff] }
 0x7e3   :  { %3196 = vmatprep.subr.mxu0 %v10870_v34  ;;  %3267 = vmatprep.subr.mxu1 %v10871_v36  ;;  %v10929_v34 = vld [vmem:[#allocation109_spill] sm:$0xff]  ;;  %v10930_v36 = vld [vmem:[#allocation110_spill] sm:$0xff] }
 0x7e4   :  { %3197 = vmatpush1.msra.mxu0 %v10872_v0  ;;  %3268 = vmatpush1.msra.mxu1 %v10873_v9  ;;  %v10931_v0 = vld [vmem:[#allocation111_spill] sm:$0xff]  ;;  %v10932_v9 = vld [vmem:[#allocation112_spill] sm:$0xff] }
 0x7e5   :  { %3198 = vmatprep.subr.mxu0 %v10874_v41  ;;  %3269 = vmatprep.subr.mxu1 %v10875_v42  ;;  %v10933_v41 = vld [vmem:[#allocation113_spill] sm:$0xff]  ;;  %v10934_v42 = vld [vmem:[#allocation114_spill] sm:$0xff] }
 0x7e6   :  { %3199 = vmatpush1.msra.mxu0 %v10876_v6  ;;  %3270 = vmatpush1.msra.mxu1 %v10877_v43  ;;  %v10935_v6 = vld [vmem:[#allocation115_spill] sm:$0xff]  ;;  %v10936_v43 = vld [vmem:[#allocation116_spill] sm:$0xff] }
 0x7e7   :  { %3200 = vmatprep.subr.mxu0 %v10878_v44  ;;  %3271 = vmatprep.subr.mxu1 %v10879_v45  ;;  %v10937_v44 = vld [vmem:[#allocation117_spill] sm:$0xff]  ;;  %v10938_v45 = vld [vmem:[#allocation118_spill] sm:$0xff] }
 0x7e8   :  { %3201 = vmatpush1.msra.mxu0 %v10880_v46  ;;  %3272 = vmatpush1.msra.mxu1 %v10881_v48  ;;  %v10939_v46 = vld [vmem:[#allocation119_spill] sm:$0xff]  ;;  %v10940_v48 = vld [vmem:[#allocation120_spill] sm:$0xff] }
 0x7e9   :  { %3202 = vmatprep.subr.mxu0 %v10882_v39  ;;  %3273 = vmatprep.subr.mxu1 %v10883_v59  ;;  %v10941_v39 = vld [vmem:[#allocation121_spill] sm:$0xff]  ;;  %v10942_v59 = vld [vmem:[#allocation122_spill] sm:$0xff] }
 0x7ea   :  { %3203 = vmatpush1.msra.mxu0 %v10884_v3  ;;  %3274 = vmatpush1.msra.mxu1 %v10885_v62  ;;  %v10943_v3 = vld [vmem:[#allocation123_spill] sm:$0xff]  ;;  %v10944_v62 = vld [vmem:[#allocation124_spill] sm:$0xff] }
 0x7eb   :  { %3204 = vmatprep.subr.mxu0 %v10886_v17  ;;  %3275 = vmatprep.subr.mxu1 %v10887_v26  ;;  %v10945_v17 = vld [vmem:[#allocation125_spill] sm:$0xff]  ;;  %v10946_v26 = vld [vmem:[#allocation126_spill] sm:$0xff] }
 0x7ec   :  { %3205 = vmatpush1.msra.mxu0 %v10888_v55  ;;  %3276 = vmatpush1.msra.mxu1 %v10889_v8  ;;  %v10947_v55 = vld [vmem:[#allocation127_spill] sm:$0xff]  ;;  %v10948_v8 = vld [vmem:[#allocation128_spill] sm:$0xff] }
 0x7ed   :  { %3206 = vmatprep.subr.mxu0 %v10890_v54  ;;  %3277 = vmatprep.subr.mxu1 %v10891_v57  ;;  %v10949_v54 = vld [vmem:[#allocation129_spill] sm:$0xff]  ;;  %v10950_v57 = vld [vmem:[#allocation130_spill] sm:$0xff] }
 0x7ee   :  { %3207 = vmatpush1.msra.mxu0 %v10892_v53  ;;  %3278 = vmatpush1.msra.mxu1 %v10893_v56  ;;  %v10951_v53 = vld [vmem:[#allocation131_spill] sm:$0xff]  ;;  %v10952_v56 = vld [vmem:[#allocation132_spill] sm:$0xff] }
 0x7ef   :  { %3208 = vmatprep.subr.mxu0 %v10894_v40  ;;  %3279 = vmatprep.subr.mxu1 %v10895_v29  ;;  %v10953_v40 = vld [vmem:[#allocation133_spill] sm:$0xff]  ;;  %v10954_v29 = vld [vmem:[#allocation134_spill] sm:$0xff] }
 0x7f0   :  { %3209 = vmatpush1.msra.mxu0 %v10896_v14  ;;  %3280 = vmatpush1.msra.mxu1 %v10897_v50  ;;  %v10955_v14 = vld [vmem:[#allocation135_spill] sm:$0xff]  ;;  %v10956_v50 = vld [vmem:[#allocation136_spill] sm:$0xff] }
 0x7f1   :  { %3210 = vmatprep.subr.mxu0 %v10898_v1  ;;  %3281 = vmatprep.subr.mxu1 %v10899_v47  ;;  %v10957_v1 = vld [vmem:[#allocation137_spill] sm:$0xff]  ;;  %v10958_v47 = vld [vmem:[#allocation138_spill] sm:$0xff] }
 0x7f2   :  { %3211 = vmatpush1.msra.mxu0 %v10900_v63  ;;  %3282 = vmatpush1.msra.mxu1 %v10901_v28  ;;  %v10959_v63 = vld [vmem:[#allocation139_spill] sm:$0xff]  ;;  %v10960_v28 = vld [vmem:[#allocation140_spill] sm:$0xff] }
 0x7f3   :  { %3212 = vmatprep.subr.mxu0 %v10902_v2  ;;  %3283 = vmatprep.subr.mxu1 %v10903_v30  ;;  %v10961_v2 = vld [vmem:[#allocation141_spill] sm:$0xff]  ;;  %v10962_v30 = vld [vmem:[#allocation142_spill] sm:$0xff] }
 0x7f4   :  { %3213 = vmatpush1.msra.mxu0 %v10904_v23  ;;  %3284 = vmatpush1.msra.mxu1 %v10905_v24  ;;  %v10963_v23 = vld [vmem:[#allocation143_spill] sm:$0xff]  ;;  %v10964_v24 = vld [vmem:[#allocation144_spill] sm:$0xff] }
 0x7f5   :  { %3214 = vmatprep.subr.mxu0 %v10906_v4  ;;  %3285 = vmatprep.subr.mxu1 %v10907_v61  ;;  %v10965_v4 = vld [vmem:[#allocation145_spill] sm:$0xff]  ;;  %v10966_v61 = vld [vmem:[#allocation146_spill] sm:$0xff] }
 0x7f6   :  { %3215 = vmatpush1.msra.mxu0 %v10908_v7  ;;  %3286 = vmatpush1.msra.mxu1 %v10909_v52  ;;  %v10967_v7 = vld [vmem:[#allocation147_spill] sm:$0xff]  ;;  %v10968_v52 = vld [vmem:[#allocation148_spill] sm:$0xff] }
 0x7f7   :  { %3216 = vmatprep.subr.mxu0 %v10910_v58  ;;  %3287 = vmatprep.subr.mxu1 %v10911_v18  ;;  %v10969_v58 = vld [vmem:[#allocation149_spill] sm:$0xff]  ;;  %v10970_v18 = vld [vmem:[#allocation150_spill] sm:$0xff] }
 0x7f8   :  { %3217 = vmatpush1.msra.mxu0 %v10912_v27  ;;  %3288 = vmatpush1.msra.mxu1 %v10913_v31  ;;  %v10971_v27 = vld [vmem:[#allocation151_spill] sm:$0xff]  ;;  %v10972_v31 = vld [vmem:[#allocation152_spill] sm:$0xff] }
 0x7f9   :  { %3218 = vmatprep.subr.mxu0 %v10914_v35  ;;  %3289 = vmatprep.subr.mxu1 %v10915_v38  ;;  %v10973_v35 = vld [vmem:[#allocation153_spill] sm:$0xff]  ;;  %v10974_v38 = vld [vmem:[#allocation154_spill] sm:$0xff] }
 0x7fa   :  { %3219 = vmatpush1.msra.mxu0 %v10916_v32  ;;  %3290 = vmatpush1.msra.mxu1 %v10917_v15  ;;  %v10975_v32 = vld [vmem:[#allocation155_spill] sm:$0xff]  ;;  %v10976_v15 = vld [vmem:[#allocation156_spill] sm:$0xff] }
 0x7fb   :  { %3220 = vmatprep.subr.mxu0 %v10918_v33  ;;  %3291 = vmatprep.subr.mxu1 %v10919_v13  ;;  %v10977_v33 = vld [vmem:[#allocation157_spill] sm:$0xff]  ;;  %v10978_v13 = vld [vmem:[#allocation158_spill] sm:$0xff] }
 0x7fc   :  { %3221 = vmatpush1.msra.mxu0 %v10920_v49  ;;  %3292 = vmatpush1.msra.mxu1 %v10921_v11  ;;  %v10979_v49 = vld [vmem:[#allocation159_spill] sm:$0xff]  ;;  %v10980_v11 = vld [vmem:[#allocation160_spill] sm:$0xff] }
 0x7fd   :  { %3222 = vmatprep.subr.mxu0 %v10922_v16  ;;  %3293 = vmatprep.subr.mxu1 %v10923_v37  ;;  %v10981_v16 = vld [vmem:[#allocation161_spill] sm:$0xff]  ;;  %v10982_v37 = vld [vmem:[#allocation162_spill] sm:$0xff] }
 0x7fe   :  { %3223 = vmatpush1.msra.mxu0 %v10924_v5  ;;  %3294 = vmatpush1.msra.mxu1 %v10925_v10  ;;  %v10983_v5 = vld [vmem:[#allocation163_spill] sm:$0xff]  ;;  %v10984_v10 = vld [vmem:[#allocation164_spill] sm:$0xff] }
 0x7ff   :  { %3224 = vmatprep.subr.mxu0 %v10926_v19  ;;  %3295 = vmatprep.subr.mxu1 %v10927_v21  ;;  %v10985_v19 = vld [vmem:[#allocation165_spill] sm:$0xff]  ;;  %v10986_v21 = vld [vmem:[#allocation166_spill] sm:$0xff] }
 0x800   :  { %3225 = vmatpush1.msra.mxu0 %v10928_v25  ;;  %3296 = vmatpush1.msra.mxu1 %v10929_v34  ;;  %v10987_v25 = vld [vmem:[#allocation167_spill] sm:$0xff]  ;;  %v10988_v34 = vld [vmem:[#allocation168_spill] sm:$0xff] }
 0x801   :  { %3226 = vmatprep.subr.mxu0 %v10930_v36  ;;  %3297 = vmatprep.subr.mxu1 %v10931_v0  ;;  %v10989_v36 = vld [vmem:[#allocation169_spill] sm:$0xff]  ;;  %v10990_v0 = vld [vmem:[#allocation170_spill] sm:$0xff] }
 0x802   :  { %3227 = vmatpush2.msra.mxu0 %v10932_v9  ;;  %3298 = vmatpush2.msra.mxu1 %v10933_v41  ;;  %v10991_v9 = vld [vmem:[#allocation171_spill] sm:$0xff]  ;;  %v10992_v41 = vld [vmem:[#allocation172_spill] sm:$0xff] }
 0x803   :  { %3228 = vmatprep.subr.mxu0 %v10934_v42  ;;  %3299 = vmatprep.subr.mxu1 %v10935_v6  ;;  %v10993_v42 = vld [vmem:[#allocation173_spill] sm:$0xff] }
 0x804   :  { %3229 = vmatpush2.msra.mxu0 %v10936_v43  ;;  %3300 = vmatpush2.msra.mxu1 %v10937_v44  ;;  %v10994_v43 = vld [vmem:[#allocation34_spill] sm:$0xff] }
 0x805   :  { %3230 = vmatprep.subr.mxu0 %v10938_v45  ;;  %3301 = vmatprep.subr.mxu1 %v10939_v46 }
 0x806   :  { %3231 = vmatpush2.msra.mxu0 %v10940_v48  ;;  %3302 = vmatpush2.msra.mxu1 %v10941_v39  ;;  %v10995_v48 = vld [vmem:[#allocation37_spill] sm:$0xff] }
 0x807   :  { %3232 = vmatprep.subr.mxu0 %v10942_v59  ;;  %3303 = vmatprep.subr.mxu1 %v10943_v3 }
 0x808   :  { %3233 = vmatpush2.msra.mxu0 %v10944_v62  ;;  %3304 = vmatpush2.msra.mxu1 %v10945_v17  ;;  %v10996_v62 = vld [vmem:[#allocation35_spill] sm:$0xff] }
 0x809   :  { %3234 = vmatprep.subr.mxu0 %v10946_v26  ;;  %3305 = vmatprep.subr.mxu1 %v10947_v55  ;;  %v10997_v55 = vld [vmem:[#allocation39_spill] sm:$0xff] }
 0x80a   :  { %3235 = vmatpush2.msra.mxu0 %v10948_v8  ;;  %3306 = vmatpush2.msra.mxu1 %v10949_v54 }
 0x80b   :  { %3236 = vmatprep.subr.mxu0 %v10950_v57  ;;  %3307 = vmatprep.subr.mxu1 %v10951_v53 }
 0x80c   :  { %3237 = vmatpush2.msra.mxu0 %v10952_v56  ;;  %3308 = vmatpush2.msra.mxu1 %v10953_v40 }
 0x80d   :  { %3238 = vmatprep.subr.mxu0 %v10954_v29  ;;  %3309 = vmatprep.subr.mxu1 %v10955_v14 }
 0x80e   :  { %3239 = vmatpush2.msra.mxu0 %v10956_v50  ;;  %3310 = vmatpush2.msra.mxu1 %v10957_v1  ;;  %v10998_v1 = vld [vmem:[#allocation174_spill] sm:$0xff] }
 0x80f   :  { %3240 = vmatprep.subr.mxu0 %v10958_v47  ;;  %3311 = vmatprep.subr.mxu1 %v10959_v63 }
 0x810   :  { %3241 = vmatpush2.msra.mxu0 %v10960_v28  ;;  %3312 = vmatpush2.msra.mxu1 %v10961_v2 }
 0x811   :  { %3242 = vmatprep.subr.mxu0 %v10962_v30  ;;  %3313 = vmatprep.subr.mxu1 %v10963_v23  ;;  %v10999_v23 = vld [vmem:[#allocation206_spill] sm:$0xff] }
 0x812   :  { %3243 = vmatpush2.msra.mxu0 %v10964_v24  ;;  %3314 = vmatpush2.msra.mxu1 %v10965_v4 }
 0x813   :  { %3244 = vmatprep.subr.mxu0 %v10966_v61  ;;  %3315 = vmatprep.subr.mxu1 %v10967_v7 }
 0x814   :  { %3245 = vmatpush2.msra.mxu0 %v10968_v52  ;;  %3316 = vmatpush2.msra.mxu1 %v10969_v58  ;;  %v11000_v52 = vld [vmem:[#allocation209_spill] sm:$0xff] }
 0x815   :  { %3246 = vmatprep.subr.mxu0 %v10970_v18  ;;  %3317 = vmatprep.subr.mxu1 %v10971_v27 }
 0x816   :  { %3247 = vmatpush2.msra.mxu0 %v10972_v31  ;;  %3318 = vmatpush2.msra.mxu1 %v10973_v35  ;;  %v11001_v31 = vld [vmem:[#allocation211_spill] sm:$0xff] }
 0x817   :  { %3248 = vmatprep.subr.mxu0 %v10974_v38  ;;  %3319 = vmatprep.subr.mxu1 %v10975_v32 }
 0x818   :  { %3249 = vmatpush2.msra.mxu0 %v10976_v15  ;;  %3320 = vmatpush2.msra.mxu1 %v10977_v33 }
 0x819   :  { %3250 = vmatprep.subr.mxu0 %v10978_v13  ;;  %3321 = vmatprep.subr.mxu1 %v10979_v49 }
 0x81a   :  { %3251 = vmatpush2.msra.mxu0 %v10980_v11  ;;  %3322 = vmatpush2.msra.mxu1 %v10981_v16  ;;  %v11002_v16 = vld [vmem:[#allocation213_spill] sm:$0xff] }
 0x81b   :  { %3252 = vmatprep.subr.mxu0 %v10982_v37  ;;  %3323 = vmatprep.subr.mxu1 %v10983_v5 }
 0x81c   :  { %3253 = vmatpush2.msra.mxu0 %v10984_v10  ;;  %3324 = vmatpush2.msra.mxu1 %v10985_v19 }
 0x81d   :  { %3254 = vmatprep.subr.mxu0 %v10986_v21  ;;  %3325 = vmatprep.subr.mxu1 %v10987_v25 }
 0x81e   :  { %3255 = vmatpush2.msra.mxu0 %v10988_v34  ;;  %3326 = vmatpush2.msra.mxu1 %v10989_v36 }
 0x81f   :  { %3256 = vmatprep.subr.mxu0 %v10990_v0  ;;  %3327 = vmatprep.subr.mxu1 %v10991_v9 }
 0x820   :  { %3257 = vmatpush2.msra.mxu0 %v10992_v41  ;;  %3328 = vmatpush2.msra.mxu1 %v10993_v42 }
 0x87f   :  { %v2925_v6 = vpop.f32.mrf.mxu0  ;;  %v2996_v59 = vpop.f32.mrf.mxu1 }
 0x880   :  { %v2926_v44 = vadd.f32 %v2925_v6, %v10994_v43  ;;  %v2997_v17 = vadd.f32 %v2996_v59, %v10996_v62 }
 0x881   :  { %v2927_v45 = vpop.f32.mrf.mxu0  ;;  %v2998_v26 = vpop.f32.mrf.mxu1 }
 0x882   :  { %v3001_v46 = vmul.f32 0.5, %v2926_v44  ;;  %v2928_v39 = vadd.f32 %v2927_v45, %v10995_v48  ;;  %v2999_v8 = vadd.f32 %v2998_v26, %v10997_v55 }
 0x884   :  { %4479 = vtanh.f32 %v3001_v46  ;;  %v3005_v3 = vmul.f32 0.5, %v2928_v39  ;;  %v3010_v54 = vmul.f32 0.5, %v2999_v8 }
 0x886   :  { %4481 = vtanh.f32 %v3005_v3 }
 0x887   :  { %4483 = vtanh.f32 %v2997_v17 }
 0x888   :  { %4485 = vtanh.f32 %v3010_v54 }
 0x891   :  { %v4480_v57 = vpop.eup %4479 }
 0x892   :  { %v3003_v53 = vadd.f32 1.0, %v4480_v57 }
 0x893   :  { %v4482_v56 = vpop.eup %4481 }
 0x894   :  { %v3004_v40 = vmul.f32 0.5, %v3003_v53  ;;  %v3007_v29 = vadd.f32 1.0, %v4482_v56  ;;  %v4484_v50 = vpop.eup %4483 }
 0x895   :  { %v4486_v30 = vpop.eup %4485 }
 0x896   :  { %v3008_v14 = vmul.f32 0.5, %v3007_v29  ;;  %v3015_v63 = vmul.f32 %v4484_v50, %v3004_v40  ;;  %v3012_v18 = vadd.f32 1.0, %v4486_v30 }
 0x898   :  { %v3014_v47 = vmul.f32 %v3008_v14, %v10998_v1  ;;  %v3013_v15 = vmul.f32 0.5, %v3012_v18 }
 0x89a   :  { %v8880_v28 = vadd.f32 %v3015_v63, %v3014_v47 }
 0x89c   :  { %4487 = vtanh.f32 %v8880_v28 }
 0x8a0   :  { %v3092_v2 = vpop.f32.mrf.mxu0  ;;  %v3163_v4 = vpop.f32.mrf.mxu1 }
 0x8a1   :  { %v3168_v24 = vadd.f32 %v3092_v2, %v10999_v23  ;;  %v3170_v35 = vadd.f32 %v3163_v4, %v11001_v31 }
 0x8a2   :  { %v3094_v61 = vpop.f32.mrf.mxu0  ;;  %v3165_v33 = vpop.f32.mrf.mxu1 }
 0x8a3   :  { %v3172_v7 = vadd.f32 %v3168_v24, %v10047_v12  ;;  %v3169_v58 = vadd.f32 %v3094_v61, %v11000_v52  ;;  %v3174_v49 = vadd.f32 %v3170_v35, %v6177_v22  ;;  %v3171_v37 = vadd.f32 %v3165_v33, %v11002_v16 }
 0x8a5   :  { %v3176_v27 = vmul.f32 0.5, %v3172_v7  ;;  %v3173_v38 = vadd.f32 %v3169_v58, %v10050_v51  ;;  %v3175_v12 = vadd.f32 %v3171_v37, %v6185_v20 }
 0x8a7   :  { %4489 = vtanh.f32 %v3176_v27  ;;  %v3180_v32 = vmul.f32 0.5, %v3173_v38  ;;  %v3185_v5 = vmul.f32 0.5, %v3175_v12 }
 0x8a9   :  { %v4488_v13 = vpop.eup %4487  ;;  %4491 = vtanh.f32 %v3180_v32 }
 0x8aa   :  { %v3018_v11 = vmul.f32 %v4488_v13, %v3013_v15  ;;  %4493 = vtanh.f32 %v3174_v49 }
 0x8ab   :  { %4495 = vtanh.f32 %v3185_v5 }
 0x8ac   :  { %3258 = vmatprep.mubr.f32.mxu0 %v3018_v11  ;;  %3329 = vmatprep.mubr.f32.mxu1 %v3018_v11 }
 0x8b4   :  { %v4490_v10 = vpop.eup %4489 }
 0x8b5   :  { %v3178_v19 = vadd.f32 1.0, %v4490_v10 }
 0x8b6   :  { %v4492_v51 = vpop.eup %4491 }
 0x8b7   :  { %v3179_v21 = vmul.f32 0.5, %v3178_v19  ;;  %v3182_v25 = vadd.f32 1.0, %v4492_v51  ;;  %v4494_v36 = vpop.eup %4493 }
 0x8b8   :  { %v4496_v41 = vpop.eup %4495 }
 0x8b9   :  { %v3183_v34 = vmul.f32 0.5, %v3182_v25  ;;  %v3190_v0 = vmul.f32 %v4494_v36, %v3179_v21  ;;  %v3187_v42 = vadd.f32 1.0, %v4496_v41 }
 0x8bb   :  { %v3189_v22 = vmul.f32 %v3183_v34, %v8674_v60  ;;  %v3188_v6 = vmul.f32 0.5, %v3187_v42 }
 0x8bd   :  { %v3191_v9 = vadd.f32 %v3190_v0, %v3189_v22  }
 0x8bf   :  { %4497 = vtanh.f32 %v3191_v9 }
 0x8cc   :  { %v4498_v44 = vpop.eup %4497 }
 0x8cd   :  { %v3193_v45 = vmul.f32 %v4498_v44, %v3188_v6  }
 0x8cf   :  { %3259 = vmatmul.mubr.f32.vlgmr.msra.gmra.mxu0 %v3193_v45  ;;  %3330 = vmatmul.mubr.f32.vlgmr.msra.gmra.mxu1 %v3193_v45 }
 0x98f   :  { %v3260_v20 = vpop.f32.mrf.mxu0  ;;  %v3331_v17 = vpop.f32.mrf.mxu1 }
 0x990   :  { %v3261_v46 = vadd.f32 %v3260_v20, %v10994_v43  ;;  %v3332_v26 = vadd.f32 %v3331_v17, %v10996_v62 }
 0x991   :  { %v3262_v39 = vpop.f32.mrf.mxu0  ;;  %v3333_v8 = vpop.f32.mrf.mxu1 }
 0x992   :  { %v3336_v59 = vmul.f32 0.5, %v3261_v46  ;;  %v3263_v3 = vadd.f32 %v3262_v39, %v10995_v48  ;;  %v3334_v54 = vadd.f32 %v3333_v8, %v10997_v55  ;;  %v11003_v55 = vld [vmem:[#allocation43_spill] sm:$0xff] }
 0x994   :  { %4499 = vtanh.f32 %v3336_v59  ;;  %v3340_v60 = vmul.f32 0.5, %v3263_v3  ;;  %v3345_v57 = vmul.f32 0.5, %v3334_v54 }
 0x996   :  { %4501 = vtanh.f32 %v3340_v60 }
 0x997   :  { %4503 = vtanh.f32 %v3332_v26 }
 0x998   :  { %4505 = vtanh.f32 %v3345_v57 }
 0x9a1   :  { %v4500_v53 = vpop.eup %4499 }
 0x9a2   :  { %v3338_v56 = vadd.f32 1.0, %v4500_v53 }
 0x9a3   :  { %v4502_v40 = vpop.eup %4501 }
 0x9a4   :  { %v3339_v29 = vmul.f32 0.5, %v3338_v56  ;;  %v3342_v43 = vadd.f32 1.0, %v4502_v40  ;;  %v4504_v50 = vpop.eup %4503 }
 0x9a5   :  { %v4506_v62 = vpop.eup %4505 }
 0x9a6   :  { %v3343_v14 = vmul.f32 0.5, %v3342_v43  ;;  %v3350_v1 = vmul.f32 %v4504_v50, %v3339_v29  ;;  %v3347_v63 = vadd.f32 1.0, %v4506_v62 }
 0x9a8   :  { %v3349_v48 = vmul.f32 %v3343_v14, %v8880_v28  ;;  %v3348_v2 = vmul.f32 0.5, %v3347_v63 }
 0x9aa   :  { %v3351_v47 = vadd.f32 %v3350_v1, %v3349_v48  }
 0x9ac   :  { %4507 = vtanh.f32 %v3351_v47 }
 0x9b9   :  { %v4508_v30 = vpop.eup %4507 }
 0x9ba   :  { %v3353_v23 = vmul.f32 %v4508_v30, %v3348_v2  }
 0x9bb LB: > { %v3429_v28 = vld [vmem:[#allocation7 + $0x1f8] sm:$0xff]  ;;  %v3428_v24 = vld [vmem:[#allocation7 + $0x1f0] sm:$0xff]  ;;  %v3427_v61 = vld [vmem:[#allocation7 + $0x1e8] sm:$0xff]  ;;  %v5247_v58 = vmov 0.0   ;;  %vm5248_vm2 = vmmov 0   ;;  %s4237_s17 = sshll.u32 %s5237_s5, 3  ;;  %s5237_s5 = sphi %s8908_s5, %s3360_s5   ;;  %v5233_v55 = vphi %v11003_v55, %v4168_v55   ;;  %v5229_v45 = vphi %v3193_v45, %v8962_v45   ;;  %v5225_v9 = vphi %v3191_v9, %v8959_v9   ;;  %v5221_v23 = vphi %v3353_v23, %v4094_v23   ;;  %v5217_v47 = vphi %v3351_v47, %v4092_v47  }
 0x9bc   : > { %v3425_v4 = vld [vmem:[#allocation7 + $0x1d8] sm:$0xff]  ;;  %3501 = vmatprep.subr.mxu1 %v3429_v28  ;;  %v3424_v7 = vld [vmem:[#allocation7 + $0x1d0] sm:$0xff]  ;;  %v3426_v52 = vld [vmem:[#allocation7 + $0x1e0] sm:$0xff]  ;;  %3565 = vmatprep.mubr.f32.mxu1 %v5247_v58  ;;  %s4172_s10 = scalar_lea.vmem %s9041_s13, %s4237_s17  ;;  %s3360_s5 = sadd.s32 1, %s5237_s5  }
 0x9bd   : > { %3502 = vmatpush1.msra.mxu1 %v3428_v24  ;;  %3430 = vmatprep.subr.mxu0 %v3427_v61  ;;  %v3421_v18 = vld [vmem:[#allocation7 + $0x1b8] sm:$0xff]  ;;  %v3423_v27 = vld [vmem:[#allocation7 + $0x1c8] sm:$0xff]  ;;  %v3420_v31 = vld [vmem:[#allocation7 + $0x1b0] sm:$0xff]  ;;  %p3357_p6 = scmp.ge.s32.totalorder %s3360_s5, 45  }
 0x9be   : > { %3503 = vmatprep.subr.mxu1 %v3425_v4  ;;  %3431 = vmatpush1.msra.mxu0 %v3426_v52  ;;  %v3422_v35 = vld [vmem:[#allocation7 + $0x1c0] sm:$0xff]  ;;  %v3419_v38 = vld [vmem:[#allocation7 + $0x1a8] sm:$0xff]  ;;  %v3417_v32 = vld [vmem:[#allocation7 + $0x198] sm:$0xff] }
 0x9bf   : > { %3504 = vmatpush1.msra.mxu1 %v3424_v7  ;;  %3432 = vmatprep.subr.mxu0 %v3423_v27  ;;  %v3418_v15 = vld [vmem:[#allocation7 + $0x1a0] sm:$0xff]  ;;  %v3416_v33 = vld [vmem:[#allocation7 + $0x190] sm:$0xff]  ;;  %v3415_v13 = vld [vmem:[#allocation7 + $0x188] sm:$0xff] }
 0x9c0   : > { %3505 = vmatprep.subr.mxu1 %v3421_v18  ;;  %3433 = vmatpush1.msra.mxu0 %v3422_v35  ;;  %v3413_v49 = vld [vmem:[#allocation7 + $0x178] sm:$0xff]  ;;  %v3414_v11 = vld [vmem:[#allocation7 + $0x180] sm:$0xff]  ;;  %v3412_v16 = vld [vmem:[#allocation7 + $0x170] sm:$0xff] }
 0x9c1   : > { %3506 = vmatpush1.msra.mxu1 %v3420_v31  ;;  %3434 = vmatprep.subr.mxu0 %v3419_v38  ;;  %v3411_v37 = vld [vmem:[#allocation7 + $0x168] sm:$0xff]  ;;  %v3409_v12 = vld [vmem:[#allocation7 + $0x158] sm:$0xff]  ;;  %v3410_v5 = vld [vmem:[#allocation7 + $0x160] sm:$0xff] }
 0x9c2   : > { %3507 = vmatprep.subr.mxu1 %v3417_v32  ;;  %3435 = vmatpush1.msra.mxu0 %v3418_v15  ;;  %v3408_v10 = vld [vmem:[#allocation7 + $0x150] sm:$0xff]  ;;  %v3407_v19 = vld [vmem:[#allocation7 + $0x148] sm:$0xff]  ;;  %v3405_v51 = vld [vmem:[#allocation7 + $0x138] sm:$0xff] }
 0x9c3   : > { %3508 = vmatpush1.msra.mxu1 %v3416_v33  ;;  %3436 = vmatprep.subr.mxu0 %v3415_v13  ;;  %v3406_v21 = vld [vmem:[#allocation7 + $0x140] sm:$0xff]  ;;  %v3404_v25 = vld [vmem:[#allocation7 + $0x130] sm:$0xff]  ;;  %v3403_v34 = vld [vmem:[#allocation7 + $0x128] sm:$0xff] }
 0x9c4   : > { %3509 = vmatprep.subr.mxu1 %v3413_v49  ;;  %3437 = vmatpush1.msra.mxu0 %v3414_v11  ;;  %v3401_v36 = vld [vmem:[#allocation7 + $0x118] sm:$0xff]  ;;  %v3402_v22 = vld [vmem:[#allocation7 + $0x120] sm:$0xff]  ;;  %v3400_v0 = vld [vmem:[#allocation7 + $0x110] sm:$0xff] }
 0x9c5   : > { %3510 = vmatpush1.msra.mxu1 %v3412_v16  ;;  %3438 = vmatprep.subr.mxu0 %v3411_v37  ;;  %v3399_v41 = vld [vmem:[#allocation7 + $0x108] sm:$0xff]  ;;  %v3397_v42 = vld [vmem:[#allocation7 + $0xf8] sm:$0xff]  ;;  %v3398_v6 = vld [vmem:[#allocation7 + $0x100] sm:$0xff] }
 0x9c6   : > { %3511 = vmatprep.subr.mxu1 %v3409_v12  ;;  %3439 = vmatpush1.msra.mxu0 %v3410_v5  ;;  %v3396_v44 = vld [vmem:[#allocation7 + $0xf0] sm:$0xff]  ;;  %v3395_v20 = vld [vmem:[#allocation7 + $0xe8] sm:$0xff]  ;;  %v3393_v46 = vld [vmem:[#allocation7 + $0xd8] sm:$0xff] }
 0x9c7   : > { %3512 = vmatpush1.msra.mxu1 %v3408_v10  ;;  %3440 = vmatprep.subr.mxu0 %v3407_v19  ;;  %v3394_v39 = vld [vmem:[#allocation7 + $0xe0] sm:$0xff]  ;;  %v3392_v59 = vld [vmem:[#allocation7 + $0xd0] sm:$0xff]  ;;  %v3391_v3 = vld [vmem:[#allocation7 + $0xc8] sm:$0xff] }
 0x9c8   : > { %3513 = vmatprep.subr.mxu1 %v3405_v51  ;;  %3441 = vmatpush1.msra.mxu0 %v3406_v21  ;;  %v3389_v17 = vld [vmem:[#allocation7 + $0xb8] sm:$0xff]  ;;  %v3390_v60 = vld [vmem:[#allocation7 + $0xc0] sm:$0xff]  ;;  %v3388_v26 = vld [vmem:[#allocation7 + $0xb0] sm:$0xff] }
 0x9c9   : > { %3514 = vmatpush1.msra.mxu1 %v3404_v25  ;;  %3442 = vmatprep.subr.mxu0 %v3403_v34  ;;  %v3387_v8 = vld [vmem:[#allocation7 + $0xa8] sm:$0xff]  ;;  %v3385_v54 = vld [vmem:[#allocation7 + $0x98] sm:$0xff]  ;;  %v3386_v57 = vld [vmem:[#allocation7 + $0xa0] sm:$0xff] }
 0x9ca   : > { %3515 = vmatprep.subr.mxu1 %v3401_v36  ;;  %3443 = vmatpush1.msra.mxu0 %v3402_v22  ;;  %v3384_v53 = vld [vmem:[#allocation7 + $0x90] sm:$0xff]  ;;  %v3383_v56 = vld [vmem:[#allocation7 + $0x88] sm:$0xff]  ;;  %v3381_v40 = vld [vmem:[#allocation7 + $0x78] sm:$0xff] }
 0x9cb   : > { %3516 = vmatpush1.msra.mxu1 %v3400_v0  ;;  %3444 = vmatprep.subr.mxu0 %v3399_v41  ;;  %v3382_v29 = vld [vmem:[#allocation7 + $0x80] sm:$0xff]  ;;  %v3380_v43 = vld [vmem:[#allocation7 + $0x70] sm:$0xff]  ;;  %v3379_v14 = vld [vmem:[#allocation7 + $0x68] sm:$0xff] }
 0x9cc   : > { %3517 = vmatprep.subr.mxu1 %v3397_v42  ;;  %3445 = vmatpush1.msra.mxu0 %v3398_v6  ;;  %v3377_v50 = vld [vmem:[#allocation7 + $0x58] sm:$0xff]  ;;  %v3378_v48 = vld [vmem:[#allocation7 + $0x60] sm:$0xff]  ;;  %v3376_v63 = vld [vmem:[#allocation7 + $0x50] sm:$0xff] }
 0x9cd   : > { %3518 = vmatpush1.msra.mxu1 %v3396_v44  ;;  %3446 = vmatprep.subr.mxu0 %v3395_v20  ;;  %v11004_v1 = vld [vmem:[#allocation13_spill] sm:$0xff]  ;;  %v3375_v2 = vld [vmem:[#allocation7 + $0x48] sm:$0xff]  ;;  %v11005_v30 = vld [vmem:[#allocation28_spill] sm:$0xff] }
 0x9ce   : > { %3519 = vmatprep.subr.mxu1 %v3393_v46  ;;  %3447 = vmatpush1.msra.mxu0 %v3394_v39  ;;  %v3573_v62 = vcombine.high %v11004_v1, %v11004_v1  ;;  %v3580_v28 = vrot.slane %v11004_v1, %v11005_v30  ;;  %v3373_v24 = vld [vmem:[#allocation7 + $0x38] sm:$0xff]  ;;  %v3374_v4 = vld [vmem:[#allocation7 + $0x40] sm:$0xff]  ;;  %v3372_v61 = vld [vmem:[#allocation7 + $0x30] sm:$0xff] }
 0x9cf   : > { %3520 = vmatpush1.msra.mxu1 %v3392_v59  ;;  %3448 = vmatprep.subr.mxu0 %v3391_v3  ;;  %v3371_v7 = vld [vmem:[#allocation7 + $0x28] sm:$0xff]  ;;  %v3369_v52 = vld [vmem:[#allocation7 + $0x18] sm:$0xff]  ;;  %v3370_v18 = vld [vmem:[#allocation7 + $0x20] sm:$0xff] }
 0x9d0   : > { %3521 = vmatprep.subr.mxu1 %v3389_v17  ;;  %3449 = vmatpush1.msra.mxu0 %v3390_v60  ;;  %v3587_v27 = vrot.slane %v3573_v62, %v11005_v30  ;;  %v3368_v31 = vld [vmem:[#allocation7 + $0x10] sm:$0xff]  ;;  %v3588_v35 = vcombine.high %v3580_v28, %v3580_v28  ;;  %v3367_v38 = vld [vmem:[#allocation7 + $0x8] sm:$0xff]  ;;  %v3366_v32 = vld [vmem:[#allocation7] sm:$0xff] }
 0x9d1   : > { %3522 = vmatpush1.msra.mxu1 %v3388_v26  ;;  %3450 = vmatprep.subr.mxu0 %v3387_v8  ;;  %v3847_v33 = vld [vmem:[#allocation8 + $0x1e8] sm:$0xff]  ;;  %v3849_v13 = vld [vmem:[#allocation8 + $0x1f8] sm:$0xff]  ;;  %v3846_v49 = vld [vmem:[#allocation8 + $0x1e0] sm:$0xff] }
 0x9d2   : > { %3523 = vmatprep.subr.mxu1 %v3385_v54  ;;  %3451 = vmatpush1.msra.mxu0 %v3386_v57  ;;  %v3589_v15 = vcombine.high %v3587_v27, %v3587_v27  ;;  %v3843_v11 = vld [vmem:[#allocation8 + $0x1c8] sm:$0xff]  ;;  %v3842_v16 = vld [vmem:[#allocation8 + $0x1c0] sm:$0xff]  ;;  %v3848_v37 = vld [vmem:[#allocation8 + $0x1f0] sm:$0xff] }
 0x9d3   : > { %3524 = vmatpush1.msra.mxu1 %v3384_v53  ;;  %3452 = vmatprep.subr.mxu0 %v3383_v56  ;;  %v3839_v12 = vld [vmem:[#allocation8 + $0x1a8] sm:$0xff]  ;;  %v3838_v5 = vld [vmem:[#allocation8 + $0x1a0] sm:$0xff]  ;;  %v3844_v10 = vld [vmem:[#allocation8 + $0x1d0] sm:$0xff] }
 0x9d4   : > { %3525 = vmatprep.subr.mxu1 %v3381_v40  ;;  %3453 = vmatpush1.msra.mxu0 %v3382_v29  ;;  %v3835_v19 = vld [vmem:[#allocation8 + $0x188] sm:$0xff]  ;;  %v3841_v51 = vld [vmem:[#allocation8 + $0x1b8] sm:$0xff]  ;;  %v3834_v21 = vld [vmem:[#allocation8 + $0x180] sm:$0xff] }
 0x9d5   : > { %3526 = vmatpush1.msra.mxu1 %v3380_v43  ;;  %3454 = vmatprep.subr.mxu0 %v3379_v14  ;;  %v3840_v25 = vld [vmem:[#allocation8 + $0x1b0] sm:$0xff]  ;;  %v3831_v34 = vld [vmem:[#allocation8 + $0x168] sm:$0xff]  ;;  %v3837_v36 = vld [vmem:[#allocation8 + $0x198] sm:$0xff] }
 0x9d6   : > { %3527 = vmatprep.subr.mxu1 %v3377_v50  ;;  %3455 = vmatpush1.msra.mxu0 %v3378_v48  ;;  %v3830_v22 = vld [vmem:[#allocation8 + $0x160] sm:$0xff]  ;;  %v3836_v0 = vld [vmem:[#allocation8 + $0x190] sm:$0xff]  ;;  %v3827_v41 = vld [vmem:[#allocation8 + $0x148] sm:$0xff] }
 0x9d7   : > { %3528 = vmatpush1.msra.mxu1 %v3376_v63  ;;  %3456 = vmatprep.subr.mxu0 %v3375_v2  ;;  %v3826_v42 = vld [vmem:[#allocation8 + $0x140] sm:$0xff]  ;;  %v3832_v6 = vld [vmem:[#allocation8 + $0x170] sm:$0xff]  ;;  %v3823_v44 = vld [vmem:[#allocation8 + $0x128] sm:$0xff] }
 0x9d8   : > { %3529 = vmatprep.subr.mxu1 %v3373_v24  ;;  %3457 = vmatpush1.msra.mxu0 %v3374_v4  ;;  %v3829_v20 = vld [vmem:[#allocation8 + $0x158] sm:$0xff]  ;;  %v3828_v46 = vld [vmem:[#allocation8 + $0x150] sm:$0xff]  ;;  %v3822_v59 = vld [vmem:[#allocation8 + $0x120] sm:$0xff] }
 0x9d9   : > { %3530 = vmatpush1.msra.mxu1 %v3372_v61  ;;  %3458 = vmatprep.subr.mxu0 %v3371_v7  ;;  %v3825_v39 = vld [vmem:[#allocation8 + $0x138] sm:$0xff]  ;;  %v3824_v3 = vld [vmem:[#allocation8 + $0x130] sm:$0xff]  ;;  %v3819_v17 = vld [vmem:[#allocation8 + $0x108] sm:$0xff] }
 0x9da   : > { %3531 = vmatprep.subr.mxu1 %v3369_v52  ;;  %3459 = vmatpush1.msra.mxu0 %v3370_v18  ;;  %v3821_v60 = vld [vmem:[#allocation8 + $0x118] sm:$0xff]  ;;  %v3818_v26 = vld [vmem:[#allocation8 + $0x100] sm:$0xff]  ;;  %v3820_v8 = vld [vmem:[#allocation8 + $0x110] sm:$0xff] }
 0x9db   : > { %3532 = vmatpush1.msra.mxu1 %v3368_v31  ;;  %3460 = vmatprep.subr.mxu0 %v3367_v38  ;;  %v3815_v54 = vld [vmem:[#allocation8 + $0xe8] sm:$0xff]  ;;  %v3817_v57 = vld [vmem:[#allocation8 + $0xf8] sm:$0xff]  ;;  %v3814_v53 = vld [vmem:[#allocation8 + $0xe0] sm:$0xff] }
 0x9dc   : > { %3566 = vmatmul.mubr.f32.vlgmr.msra.gmra.mxu1 %v5229_v45  ;;  %4230 = vmatprep.subr.msk.mxu1 %vm173_vm0, %v3588_v35  ;;  %v3816_v56 = vld [vmem:[#allocation8 + $0xf0] sm:$0xff]  ;;  %v3811_v40 = vld [vmem:[#allocation8 + $0xc8] sm:$0xff]  ;;  %v3813_v29 = vld [vmem:[#allocation8 + $0xd8] sm:$0xff] }
 0x9dd   : > { %4231 = vmatpush1.msk.msra.mxu1 %vm173_vm0, %v3580_v28  ;;  %3461 = vmatpush1.msra.mxu0 %v3366_v32  ;;  %v3810_v43 = vld [vmem:[#allocation8 + $0xc0] sm:$0xff]  ;;  %v3812_v14 = vld [vmem:[#allocation8 + $0xd0] sm:$0xff]  ;;  %v3807_v50 = vld [vmem:[#allocation8 + $0xa8] sm:$0xff] }
 0x9de   : > { %3494 = vmatprep.mubr.f32.mxu0 %v5247_v58  ;;  %3665 = vmatprep.mubr.f32.mxu1 %v5247_v58  ;;  %v3809_v48 = vld [vmem:[#allocation8 + $0xb8] sm:$0xff]  ;;  %v3806_v62 = vld [vmem:[#allocation8 + $0xa0] sm:$0xff]  ;;  %v3808_v63 = vld [vmem:[#allocation8 + $0xb0] sm:$0xff] }
 0x9df   : > { %3495 = vmatmul.mubr.f32.vlgmr.msra.gmra.mxu0 %v5229_v45  ;;  %4233 = vmatprep.subr.msk.mxu1 %vm173_vm0, %v3589_v15  ;;  %v3845_v45 = vld [vmem:[#allocation8 + $0x1d8] sm:$0xff]  ;;  %v3803_v2 = vld [vmem:[#allocation8 + $0x88] sm:$0xff]  ;;  %v3802_v24 = vld [vmem:[#allocation8 + $0x80] sm:$0xff] }
 0x9e0   : > { %4232 = vmatmul.mubr.msk.f32.vlgmr.msra.gmra.mxu1 %vm148_vm1, %v5233_v55  ;;  %3935 = vmatprep.subr.mxu0 %v3847_v33  ;;  %v3805_v28 = vld [vmem:[#allocation8 + $0x98] sm:$0xff]  ;;  %v3804_v4 = vld [vmem:[#allocation8 + $0x90] sm:$0xff]  ;;  %v3799_v61 = vld [vmem:[#allocation8 + $0x68] sm:$0xff] }
 0x9e1   : > { %4234 = vmatpush1.msk.msra.mxu1 %vm173_vm0, %v3587_v27  ;;  %3736 = vmatprep.mubr.f32.mxu1 %v5247_v58  ;;  %v3801_v7 = vld [vmem:[#allocation8 + $0x78] sm:$0xff]  ;;  %v3798_v52 = vld [vmem:[#allocation8 + $0x60] sm:$0xff]  ;;  %v3800_v18 = vld [vmem:[#allocation8 + $0x70] sm:$0xff] }
 0x9e2   : > { %4006 = vmatprep.subr.mxu1 %v3849_v13  ;;  %3936 = vmatpush1.msra.mxu0 %v3846_v49  ;;  %v3795_v27 = vld [vmem:[#allocation8 + $0x48] sm:$0xff]  ;;  %v3797_v31 = vld [vmem:[#allocation8 + $0x58] sm:$0xff]  ;;  %v3794_v35 = vld [vmem:[#allocation8 + $0x40] sm:$0xff] }
 0x9e3   : > { %3937 = vmatprep.subr.mxu0 %v3843_v11  ;;  %v3796_v38 = vld [vmem:[#allocation8 + $0x50] sm:$0xff]  ;;  %v3791_v32 = vld [vmem:[#allocation8 + $0x28] sm:$0xff]  ;;  %v3793_v15 = vld [vmem:[#allocation8 + $0x38] sm:$0xff]  ;;  %3999 = vmatprep.mubr.f32.mxu0 %v5221_v23 }
 0x9e4   : > { %4235 = vmatmul.mubr.msk.f32.vlgmr.msra.gmra.mxu1 %vm148_vm1, %v5233_v55  ;;  %3938 = vmatpush1.msra.mxu0 %v3842_v16  ;;  %v3833_v55 = vld [vmem:[#allocation8 + $0x178] sm:$0xff]  ;;  %v3790_v33 = vld [vmem:[#allocation8 + $0x20] sm:$0xff]  ;;  %v3792_v13 = vld [vmem:[#allocation8 + $0x30] sm:$0xff] }
 0x9e5   : > { %4007 = vmatpush1.msra.mxu1 %v3848_v37  ;;  %3939 = vmatprep.subr.mxu0 %v3839_v12  ;;  %v3787_v49 = vld [vmem:[#allocation8 + $0x8] sm:$0xff]  ;;  %v3789_v11 = vld [vmem:[#allocation8 + $0x18] sm:$0xff]  ;;  %v3786_v16 = vld [vmem:[#allocation8] sm:$0xff] }
 0x9e6   : > { %4008 = vmatprep.subr.mxu1 %v3845_v45  ;;  %3940 = vmatpush1.msra.mxu0 %v3838_v5  ;;  %v3788_v37 = vld [vmem:[#allocation8 + $0x10] sm:$0xff]  ;;  %v3911_v12 = vld [vmem:[#allocation8 + $0x3e8] sm:$0xff]  ;;  %v3913_v45 = vld [vmem:[#allocation8 + $0x3f8] sm:$0xff] }
 0x9e7   : > { %4009 = vmatpush1.msra.mxu1 %v3844_v10  ;;  %3941 = vmatprep.subr.mxu0 %v3835_v19  ;;  %v3910_v5 = vld [vmem:[#allocation8 + $0x3e0] sm:$0xff]  ;;  %v3912_v10 = vld [vmem:[#allocation8 + $0x3f0] sm:$0xff]  ;;  %v3907_v19 = vld [vmem:[#allocation8 + $0x3c8] sm:$0xff] }
 0x9e8   : > { %4010 = vmatprep.subr.mxu1 %v3841_v51  ;;  %3942 = vmatpush1.msra.mxu0 %v3834_v21  ;;  %v3909_v51 = vld [vmem:[#allocation8 + $0x3d8] sm:$0xff]  ;;  %v3906_v21 = vld [vmem:[#allocation8 + $0x3c0] sm:$0xff] }
 0x9e9   : > { %4011 = vmatpush1.msra.mxu1 %v3840_v25  ;;  %3943 = vmatprep.subr.mxu0 %v3831_v34  ;;  %v3908_v25 = vld [vmem:[#allocation8 + $0x3d0] sm:$0xff]  ;;  %v3903_v34 = vld [vmem:[#allocation8 + $0x3a8] sm:$0xff] }
 0x9ea   : > { %4012 = vmatprep.subr.mxu1 %v3837_v36  ;;  %3944 = vmatpush1.msra.mxu0 %v3830_v22  ;;  %v3905_v36 = vld [vmem:[#allocation8 + $0x3b8] sm:$0xff]  ;;  %v3902_v22 = vld [vmem:[#allocation8 + $0x3a0] sm:$0xff] }
 0x9eb   : > { %4013 = vmatpush1.msra.mxu1 %v3836_v0  ;;  %3945 = vmatprep.subr.mxu0 %v3827_v41  ;;  %v3904_v0 = vld [vmem:[#allocation8 + $0x3b0] sm:$0xff]  ;;  %v3899_v41 = vld [vmem:[#allocation8 + $0x388] sm:$0xff] }
 0x9ec   : > { %4014 = vmatprep.subr.mxu1 %v3833_v55  ;;  %3946 = vmatpush1.msra.mxu0 %v3826_v42  ;;  %v3901_v55 = vld [vmem:[#allocation8 + $0x398] sm:$0xff]  ;;  %v3898_v42 = vld [vmem:[#allocation8 + $0x380] sm:$0xff] }
 0x9ed   : > { %4015 = vmatpush1.msra.mxu1 %v3832_v6  ;;  %3947 = vmatprep.subr.mxu0 %v3823_v44  ;;  %v3900_v6 = vld [vmem:[#allocation8 + $0x390] sm:$0xff]  ;;  %v3895_v44 = vld [vmem:[#allocation8 + $0x368] sm:$0xff] }
 0x9ee   : > { %4016 = vmatprep.subr.mxu1 %v3829_v20  ;;  %3948 = vmatpush1.msra.mxu0 %v3822_v59  ;;  %v3897_v20 = vld [vmem:[#allocation8 + $0x378] sm:$0xff]  ;;  %v3891_v59 = vld [vmem:[#allocation8 + $0x348] sm:$0xff] }
 0x9ef   : > { %4017 = vmatpush1.msra.mxu1 %v3828_v46  ;;  %3949 = vmatprep.subr.mxu0 %v3819_v17  ;;  %v3894_v46 = vld [vmem:[#allocation8 + $0x360] sm:$0xff] }
 0x9f0   : > { %4018 = vmatprep.subr.mxu1 %v3825_v39  ;;  %3950 = vmatpush1.msra.mxu0 %v3818_v26  ;;  %v3896_v39 = vld [vmem:[#allocation8 + $0x370] sm:$0xff]  ;;  %v3890_v17 = vld [vmem:[#allocation8 + $0x340] sm:$0xff]  ;;  %v3887_v26 = vld [vmem:[#allocation8 + $0x328] sm:$0xff] }
 0x9f1   : > { %4019 = vmatpush1.msra.mxu1 %v3824_v3  ;;  %3951 = vmatprep.subr.mxu0 %v3815_v54  ;;  %v3893_v3 = vld [vmem:[#allocation8 + $0x358] sm:$0xff]  ;;  %v3886_v54 = vld [vmem:[#allocation8 + $0x320] sm:$0xff] }
 0x9f2   : > { %4020 = vmatprep.subr.mxu1 %v3821_v60  ;;  %3952 = vmatpush1.msra.mxu0 %v3814_v53  ;;  %v3892_v60 = vld [vmem:[#allocation8 + $0x350] sm:$0xff]  ;;  %v3883_v53 = vld [vmem:[#allocation8 + $0x308] sm:$0xff] }
 0x9f3   : > { %4021 = vmatpush1.msra.mxu1 %v3820_v8  ;;  %3953 = vmatprep.subr.mxu0 %v3811_v40  ;;  %v3889_v8 = vld [vmem:[#allocation8 + $0x338] sm:$0xff]  ;;  %v3882_v40 = vld [vmem:[#allocation8 + $0x300] sm:$0xff] }
 0x9f4   : > { %4022 = vmatprep.subr.mxu1 %v3817_v57  ;;  %3954 = vmatpush1.msra.mxu0 %v3810_v43  ;;  %v3888_v57 = vld [vmem:[#allocation8 + $0x330] sm:$0xff]  ;;  %v3879_v43 = vld [vmem:[#allocation8 + $0x2e8] sm:$0xff] }
 0x9f5   : > { %4023 = vmatpush1.msra.mxu1 %v3816_v56  ;;  %3955 = vmatprep.subr.mxu0 %v3807_v50  ;;  %v3885_v56 = vld [vmem:[#allocation8 + $0x318] sm:$0xff]  ;;  %v3878_v50 = vld [vmem:[#allocation8 + $0x2e0] sm:$0xff] }
 0x9f6   : > { %4024 = vmatprep.subr.mxu1 %v3813_v29  ;;  %3956 = vmatpush1.msra.mxu0 %v3806_v62  ;;  %v3884_v29 = vld [vmem:[#allocation8 + $0x310] sm:$0xff]  ;;  %v3875_v62 = vld [vmem:[#allocation8 + $0x2c8] sm:$0xff] }
 0x9f7   : > { %4025 = vmatpush1.msra.mxu1 %v3812_v14  ;;  %3957 = vmatprep.subr.mxu0 %v3803_v2  ;;  %v3881_v14 = vld [vmem:[#allocation8 + $0x2f8] sm:$0xff]  ;;  %v3874_v2 = vld [vmem:[#allocation8 + $0x2c0] sm:$0xff] }
 0x9f8   : > { %4026 = vmatprep.subr.mxu1 %v3809_v48  ;;  %3958 = vmatpush1.msra.mxu0 %v3802_v24  ;;  %v3880_v48 = vld [vmem:[#allocation8 + $0x2f0] sm:$0xff]  ;;  %v3871_v24 = vld [vmem:[#allocation8 + $0x2a8] sm:$0xff] }
 0x9f9   : > { %4027 = vmatpush1.msra.mxu1 %v3808_v63  ;;  %3959 = vmatprep.subr.mxu0 %v3799_v61  ;;  %v3877_v63 = vld [vmem:[#allocation8 + $0x2d8] sm:$0xff]  ;;  %v3870_v61 = vld [vmem:[#allocation8 + $0x2a0] sm:$0xff] }
 0x9fa   : > { %4028 = vmatprep.subr.mxu1 %v3805_v28  ;;  %3960 = vmatpush1.msra.mxu0 %v3798_v52  ;;  %v3876_v28 = vld [vmem:[#allocation8 + $0x2d0] sm:$0xff]  ;;  %v3867_v52 = vld [vmem:[#allocation8 + $0x288] sm:$0xff] }
 0x9fb   : > { %4029 = vmatpush1.msra.mxu1 %v3804_v4  ;;  %3961 = vmatprep.subr.mxu0 %v3795_v27  ;;  %v3873_v4 = vld [vmem:[#allocation8 + $0x2b8] sm:$0xff]  ;;  %v3866_v27 = vld [vmem:[#allocation8 + $0x280] sm:$0xff] }
 0x9fc   : > { %4030 = vmatprep.subr.mxu1 %v3801_v7  ;;  %3962 = vmatpush1.msra.mxu0 %v3794_v35  ;;  %v3872_v7 = vld [vmem:[#allocation8 + $0x2b0] sm:$0xff]  ;;  %v3863_v35 = vld [vmem:[#allocation8 + $0x268] sm:$0xff] }
 0x9fd   : > { %4031 = vmatpush1.msra.mxu1 %v3800_v18  ;;  %3963 = vmatprep.subr.mxu0 %v3791_v32  ;;  %v3869_v18 = vld [vmem:[#allocation8 + $0x298] sm:$0xff]  ;;  %v3862_v32 = vld [vmem:[#allocation8 + $0x260] sm:$0xff] }
 0x9fe   : > { %4032 = vmatprep.subr.mxu1 %v3797_v31  ;;  %3964 = vmatpush1.msra.mxu0 %v3790_v33  ;;  %v3868_v31 = vld [vmem:[#allocation8 + $0x290] sm:$0xff]  ;;  %v3859_v33 = vld [vmem:[#allocation8 + $0x248] sm:$0xff] }
 0x9ff   : > { %4033 = vmatpush1.msra.mxu1 %v3796_v38  ;;  %3965 = vmatprep.subr.mxu0 %v3787_v49  ;;  %v3865_v38 = vld [vmem:[#allocation8 + $0x278] sm:$0xff]  ;;  %v3858_v49 = vld [vmem:[#allocation8 + $0x240] sm:$0xff] }
 0xa00   : > { %4034 = vmatprep.subr.mxu1 %v3793_v15  ;;  %3966 = vmatpush1.msra.mxu0 %v3786_v16  ;;  %v3864_v15 = vld [vmem:[#allocation8 + $0x270] sm:$0xff]  ;;  %v3855_v16 = vld [vmem:[#allocation8 + $0x228] sm:$0xff] }
 0xa01   : > { %4035 = vmatpush1.msra.mxu1 %v3792_v13  ;;  %3967 = vmatprep.subr.mxu0 %v3911_v12  ;;  %v3861_v13 = vld [vmem:[#allocation8 + $0x258] sm:$0xff]  ;;  %v3854_v12 = vld [vmem:[#allocation8 + $0x220] sm:$0xff] }
 0xa02   : > { %4036 = vmatprep.subr.mxu1 %v3789_v11  ;;  %3968 = vmatpush2.msra.mxu0 %v3910_v5  ;;  %v3860_v11 = vld [vmem:[#allocation8 + $0x250] sm:$0xff]  ;;  %v3851_v5 = vld [vmem:[#allocation8 + $0x208] sm:$0xff] }
 0xa03   : > { %4037 = vmatpush1.msra.mxu1 %v3788_v37  ;;  %3969 = vmatprep.subr.mxu0 %v3907_v19  ;;  %v3857_v37 = vld [vmem:[#allocation8 + $0x238] sm:$0xff]  ;;  %v3850_v19 = vld [vmem:[#allocation8 + $0x200] sm:$0xff] }
 0xa04   : > { %4038 = vmatprep.subr.mxu1 %v3913_v45  ;;  %3970 = vmatpush2.msra.mxu0 %v3906_v21  ;;  %v3856_v45 = vld [vmem:[#allocation8 + $0x230] sm:$0xff] }
 0xa05   : > { %4039 = vmatpush2.msra.mxu1 %v3912_v10  ;;  %3971 = vmatprep.subr.mxu0 %v3903_v34  ;;  %v3853_v10 = vld [vmem:[#allocation8 + $0x218] sm:$0xff] }
 0xa06   : > { %4040 = vmatprep.subr.mxu1 %v3909_v51  ;;  %3972 = vmatpush2.msra.mxu0 %v3902_v22  ;;  %v3852_v51 = vld [vmem:[#allocation8 + $0x210] sm:$0xff]  ;;  %v11007_v22 = vld [vmem:[#allocation14_spill] sm:$0xff] }
 0xa07   : > { %4041 = vmatpush2.msra.mxu1 %v3908_v25  ;;  %3973 = vmatprep.subr.mxu0 %v3899_v41 }
 0xa08   : > { %4042 = vmatprep.subr.mxu1 %v3905_v36  ;;  %3974 = vmatpush2.msra.mxu0 %v3898_v42  ;;  %v11006_v36 = vld [vmem:[#allocation208_spill] sm:$0xff]  ;;  %v11008_v42 = vld [vmem:[#allocation210_spill] sm:$0xff] }
 0xa09   : > { %4043 = vmatpush2.msra.mxu1 %v3904_v0  ;;  %3975 = vmatprep.subr.mxu0 %v3895_v44  ;;  %v3747_v0 = vrot.slane %v11007_v22, %v11006_v36 }
 0xa0a   : > { %4044 = vmatprep.subr.mxu1 %v3901_v55  ;;  %3976 = vmatpush2.msra.mxu0 %v3894_v46 }
 0xa0b   : > { %4045 = vmatpush2.msra.mxu1 %v3900_v6  ;;  %3977 = vmatprep.subr.mxu0 %v3891_v59  ;;  %v3751_v6 = vrot.slane %v11007_v22, %v11008_v42 }
 0xa0c   : > { %4046 = vmatprep.subr.mxu1 %v3897_v20  ;;  %3978 = vmatpush2.msra.mxu0 %v3890_v17 }
 0xa0d   : > { %4047 = vmatpush2.msra.mxu1 %v3896_v39  ;;  %3979 = vmatprep.subr.mxu0 %v3887_v26 }
 0xa0e   : > { %4048 = vmatprep.subr.mxu1 %v3893_v3  ;;  %3980 = vmatpush2.msra.mxu0 %v3886_v54 }
 0xa0f   : > { %4049 = vmatpush2.msra.mxu1 %v3892_v60  ;;  %3981 = vmatprep.subr.mxu0 %v3883_v53  ;;  %v11009_v60 = vld [vmem:[#allocation215_spill] sm:$0xff] }
 0xa10   : > { %4050 = vmatprep.subr.mxu1 %v3889_v8  ;;  %3982 = vmatpush2.msra.mxu0 %v3882_v40  ;;  %v3755_v26 = vrot.slane %v11007_v22, %v11009_v60 }
 0xa11   : > { %4051 = vmatpush2.msra.mxu1 %v3888_v57  ;;  %3983 = vmatprep.subr.mxu0 %v3879_v43 }
 0xa12   : > { %4052 = vmatprep.subr.mxu1 %v3885_v56  ;;  %3984 = vmatpush2.msra.mxu0 %v3878_v50  ;;  %v11010_v56 = vld [vmem:[#allocation216_spill] sm:$0xff] }
 0xa13   : > { %4053 = vmatpush2.msra.mxu1 %v3884_v29  ;;  %3985 = vmatprep.subr.mxu0 %v3875_v62  ;;  %v3759_v40 = vrot.slane %v11007_v22, %v11010_v56 }
 0xa14   : > { %4054 = vmatprep.subr.mxu1 %v3881_v14  ;;  %3986 = vmatpush2.msra.mxu0 %v3874_v2 }
 0xa15   : > { %4055 = vmatpush2.msra.mxu1 %v3880_v48  ;;  %3987 = vmatprep.subr.mxu0 %v3871_v24 }
 0xa16   : > { %4056 = vmatprep.subr.mxu1 %v3877_v63  ;;  %3988 = vmatpush2.msra.mxu0 %v3870_v61 }
 0xa17   : > { %4057 = vmatpush2.msra.mxu1 %v3876_v28  ;;  %3989 = vmatprep.subr.mxu0 %v3867_v52 }
 0xa18   : > { %4058 = vmatprep.subr.mxu1 %v3873_v4  ;;  %3990 = vmatpush2.msra.mxu0 %v3866_v27  ;;  %v11011_v27 = vld [vmem:[#allocation32_spill] sm:$0xff] }
 0xa19   : > { %4059 = vmatpush2.msra.mxu1 %v3872_v7  ;;  %3991 = vmatprep.subr.mxu0 %v3863_v35  ;;  %v11013_v35 = vld [vmem:[#allocation30_spill] sm:$0xff] }
 0xa1a   : > { %4060 = vmatprep.subr.mxu1 %v3869_v18  ;;  %3992 = vmatpush2.msra.mxu0 %v3862_v32  ;;  %v11015_v32 = vld [vmem:[#allocation27_spill] sm:$0xff] }
 0xa1b   : > { %4061 = vmatpush2.msra.mxu1 %v3868_v31  ;;  %3993 = vmatprep.subr.mxu0 %v3859_v33  ;;  %v11012_v31 = vld [vmem:[#allocation31_spill] sm:$0xff]  ;;  %v11017_v33 = vld [vmem:[#allocation25_spill] sm:$0xff] }
 0xa1c   : > { %4062 = vmatprep.subr.mxu1 %v3865_v38  ;;  %3994 = vmatpush2.msra.mxu0 %v3858_v49  ;;  %v11014_v38 = vld [vmem:[#allocation29_spill] sm:$0xff]  ;;  %v11019_v49 = vld [vmem:[#allocation23_spill] sm:$0xff] }
 0xa1d   : > { %4063 = vmatpush2.msra.mxu1 %v3864_v15  ;;  %3995 = vmatprep.subr.mxu0 %v3855_v16  ;;  %v11016_v15 = vld [vmem:[#allocation26_spill] sm:$0xff]  ;;  %v11021_v16 = vld [vmem:[#allocation21_spill] sm:$0xff] }
 0xa1e   : > { %4064 = vmatprep.subr.mxu1 %v3861_v13  ;;  %3996 = vmatpush2.msra.mxu0 %v3854_v12  ;;  %v11018_v13 = vld [vmem:[#allocation24_spill] sm:$0xff]  ;;  %v11023_v12 = vld [vmem:[#allocation19_spill] sm:$0xff] }
 0xa1f   : > { %4065 = vmatpush2.msra.mxu1 %v3860_v11  ;;  %3997 = vmatprep.subr.mxu0 %v3851_v5  ;;  %v11020_v11 = vld [vmem:[#allocation22_spill] sm:$0xff] }
 0xa20   : > { %4066 = vmatprep.subr.mxu1 %v3857_v37  ;;  %3998 = vmatpush2.msra.mxu0 %v3850_v19  ;;  %v11022_v37 = vld [vmem:[#allocation20_spill] sm:$0xff]  ;;  %v11024_v5 = vld [vmem:[#allocation18_spill] sm:$0xff] }
 0xa21   : > { %4067 = vmatpush2.msra.mxu1 %v3856_v45  ;;  %4070 = vmatprep.mubr.f32.mxu1 %v5221_v23  ;;  %v11026_v19 = vld [vmem:[#allocation16_spill] sm:$0xff] }
 0xa22   : > { %4068 = vmatprep.subr.mxu1 %v3853_v10  ;;  %4255 = vmatprep.subr.mxu0 %v5247_v58  ;;  %v11025_v10 = vld [vmem:[#allocation17_spill] sm:$0xff] }
 0xa23   : > { %4069 = vmatpush2.msra.mxu1 %v3852_v51  ;;  %v11027_v51 = vld [vmem:[#allocation15_spill] sm:$0xff] }
 0xa9c   : > { %v3567_v21 = vpop.f32.mrf.mxu1 }
 0xa9e   : > { %v3569_v25 = vpop.f32.mrf.mxu1 }
 0xa9f   : > { %v3496_v34 = vpop.f32.mrf.mxu0 }
 0xaa0   : > { %v3667_v41 = vpop.f32.mrf.mxu1 }
 0xaa1   : > { %v3668_v55 = vadd.f32 %v3667_v41, %v3496_v34  ;;  %v3498_v44 = vpop.f32.mrf.mxu0 }
 0xaa2   : > { %v3669_v20 = vpop.f32.mrf.mxu1 }
 0xaa3   : > { %v3764_v46 = vadd.f32 %v3747_v0, %v3668_v55  ;;  %v3670_v39 = vadd.f32 %v3669_v20, %v3498_v44 }
 0xaa4   : > { %v3738_v59 = vpop.f32.mrf.mxu1 }
 0xaa5   : > { %v3768_v3 = vmul.f32 0.5, %v3764_v46  ;;  %v3765_v23 = vadd.f32 %v3751_v6, %v3670_v39  ;;  %v3739_v17 = vadd.f32 %v3738_v59, %v3567_v21  ;;  %v3918_v21 = vrot.slane %v11027_v51, %v11006_v36 }
 0xaa6   : > { %v3740_v54 = vpop.f32.mrf.mxu1  ;;  %v3926_v6 = vrot.slane %v11027_v51, %v11009_v60 }
 0xaa7   : > { %5085 = vtanh.f32 %v3768_v3  ;;  %v3772_v8 = vmul.f32 0.5, %v3765_v23  ;;  %v3766_v57 = vadd.f32 %v3755_v26, %v3739_v17  ;;  %v3741_v53 = vadd.f32 %v3740_v54, %v3569_v25 }
 0xaa8   : > { %v3922_v25 = vrot.slane %v11027_v51, %v11008_v42 }
 0xaa9   : > { %5087 = vtanh.f32 %v3772_v8  ;;  %v3767_v29 = vadd.f32 %v3759_v40, %v3741_v53 }
 0xaaa   : > { %5089 = vtanh.f32 %v3766_v57 }
 0xaab   : > { %v3777_v43 = vmul.f32 0.5, %v3767_v29 }
 0xaad   : > { %5091 = vtanh.f32 %v3777_v43 }
 0xab4   : > { %v5086_v14 = vpop.eup %5085 }
 0xab5   : > { %v3770_v50 = vadd.f32 1.0, %v5086_v14 }
 0xab6   : > { %v5088_v48 = vpop.eup %5087 }
 0xab7   : > { %v3771_v62 = vmul.f32 0.5, %v3770_v50  ;;  %v3774_v63 = vadd.f32 1.0, %v5088_v48  ;;  %v5090_v28 = vpop.eup %5089 }
 0xab9   : > { %v3775_v2 = vmul.f32 0.5, %v3774_v63  ;;  %v3782_v4 = vmul.f32 %v5090_v28, %v3771_v62  ;;  %v11028_v62 = vld [vmem:[#allocation33_spill] sm:$0xff] }
 0xaba   : > { %v5092_v61 = vpop.eup %5091 }
 0xabb   : > { %v3781_v24 = vmul.f32 %v5225_v9, %v3775_v2  ;;  %v3779_v7 = vadd.f32 1.0, %v5092_v61 }
 0xabd   : > { %v8959_v9 = vadd.f32 %v3782_v4, %v3781_v24   ;;  %v3780_v52 = vmul.f32 0.5, %v3779_v7 }
 0xabf   : > { %5093 = vtanh.f32 %v8959_v9 }
 0xacc   : > { %v5094_v18 = vpop.eup %5093 }
 0xacd   : > { %v8962_v45 = vmul.f32 %v5094_v18, %v3780_v52  }
 0xacf   : > { %4000 = vmatmul.mubr.f32.vlgmr.msra.gmra.mxu0 %v8962_v45  ;;  %4071 = vmatmul.mubr.f32.vlgmr.msra.gmra.mxu1 %v8962_v45 }
 0xad0   : > { %4256 = vmatpush3.msra.mxu0 %v11011_v27  ;;  %4287 = vmatprep.mubr.msk.f32.mxu0 %vm5248_vm2, %v5247_v58 }
 0xad1   : > { %4257 = vmatprep.subr.mxu0 %v5247_v58 }
 0xad2   : > { %4258 = vmatpush3.msra.mxu0 %v11012_v31 }
 0xad3   : > { %4259 = vmatprep.subr.mxu0 %v5247_v58 }
 0xad4   : > { %4260 = vmatpush3.msra.mxu0 %v11013_v35 }
 0xad5   : > { %4261 = vmatprep.subr.mxu0 %v5247_v58 }
 0xad6   : > { %4262 = vmatpush3.msra.mxu0 %v11014_v38 }
 0xad7   : > { %4263 = vmatprep.subr.mxu0 %v5247_v58 }
 0xad8   : > { %4264 = vmatpush3.msra.mxu0 %v11015_v32 }
 0xad9   : > { %4265 = vmatprep.subr.mxu0 %v5247_v58 }
 0xada   : > { %4266 = vmatpush3.msra.mxu0 %v11016_v15 }
 0xadb   : > { %4267 = vmatprep.subr.mxu0 %v5247_v58 }
 0xadc   : > { %4268 = vmatpush3.msra.mxu0 %v11017_v33 }
 0xadd   : > { %4269 = vmatprep.subr.mxu0 %v5247_v58 }
 0xade   : > { %4270 = vmatpush3.msra.mxu0 %v11018_v13 }
 0xadf   : > { %4271 = vmatprep.subr.mxu0 %v5247_v58 }
 0xae0   : > { %4272 = vmatpush3.msra.mxu0 %v11019_v49 }
 0xae1   : > { %4273 = vmatprep.subr.mxu0 %v5247_v58 }
 0xae2   : > { %4274 = vmatpush3.msra.mxu0 %v11020_v11 }
 0xae3   : > { %4275 = vmatprep.subr.mxu0 %v5247_v58 }
 0xae4   : > { %4276 = vmatpush3.msra.mxu0 %v11021_v16 }
 0xae5   : > { %4277 = vmatprep.subr.mxu0 %v5247_v58 }
 0xae6   : > { %4278 = vmatpush3.msra.mxu0 %v11022_v37 }
 0xae7   : > { %4279 = vmatprep.subr.mxu0 %v5247_v58 }
 0xae8   : > { %4280 = vmatpush3.msra.mxu0 %v11023_v12 }
 0xae9   : > { %4281 = vmatprep.subr.mxu0 %v5247_v58 }
 0xaea   : > { %4282 = vmatpush3.msra.mxu0 %v11024_v5 }
 0xaeb   : > { %4283 = vmatprep.subr.mxu0 %v5247_v58 }
 0xaec   : > { %4284 = vmatpush3.msra.mxu0 %v11025_v10 }
 0xaed   : > { %4285 = vmatprep.subr.mxu0 %v5247_v58  ;;  %v3930_v58 = vrot.slane %v11027_v51, %v11010_v56 }
 0xaee   : > { %4286 = vmatpush3.msra.mxu0 %v11026_v19 }
 0xb8f   : > { %v4001_v34 = vpop.f32.mrf.mxu0  ;;  %v4072_v20 = vpop.f32.mrf.mxu1 }
 0xb90   : > { %v4002_v0 = vadd.f32 %v4001_v34, %v3918_v21  ;;  %v4073_v39 = vadd.f32 %v4072_v20, %v3926_v6 }
 0xb91   : > { %v4003_v41 = vpop.f32.mrf.mxu0  ;;  %v4074_v36 = vpop.f32.mrf.mxu1 }
 0xb92   : > { %v4077_v55 = vmul.f32 0.5, %v4002_v0  ;;  %v4004_v44 = vadd.f32 %v4003_v41, %v3922_v25  ;;  %v4075_v59 = vadd.f32 %v4074_v36, %v3930_v58 }
 0xb94   : > { %5095 = vtanh.f32 %v4077_v55  ;;  %v4081_v46 = vmul.f32 0.5, %v4004_v44  ;;  %v4086_v42 = vmul.f32 0.5, %v4075_v59 }
 0xb96   : > { %5097 = vtanh.f32 %v4081_v46 }
 0xb97   : > { %5099 = vtanh.f32 %v4073_v39 }
 0xb98   : > { %5101 = vtanh.f32 %v4086_v42 }
 0xba1   : > { %v5096_v3 = vpop.eup %5095 }
 0xba2   : > { %v4079_v23 = vadd.f32 1.0, %v5096_v3 }
 0xba3   : > { %v5098_v17 = vpop.eup %5097 }
 0xba4   : > { %v4080_v26 = vmul.f32 0.5, %v4079_v23  ;;  %v4083_v8 = vadd.f32 1.0, %v5098_v17  ;;  %v5100_v57 = vpop.eup %5099 }
 0xba5   : > { %v5102_v29 = vpop.eup %5101 }
 0xba6   : > { %v4084_v54 = vmul.f32 0.5, %v4083_v8  ;;  %v4091_v40 = vmul.f32 %v5100_v57, %v4080_v26  ;;  %v4088_v43 = vadd.f32 1.0, %v5102_v29 }
 0xba8   : > { %v4090_v53 = vmul.f32 %v5217_v47, %v4084_v54  ;;  %v4089_v14 = vmul.f32 0.5, %v4088_v43 }
 0xbaa   : > { %v4092_v47 = vadd.f32 %v4091_v40, %v4090_v53  }
 0xbac   : > { %5103 = vtanh.f32 %v4092_v47 }
 0xbb9   : > { %v5104_v50 = vpop.eup %5103 }
 0xbba   : > { %v4094_v23 = vmul.f32 %v5104_v50, %v4089_v14  }
 0xbbc   : > { %4288 = vmatmul.mubr.f32.vlgmr.msra.gmra.mxu0 %v4094_v23 }
 0xc7b   :  { %3359 = sbr.rel (!%p3357_p6) target bundleno = 2491 (0x9bb), region = 104 }
 0xc7c   : > { %v4167_v48 = vpop.f32.mrf.mxu0 }
 0xc7d   : > { %v4168_v55 = vadd.f32 %v11028_v62, %v4167_v48  }
 0xc7e   : > { %v4289_v63 = vpop.f32.mrf.mxu0 }
 0xc7f   : > { %4173 = vst.msk [vmem:[%s4172_s10] sm:$0xff] %vm148_vm1, %v4168_v55 }
 0xc80   :  { %4178 = vsyncpa [#allocation4], 1 }
 0xc81   :  { %4179 = vsyncpa [#allocation6], 1 }
 0xc82   :  { %4180 = vsyncpa [#allocation9], 1 }

</bundles_post_ra>
